<compile_context>
chip_gen: v5e
topology: v5e:2x2
jax: 0.10.0
libtpu: 0.0.40
codegen_flags: <defaults>
</compile_context>

<pallas_src>
import jax
import jax.numpy as jnp
from jax.experimental import pallas as pl
from jax.experimental.pallas import tpu as pltpu

# ----------------------------- configuration --------------------------------
BATCH          = 16           # total episodes per call (multiple of B_BLOCK)
B_BLOCK        = 8            # batch rows per grid step (parallel axis)
NUM_ENTITIES   = 40
NUM_REL        = 12           # pad / NO_OP relation id == NUM_REL
MAX_ACTION_NUM = 128          # A (lane dimension)
PATH_LENGTH    = 3

E_STATIC  = 16
E_TIME    = 16
ENT_DIM   = E_STATIC + E_TIME   # 32
REL_DIM   = 32
STATE_DIM = 64                  # LSTM hidden
MLP_DIM   = 64

NENT_P = 48    # entity-table rows padded up (multiple of 8)
NREL_P = 16    # relation-table rows padded up (multiple of 8)
MAX_DT = 32    # time-delta table rows; query timestamps must be < MAX_DT

Q_SLOTS = NENT_P + NREL_P           # 64  query one-hot slots [ent | rel]
G_SLOTS = NREL_P + NENT_P + MAX_DT  # 96  LSTM one-hot slots [rel | ent | dt]
N1      = 128                       # packed layer-1 output width

_F32 = jnp.float32
_BF16 = jnp.bfloat16


# ------------------------------ kernel helpers --------------------------------
def _imod(x, m):
  """Elementwise x % m for small non-negative int32.

  Uses a float reciprocal; valid while x < ~2^20 and the 0.5/m guard exceeds
  f32 rounding (here x <= ~700, m <= 127, so exact).  Do NOT reuse for large
  id spaces without revisiting this bound.
  """
  q = ((x.astype(_F32) + 0.5) * (1.0 / m)).astype(jnp.int32)
  return x - q * m


def _clamp(x, lo, hi):
  x = jnp.where(x < lo, lo, x)
  return jnp.where(x > hi, hi, x)


# ------------------------------ fused Pallas kernel ---------------------------
def episode_kernel(
    # queries (per batch block)
    q_ent_ref, q_ts_ref, q_rel_ref,
    # fused / packed weights (broadcast across the grid)
    w_gates_ref, whh_ref, b_lstm_ref,
    w1h_ref, wq_ref, b_pre_ref,
    w2r_ref, b2r_ref, w2e_ref, b2e_ref, w2d_ref, b2d_ref,
    a_nr_ref, a_ne_ref, a_nt_ref,
    # outputs
    logits_ref, aux_ref):
  B = q_ent_ref.shape[0]
  A = MAX_ACTION_NUM
  H = STATE_DIM

  q_ent = q_ent_ref[...]              # (B, 1) int32
  q_ts = q_ts_ref[...]
  q_rel = q_rel_ref[...]

  k_iota = jax.lax.broadcasted_iota(jnp.int32, (B, A), 1)

  # ---- query-invariant contribution to policy layer-1 (hoisted out of loop) --
  # one-hot over [q_ent slots 0..47 | q_rel slots 48..63], fused gather+matmul
  q_slot = jax.lax.broadcasted_iota(jnp.int32, (B, Q_SLOTS), 1)
  q_oh = ((q_slot == q_ent) | (q_slot == q_rel + NENT_P)).astype(_F32)
  q_contrib = (jnp.dot(q_oh.astype(_BF16), wq_ref[...],
                       preferred_element_type=_F32)
               + b_pre_ref[...])                                     # (B, 128)

  # constant attention-logit rows (second row of the gather matmuls)
  a_nr_row = a_nr_ref[...].reshape(1, 1, NREL_P)
  a_ne_row = a_ne_ref[...].reshape(1, 1, NENT_P)
  a_nt_row = a_nt_ref[...].reshape(1, 1, MAX_DT)

  # rollout state, carried fully inside the kernel
  cur_ent = q_ent
  cur_ts = q_ts
  prev_rel = jnp.full((B, 1), NUM_REL, jnp.int32)
  hx = jnp.zeros((B, H), _F32)
  cx = jnp.zeros((B, H), _F32)

  def gather2(proj, a_row, oh):
    """score[b,a] = proj[b, id[b,a]], a[b,a] = a_row[id[b,a]] via one MXU matmul."""
    Bc, depth = proj.shape
    c_iota = jax.lax.broadcasted_iota(jnp.int32, (Bc, 8, depth), 1)
    lhs = jnp.where(c_iota == 1, a_row, proj[:, None, :])            # (B, 8, d)
    out = jnp.einsum('bcn,bna->bca', lhs, oh, preferred_element_type=_F32)
    return out[:, 0, :], out[:, 1, :]

  for t in range(PATH_LENGTH):
    # -------- env.next_actions: synthetic deterministic action space --------
    rel_id = _imod(cur_ent * 7 + k_iota * 3, NUM_REL)
    ent_id = _imod(cur_ent * 5 + k_iota * 11 + 1, NUM_ENTITIES)
    ts_cand = cur_ts - _imod(k_iota, 5)
    ts_cand = jnp.where(ts_cand < 0, 0, ts_cand)
    n_valid = 1 + _imod(cur_ent, A - 1)            # >= 1 valid action per row
    valid = k_iota < n_valid
    rel_id = jnp.where(valid, rel_id, NUM_REL)     # pad relation id
    ent_id = jnp.where(valid, ent_id, cur_ent)
    ts = jnp.where(valid, ts_cand, cur_ts)

    # -------- fused embedding gather -> LSTM gates (one matmul) --------
    # one-hot over [prev_rel 0..15 | cur_ent 16..63 | dt 64..95]
    dt_cur = _clamp(q_ts - cur_ts, 0, MAX_DT - 1)
    g_slot = jax.lax.broadcasted_iota(jnp.int32, (B, G_SLOTS), 1)
    g_oh = ((g_slot == prev_rel)
            | (g_slot == cur_ent + NREL_P)
            | (g_slot == dt_cur + NREL_P + NENT_P)).astype(_F32)
    gates = (jnp.dot(g_oh.astype(_BF16), w_gates_ref[...],
                     preferred_element_type=_F32)
             + jnp.dot(hx.astype(_BF16), whh_ref[...],
                       preferred_element_type=_F32)
             + b_lstm_ref[...])                                      # (B, 256)
    i_g = jax.nn.sigmoid(gates[:, 0 * H:1 * H])
    f_g = jax.nn.sigmoid(gates[:, 1 * H:2 * H])
    g_g = jnp.tanh(gates[:, 2 * H:3 * H])
    o_g = jax.nn.sigmoid(gates[:, 3 * H:4 * H])
    cx = f_g * cx + i_g * g_g
    hx = o_g * jnp.tanh(cx)

    # -------- policy layer-1 (query-invariant part hoisted) --------
    pre = (jnp.dot(hx.astype(_BF16), w1h_ref[...],
                   preferred_element_type=_F32) + q_contrib)         # (B, 128)
    hid = jnp.maximum(pre[:, :MLP_DIM], 0.0)                         # (B, 64)
    s_contrib = pre[:, MLP_DIM:MLP_DIM + 1]                          # (B, 1)

    # -------- layer-2 fused with the score-projection tables (host algebra) --
    rel_proj = jnp.dot(hid, w2r_ref[...], preferred_element_type=_F32) + b2r_ref[...]
    ent_proj = jnp.dot(hid, w2e_ref[...], preferred_element_type=_F32) + b2e_ref[...]
    dt_proj = jnp.dot(hid, w2d_ref[...], preferred_element_type=_F32) + b2d_ref[...]
    dt_idx = _clamp(q_ts - ts, 0, MAX_DT - 1)                        # (B, A)

    # -------- one-hot gathers via batched MXU matmuls (no per-id loops) ------
    oh_rel = (jax.lax.broadcasted_iota(jnp.int32, (B, NREL_P, A), 1)
              == rel_id[:, None, :]).astype(_F32)
    oh_ent = (jax.lax.broadcasted_iota(jnp.int32, (B, NENT_P, A), 1)
              == ent_id[:, None, :]).astype(_F32)
    oh_dt = (jax.lax.broadcasted_iota(jnp.int32, (B, MAX_DT, A), 1)
             == dt_idx[:, None, :]).astype(_F32)

    rel_score, a_nr = gather2(rel_proj, a_nr_row, oh_rel)
    ent_s, a_ne = gather2(ent_proj, a_ne_row, oh_ent)
    dt_s, a_nt = gather2(dt_proj, a_nt_row, oh_dt)
    ent_score = ent_s + dt_s
    a_logit = a_nr + a_ne + a_nt + s_contrib                         # (B, A)

    a = jax.nn.sigmoid(a_logit)
    scores = (1.0 - a) * rel_score + a * ent_score
    scores = jnp.where(valid, scores, -1e9)                          # mask pads

    # -------- masked log-softmax, greedy action, NLL loss --------
    m = jnp.max(scores, axis=-1, keepdims=True)
    exps = jnp.exp(scores - m)
    log_denom = jnp.log(jnp.sum(exps, axis=-1, keepdims=True))
    logits = scores - m - log_denom
    cand = jnp.where(scores >= m, k_iota, A)
    aid = jnp.min(cand, axis=-1, keepdims=True)                      # (B, 1) i32

    # -------- chosen-action gather (torch.gather) as int32 lane reductions ---
    sel_a = k_iota == aid
    prev_rel = jnp.max(jnp.where(sel_a, rel_id, 0), axis=-1, keepdims=True)
    cur_ent = jnp.max(jnp.where(sel_a, ent_id, 0), axis=-1, keepdims=True)
    cur_ts = jnp.max(jnp.where(sel_a, ts, 0), axis=-1, keepdims=True)

    logits_ref[t] = logits
    # lane-dense aux slab: lane0 = loss (== log_denom for the greedy/argmax
    # action since scores[aid] == m), lane1 = action id, lane2 = chosen entity,
    # lane3 = chosen timestamp.  NOTE: if multinomial sampling is restored the
    # loss must become -take(logits, aid) instead of log_denom.
    aux = jnp.where(k_iota == 0, log_denom, 0.0)
    aux = jnp.where(k_iota == 1, aid.astype(_F32), aux)
    aux = jnp.where(k_iota == 2, cur_ent.astype(_F32), aux)
    aux = jnp.where(k_iota == 3, cur_ts.astype(_F32), aux)
    aux_ref[t] = aux


# ------------------------------ host-side glue --------------------------------
def init_params(key):
  ks = jax.random.split(key, 24)
  n = lambda k, s, sc=0.1: jax.random.normal(k, s, _F32) * sc
  H4 = 4 * STATE_DIM
  return dict(
      ent_table=n(ks[0], (NUM_ENTITIES, E_STATIC), 0.3),
      time_w=n(ks[1], (E_TIME,), 0.3),
      time_b=n(ks[2], (E_TIME,), 0.3),
      rel_table=n(ks[3], (NUM_REL + 1, REL_DIM), 0.3),
      wih_r=n(ks[4], (REL_DIM, H4)), wih_e=n(ks[5], (ENT_DIM, H4)),
      whh=n(ks[6], (STATE_DIM, H4)), b_lstm=n(ks[7], (1, H4)),
      w1_h=n(ks[8], (STATE_DIM, MLP_DIM)), w1_qe=n(ks[9], (ENT_DIM, MLP_DIM)),
      w1_qr=n(ks[10], (REL_DIM, MLP_DIM)), b1=n(ks[11], (1, MLP_DIM)),
      w2_rel=n(ks[12], (MLP_DIM, REL_DIM)), b2_rel=n(ks[13], (1, REL_DIM)),
      w2_ent=n(ks[14], (MLP_DIM, ENT_DIM)), b2_ent=n(ks[15], (1, ENT_DIM)),
      wa_nr=n(ks[16], (1, REL_DIM)), wa_ne=n(ks[17], (1, ENT_DIM)),
      wa_h=n(ks[18], (1, STATE_DIM)), wa_qe=n(ks[19], (1, ENT_DIM)),
      wa_qr=n(ks[20], (1, REL_DIM)), ba=n(ks[21], (1, 1)),
  )


def pack_params(p):
  """Pack/fuse raw agent parameters into MXU-friendly kernel operands."""
  ent_tab = jnp.pad(p["ent_table"], ((0, NENT_P - NUM_ENTITIES), (0, 0)))  # (48,16)
  rel_tab = jnp.pad(p["rel_table"], ((0, NREL_P - (NUM_REL + 1)), (0, 0)))  # (16,32)
  dts = jnp.arange(MAX_DT, dtype=_F32)[:, None]
  cos_tab = jnp.cos(dts * p["time_w"][None, :] + p["time_b"][None, :])     # (32,16)

  # fused one-hot -> LSTM gates: slots [rel 0..15 | ent 16..63 | dt 64..95]
  wih_e_s = p["wih_e"][:E_STATIC, :]
  wih_e_t = p["wih_e"][E_STATIC:, :]
  w_gates = jnp.concatenate([rel_tab @ p["wih_r"],
                             ent_tab @ wih_e_s,
                             cos_tab @ wih_e_t], axis=0)                   # (96,256)

  # policy layer-1 packing: columns [MLP 0..63 | attention scalar 64 | 0 pad]
  def col_pack(w_main, wa_row):
    k = w_main.shape[0]
    return jnp.concatenate(
        [w_main, wa_row.T, jnp.zeros((k, N1 - MLP_DIM - 1), _F32)], axis=1)
  w1h = col_pack(p["w1_h"], p["wa_h"])                                     # (64,128)
  w1_qe_pack = col_pack(p["w1_qe"], p["wa_qe"])                            # (32,128)
  w1_qr_pack = col_pack(p["w1_qr"], p["wa_qr"])                            # (32,128)
  # fused query one-hot -> layer-1 pre-activation: slots [ent 0..47 | rel 48..63]
  w_q = jnp.concatenate([ent_tab @ w1_qe_pack[:E_STATIC, :],
                         rel_tab @ w1_qr_pack], axis=0)                    # (64,128)
  # bias: b1 and ba, plus the constant q_time = cos(0*w+b) contribution
  b_pre = (jnp.concatenate([p["b1"], p["ba"],
                            jnp.zeros((1, N1 - MLP_DIM - 1), _F32)], axis=1)
           + cos_tab[0:1, :] @ w1_qe_pack[E_STATIC:, :])                   # (1,128)

  # layer-2 folded into the score-projection tables
  w2r = p["w2_rel"] @ rel_tab.T                                            # (64,16)
  b2r = p["b2_rel"] @ rel_tab.T                                            # (1,16)
  w2e = p["w2_ent"][:, :E_STATIC] @ ent_tab.T                              # (64,48)
  b2e = p["b2_ent"][:, :E_STATIC] @ ent_tab.T                              # (1,48)
  w2d = p["w2_ent"][:, E_STATIC:] @ cos_tab.T                              # (64,32)
  b2d = p["b2_ent"][:, E_STATIC:] @ cos_tab.T                              # (1,32)

  # constant attention-logit tables
  a_nr = p["wa_nr"] @ rel_tab.T                                            # (1,16)
  a_ne = p["wa_ne"][:, :E_STATIC] @ ent_tab.T                              # (1,48)
  a_nt = p["wa_ne"][:, E_STATIC:] @ cos_tab.T                              # (1,32)

  return dict(
      w_gates=w_gates.astype(_BF16), whh=p["whh"].astype(_BF16),
      b_lstm=p["b_lstm"],
      w1h=w1h.astype(_BF16), w_q=w_q.astype(_BF16), b_pre=b_pre,
      w2r=w2r, b2r=b2r, w2e=w2e, b2e=b2e, w2d=w2d, b2d=b2d,
      a_nr=a_nr, a_ne=a_ne, a_nt=a_nt)


def _full_spec(arr):
  return pl.BlockSpec(arr.shape, lambda i: (0,) * arr.ndim)


@jax.jit
def episode_forward(packed, query_entities, query_timestamps, query_relations):
  """Mirrors Episode.forward: the whole rollout is a single fused pallas_call."""
  B = query_entities.shape[0]
  assert B % B_BLOCK == 0
  A = MAX_ACTION_NUM

  q_ent = query_entities.reshape(B, 1).astype(jnp.int32)
  q_ts = query_timestamps.reshape(B, 1).astype(jnp.int32)
  q_rel = query_relations.reshape(B, 1).astype(jnp.int32)

  weights = (packed["w_gates"], packed["whh"], packed["b_lstm"],
             packed["w1h"], packed["w_q"], packed["b_pre"],
             packed["w2r"], packed["b2r"], packed["w2e"], packed["b2e"],
             packed["w2d"], packed["b2d"],
             packed["a_nr"], packed["a_ne"], packed["a_nt"])

  q_spec = pl.BlockSpec((B_BLOCK, 1), lambda i: (i, 0))
  in_specs = [q_spec, q_spec, q_spec] + [_full_spec(w) for w in weights]
  out_specs = (
      pl.BlockSpec((PATH_LENGTH, B_BLOCK, A), lambda i: (0, i, 0)),
      pl.BlockSpec((PATH_LENGTH, B_BLOCK, 128), lambda i: (0, i, 0)),
  )
  out_shapes = (
      jax.ShapeDtypeStruct((PATH_LENGTH, B, A), _F32),      # logits
      jax.ShapeDtypeStruct((PATH_LENGTH, B, 128), _F32),    # packed aux slab
  )

  logits, aux = pl.pallas_call(
      episode_kernel,
      out_shape=out_shapes,
      grid=(B // B_BLOCK,),
      in_specs=in_specs,
      out_specs=out_specs,
      compiler_params=pltpu.CompilerParams(
          dimension_semantics=("parallel",)),
  )(q_ent, q_ts, q_rel, *weights)

  all_loss = [aux[t, :, 0] for t in range(PATH_LENGTH)]
  all_logits = [logits[t] for t in range(PATH_LENGTH)]
  all_actions_idx = [aux[t, :, 1].astype(jnp.int32)[:, None]
                     for t in range(PATH_LENGTH)]
  current_entities = aux[PATH_LENGTH - 1, :, 2].astype(jnp.int32)
  current_timestamps = aux[PATH_LENGTH - 1, :, 3].astype(jnp.int32)
  return (all_loss, all_logits, all_actions_idx,
          current_entities, current_timestamps)


# ------------------------------------ main ------------------------------------
if __name__ == "__main__":
  key = jax.random.PRNGKey(0)
  k_params, k_e, k_t, k_r = jax.random.split(key, 4)
  params = init_params(k_params)
  packed = pack_params(params)

  query_entities = jax.random.randint(k_e, (BATCH,), 0, NUM_ENTITIES,
                                      dtype=jnp.int32)
  query_timestamps = jax.random.randint(k_t, (BATCH,), 5, 30,   # < MAX_DT
                                        dtype=jnp.int32)
  query_relations = jax.random.randint(k_r, (BATCH,), 0, NUM_REL,
                                       dtype=jnp.int32)

  (all_loss, all_logits, all_actions_idx,
   current_entities, current_timestamps) = episode_forward(
       packed, query_entities, query_timestamps, query_relations)

  jax.block_until_ready((all_loss, all_logits, all_actions_idx,
                         current_entities, current_timestamps))

  # light sanity checks
  assert len(all_loss) == PATH_LENGTH
  assert all_logits[0].shape == (BATCH, MAX_ACTION_NUM)
  assert all_actions_idx[0].shape == (BATCH, 1)
  assert current_entities.shape == (BATCH,)
  assert bool(jnp.all(jnp.isfinite(jnp.stack(all_loss))))
  assert bool(jnp.all((current_entities >= 0)
                      & (current_entities < NUM_ENTITIES)))
  # loss must equal the NLL of the chosen (greedy) action
  nll0 = -jnp.take_along_axis(all_logits[0], all_actions_idx[0], axis=1)[:, 0]
  assert bool(jnp.allclose(nll0, all_loss[0], atol=1e-4))

  print("KERNEL_OK")
</pallas_src>

<mosaic_0001>
module attributes {stable_mosaic.version = 11 : i64} {
  func.func @episode_kernel(%arg0: i32, %arg1: memref<8x1xi32, #tpu.memory_space<vmem>>, %arg2: memref<8x1xi32, #tpu.memory_space<vmem>>, %arg3: memref<8x1xi32, #tpu.memory_space<vmem>>, %arg4: memref<96x256xbf16, #tpu.memory_space<vmem>>, %arg5: memref<64x256xbf16, #tpu.memory_space<vmem>>, %arg6: memref<1x256xf32, #tpu.memory_space<vmem>>, %arg7: memref<64x128xbf16, #tpu.memory_space<vmem>>, %arg8: memref<64x128xbf16, #tpu.memory_space<vmem>>, %arg9: memref<1x128xf32, #tpu.memory_space<vmem>>, %arg10: memref<64x16xf32, #tpu.memory_space<vmem>>, %arg11: memref<1x16xf32, #tpu.memory_space<vmem>>, %arg12: memref<64x48xf32, #tpu.memory_space<vmem>>, %arg13: memref<1x48xf32, #tpu.memory_space<vmem>>, %arg14: memref<64x32xf32, #tpu.memory_space<vmem>>, %arg15: memref<1x32xf32, #tpu.memory_space<vmem>>, %arg16: memref<1x16xf32, #tpu.memory_space<vmem>>, %arg17: memref<1x48xf32, #tpu.memory_space<vmem>>, %arg18: memref<1x32xf32, #tpu.memory_space<vmem>>, %arg19: memref<3x8x128xf32, #tpu.memory_space<vmem>>, %arg20: memref<3x8x128xf32, #tpu.memory_space<vmem>>) attributes {dimension_semantics = [#tpu.dimension_semantics<parallel>], iteration_bounds = array<i64: 2>, scalar_prefetch = 0 : i64, scratch_operands = 0 : i64, tpu.core_type = #tpu.core_type<tc>, window_params = [{transform_indices = @transform_0, window_bounds = array<i64: 8, 1>}, {transform_indices = @transform_1, window_bounds = array<i64: 8, 1>}, {transform_indices = @transform_2, window_bounds = array<i64: 8, 1>}, {pipeline_mode = #tpu.pipeline_mode<synchronous>, transform_indices = @transform_3, window_bounds = array<i64: 96, 256>}, {pipeline_mode = #tpu.pipeline_mode<synchronous>, transform_indices = @transform_4, window_bounds = array<i64: 64, 256>}, {pipeline_mode = #tpu.pipeline_mode<synchronous>, transform_indices = @transform_5, window_bounds = array<i64: 1, 256>}, {pipeline_mode = #tpu.pipeline_mode<synchronous>, transform_indices = @transform_6, window_bounds = array<i64: 64, 128>}, {pipeline_mode = #tpu.pipeline_mode<synchronous>, transform_indices = @transform_7, window_bounds = array<i64: 64, 128>}, {pipeline_mode = #tpu.pipeline_mode<synchronous>, transform_indices = @transform_8, window_bounds = array<i64: 1, 128>}, {pipeline_mode = #tpu.pipeline_mode<synchronous>, transform_indices = @transform_9, window_bounds = array<i64: 64, 16>}, {pipeline_mode = #tpu.pipeline_mode<synchronous>, transform_indices = @transform_10, window_bounds = array<i64: 1, 16>}, {pipeline_mode = #tpu.pipeline_mode<synchronous>, transform_indices = @transform_11, window_bounds = array<i64: 64, 48>}, {pipeline_mode = #tpu.pipeline_mode<synchronous>, transform_indices = @transform_12, window_bounds = array<i64: 1, 48>}, {pipeline_mode = #tpu.pipeline_mode<synchronous>, transform_indices = @transform_13, window_bounds = array<i64: 64, 32>}, {pipeline_mode = #tpu.pipeline_mode<synchronous>, transform_indices = @transform_14, window_bounds = array<i64: 1, 32>}, {pipeline_mode = #tpu.pipeline_mode<synchronous>, transform_indices = @transform_15, window_bounds = array<i64: 1, 16>}, {pipeline_mode = #tpu.pipeline_mode<synchronous>, transform_indices = @transform_16, window_bounds = array<i64: 1, 48>}, {pipeline_mode = #tpu.pipeline_mode<synchronous>, transform_indices = @transform_17, window_bounds = array<i64: 1, 32>}, {transform_indices = @transform_18, window_bounds = array<i64: 3, 8, 128>}, {transform_indices = @transform_19, window_bounds = array<i64: 3, 8, 128>}]} {
    %c0 = arith.constant 0 : index
    %c0_0 = arith.constant 0 : index
    %0 = vector.load %arg1[%c0, %c0_0] : memref<8x1xi32, #tpu.memory_space<vmem>>, vector<8x1xi32>
    %c0_1 = arith.constant 0 : index
    %c0_2 = arith.constant 0 : index
    %1 = vector.load %arg2[%c0_1, %c0_2] : memref<8x1xi32, #tpu.memory_space<vmem>>, vector<8x1xi32>
    %c0_3 = arith.constant 0 : index
    %c0_4 = arith.constant 0 : index
    %2 = vector.load %arg3[%c0_3, %c0_4] : memref<8x1xi32, #tpu.memory_space<vmem>>, vector<8x1xi32>
    %3 = tpu.iota {dimensions = array<i32: 1>} : vector<8x128xi32>
    %4 = tpu.iota {dimensions = array<i32: 1>} : vector<8x64xi32>
    %5 = vector.broadcast %0 : vector<8x1xi32> to vector<8x64xi32>
    %6 = arith.cmpi eq, %4, %5 : vector<8x64xi32>
    %c48_i32 = arith.constant 48 : i32
    %7 = vector.broadcast %c48_i32 : i32 to vector<8x1xi32>
    %8 = arith.addi %2, %7 : vector<8x1xi32>
    %9 = vector.broadcast %8 : vector<8x1xi32> to vector<8x64xi32>
    %10 = arith.cmpi eq, %4, %9 : vector<8x64xi32>
    %11 = arith.ori %6, %10 : vector<8x64xi1>
    %12 = arith.extui %11 : vector<8x64xi1> to vector<8x64xi32>
    %13 = arith.sitofp %12 : vector<8x64xi32> to vector<8x64xf32>
    %14 = arith.truncf %13 : vector<8x64xf32> to vector<8x64xbf16>
    %c0_5 = arith.constant 0 : index
    %c0_6 = arith.constant 0 : index
    %15 = vector.load %arg8[%c0_5, %c0_6] : memref<64x128xbf16, #tpu.memory_space<vmem>>, vector<64x128xbf16>
    %cst = arith.constant dense<0.000000e+00> : vector<8x128xf32>
    %16 = tpu.matmul %14, %15, %cst {dimension_numbers = #tpu.dot_dimension_numbers<[1], [0], [0], [1], [0, 0, 1, 1], [], []>} : vector<8x64xbf16>, vector<64x128xbf16>, vector<8x128xf32> -> vector<8x128xf32>
    %c0_7 = arith.constant 0 : index
    %c0_8 = arith.constant 0 : index
    %17 = vector.load %arg9[%c0_7, %c0_8] : memref<1x128xf32, #tpu.memory_space<vmem>>, vector<1x128xf32>
    %18 = vector.broadcast %17 : vector<1x128xf32> to vector<8x128xf32>
    %19 = arith.addf %16, %18 : vector<8x128xf32>
    %c0_9 = arith.constant 0 : index
    %c0_10 = arith.constant 0 : index
    %20 = vector.load %arg16[%c0_9, %c0_10] : memref<1x16xf32, #tpu.memory_space<vmem>>, vector<1x16xf32>
    %21 = vector.shape_cast %20 : vector<1x16xf32> to vector<1x1x16xf32>
    %c0_11 = arith.constant 0 : index
    %c0_12 = arith.constant 0 : index
    %22 = vector.load %arg17[%c0_11, %c0_12] : memref<1x48xf32, #tpu.memory_space<vmem>>, vector<1x48xf32>
    %23 = vector.shape_cast %22 : vector<1x48xf32> to vector<1x1x48xf32>
    %c0_13 = arith.constant 0 : index
    %c0_14 = arith.constant 0 : index
    %24 = vector.load %arg18[%c0_13, %c0_14] : memref<1x32xf32, #tpu.memory_space<vmem>>, vector<1x32xf32>
    %25 = vector.shape_cast %24 : vector<1x32xf32> to vector<1x1x32xf32>
    %c12_i32 = arith.constant 12 : i32
    %26 = vector.broadcast %c12_i32 : i32 to vector<8x1xi32>
    %cst_15 = arith.constant 0.000000e+00 : f32
    %27 = vector.broadcast %cst_15 : f32 to vector<8x64xf32>
    %cst_16 = arith.constant 0.000000e+00 : f32
    %28 = vector.broadcast %cst_16 : f32 to vector<8x64xf32>
    %c7_i32 = arith.constant 7 : i32
    %29 = vector.broadcast %c7_i32 : i32 to vector<8x1xi32>
    %30 = arith.muli %0, %29 : vector<8x1xi32>
    %c3_i32 = arith.constant 3 : i32
    %31 = vector.broadcast %c3_i32 : i32 to vector<8x128xi32>
    %32 = arith.muli %3, %31 : vector<8x128xi32>
    %33 = vector.broadcast %30 : vector<8x1xi32> to vector<8x128xi32>
    %34 = arith.addi %33, %32 : vector<8x128xi32>
    %35 = arith.sitofp %34 : vector<8x128xi32> to vector<8x128xf32>
    %cst_17 = arith.constant 5.000000e-01 : f32
    %36 = vector.broadcast %cst_17 : f32 to vector<8x128xf32>
    %37 = arith.addf %35, %36 : vector<8x128xf32>
    %cst_18 = arith.constant 0.0833333358 : f32
    %38 = vector.broadcast %cst_18 : f32 to vector<8x128xf32>
    %39 = arith.mulf %37, %38 : vector<8x128xf32>
    %40 = arith.fptosi %39 : vector<8x128xf32> to vector<8x128xi32>
    %c12_i32_19 = arith.constant 12 : i32
    %41 = vector.broadcast %c12_i32_19 : i32 to vector<8x128xi32>
    %42 = arith.muli %40, %41 : vector<8x128xi32>
    %43 = arith.subi %34, %42 : vector<8x128xi32>
    %c5_i32 = arith.constant 5 : i32
    %44 = vector.broadcast %c5_i32 : i32 to vector<8x1xi32>
    %45 = arith.muli %0, %44 : vector<8x1xi32>
    %c11_i32 = arith.constant 11 : i32
    %46 = vector.broadcast %c11_i32 : i32 to vector<8x128xi32>
    %47 = arith.muli %3, %46 : vector<8x128xi32>
    %48 = vector.broadcast %45 : vector<8x1xi32> to vector<8x128xi32>
    %49 = arith.addi %48, %47 : vector<8x128xi32>
    %c1_i32 = arith.constant 1 : i32
    %50 = vector.broadcast %c1_i32 : i32 to vector<8x128xi32>
    %51 = arith.addi %49, %50 : vector<8x128xi32>
    %52 = arith.sitofp %51 : vector<8x128xi32> to vector<8x128xf32>
    %cst_20 = arith.constant 5.000000e-01 : f32
    %53 = vector.broadcast %cst_20 : f32 to vector<8x128xf32>
    %54 = arith.addf %52, %53 : vector<8x128xf32>
    %cst_21 = arith.constant 2.500000e-02 : f32
    %55 = vector.broadcast %cst_21 : f32 to vector<8x128xf32>
    %56 = arith.mulf %54, %55 : vector<8x128xf32>
    %57 = arith.fptosi %56 : vector<8x128xf32> to vector<8x128xi32>
    %c40_i32 = arith.constant 40 : i32
    %58 = vector.broadcast %c40_i32 : i32 to vector<8x128xi32>
    %59 = arith.muli %57, %58 : vector<8x128xi32>
    %60 = arith.subi %51, %59 : vector<8x128xi32>
    %61 = arith.sitofp %3 : vector<8x128xi32> to vector<8x128xf32>
    %cst_22 = arith.constant 5.000000e-01 : f32
    %62 = vector.broadcast %cst_22 : f32 to vector<8x128xf32>
    %63 = arith.addf %61, %62 : vector<8x128xf32>
    %cst_23 = arith.constant 2.000000e-01 : f32
    %64 = vector.broadcast %cst_23 : f32 to vector<8x128xf32>
    %65 = arith.mulf %63, %64 : vector<8x128xf32>
    %66 = arith.fptosi %65 : vector<8x128xf32> to vector<8x128xi32>
    %c5_i32_24 = arith.constant 5 : i32
    %67 = vector.broadcast %c5_i32_24 : i32 to vector<8x128xi32>
    %68 = arith.muli %66, %67 : vector<8x128xi32>
    %69 = arith.subi %3, %68 : vector<8x128xi32>
    %70 = vector.broadcast %1 : vector<8x1xi32> to vector<8x128xi32>
    %71 = arith.subi %70, %69 : vector<8x128xi32>
    %c0_i32 = arith.constant 0 : i32
    %72 = vector.broadcast %c0_i32 : i32 to vector<8x128xi32>
    %73 = arith.cmpi slt, %71, %72 : vector<8x128xi32>
    %c0_i32_25 = arith.constant 0 : i32
    %74 = vector.broadcast %c0_i32_25 : i32 to vector<8x128xi32>
    %75 = arith.select %73, %74, %71 : vector<8x128xi1>, vector<8x128xi32>
    %76 = arith.sitofp %0 : vector<8x1xi32> to vector<8x1xf32>
    %cst_26 = arith.constant 5.000000e-01 : f32
    %77 = vector.broadcast %cst_26 : f32 to vector<8x1xf32>
    %78 = arith.addf %76, %77 : vector<8x1xf32>
    %cst_27 = arith.constant 0.00787401571 : f32
    %79 = vector.broadcast %cst_27 : f32 to vector<8x1xf32>
    %80 = arith.mulf %78, %79 : vector<8x1xf32>
    %81 = arith.fptosi %80 : vector<8x1xf32> to vector<8x1xi32>
    %c127_i32 = arith.constant 127 : i32
    %82 = vector.broadcast %c127_i32 : i32 to vector<8x1xi32>
    %83 = arith.muli %81, %82 : vector<8x1xi32>
    %84 = arith.subi %0, %83 : vector<8x1xi32>
    %c1_i32_28 = arith.constant 1 : i32
    %85 = vector.broadcast %c1_i32_28 : i32 to vector<8x1xi32>
    %86 = arith.addi %85, %84 : vector<8x1xi32>
    %87 = vector.broadcast %86 : vector<8x1xi32> to vector<8x128xi32>
    %88 = arith.cmpi slt, %3, %87 : vector<8x128xi32>
    %c12_i32_29 = arith.constant 12 : i32
    %89 = vector.broadcast %c12_i32_29 : i32 to vector<8x128xi32>
    %90 = arith.select %88, %43, %89 : vector<8x128xi1>, vector<8x128xi32>
    %91 = vector.shape_cast %0 : vector<8x1xi32> to vector<8x1xi32>
    %92 = vector.broadcast %91 : vector<8x1xi32> to vector<8x128xi32>
    %93 = arith.select %88, %60, %92 : vector<8x128xi1>, vector<8x128xi32>
    %94 = vector.shape_cast %1 : vector<8x1xi32> to vector<8x1xi32>
    %95 = vector.broadcast %94 : vector<8x1xi32> to vector<8x128xi32>
    %96 = arith.select %88, %75, %95 : vector<8x128xi1>, vector<8x128xi32>
    %97 = arith.subi %1, %1 : vector<8x1xi32>
    %c0_i32_30 = arith.constant 0 : i32
    %98 = vector.broadcast %c0_i32_30 : i32 to vector<8x1xi32>
    %99 = arith.cmpi slt, %97, %98 : vector<8x1xi32>
    %c0_i32_31 = arith.constant 0 : i32
    %100 = vector.broadcast %c0_i32_31 : i32 to vector<8x1xi32>
    %101 = arith.select %99, %100, %97 : vector<8x1xi1>, vector<8x1xi32>
    %c31_i32 = arith.constant 31 : i32
    %102 = vector.broadcast %c31_i32 : i32 to vector<8x1xi32>
    %103 = arith.cmpi sgt, %101, %102 : vector<8x1xi32>
    %c31_i32_32 = arith.constant 31 : i32
    %104 = vector.broadcast %c31_i32_32 : i32 to vector<8x1xi32>
    %105 = arith.select %103, %104, %101 : vector<8x1xi1>, vector<8x1xi32>
    %106 = tpu.iota {dimensions = array<i32: 1>} : vector<8x96xi32>
    %107 = vector.broadcast %26 : vector<8x1xi32> to vector<8x96xi32>
    %108 = arith.cmpi eq, %106, %107 : vector<8x96xi32>
    %c16_i32 = arith.constant 16 : i32
    %109 = vector.broadcast %c16_i32 : i32 to vector<8x1xi32>
    %110 = arith.addi %0, %109 : vector<8x1xi32>
    %111 = vector.broadcast %110 : vector<8x1xi32> to vector<8x96xi32>
    %112 = arith.cmpi eq, %106, %111 : vector<8x96xi32>
    %113 = arith.ori %108, %112 : vector<8x96xi1>
    %c16_i32_33 = arith.constant 16 : i32
    %114 = vector.broadcast %c16_i32_33 : i32 to vector<8x1xi32>
    %115 = arith.addi %105, %114 : vector<8x1xi32>
    %c48_i32_34 = arith.constant 48 : i32
    %116 = vector.broadcast %c48_i32_34 : i32 to vector<8x1xi32>
    %117 = arith.addi %115, %116 : vector<8x1xi32>
    %118 = vector.broadcast %117 : vector<8x1xi32> to vector<8x96xi32>
    %119 = arith.cmpi eq, %106, %118 : vector<8x96xi32>
    %120 = arith.ori %113, %119 : vector<8x96xi1>
    %121 = arith.extui %120 : vector<8x96xi1> to vector<8x96xi32>
    %122 = arith.sitofp %121 : vector<8x96xi32> to vector<8x96xf32>
    %123 = arith.truncf %122 : vector<8x96xf32> to vector<8x96xbf16>
    %c0_35 = arith.constant 0 : index
    %c0_36 = arith.constant 0 : index
    %124 = vector.load %arg4[%c0_35, %c0_36] : memref<96x256xbf16, #tpu.memory_space<vmem>>, vector<96x256xbf16>
    %cst_37 = arith.constant dense<0.000000e+00> : vector<8x256xf32>
    %125 = tpu.matmul %123, %124, %cst_37 {dimension_numbers = #tpu.dot_dimension_numbers<[1], [0], [0], [1], [0, 0, 1, 1], [], []>} : vector<8x96xbf16>, vector<96x256xbf16>, vector<8x256xf32> -> vector<8x256xf32>
    %126 = arith.truncf %27 : vector<8x64xf32> to vector<8x64xbf16>
    %c0_38 = arith.constant 0 : index
    %c0_39 = arith.constant 0 : index
    %127 = vector.load %arg5[%c0_38, %c0_39] : memref<64x256xbf16, #tpu.memory_space<vmem>>, vector<64x256xbf16>
    %cst_40 = arith.constant dense<0.000000e+00> : vector<8x256xf32>
    %128 = tpu.matmul %126, %127, %cst_40 {dimension_numbers = #tpu.dot_dimension_numbers<[1], [0], [0], [1], [0, 0, 1, 1], [], []>} : vector<8x64xbf16>, vector<64x256xbf16>, vector<8x256xf32> -> vector<8x256xf32>
    %129 = arith.addf %125, %128 : vector<8x256xf32>
    %c0_41 = arith.constant 0 : index
    %c0_42 = arith.constant 0 : index
    %130 = vector.load %arg6[%c0_41, %c0_42] : memref<1x256xf32, #tpu.memory_space<vmem>>, vector<1x256xf32>
    %131 = vector.broadcast %130 : vector<1x256xf32> to vector<8x256xf32>
    %132 = arith.addf %129, %131 : vector<8x256xf32>
    %133 = vector.extract_strided_slice %132 {offsets = [0, 0], sizes = [8, 64], strides = [1, 1]} : vector<8x256xf32> to vector<8x64xf32>
    %134 = arith.negf %133 : vector<8x64xf32>
    %135 = math.exp %134 : vector<8x64xf32>
    %cst_43 = arith.constant 1.000000e+00 : f32
    %136 = vector.broadcast %cst_43 : f32 to vector<8x64xf32>
    %137 = arith.addf %136, %135 : vector<8x64xf32>
    %138 = arith.divf %136, %137 : vector<8x64xf32>
    %139 = vector.extract_strided_slice %132 {offsets = [0, 64], sizes = [8, 64], strides = [1, 1]} : vector<8x256xf32> to vector<8x64xf32>
    %140 = arith.negf %139 : vector<8x64xf32>
    %141 = math.exp %140 : vector<8x64xf32>
    %cst_44 = arith.constant 1.000000e+00 : f32
    %142 = vector.broadcast %cst_44 : f32 to vector<8x64xf32>
    %143 = arith.addf %142, %141 : vector<8x64xf32>
    %144 = arith.divf %142, %143 : vector<8x64xf32>
    %145 = vector.extract_strided_slice %132 {offsets = [0, 128], sizes = [8, 64], strides = [1, 1]} : vector<8x256xf32> to vector<8x64xf32>
    %146 = math.tanh %145 : vector<8x64xf32>
    %147 = vector.extract_strided_slice %132 {offsets = [0, 192], sizes = [8, 64], strides = [1, 1]} : vector<8x256xf32> to vector<8x64xf32>
    %148 = arith.negf %147 : vector<8x64xf32>
    %149 = math.exp %148 : vector<8x64xf32>
    %cst_45 = arith.constant 1.000000e+00 : f32
    %150 = vector.broadcast %cst_45 : f32 to vector<8x64xf32>
    %151 = arith.addf %150, %149 : vector<8x64xf32>
    %152 = arith.divf %150, %151 : vector<8x64xf32>
    %153 = arith.mulf %144, %28 : vector<8x64xf32>
    %154 = arith.mulf %138, %146 : vector<8x64xf32>
    %155 = arith.addf %153, %154 : vector<8x64xf32>
    %156 = math.tanh %155 : vector<8x64xf32>
    %157 = arith.mulf %152, %156 : vector<8x64xf32>
    %158 = arith.truncf %157 : vector<8x64xf32> to vector<8x64xbf16>
    %c0_46 = arith.constant 0 : index
    %c0_47 = arith.constant 0 : index
    %159 = vector.load %arg7[%c0_46, %c0_47] : memref<64x128xbf16, #tpu.memory_space<vmem>>, vector<64x128xbf16>
    %cst_48 = arith.constant dense<0.000000e+00> : vector<8x128xf32>
    %160 = tpu.matmul %158, %159, %cst_48 {dimension_numbers = #tpu.dot_dimension_numbers<[1], [0], [0], [1], [0, 0, 1, 1], [], []>} : vector<8x64xbf16>, vector<64x128xbf16>, vector<8x128xf32> -> vector<8x128xf32>
    %161 = arith.addf %160, %19 : vector<8x128xf32>
    %162 = vector.extract_strided_slice %161 {offsets = [0, 0], sizes = [8, 64], strides = [1, 1]} : vector<8x128xf32> to vector<8x64xf32>
    %cst_49 = arith.constant 0.000000e+00 : f32
    %163 = vector.broadcast %cst_49 : f32 to vector<8x64xf32>
    %164 = arith.maximumf %162, %163 : vector<8x64xf32>
    %165 = vector.extract_strided_slice %161 {offsets = [0, 64], sizes = [8, 1], strides = [1, 1]} : vector<8x128xf32> to vector<8x1xf32>
    %c0_50 = arith.constant 0 : index
    %c0_51 = arith.constant 0 : index
    %166 = vector.load %arg10[%c0_50, %c0_51] : memref<64x16xf32, #tpu.memory_space<vmem>>, vector<64x16xf32>
    %cst_52 = arith.constant dense<0.000000e+00> : vector<8x16xf32>
    %167 = tpu.matmul %164, %166, %cst_52 {dimension_numbers = #tpu.dot_dimension_numbers<[1], [0], [0], [1], [0, 0, 1, 1], [], []>} : vector<8x64xf32>, vector<64x16xf32>, vector<8x16xf32> -> vector<8x16xf32>
    %c0_53 = arith.constant 0 : index
    %c0_54 = arith.constant 0 : index
    %168 = vector.load %arg11[%c0_53, %c0_54] : memref<1x16xf32, #tpu.memory_space<vmem>>, vector<1x16xf32>
    %169 = vector.broadcast %168 : vector<1x16xf32> to vector<8x16xf32>
    %170 = arith.addf %167, %169 : vector<8x16xf32>
    %c0_55 = arith.constant 0 : index
    %c0_56 = arith.constant 0 : index
    %171 = vector.load %arg12[%c0_55, %c0_56] : memref<64x48xf32, #tpu.memory_space<vmem>>, vector<64x48xf32>
    %cst_57 = arith.constant dense<0.000000e+00> : vector<8x48xf32>
    %172 = tpu.matmul %164, %171, %cst_57 {dimension_numbers = #tpu.dot_dimension_numbers<[1], [0], [0], [1], [0, 0, 1, 1], [], []>} : vector<8x64xf32>, vector<64x48xf32>, vector<8x48xf32> -> vector<8x48xf32>
    %c0_58 = arith.constant 0 : index
    %c0_59 = arith.constant 0 : index
    %173 = vector.load %arg13[%c0_58, %c0_59] : memref<1x48xf32, #tpu.memory_space<vmem>>, vector<1x48xf32>
    %174 = vector.broadcast %173 : vector<1x48xf32> to vector<8x48xf32>
    %175 = arith.addf %172, %174 : vector<8x48xf32>
    %c0_60 = arith.constant 0 : index
    %c0_61 = arith.constant 0 : index
    %176 = vector.load %arg14[%c0_60, %c0_61] : memref<64x32xf32, #tpu.memory_space<vmem>>, vector<64x32xf32>
    %cst_62 = arith.constant dense<0.000000e+00> : vector<8x32xf32>
    %177 = tpu.matmul %164, %176, %cst_62 {dimension_numbers = #tpu.dot_dimension_numbers<[1], [0], [0], [1], [0, 0, 1, 1], [], []>} : vector<8x64xf32>, vector<64x32xf32>, vector<8x32xf32> -> vector<8x32xf32>
    %c0_63 = arith.constant 0 : index
    %c0_64 = arith.constant 0 : index
    %178 = vector.load %arg15[%c0_63, %c0_64] : memref<1x32xf32, #tpu.memory_space<vmem>>, vector<1x32xf32>
    %179 = vector.broadcast %178 : vector<1x32xf32> to vector<8x32xf32>
    %180 = arith.addf %177, %179 : vector<8x32xf32>
    %181 = vector.broadcast %1 : vector<8x1xi32> to vector<8x128xi32>
    %182 = arith.subi %181, %96 : vector<8x128xi32>
    %c0_i32_65 = arith.constant 0 : i32
    %183 = vector.broadcast %c0_i32_65 : i32 to vector<8x128xi32>
    %184 = arith.cmpi slt, %182, %183 : vector<8x128xi32>
    %c0_i32_66 = arith.constant 0 : i32
    %185 = vector.broadcast %c0_i32_66 : i32 to vector<8x128xi32>
    %186 = arith.select %184, %185, %182 : vector<8x128xi1>, vector<8x128xi32>
    %c31_i32_67 = arith.constant 31 : i32
    %187 = vector.broadcast %c31_i32_67 : i32 to vector<8x128xi32>
    %188 = arith.cmpi sgt, %186, %187 : vector<8x128xi32>
    %c31_i32_68 = arith.constant 31 : i32
    %189 = vector.broadcast %c31_i32_68 : i32 to vector<8x128xi32>
    %190 = arith.select %188, %189, %186 : vector<8x128xi1>, vector<8x128xi32>
    %191 = tpu.iota {dimensions = array<i32: 1>} : vector<8x16x128xi32>
    %192 = vector.shape_cast %90 : vector<8x128xi32> to vector<8x1x128xi32>
    %193 = vector.broadcast %192 : vector<8x1x128xi32> to vector<8x16x128xi32>
    %194 = arith.cmpi eq, %191, %193 : vector<8x16x128xi32>
    %195 = arith.extui %194 : vector<8x16x128xi1> to vector<8x16x128xi32>
    %196 = arith.sitofp %195 : vector<8x16x128xi32> to vector<8x16x128xf32>
    %197 = tpu.iota {dimensions = array<i32: 1>} : vector<8x48x128xi32>
    %198 = vector.shape_cast %93 : vector<8x128xi32> to vector<8x1x128xi32>
    %199 = vector.broadcast %198 : vector<8x1x128xi32> to vector<8x48x128xi32>
    %200 = arith.cmpi eq, %197, %199 : vector<8x48x128xi32>
    %201 = arith.extui %200 : vector<8x48x128xi1> to vector<8x48x128xi32>
    %202 = arith.sitofp %201 : vector<8x48x128xi32> to vector<8x48x128xf32>
    %203 = tpu.iota {dimensions = array<i32: 1>} : vector<8x32x128xi32>
    %204 = vector.shape_cast %190 : vector<8x128xi32> to vector<8x1x128xi32>
    %205 = vector.broadcast %204 : vector<8x1x128xi32> to vector<8x32x128xi32>
    %206 = arith.cmpi eq, %203, %205 : vector<8x32x128xi32>
    %207 = arith.extui %206 : vector<8x32x128xi1> to vector<8x32x128xi32>
    %208 = arith.sitofp %207 : vector<8x32x128xi32> to vector<8x32x128xf32>
    %209 = tpu.iota {dimensions = array<i32: 1>} : vector<8x8x16xi32>
    %c1_i32_69 = arith.constant 1 : i32
    %210 = vector.broadcast %c1_i32_69 : i32 to vector<8x8x16xi32>
    %211 = arith.cmpi eq, %209, %210 : vector<8x8x16xi32>
    %212 = vector.shape_cast %170 : vector<8x16xf32> to vector<8x1x16xf32>
    %213 = vector.shape_cast %21 : vector<1x1x16xf32> to vector<1x1x16xf32>
    %214 = vector.broadcast %213 : vector<1x1x16xf32> to vector<8x8x16xf32>
    %215 = vector.shape_cast %212 : vector<8x1x16xf32> to vector<8x1x16xf32>
    %216 = vector.broadcast %215 : vector<8x1x16xf32> to vector<8x8x16xf32>
    %217 = arith.select %211, %214, %216 : vector<8x8x16xi1>, vector<8x8x16xf32>
    "tpu.trace_start"() <{level = 10 : i32, message = "bcn,bna->bca"}> : () -> ()
    %cst_70 = arith.constant dense<0.000000e+00> : vector<8x8x128xf32>
    %218 = tpu.matmul %217, %196, %cst_70 {dimension_numbers = #tpu.dot_dimension_numbers<[2], [1], [1], [2], [0, 0, 0, 1, 1, 2], [0], [0]>} : vector<8x8x16xf32>, vector<8x16x128xf32>, vector<8x8x128xf32> -> vector<8x8x128xf32>
    "tpu.trace_stop"() : () -> ()
    %219 = vector.extract_strided_slice %218 {offsets = [0, 0, 0], sizes = [8, 1, 128], strides = [1, 1, 1]} : vector<8x8x128xf32> to vector<8x1x128xf32>
    %220 = vector.shape_cast %219 : vector<8x1x128xf32> to vector<8x128xf32>
    %221 = vector.extract_strided_slice %218 {offsets = [0, 1, 0], sizes = [8, 1, 128], strides = [1, 1, 1]} : vector<8x8x128xf32> to vector<8x1x128xf32>
    %222 = vector.shape_cast %221 : vector<8x1x128xf32> to vector<8x128xf32>
    %223 = tpu.iota {dimensions = array<i32: 1>} : vector<8x8x48xi32>
    %c1_i32_71 = arith.constant 1 : i32
    %224 = vector.broadcast %c1_i32_71 : i32 to vector<8x8x48xi32>
    %225 = arith.cmpi eq, %223, %224 : vector<8x8x48xi32>
    %226 = vector.shape_cast %175 : vector<8x48xf32> to vector<8x1x48xf32>
    %227 = vector.shape_cast %23 : vector<1x1x48xf32> to vector<1x1x48xf32>
    %228 = vector.broadcast %227 : vector<1x1x48xf32> to vector<8x8x48xf32>
    %229 = vector.shape_cast %226 : vector<8x1x48xf32> to vector<8x1x48xf32>
    %230 = vector.broadcast %229 : vector<8x1x48xf32> to vector<8x8x48xf32>
    %231 = arith.select %225, %228, %230 : vector<8x8x48xi1>, vector<8x8x48xf32>
    "tpu.trace_start"() <{level = 10 : i32, message = "bcn,bna->bca"}> : () -> ()
    %cst_72 = arith.constant dense<0.000000e+00> : vector<8x8x128xf32>
    %232 = tpu.matmul %231, %202, %cst_72 {dimension_numbers = #tpu.dot_dimension_numbers<[2], [1], [1], [2], [0, 0, 0, 1, 1, 2], [0], [0]>} : vector<8x8x48xf32>, vector<8x48x128xf32>, vector<8x8x128xf32> -> vector<8x8x128xf32>
    "tpu.trace_stop"() : () -> ()
    %233 = vector.extract_strided_slice %232 {offsets = [0, 0, 0], sizes = [8, 1, 128], strides = [1, 1, 1]} : vector<8x8x128xf32> to vector<8x1x128xf32>
    %234 = vector.shape_cast %233 : vector<8x1x128xf32> to vector<8x128xf32>
    %235 = vector.extract_strided_slice %232 {offsets = [0, 1, 0], sizes = [8, 1, 128], strides = [1, 1, 1]} : vector<8x8x128xf32> to vector<8x1x128xf32>
    %236 = vector.shape_cast %235 : vector<8x1x128xf32> to vector<8x128xf32>
    %237 = tpu.iota {dimensions = array<i32: 1>} : vector<8x8x32xi32>
    %c1_i32_73 = arith.constant 1 : i32
    %238 = vector.broadcast %c1_i32_73 : i32 to vector<8x8x32xi32>
    %239 = arith.cmpi eq, %237, %238 : vector<8x8x32xi32>
    %240 = vector.shape_cast %180 : vector<8x32xf32> to vector<8x1x32xf32>
    %241 = vector.shape_cast %25 : vector<1x1x32xf32> to vector<1x1x32xf32>
    %242 = vector.broadcast %241 : vector<1x1x32xf32> to vector<8x8x32xf32>
    %243 = vector.shape_cast %240 : vector<8x1x32xf32> to vector<8x1x32xf32>
    %244 = vector.broadcast %243 : vector<8x1x32xf32> to vector<8x8x32xf32>
    %245 = arith.select %239, %242, %244 : vector<8x8x32xi1>, vector<8x8x32xf32>
    "tpu.trace_start"() <{level = 10 : i32, message = "bcn,bna->bca"}> : () -> ()
    %cst_74 = arith.constant dense<0.000000e+00> : vector<8x8x128xf32>
    %246 = tpu.matmul %245, %208, %cst_74 {dimension_numbers = #tpu.dot_dimension_numbers<[2], [1], [1], [2], [0, 0, 0, 1, 1, 2], [0], [0]>} : vector<8x8x32xf32>, vector<8x32x128xf32>, vector<8x8x128xf32> -> vector<8x8x128xf32>
    "tpu.trace_stop"() : () -> ()
    %247 = vector.extract_strided_slice %246 {offsets = [0, 0, 0], sizes = [8, 1, 128], strides = [1, 1, 1]} : vector<8x8x128xf32> to vector<8x1x128xf32>
    %248 = vector.shape_cast %247 : vector<8x1x128xf32> to vector<8x128xf32>
    %249 = vector.extract_strided_slice %246 {offsets = [0, 1, 0], sizes = [8, 1, 128], strides = [1, 1, 1]} : vector<8x8x128xf32> to vector<8x1x128xf32>
    %250 = vector.shape_cast %249 : vector<8x1x128xf32> to vector<8x128xf32>
    %251 = arith.addf %234, %248 : vector<8x128xf32>
    %252 = arith.addf %222, %236 : vector<8x128xf32>
    %253 = arith.addf %252, %250 : vector<8x128xf32>
    %254 = vector.broadcast %165 : vector<8x1xf32> to vector<8x128xf32>
    %255 = arith.addf %253, %254 : vector<8x128xf32>
    %256 = arith.negf %255 : vector<8x128xf32>
    %257 = math.exp %256 : vector<8x128xf32>
    %cst_75 = arith.constant 1.000000e+00 : f32
    %258 = vector.broadcast %cst_75 : f32 to vector<8x128xf32>
    %259 = arith.addf %258, %257 : vector<8x128xf32>
    %260 = arith.divf %258, %259 : vector<8x128xf32>
    %cst_76 = arith.constant 1.000000e+00 : f32
    %261 = vector.broadcast %cst_76 : f32 to vector<8x128xf32>
    %262 = arith.subf %261, %260 : vector<8x128xf32>
    %263 = arith.mulf %262, %220 : vector<8x128xf32>
    %264 = arith.mulf %260, %251 : vector<8x128xf32>
    %265 = arith.addf %263, %264 : vector<8x128xf32>
    %cst_77 = arith.constant -1.000000e+09 : f32
    %266 = vector.broadcast %cst_77 : f32 to vector<8x128xf32>
    %267 = arith.select %88, %265, %266 : vector<8x128xi1>, vector<8x128xf32>
    %cst_78 = arith.constant dense<0xFF800000> : vector<8xf32>
    %268 = vector.multi_reduction <maximumf>, %267, %cst_78 [1] : vector<8x128xf32> to vector<8xf32>
    %269 = vector.shape_cast %268 : vector<8xf32> to vector<8x1xf32>
    %270 = vector.broadcast %269 : vector<8x1xf32> to vector<8x128xf32>
    %271 = arith.subf %267, %270 : vector<8x128xf32>
    %272 = math.exp %271 : vector<8x128xf32>
    %cst_79 = arith.constant dense<0.000000e+00> : vector<8xf32>
    %273 = vector.multi_reduction <add>, %272, %cst_79 [1] : vector<8x128xf32> to vector<8xf32>
    %274 = vector.shape_cast %273 : vector<8xf32> to vector<8x1xf32>
    %275 = math.log %274 : vector<8x1xf32>
    %276 = vector.broadcast %269 : vector<8x1xf32> to vector<8x128xf32>
    %277 = arith.subf %267, %276 : vector<8x128xf32>
    %278 = vector.broadcast %275 : vector<8x1xf32> to vector<8x128xf32>
    %279 = arith.subf %277, %278 : vector<8x128xf32>
    %280 = vector.broadcast %269 : vector<8x1xf32> to vector<8x128xf32>
    %281 = arith.cmpf oge, %267, %280 : vector<8x128xf32>
    %c128_i32 = arith.constant 128 : i32
    %282 = vector.broadcast %c128_i32 : i32 to vector<8x128xi32>
    %283 = arith.select %281, %3, %282 : vector<8x128xi1>, vector<8x128xi32>
    %cst_80 = arith.constant dense<2147483647> : vector<8xi32>
    %284 = vector.multi_reduction <minsi>, %283, %cst_80 [1] : vector<8x128xi32> to vector<8xi32>
    %285 = vector.shape_cast %284 : vector<8xi32> to vector<8x1xi32>
    %286 = vector.broadcast %285 : vector<8x1xi32> to vector<8x128xi32>
    %287 = arith.cmpi eq, %3, %286 : vector<8x128xi32>
    %c0_i32_81 = arith.constant 0 : i32
    %288 = vector.broadcast %c0_i32_81 : i32 to vector<8x128xi32>
    %289 = arith.select %287, %90, %288 : vector<8x128xi1>, vector<8x128xi32>
    %cst_82 = arith.constant dense<-2147483648> : vector<8xi32>
    %290 = vector.multi_reduction <maxsi>, %289, %cst_82 [1] : vector<8x128xi32> to vector<8xi32>
    %291 = vector.shape_cast %290 : vector<8xi32> to vector<8x1xi32>
    %c0_i32_83 = arith.constant 0 : i32
    %292 = vector.broadcast %c0_i32_83 : i32 to vector<8x128xi32>
    %293 = arith.select %287, %93, %292 : vector<8x128xi1>, vector<8x128xi32>
    %cst_84 = arith.constant dense<-2147483648> : vector<8xi32>
    %294 = vector.multi_reduction <maxsi>, %293, %cst_84 [1] : vector<8x128xi32> to vector<8xi32>
    %295 = vector.shape_cast %294 : vector<8xi32> to vector<8x1xi32>
    %c0_i32_85 = arith.constant 0 : i32
    %296 = vector.broadcast %c0_i32_85 : i32 to vector<8x128xi32>
    %297 = arith.select %287, %96, %296 : vector<8x128xi1>, vector<8x128xi32>
    %cst_86 = arith.constant dense<-2147483648> : vector<8xi32>
    %298 = vector.multi_reduction <maxsi>, %297, %cst_86 [1] : vector<8x128xi32> to vector<8xi32>
    %299 = vector.shape_cast %298 : vector<8xi32> to vector<8x1xi32>
    %c0_87 = arith.constant 0 : index
    %c0_88 = arith.constant 0 : index
    %c0_89 = arith.constant 0 : index
    %300 = vector.load %arg19[%c0_87, %c0_88, %c0_89] : memref<3x8x128xf32, #tpu.memory_space<vmem>>, vector<1x8x128xf32>
    %301 = vector.shape_cast %300 : vector<1x8x128xf32> to vector<8x128xf32>
    %302 = vector.shape_cast %279 : vector<8x128xf32> to vector<1x8x128xf32>
    tpu.vector_store %arg19[%c0_87, %c0_88, %c0_89], %302 {strides = array<i32>} : memref<3x8x128xf32, #tpu.memory_space<vmem>>, vector<1x8x128xf32>,
    %c0_i32_90 = arith.constant 0 : i32
    %303 = vector.broadcast %c0_i32_90 : i32 to vector<8x128xi32>
    %304 = arith.cmpi eq, %3, %303 : vector<8x128xi32>
    %cst_91 = arith.constant 0.000000e+00 : f32
    %305 = vector.shape_cast %275 : vector<8x1xf32> to vector<8x1xf32>
    %306 = vector.broadcast %305 : vector<8x1xf32> to vector<8x128xf32>
    %307 = vector.broadcast %cst_91 : f32 to vector<8x128xf32>
    %308 = arith.select %304, %306, %307 : vector<8x128xi1>, vector<8x128xf32>
    %c1_i32_92 = arith.constant 1 : i32
    %309 = vector.broadcast %c1_i32_92 : i32 to vector<8x128xi32>
    %310 = arith.cmpi eq, %3, %309 : vector<8x128xi32>
    %311 = arith.sitofp %285 : vector<8x1xi32> to vector<8x1xf32>
    %312 = vector.shape_cast %311 : vector<8x1xf32> to vector<8x1xf32>
    %313 = vector.broadcast %312 : vector<8x1xf32> to vector<8x128xf32>
    %314 = arith.select %310, %313, %308 : vector<8x128xi1>, vector<8x128xf32>
    %c2_i32 = arith.constant 2 : i32
    %315 = vector.broadcast %c2_i32 : i32 to vector<8x128xi32>
    %316 = arith.cmpi eq, %3, %315 : vector<8x128xi32>
    %317 = arith.sitofp %295 : vector<8x1xi32> to vector<8x1xf32>
    %318 = vector.shape_cast %317 : vector<8x1xf32> to vector<8x1xf32>
    %319 = vector.broadcast %318 : vector<8x1xf32> to vector<8x128xf32>
    %320 = arith.select %316, %319, %314 : vector<8x128xi1>, vector<8x128xf32>
    %c3_i32_93 = arith.constant 3 : i32
    %321 = vector.broadcast %c3_i32_93 : i32 to vector<8x128xi32>
    %322 = arith.cmpi eq, %3, %321 : vector<8x128xi32>
    %323 = arith.sitofp %299 : vector<8x1xi32> to vector<8x1xf32>
    %324 = vector.shape_cast %323 : vector<8x1xf32> to vector<8x1xf32>
    %325 = vector.broadcast %324 : vector<8x1xf32> to vector<8x128xf32>
    %326 = arith.select %322, %325, %320 : vector<8x128xi1>, vector<8x128xf32>
    %c0_94 = arith.constant 0 : index
    %c0_95 = arith.constant 0 : index
    %c0_96 = arith.constant 0 : index
    %327 = vector.load %arg20[%c0_94, %c0_95, %c0_96] : memref<3x8x128xf32, #tpu.memory_space<vmem>>, vector<1x8x128xf32>
    %328 = vector.shape_cast %327 : vector<1x8x128xf32> to vector<8x128xf32>
    %329 = vector.shape_cast %326 : vector<8x128xf32> to vector<1x8x128xf32>
    tpu.vector_store %arg20[%c0_94, %c0_95, %c0_96], %329 {strides = array<i32>} : memref<3x8x128xf32, #tpu.memory_space<vmem>>, vector<1x8x128xf32>,
    %c7_i32_97 = arith.constant 7 : i32
    %330 = vector.broadcast %c7_i32_97 : i32 to vector<8x1xi32>
    %331 = arith.muli %295, %330 : vector<8x1xi32>
    %c3_i32_98 = arith.constant 3 : i32
    %332 = vector.broadcast %c3_i32_98 : i32 to vector<8x128xi32>
    %333 = arith.muli %3, %332 : vector<8x128xi32>
    %334 = vector.broadcast %331 : vector<8x1xi32> to vector<8x128xi32>
    %335 = arith.addi %334, %333 : vector<8x128xi32>
    %336 = arith.sitofp %335 : vector<8x128xi32> to vector<8x128xf32>
    %cst_99 = arith.constant 5.000000e-01 : f32
    %337 = vector.broadcast %cst_99 : f32 to vector<8x128xf32>
    %338 = arith.addf %336, %337 : vector<8x128xf32>
    %cst_100 = arith.constant 0.0833333358 : f32
    %339 = vector.broadcast %cst_100 : f32 to vector<8x128xf32>
    %340 = arith.mulf %338, %339 : vector<8x128xf32>
    %341 = arith.fptosi %340 : vector<8x128xf32> to vector<8x128xi32>
    %c12_i32_101 = arith.constant 12 : i32
    %342 = vector.broadcast %c12_i32_101 : i32 to vector<8x128xi32>
    %343 = arith.muli %341, %342 : vector<8x128xi32>
    %344 = arith.subi %335, %343 : vector<8x128xi32>
    %c5_i32_102 = arith.constant 5 : i32
    %345 = vector.broadcast %c5_i32_102 : i32 to vector<8x1xi32>
    %346 = arith.muli %295, %345 : vector<8x1xi32>
    %c11_i32_103 = arith.constant 11 : i32
    %347 = vector.broadcast %c11_i32_103 : i32 to vector<8x128xi32>
    %348 = arith.muli %3, %347 : vector<8x128xi32>
    %349 = vector.broadcast %346 : vector<8x1xi32> to vector<8x128xi32>
    %350 = arith.addi %349, %348 : vector<8x128xi32>
    %c1_i32_104 = arith.constant 1 : i32
    %351 = vector.broadcast %c1_i32_104 : i32 to vector<8x128xi32>
    %352 = arith.addi %350, %351 : vector<8x128xi32>
    %353 = arith.sitofp %352 : vector<8x128xi32> to vector<8x128xf32>
    %cst_105 = arith.constant 5.000000e-01 : f32
    %354 = vector.broadcast %cst_105 : f32 to vector<8x128xf32>
    %355 = arith.addf %353, %354 : vector<8x128xf32>
    %cst_106 = arith.constant 2.500000e-02 : f32
    %356 = vector.broadcast %cst_106 : f32 to vector<8x128xf32>
    %357 = arith.mulf %355, %356 : vector<8x128xf32>
    %358 = arith.fptosi %357 : vector<8x128xf32> to vector<8x128xi32>
    %c40_i32_107 = arith.constant 40 : i32
    %359 = vector.broadcast %c40_i32_107 : i32 to vector<8x128xi32>
    %360 = arith.muli %358, %359 : vector<8x128xi32>
    %361 = arith.subi %352, %360 : vector<8x128xi32>
    %362 = arith.sitofp %3 : vector<8x128xi32> to vector<8x128xf32>
    %cst_108 = arith.constant 5.000000e-01 : f32
    %363 = vector.broadcast %cst_108 : f32 to vector<8x128xf32>
    %364 = arith.addf %362, %363 : vector<8x128xf32>
    %cst_109 = arith.constant 2.000000e-01 : f32
    %365 = vector.broadcast %cst_109 : f32 to vector<8x128xf32>
    %366 = arith.mulf %364, %365 : vector<8x128xf32>
    %367 = arith.fptosi %366 : vector<8x128xf32> to vector<8x128xi32>
    %c5_i32_110 = arith.constant 5 : i32
    %368 = vector.broadcast %c5_i32_110 : i32 to vector<8x128xi32>
    %369 = arith.muli %367, %368 : vector<8x128xi32>
    %370 = arith.subi %3, %369 : vector<8x128xi32>
    %371 = vector.broadcast %299 : vector<8x1xi32> to vector<8x128xi32>
    %372 = arith.subi %371, %370 : vector<8x128xi32>
    %c0_i32_111 = arith.constant 0 : i32
    %373 = vector.broadcast %c0_i32_111 : i32 to vector<8x128xi32>
    %374 = arith.cmpi slt, %372, %373 : vector<8x128xi32>
    %c0_i32_112 = arith.constant 0 : i32
    %375 = vector.broadcast %c0_i32_112 : i32 to vector<8x128xi32>
    %376 = arith.select %374, %375, %372 : vector<8x128xi1>, vector<8x128xi32>
    %377 = arith.sitofp %295 : vector<8x1xi32> to vector<8x1xf32>
    %cst_113 = arith.constant 5.000000e-01 : f32
    %378 = vector.broadcast %cst_113 : f32 to vector<8x1xf32>
    %379 = arith.addf %377, %378 : vector<8x1xf32>
    %cst_114 = arith.constant 0.00787401571 : f32
    %380 = vector.broadcast %cst_114 : f32 to vector<8x1xf32>
    %381 = arith.mulf %379, %380 : vector<8x1xf32>
    %382 = arith.fptosi %381 : vector<8x1xf32> to vector<8x1xi32>
    %c127_i32_115 = arith.constant 127 : i32
    %383 = vector.broadcast %c127_i32_115 : i32 to vector<8x1xi32>
    %384 = arith.muli %382, %383 : vector<8x1xi32>
    %385 = arith.subi %295, %384 : vector<8x1xi32>
    %c1_i32_116 = arith.constant 1 : i32
    %386 = vector.broadcast %c1_i32_116 : i32 to vector<8x1xi32>
    %387 = arith.addi %386, %385 : vector<8x1xi32>
    %388 = vector.broadcast %387 : vector<8x1xi32> to vector<8x128xi32>
    %389 = arith.cmpi slt, %3, %388 : vector<8x128xi32>
    %c12_i32_117 = arith.constant 12 : i32
    %390 = vector.broadcast %c12_i32_117 : i32 to vector<8x128xi32>
    %391 = arith.select %389, %344, %390 : vector<8x128xi1>, vector<8x128xi32>
    %392 = vector.shape_cast %295 : vector<8x1xi32> to vector<8x1xi32>
    %393 = vector.broadcast %392 : vector<8x1xi32> to vector<8x128xi32>
    %394 = arith.select %389, %361, %393 : vector<8x128xi1>, vector<8x128xi32>
    %395 = vector.shape_cast %299 : vector<8x1xi32> to vector<8x1xi32>
    %396 = vector.broadcast %395 : vector<8x1xi32> to vector<8x128xi32>
    %397 = arith.select %389, %376, %396 : vector<8x128xi1>, vector<8x128xi32>
    %398 = arith.subi %1, %299 : vector<8x1xi32>
    %c0_i32_118 = arith.constant 0 : i32
    %399 = vector.broadcast %c0_i32_118 : i32 to vector<8x1xi32>
    %400 = arith.cmpi slt, %398, %399 : vector<8x1xi32>
    %c0_i32_119 = arith.constant 0 : i32
    %401 = vector.broadcast %c0_i32_119 : i32 to vector<8x1xi32>
    %402 = arith.select %400, %401, %398 : vector<8x1xi1>, vector<8x1xi32>
    %c31_i32_120 = arith.constant 31 : i32
    %403 = vector.broadcast %c31_i32_120 : i32 to vector<8x1xi32>
    %404 = arith.cmpi sgt, %402, %403 : vector<8x1xi32>
    %c31_i32_121 = arith.constant 31 : i32
    %405 = vector.broadcast %c31_i32_121 : i32 to vector<8x1xi32>
    %406 = arith.select %404, %405, %402 : vector<8x1xi1>, vector<8x1xi32>
    %407 = tpu.iota {dimensions = array<i32: 1>} : vector<8x96xi32>
    %408 = vector.broadcast %291 : vector<8x1xi32> to vector<8x96xi32>
    %409 = arith.cmpi eq, %407, %408 : vector<8x96xi32>
    %c16_i32_122 = arith.constant 16 : i32
    %410 = vector.broadcast %c16_i32_122 : i32 to vector<8x1xi32>
    %411 = arith.addi %295, %410 : vector<8x1xi32>
    %412 = vector.broadcast %411 : vector<8x1xi32> to vector<8x96xi32>
    %413 = arith.cmpi eq, %407, %412 : vector<8x96xi32>
    %414 = arith.ori %409, %413 : vector<8x96xi1>
    %c16_i32_123 = arith.constant 16 : i32
    %415 = vector.broadcast %c16_i32_123 : i32 to vector<8x1xi32>
    %416 = arith.addi %406, %415 : vector<8x1xi32>
    %c48_i32_124 = arith.constant 48 : i32
    %417 = vector.broadcast %c48_i32_124 : i32 to vector<8x1xi32>
    %418 = arith.addi %416, %417 : vector<8x1xi32>
    %419 = vector.broadcast %418 : vector<8x1xi32> to vector<8x96xi32>
    %420 = arith.cmpi eq, %407, %419 : vector<8x96xi32>
    %421 = arith.ori %414, %420 : vector<8x96xi1>
    %422 = arith.extui %421 : vector<8x96xi1> to vector<8x96xi32>
    %423 = arith.sitofp %422 : vector<8x96xi32> to vector<8x96xf32>
    %424 = arith.truncf %423 : vector<8x96xf32> to vector<8x96xbf16>
    %c0_125 = arith.constant 0 : index
    %c0_126 = arith.constant 0 : index
    %425 = vector.load %arg4[%c0_125, %c0_126] : memref<96x256xbf16, #tpu.memory_space<vmem>>, vector<96x256xbf16>
    %cst_127 = arith.constant dense<0.000000e+00> : vector<8x256xf32>
    %426 = tpu.matmul %424, %425, %cst_127 {dimension_numbers = #tpu.dot_dimension_numbers<[1], [0], [0], [1], [0, 0, 1, 1], [], []>} : vector<8x96xbf16>, vector<96x256xbf16>, vector<8x256xf32> -> vector<8x256xf32>
    %427 = arith.truncf %157 : vector<8x64xf32> to vector<8x64xbf16>
    %c0_128 = arith.constant 0 : index
    %c0_129 = arith.constant 0 : index
    %428 = vector.load %arg5[%c0_128, %c0_129] : memref<64x256xbf16, #tpu.memory_space<vmem>>, vector<64x256xbf16>
    %cst_130 = arith.constant dense<0.000000e+00> : vector<8x256xf32>
    %429 = tpu.matmul %427, %428, %cst_130 {dimension_numbers = #tpu.dot_dimension_numbers<[1], [0], [0], [1], [0, 0, 1, 1], [], []>} : vector<8x64xbf16>, vector<64x256xbf16>, vector<8x256xf32> -> vector<8x256xf32>
    %430 = arith.addf %426, %429 : vector<8x256xf32>
    %c0_131 = arith.constant 0 : index
    %c0_132 = arith.constant 0 : index
    %431 = vector.load %arg6[%c0_131, %c0_132] : memref<1x256xf32, #tpu.memory_space<vmem>>, vector<1x256xf32>
    %432 = vector.broadcast %431 : vector<1x256xf32> to vector<8x256xf32>
    %433 = arith.addf %430, %432 : vector<8x256xf32>
    %434 = vector.extract_strided_slice %433 {offsets = [0, 0], sizes = [8, 64], strides = [1, 1]} : vector<8x256xf32> to vector<8x64xf32>
    %435 = arith.negf %434 : vector<8x64xf32>
    %436 = math.exp %435 : vector<8x64xf32>
    %cst_133 = arith.constant 1.000000e+00 : f32
    %437 = vector.broadcast %cst_133 : f32 to vector<8x64xf32>
    %438 = arith.addf %437, %436 : vector<8x64xf32>
    %439 = arith.divf %437, %438 : vector<8x64xf32>
    %440 = vector.extract_strided_slice %433 {offsets = [0, 64], sizes = [8, 64], strides = [1, 1]} : vector<8x256xf32> to vector<8x64xf32>
    %441 = arith.negf %440 : vector<8x64xf32>
    %442 = math.exp %441 : vector<8x64xf32>
    %cst_134 = arith.constant 1.000000e+00 : f32
    %443 = vector.broadcast %cst_134 : f32 to vector<8x64xf32>
    %444 = arith.addf %443, %442 : vector<8x64xf32>
    %445 = arith.divf %443, %444 : vector<8x64xf32>
    %446 = vector.extract_strided_slice %433 {offsets = [0, 128], sizes = [8, 64], strides = [1, 1]} : vector<8x256xf32> to vector<8x64xf32>
    %447 = math.tanh %446 : vector<8x64xf32>
    %448 = vector.extract_strided_slice %433 {offsets = [0, 192], sizes = [8, 64], strides = [1, 1]} : vector<8x256xf32> to vector<8x64xf32>
    %449 = arith.negf %448 : vector<8x64xf32>
    %450 = math.exp %449 : vector<8x64xf32>
    %cst_135 = arith.constant 1.000000e+00 : f32
    %451 = vector.broadcast %cst_135 : f32 to vector<8x64xf32>
    %452 = arith.addf %451, %450 : vector<8x64xf32>
    %453 = arith.divf %451, %452 : vector<8x64xf32>
    %454 = arith.mulf %445, %155 : vector<8x64xf32>
    %455 = arith.mulf %439, %447 : vector<8x64xf32>
    %456 = arith.addf %454, %455 : vector<8x64xf32>
    %457 = math.tanh %456 : vector<8x64xf32>
    %458 = arith.mulf %453, %457 : vector<8x64xf32>
    %459 = arith.truncf %458 : vector<8x64xf32> to vector<8x64xbf16>
    %c0_136 = arith.constant 0 : index
    %c0_137 = arith.constant 0 : index
    %460 = vector.load %arg7[%c0_136, %c0_137] : memref<64x128xbf16, #tpu.memory_space<vmem>>, vector<64x128xbf16>
    %cst_138 = arith.constant dense<0.000000e+00> : vector<8x128xf32>
    %461 = tpu.matmul %459, %460, %cst_138 {dimension_numbers = #tpu.dot_dimension_numbers<[1], [0], [0], [1], [0, 0, 1, 1], [], []>} : vector<8x64xbf16>, vector<64x128xbf16>, vector<8x128xf32> -> vector<8x128xf32>
    %462 = arith.addf %461, %19 : vector<8x128xf32>
    %463 = vector.extract_strided_slice %462 {offsets = [0, 0], sizes = [8, 64], strides = [1, 1]} : vector<8x128xf32> to vector<8x64xf32>
    %cst_139 = arith.constant 0.000000e+00 : f32
    %464 = vector.broadcast %cst_139 : f32 to vector<8x64xf32>
    %465 = arith.maximumf %463, %464 : vector<8x64xf32>
    %466 = vector.extract_strided_slice %462 {offsets = [0, 64], sizes = [8, 1], strides = [1, 1]} : vector<8x128xf32> to vector<8x1xf32>
    %c0_140 = arith.constant 0 : index
    %c0_141 = arith.constant 0 : index
    %467 = vector.load %arg10[%c0_140, %c0_141] : memref<64x16xf32, #tpu.memory_space<vmem>>, vector<64x16xf32>
    %cst_142 = arith.constant dense<0.000000e+00> : vector<8x16xf32>
    %468 = tpu.matmul %465, %467, %cst_142 {dimension_numbers = #tpu.dot_dimension_numbers<[1], [0], [0], [1], [0, 0, 1, 1], [], []>} : vector<8x64xf32>, vector<64x16xf32>, vector<8x16xf32> -> vector<8x16xf32>
    %c0_143 = arith.constant 0 : index
    %c0_144 = arith.constant 0 : index
    %469 = vector.load %arg11[%c0_143, %c0_144] : memref<1x16xf32, #tpu.memory_space<vmem>>, vector<1x16xf32>
    %470 = vector.broadcast %469 : vector<1x16xf32> to vector<8x16xf32>
    %471 = arith.addf %468, %470 : vector<8x16xf32>
    %c0_145 = arith.constant 0 : index
    %c0_146 = arith.constant 0 : index
    %472 = vector.load %arg12[%c0_145, %c0_146] : memref<64x48xf32, #tpu.memory_space<vmem>>, vector<64x48xf32>
    %cst_147 = arith.constant dense<0.000000e+00> : vector<8x48xf32>
    %473 = tpu.matmul %465, %472, %cst_147 {dimension_numbers = #tpu.dot_dimension_numbers<[1], [0], [0], [1], [0, 0, 1, 1], [], []>} : vector<8x64xf32>, vector<64x48xf32>, vector<8x48xf32> -> vector<8x48xf32>
    %c0_148 = arith.constant 0 : index
    %c0_149 = arith.constant 0 : index
    %474 = vector.load %arg13[%c0_148, %c0_149] : memref<1x48xf32, #tpu.memory_space<vmem>>, vector<1x48xf32>
    %475 = vector.broadcast %474 : vector<1x48xf32> to vector<8x48xf32>
    %476 = arith.addf %473, %475 : vector<8x48xf32>
    %c0_150 = arith.constant 0 : index
    %c0_151 = arith.constant 0 : index
    %477 = vector.load %arg14[%c0_150, %c0_151] : memref<64x32xf32, #tpu.memory_space<vmem>>, vector<64x32xf32>
    %cst_152 = arith.constant dense<0.000000e+00> : vector<8x32xf32>
    %478 = tpu.matmul %465, %477, %cst_152 {dimension_numbers = #tpu.dot_dimension_numbers<[1], [0], [0], [1], [0, 0, 1, 1], [], []>} : vector<8x64xf32>, vector<64x32xf32>, vector<8x32xf32> -> vector<8x32xf32>
    %c0_153 = arith.constant 0 : index
    %c0_154 = arith.constant 0 : index
    %479 = vector.load %arg15[%c0_153, %c0_154] : memref<1x32xf32, #tpu.memory_space<vmem>>, vector<1x32xf32>
    %480 = vector.broadcast %479 : vector<1x32xf32> to vector<8x32xf32>
    %481 = arith.addf %478, %480 : vector<8x32xf32>
    %482 = vector.broadcast %1 : vector<8x1xi32> to vector<8x128xi32>
    %483 = arith.subi %482, %397 : vector<8x128xi32>
    %c0_i32_155 = arith.constant 0 : i32
    %484 = vector.broadcast %c0_i32_155 : i32 to vector<8x128xi32>
    %485 = arith.cmpi slt, %483, %484 : vector<8x128xi32>
    %c0_i32_156 = arith.constant 0 : i32
    %486 = vector.broadcast %c0_i32_156 : i32 to vector<8x128xi32>
    %487 = arith.select %485, %486, %483 : vector<8x128xi1>, vector<8x128xi32>
    %c31_i32_157 = arith.constant 31 : i32
    %488 = vector.broadcast %c31_i32_157 : i32 to vector<8x128xi32>
    %489 = arith.cmpi sgt, %487, %488 : vector<8x128xi32>
    %c31_i32_158 = arith.constant 31 : i32
    %490 = vector.broadcast %c31_i32_158 : i32 to vector<8x128xi32>
    %491 = arith.select %489, %490, %487 : vector<8x128xi1>, vector<8x128xi32>
    %492 = tpu.iota {dimensions = array<i32: 1>} : vector<8x16x128xi32>
    %493 = vector.shape_cast %391 : vector<8x128xi32> to vector<8x1x128xi32>
    %494 = vector.broadcast %493 : vector<8x1x128xi32> to vector<8x16x128xi32>
    %495 = arith.cmpi eq, %492, %494 : vector<8x16x128xi32>
    %496 = arith.extui %495 : vector<8x16x128xi1> to vector<8x16x128xi32>
    %497 = arith.sitofp %496 : vector<8x16x128xi32> to vector<8x16x128xf32>
    %498 = tpu.iota {dimensions = array<i32: 1>} : vector<8x48x128xi32>
    %499 = vector.shape_cast %394 : vector<8x128xi32> to vector<8x1x128xi32>
    %500 = vector.broadcast %499 : vector<8x1x128xi32> to vector<8x48x128xi32>
    %501 = arith.cmpi eq, %498, %500 : vector<8x48x128xi32>
    %502 = arith.extui %501 : vector<8x48x128xi1> to vector<8x48x128xi32>
    %503 = arith.sitofp %502 : vector<8x48x128xi32> to vector<8x48x128xf32>
    %504 = tpu.iota {dimensions = array<i32: 1>} : vector<8x32x128xi32>
    %505 = vector.shape_cast %491 : vector<8x128xi32> to vector<8x1x128xi32>
    %506 = vector.broadcast %505 : vector<8x1x128xi32> to vector<8x32x128xi32>
    %507 = arith.cmpi eq, %504, %506 : vector<8x32x128xi32>
    %508 = arith.extui %507 : vector<8x32x128xi1> to vector<8x32x128xi32>
    %509 = arith.sitofp %508 : vector<8x32x128xi32> to vector<8x32x128xf32>
    %510 = tpu.iota {dimensions = array<i32: 1>} : vector<8x8x16xi32>
    %c1_i32_159 = arith.constant 1 : i32
    %511 = vector.broadcast %c1_i32_159 : i32 to vector<8x8x16xi32>
    %512 = arith.cmpi eq, %510, %511 : vector<8x8x16xi32>
    %513 = vector.shape_cast %471 : vector<8x16xf32> to vector<8x1x16xf32>
    %514 = vector.shape_cast %21 : vector<1x1x16xf32> to vector<1x1x16xf32>
    %515 = vector.broadcast %514 : vector<1x1x16xf32> to vector<8x8x16xf32>
    %516 = vector.shape_cast %513 : vector<8x1x16xf32> to vector<8x1x16xf32>
    %517 = vector.broadcast %516 : vector<8x1x16xf32> to vector<8x8x16xf32>
    %518 = arith.select %512, %515, %517 : vector<8x8x16xi1>, vector<8x8x16xf32>
    "tpu.trace_start"() <{level = 10 : i32, message = "bcn,bna->bca"}> : () -> ()
    %cst_160 = arith.constant dense<0.000000e+00> : vector<8x8x128xf32>
    %519 = tpu.matmul %518, %497, %cst_160 {dimension_numbers = #tpu.dot_dimension_numbers<[2], [1], [1], [2], [0, 0, 0, 1, 1, 2], [0], [0]>} : vector<8x8x16xf32>, vector<8x16x128xf32>, vector<8x8x128xf32> -> vector<8x8x128xf32>
    "tpu.trace_stop"() : () -> ()
    %520 = vector.extract_strided_slice %519 {offsets = [0, 0, 0], sizes = [8, 1, 128], strides = [1, 1, 1]} : vector<8x8x128xf32> to vector<8x1x128xf32>
    %521 = vector.shape_cast %520 : vector<8x1x128xf32> to vector<8x128xf32>
    %522 = vector.extract_strided_slice %519 {offsets = [0, 1, 0], sizes = [8, 1, 128], strides = [1, 1, 1]} : vector<8x8x128xf32> to vector<8x1x128xf32>
    %523 = vector.shape_cast %522 : vector<8x1x128xf32> to vector<8x128xf32>
    %524 = tpu.iota {dimensions = array<i32: 1>} : vector<8x8x48xi32>
    %c1_i32_161 = arith.constant 1 : i32
    %525 = vector.broadcast %c1_i32_161 : i32 to vector<8x8x48xi32>
    %526 = arith.cmpi eq, %524, %525 : vector<8x8x48xi32>
    %527 = vector.shape_cast %476 : vector<8x48xf32> to vector<8x1x48xf32>
    %528 = vector.shape_cast %23 : vector<1x1x48xf32> to vector<1x1x48xf32>
    %529 = vector.broadcast %528 : vector<1x1x48xf32> to vector<8x8x48xf32>
    %530 = vector.shape_cast %527 : vector<8x1x48xf32> to vector<8x1x48xf32>
    %531 = vector.broadcast %530 : vector<8x1x48xf32> to vector<8x8x48xf32>
    %532 = arith.select %526, %529, %531 : vector<8x8x48xi1>, vector<8x8x48xf32>
    "tpu.trace_start"() <{level = 10 : i32, message = "bcn,bna->bca"}> : () -> ()
    %cst_162 = arith.constant dense<0.000000e+00> : vector<8x8x128xf32>
    %533 = tpu.matmul %532, %503, %cst_162 {dimension_numbers = #tpu.dot_dimension_numbers<[2], [1], [1], [2], [0, 0, 0, 1, 1, 2], [0], [0]>} : vector<8x8x48xf32>, vector<8x48x128xf32>, vector<8x8x128xf32> -> vector<8x8x128xf32>
    "tpu.trace_stop"() : () -> ()
    %534 = vector.extract_strided_slice %533 {offsets = [0, 0, 0], sizes = [8, 1, 128], strides = [1, 1, 1]} : vector<8x8x128xf32> to vector<8x1x128xf32>
    %535 = vector.shape_cast %534 : vector<8x1x128xf32> to vector<8x128xf32>
    %536 = vector.extract_strided_slice %533 {offsets = [0, 1, 0], sizes = [8, 1, 128], strides = [1, 1, 1]} : vector<8x8x128xf32> to vector<8x1x128xf32>
    %537 = vector.shape_cast %536 : vector<8x1x128xf32> to vector<8x128xf32>
    %538 = tpu.iota {dimensions = array<i32: 1>} : vector<8x8x32xi32>
    %c1_i32_163 = arith.constant 1 : i32
    %539 = vector.broadcast %c1_i32_163 : i32 to vector<8x8x32xi32>
    %540 = arith.cmpi eq, %538, %539 : vector<8x8x32xi32>
    %541 = vector.shape_cast %481 : vector<8x32xf32> to vector<8x1x32xf32>
    %542 = vector.shape_cast %25 : vector<1x1x32xf32> to vector<1x1x32xf32>
    %543 = vector.broadcast %542 : vector<1x1x32xf32> to vector<8x8x32xf32>
    %544 = vector.shape_cast %541 : vector<8x1x32xf32> to vector<8x1x32xf32>
    %545 = vector.broadcast %544 : vector<8x1x32xf32> to vector<8x8x32xf32>
    %546 = arith.select %540, %543, %545 : vector<8x8x32xi1>, vector<8x8x32xf32>
    "tpu.trace_start"() <{level = 10 : i32, message = "bcn,bna->bca"}> : () -> ()
    %cst_164 = arith.constant dense<0.000000e+00> : vector<8x8x128xf32>
    %547 = tpu.matmul %546, %509, %cst_164 {dimension_numbers = #tpu.dot_dimension_numbers<[2], [1], [1], [2], [0, 0, 0, 1, 1, 2], [0], [0]>} : vector<8x8x32xf32>, vector<8x32x128xf32>, vector<8x8x128xf32> -> vector<8x8x128xf32>
    "tpu.trace_stop"() : () -> ()
    %548 = vector.extract_strided_slice %547 {offsets = [0, 0, 0], sizes = [8, 1, 128], strides = [1, 1, 1]} : vector<8x8x128xf32> to vector<8x1x128xf32>
    %549 = vector.shape_cast %548 : vector<8x1x128xf32> to vector<8x128xf32>
    %550 = vector.extract_strided_slice %547 {offsets = [0, 1, 0], sizes = [8, 1, 128], strides = [1, 1, 1]} : vector<8x8x128xf32> to vector<8x1x128xf32>
    %551 = vector.shape_cast %550 : vector<8x1x128xf32> to vector<8x128xf32>
    %552 = arith.addf %535, %549 : vector<8x128xf32>
    %553 = arith.addf %523, %537 : vector<8x128xf32>
    %554 = arith.addf %553, %551 : vector<8x128xf32>
    %555 = vector.broadcast %466 : vector<8x1xf32> to vector<8x128xf32>
    %556 = arith.addf %554, %555 : vector<8x128xf32>
    %557 = arith.negf %556 : vector<8x128xf32>
    %558 = math.exp %557 : vector<8x128xf32>
    %cst_165 = arith.constant 1.000000e+00 : f32
    %559 = vector.broadcast %cst_165 : f32 to vector<8x128xf32>
    %560 = arith.addf %559, %558 : vector<8x128xf32>
    %561 = arith.divf %559, %560 : vector<8x128xf32>
    %cst_166 = arith.constant 1.000000e+00 : f32
    %562 = vector.broadcast %cst_166 : f32 to vector<8x128xf32>
    %563 = arith.subf %562, %561 : vector<8x128xf32>
    %564 = arith.mulf %563, %521 : vector<8x128xf32>
    %565 = arith.mulf %561, %552 : vector<8x128xf32>
    %566 = arith.addf %564, %565 : vector<8x128xf32>
    %cst_167 = arith.constant -1.000000e+09 : f32
    %567 = vector.broadcast %cst_167 : f32 to vector<8x128xf32>
    %568 = arith.select %389, %566, %567 : vector<8x128xi1>, vector<8x128xf32>
    %cst_168 = arith.constant dense<0xFF800000> : vector<8xf32>
    %569 = vector.multi_reduction <maximumf>, %568, %cst_168 [1] : vector<8x128xf32> to vector<8xf32>
    %570 = vector.shape_cast %569 : vector<8xf32> to vector<8x1xf32>
    %571 = vector.broadcast %570 : vector<8x1xf32> to vector<8x128xf32>
    %572 = arith.subf %568, %571 : vector<8x128xf32>
    %573 = math.exp %572 : vector<8x128xf32>
    %cst_169 = arith.constant dense<0.000000e+00> : vector<8xf32>
    %574 = vector.multi_reduction <add>, %573, %cst_169 [1] : vector<8x128xf32> to vector<8xf32>
    %575 = vector.shape_cast %574 : vector<8xf32> to vector<8x1xf32>
    %576 = math.log %575 : vector<8x1xf32>
    %577 = vector.broadcast %570 : vector<8x1xf32> to vector<8x128xf32>
    %578 = arith.subf %568, %577 : vector<8x128xf32>
    %579 = vector.broadcast %576 : vector<8x1xf32> to vector<8x128xf32>
    %580 = arith.subf %578, %579 : vector<8x128xf32>
    %581 = vector.broadcast %570 : vector<8x1xf32> to vector<8x128xf32>
    %582 = arith.cmpf oge, %568, %581 : vector<8x128xf32>
    %c128_i32_170 = arith.constant 128 : i32
    %583 = vector.broadcast %c128_i32_170 : i32 to vector<8x128xi32>
    %584 = arith.select %582, %3, %583 : vector<8x128xi1>, vector<8x128xi32>
    %cst_171 = arith.constant dense<2147483647> : vector<8xi32>
    %585 = vector.multi_reduction <minsi>, %584, %cst_171 [1] : vector<8x128xi32> to vector<8xi32>
    %586 = vector.shape_cast %585 : vector<8xi32> to vector<8x1xi32>
    %587 = vector.broadcast %586 : vector<8x1xi32> to vector<8x128xi32>
    %588 = arith.cmpi eq, %3, %587 : vector<8x128xi32>
    %c0_i32_172 = arith.constant 0 : i32
    %589 = vector.broadcast %c0_i32_172 : i32 to vector<8x128xi32>
    %590 = arith.select %588, %391, %589 : vector<8x128xi1>, vector<8x128xi32>
    %cst_173 = arith.constant dense<-2147483648> : vector<8xi32>
    %591 = vector.multi_reduction <maxsi>, %590, %cst_173 [1] : vector<8x128xi32> to vector<8xi32>
    %592 = vector.shape_cast %591 : vector<8xi32> to vector<8x1xi32>
    %c0_i32_174 = arith.constant 0 : i32
    %593 = vector.broadcast %c0_i32_174 : i32 to vector<8x128xi32>
    %594 = arith.select %588, %394, %593 : vector<8x128xi1>, vector<8x128xi32>
    %cst_175 = arith.constant dense<-2147483648> : vector<8xi32>
    %595 = vector.multi_reduction <maxsi>, %594, %cst_175 [1] : vector<8x128xi32> to vector<8xi32>
    %596 = vector.shape_cast %595 : vector<8xi32> to vector<8x1xi32>
    %c0_i32_176 = arith.constant 0 : i32
    %597 = vector.broadcast %c0_i32_176 : i32 to vector<8x128xi32>
    %598 = arith.select %588, %397, %597 : vector<8x128xi1>, vector<8x128xi32>
    %cst_177 = arith.constant dense<-2147483648> : vector<8xi32>
    %599 = vector.multi_reduction <maxsi>, %598, %cst_177 [1] : vector<8x128xi32> to vector<8xi32>
    %600 = vector.shape_cast %599 : vector<8xi32> to vector<8x1xi32>
    %c1 = arith.constant 1 : index
    %c0_178 = arith.constant 0 : index
    %c0_179 = arith.constant 0 : index
    %601 = vector.load %arg19[%c1, %c0_178, %c0_179] : memref<3x8x128xf32, #tpu.memory_space<vmem>>, vector<1x8x128xf32>
    %602 = vector.shape_cast %601 : vector<1x8x128xf32> to vector<8x128xf32>
    %603 = vector.shape_cast %580 : vector<8x128xf32> to vector<1x8x128xf32>
    tpu.vector_store %arg19[%c1, %c0_178, %c0_179], %603 {strides = array<i32>} : memref<3x8x128xf32, #tpu.memory_space<vmem>>, vector<1x8x128xf32>,
    %c0_i32_180 = arith.constant 0 : i32
    %604 = vector.broadcast %c0_i32_180 : i32 to vector<8x128xi32>
    %605 = arith.cmpi eq, %3, %604 : vector<8x128xi32>
    %cst_181 = arith.constant 0.000000e+00 : f32
    %606 = vector.shape_cast %576 : vector<8x1xf32> to vector<8x1xf32>
    %607 = vector.broadcast %606 : vector<8x1xf32> to vector<8x128xf32>
    %608 = vector.broadcast %cst_181 : f32 to vector<8x128xf32>
    %609 = arith.select %605, %607, %608 : vector<8x128xi1>, vector<8x128xf32>
    %c1_i32_182 = arith.constant 1 : i32
    %610 = vector.broadcast %c1_i32_182 : i32 to vector<8x128xi32>
    %611 = arith.cmpi eq, %3, %610 : vector<8x128xi32>
    %612 = arith.sitofp %586 : vector<8x1xi32> to vector<8x1xf32>
    %613 = vector.shape_cast %612 : vector<8x1xf32> to vector<8x1xf32>
    %614 = vector.broadcast %613 : vector<8x1xf32> to vector<8x128xf32>
    %615 = arith.select %611, %614, %609 : vector<8x128xi1>, vector<8x128xf32>
    %c2_i32_183 = arith.constant 2 : i32
    %616 = vector.broadcast %c2_i32_183 : i32 to vector<8x128xi32>
    %617 = arith.cmpi eq, %3, %616 : vector<8x128xi32>
    %618 = arith.sitofp %596 : vector<8x1xi32> to vector<8x1xf32>
    %619 = vector.shape_cast %618 : vector<8x1xf32> to vector<8x1xf32>
    %620 = vector.broadcast %619 : vector<8x1xf32> to vector<8x128xf32>
    %621 = arith.select %617, %620, %615 : vector<8x128xi1>, vector<8x128xf32>
    %c3_i32_184 = arith.constant 3 : i32
    %622 = vector.broadcast %c3_i32_184 : i32 to vector<8x128xi32>
    %623 = arith.cmpi eq, %3, %622 : vector<8x128xi32>
    %624 = arith.sitofp %600 : vector<8x1xi32> to vector<8x1xf32>
    %625 = vector.shape_cast %624 : vector<8x1xf32> to vector<8x1xf32>
    %626 = vector.broadcast %625 : vector<8x1xf32> to vector<8x128xf32>
    %627 = arith.select %623, %626, %621 : vector<8x128xi1>, vector<8x128xf32>
    %c1_185 = arith.constant 1 : index
    %c0_186 = arith.constant 0 : index
    %c0_187 = arith.constant 0 : index
    %628 = vector.load %arg20[%c1_185, %c0_186, %c0_187] : memref<3x8x128xf32, #tpu.memory_space<vmem>>, vector<1x8x128xf32>
    %629 = vector.shape_cast %628 : vector<1x8x128xf32> to vector<8x128xf32>
    %630 = vector.shape_cast %627 : vector<8x128xf32> to vector<1x8x128xf32>
    tpu.vector_store %arg20[%c1_185, %c0_186, %c0_187], %630 {strides = array<i32>} : memref<3x8x128xf32, #tpu.memory_space<vmem>>, vector<1x8x128xf32>,
    %c7_i32_188 = arith.constant 7 : i32
    %631 = vector.broadcast %c7_i32_188 : i32 to vector<8x1xi32>
    %632 = arith.muli %596, %631 : vector<8x1xi32>
    %c3_i32_189 = arith.constant 3 : i32
    %633 = vector.broadcast %c3_i32_189 : i32 to vector<8x128xi32>
    %634 = arith.muli %3, %633 : vector<8x128xi32>
    %635 = vector.broadcast %632 : vector<8x1xi32> to vector<8x128xi32>
    %636 = arith.addi %635, %634 : vector<8x128xi32>
    %637 = arith.sitofp %636 : vector<8x128xi32> to vector<8x128xf32>
    %cst_190 = arith.constant 5.000000e-01 : f32
    %638 = vector.broadcast %cst_190 : f32 to vector<8x128xf32>
    %639 = arith.addf %637, %638 : vector<8x128xf32>
    %cst_191 = arith.constant 0.0833333358 : f32
    %640 = vector.broadcast %cst_191 : f32 to vector<8x128xf32>
    %641 = arith.mulf %639, %640 : vector<8x128xf32>
    %642 = arith.fptosi %641 : vector<8x128xf32> to vector<8x128xi32>
    %c12_i32_192 = arith.constant 12 : i32
    %643 = vector.broadcast %c12_i32_192 : i32 to vector<8x128xi32>
    %644 = arith.muli %642, %643 : vector<8x128xi32>
    %645 = arith.subi %636, %644 : vector<8x128xi32>
    %c5_i32_193 = arith.constant 5 : i32
    %646 = vector.broadcast %c5_i32_193 : i32 to vector<8x1xi32>
    %647 = arith.muli %596, %646 : vector<8x1xi32>
    %c11_i32_194 = arith.constant 11 : i32
    %648 = vector.broadcast %c11_i32_194 : i32 to vector<8x128xi32>
    %649 = arith.muli %3, %648 : vector<8x128xi32>
    %650 = vector.broadcast %647 : vector<8x1xi32> to vector<8x128xi32>
    %651 = arith.addi %650, %649 : vector<8x128xi32>
    %c1_i32_195 = arith.constant 1 : i32
    %652 = vector.broadcast %c1_i32_195 : i32 to vector<8x128xi32>
    %653 = arith.addi %651, %652 : vector<8x128xi32>
    %654 = arith.sitofp %653 : vector<8x128xi32> to vector<8x128xf32>
    %cst_196 = arith.constant 5.000000e-01 : f32
    %655 = vector.broadcast %cst_196 : f32 to vector<8x128xf32>
    %656 = arith.addf %654, %655 : vector<8x128xf32>
    %cst_197 = arith.constant 2.500000e-02 : f32
    %657 = vector.broadcast %cst_197 : f32 to vector<8x128xf32>
    %658 = arith.mulf %656, %657 : vector<8x128xf32>
    %659 = arith.fptosi %658 : vector<8x128xf32> to vector<8x128xi32>
    %c40_i32_198 = arith.constant 40 : i32
    %660 = vector.broadcast %c40_i32_198 : i32 to vector<8x128xi32>
    %661 = arith.muli %659, %660 : vector<8x128xi32>
    %662 = arith.subi %653, %661 : vector<8x128xi32>
    %663 = arith.sitofp %3 : vector<8x128xi32> to vector<8x128xf32>
    %cst_199 = arith.constant 5.000000e-01 : f32
    %664 = vector.broadcast %cst_199 : f32 to vector<8x128xf32>
    %665 = arith.addf %663, %664 : vector<8x128xf32>
    %cst_200 = arith.constant 2.000000e-01 : f32
    %666 = vector.broadcast %cst_200 : f32 to vector<8x128xf32>
    %667 = arith.mulf %665, %666 : vector<8x128xf32>
    %668 = arith.fptosi %667 : vector<8x128xf32> to vector<8x128xi32>
    %c5_i32_201 = arith.constant 5 : i32
    %669 = vector.broadcast %c5_i32_201 : i32 to vector<8x128xi32>
    %670 = arith.muli %668, %669 : vector<8x128xi32>
    %671 = arith.subi %3, %670 : vector<8x128xi32>
    %672 = vector.broadcast %600 : vector<8x1xi32> to vector<8x128xi32>
    %673 = arith.subi %672, %671 : vector<8x128xi32>
    %c0_i32_202 = arith.constant 0 : i32
    %674 = vector.broadcast %c0_i32_202 : i32 to vector<8x128xi32>
    %675 = arith.cmpi slt, %673, %674 : vector<8x128xi32>
    %c0_i32_203 = arith.constant 0 : i32
    %676 = vector.broadcast %c0_i32_203 : i32 to vector<8x128xi32>
    %677 = arith.select %675, %676, %673 : vector<8x128xi1>, vector<8x128xi32>
    %678 = arith.sitofp %596 : vector<8x1xi32> to vector<8x1xf32>
    %cst_204 = arith.constant 5.000000e-01 : f32
    %679 = vector.broadcast %cst_204 : f32 to vector<8x1xf32>
    %680 = arith.addf %678, %679 : vector<8x1xf32>
    %cst_205 = arith.constant 0.00787401571 : f32
    %681 = vector.broadcast %cst_205 : f32 to vector<8x1xf32>
    %682 = arith.mulf %680, %681 : vector<8x1xf32>
    %683 = arith.fptosi %682 : vector<8x1xf32> to vector<8x1xi32>
    %c127_i32_206 = arith.constant 127 : i32
    %684 = vector.broadcast %c127_i32_206 : i32 to vector<8x1xi32>
    %685 = arith.muli %683, %684 : vector<8x1xi32>
    %686 = arith.subi %596, %685 : vector<8x1xi32>
    %c1_i32_207 = arith.constant 1 : i32
    %687 = vector.broadcast %c1_i32_207 : i32 to vector<8x1xi32>
    %688 = arith.addi %687, %686 : vector<8x1xi32>
    %689 = vector.broadcast %688 : vector<8x1xi32> to vector<8x128xi32>
    %690 = arith.cmpi slt, %3, %689 : vector<8x128xi32>
    %c12_i32_208 = arith.constant 12 : i32
    %691 = vector.broadcast %c12_i32_208 : i32 to vector<8x128xi32>
    %692 = arith.select %690, %645, %691 : vector<8x128xi1>, vector<8x128xi32>
    %693 = vector.shape_cast %596 : vector<8x1xi32> to vector<8x1xi32>
    %694 = vector.broadcast %693 : vector<8x1xi32> to vector<8x128xi32>
    %695 = arith.select %690, %662, %694 : vector<8x128xi1>, vector<8x128xi32>
    %696 = vector.shape_cast %600 : vector<8x1xi32> to vector<8x1xi32>
    %697 = vector.broadcast %696 : vector<8x1xi32> to vector<8x128xi32>
    %698 = arith.select %690, %677, %697 : vector<8x128xi1>, vector<8x128xi32>
    %699 = arith.subi %1, %600 : vector<8x1xi32>
    %c0_i32_209 = arith.constant 0 : i32
    %700 = vector.broadcast %c0_i32_209 : i32 to vector<8x1xi32>
    %701 = arith.cmpi slt, %699, %700 : vector<8x1xi32>
    %c0_i32_210 = arith.constant 0 : i32
    %702 = vector.broadcast %c0_i32_210 : i32 to vector<8x1xi32>
    %703 = arith.select %701, %702, %699 : vector<8x1xi1>, vector<8x1xi32>
    %c31_i32_211 = arith.constant 31 : i32
    %704 = vector.broadcast %c31_i32_211 : i32 to vector<8x1xi32>
    %705 = arith.cmpi sgt, %703, %704 : vector<8x1xi32>
    %c31_i32_212 = arith.constant 31 : i32
    %706 = vector.broadcast %c31_i32_212 : i32 to vector<8x1xi32>
    %707 = arith.select %705, %706, %703 : vector<8x1xi1>, vector<8x1xi32>
    %708 = tpu.iota {dimensions = array<i32: 1>} : vector<8x96xi32>
    %709 = vector.broadcast %592 : vector<8x1xi32> to vector<8x96xi32>
    %710 = arith.cmpi eq, %708, %709 : vector<8x96xi32>
    %c16_i32_213 = arith.constant 16 : i32
    %711 = vector.broadcast %c16_i32_213 : i32 to vector<8x1xi32>
    %712 = arith.addi %596, %711 : vector<8x1xi32>
    %713 = vector.broadcast %712 : vector<8x1xi32> to vector<8x96xi32>
    %714 = arith.cmpi eq, %708, %713 : vector<8x96xi32>
    %715 = arith.ori %710, %714 : vector<8x96xi1>
    %c16_i32_214 = arith.constant 16 : i32
    %716 = vector.broadcast %c16_i32_214 : i32 to vector<8x1xi32>
    %717 = arith.addi %707, %716 : vector<8x1xi32>
    %c48_i32_215 = arith.constant 48 : i32
    %718 = vector.broadcast %c48_i32_215 : i32 to vector<8x1xi32>
    %719 = arith.addi %717, %718 : vector<8x1xi32>
    %720 = vector.broadcast %719 : vector<8x1xi32> to vector<8x96xi32>
    %721 = arith.cmpi eq, %708, %720 : vector<8x96xi32>
    %722 = arith.ori %715, %721 : vector<8x96xi1>
    %723 = arith.extui %722 : vector<8x96xi1> to vector<8x96xi32>
    %724 = arith.sitofp %723 : vector<8x96xi32> to vector<8x96xf32>
    %725 = arith.truncf %724 : vector<8x96xf32> to vector<8x96xbf16>
    %c0_216 = arith.constant 0 : index
    %c0_217 = arith.constant 0 : index
    %726 = vector.load %arg4[%c0_216, %c0_217] : memref<96x256xbf16, #tpu.memory_space<vmem>>, vector<96x256xbf16>
    %cst_218 = arith.constant dense<0.000000e+00> : vector<8x256xf32>
    %727 = tpu.matmul %725, %726, %cst_218 {dimension_numbers = #tpu.dot_dimension_numbers<[1], [0], [0], [1], [0, 0, 1, 1], [], []>} : vector<8x96xbf16>, vector<96x256xbf16>, vector<8x256xf32> -> vector<8x256xf32>
    %728 = arith.truncf %458 : vector<8x64xf32> to vector<8x64xbf16>
    %c0_219 = arith.constant 0 : index
    %c0_220 = arith.constant 0 : index
    %729 = vector.load %arg5[%c0_219, %c0_220] : memref<64x256xbf16, #tpu.memory_space<vmem>>, vector<64x256xbf16>
    %cst_221 = arith.constant dense<0.000000e+00> : vector<8x256xf32>
    %730 = tpu.matmul %728, %729, %cst_221 {dimension_numbers = #tpu.dot_dimension_numbers<[1], [0], [0], [1], [0, 0, 1, 1], [], []>} : vector<8x64xbf16>, vector<64x256xbf16>, vector<8x256xf32> -> vector<8x256xf32>
    %731 = arith.addf %727, %730 : vector<8x256xf32>
    %c0_222 = arith.constant 0 : index
    %c0_223 = arith.constant 0 : index
    %732 = vector.load %arg6[%c0_222, %c0_223] : memref<1x256xf32, #tpu.memory_space<vmem>>, vector<1x256xf32>
    %733 = vector.broadcast %732 : vector<1x256xf32> to vector<8x256xf32>
    %734 = arith.addf %731, %733 : vector<8x256xf32>
    %735 = vector.extract_strided_slice %734 {offsets = [0, 0], sizes = [8, 64], strides = [1, 1]} : vector<8x256xf32> to vector<8x64xf32>
    %736 = arith.negf %735 : vector<8x64xf32>
    %737 = math.exp %736 : vector<8x64xf32>
    %cst_224 = arith.constant 1.000000e+00 : f32
    %738 = vector.broadcast %cst_224 : f32 to vector<8x64xf32>
    %739 = arith.addf %738, %737 : vector<8x64xf32>
    %740 = arith.divf %738, %739 : vector<8x64xf32>
    %741 = vector.extract_strided_slice %734 {offsets = [0, 64], sizes = [8, 64], strides = [1, 1]} : vector<8x256xf32> to vector<8x64xf32>
    %742 = arith.negf %741 : vector<8x64xf32>
    %743 = math.exp %742 : vector<8x64xf32>
    %cst_225 = arith.constant 1.000000e+00 : f32
    %744 = vector.broadcast %cst_225 : f32 to vector<8x64xf32>
    %745 = arith.addf %744, %743 : vector<8x64xf32>
    %746 = arith.divf %744, %745 : vector<8x64xf32>
    %747 = vector.extract_strided_slice %734 {offsets = [0, 128], sizes = [8, 64], strides = [1, 1]} : vector<8x256xf32> to vector<8x64xf32>
    %748 = math.tanh %747 : vector<8x64xf32>
    %749 = vector.extract_strided_slice %734 {offsets = [0, 192], sizes = [8, 64], strides = [1, 1]} : vector<8x256xf32> to vector<8x64xf32>
    %750 = arith.negf %749 : vector<8x64xf32>
    %751 = math.exp %750 : vector<8x64xf32>
    %cst_226 = arith.constant 1.000000e+00 : f32
    %752 = vector.broadcast %cst_226 : f32 to vector<8x64xf32>
    %753 = arith.addf %752, %751 : vector<8x64xf32>
    %754 = arith.divf %752, %753 : vector<8x64xf32>
    %755 = arith.mulf %746, %456 : vector<8x64xf32>
    %756 = arith.mulf %740, %748 : vector<8x64xf32>
    %757 = arith.addf %755, %756 : vector<8x64xf32>
    %758 = math.tanh %757 : vector<8x64xf32>
    %759 = arith.mulf %754, %758 : vector<8x64xf32>
    %760 = arith.truncf %759 : vector<8x64xf32> to vector<8x64xbf16>
    %c0_227 = arith.constant 0 : index
    %c0_228 = arith.constant 0 : index
    %761 = vector.load %arg7[%c0_227, %c0_228] : memref<64x128xbf16, #tpu.memory_space<vmem>>, vector<64x128xbf16>
    %cst_229 = arith.constant dense<0.000000e+00> : vector<8x128xf32>
    %762 = tpu.matmul %760, %761, %cst_229 {dimension_numbers = #tpu.dot_dimension_numbers<[1], [0], [0], [1], [0, 0, 1, 1], [], []>} : vector<8x64xbf16>, vector<64x128xbf16>, vector<8x128xf32> -> vector<8x128xf32>
    %763 = arith.addf %762, %19 : vector<8x128xf32>
    %764 = vector.extract_strided_slice %763 {offsets = [0, 0], sizes = [8, 64], strides = [1, 1]} : vector<8x128xf32> to vector<8x64xf32>
    %cst_230 = arith.constant 0.000000e+00 : f32
    %765 = vector.broadcast %cst_230 : f32 to vector<8x64xf32>
    %766 = arith.maximumf %764, %765 : vector<8x64xf32>
    %767 = vector.extract_strided_slice %763 {offsets = [0, 64], sizes = [8, 1], strides = [1, 1]} : vector<8x128xf32> to vector<8x1xf32>
    %c0_231 = arith.constant 0 : index
    %c0_232 = arith.constant 0 : index
    %768 = vector.load %arg10[%c0_231, %c0_232] : memref<64x16xf32, #tpu.memory_space<vmem>>, vector<64x16xf32>
    %cst_233 = arith.constant dense<0.000000e+00> : vector<8x16xf32>
    %769 = tpu.matmul %766, %768, %cst_233 {dimension_numbers = #tpu.dot_dimension_numbers<[1], [0], [0], [1], [0, 0, 1, 1], [], []>} : vector<8x64xf32>, vector<64x16xf32>, vector<8x16xf32> -> vector<8x16xf32>
    %c0_234 = arith.constant 0 : index
    %c0_235 = arith.constant 0 : index
    %770 = vector.load %arg11[%c0_234, %c0_235] : memref<1x16xf32, #tpu.memory_space<vmem>>, vector<1x16xf32>
    %771 = vector.broadcast %770 : vector<1x16xf32> to vector<8x16xf32>
    %772 = arith.addf %769, %771 : vector<8x16xf32>
    %c0_236 = arith.constant 0 : index
    %c0_237 = arith.constant 0 : index
    %773 = vector.load %arg12[%c0_236, %c0_237] : memref<64x48xf32, #tpu.memory_space<vmem>>, vector<64x48xf32>
    %cst_238 = arith.constant dense<0.000000e+00> : vector<8x48xf32>
    %774 = tpu.matmul %766, %773, %cst_238 {dimension_numbers = #tpu.dot_dimension_numbers<[1], [0], [0], [1], [0, 0, 1, 1], [], []>} : vector<8x64xf32>, vector<64x48xf32>, vector<8x48xf32> -> vector<8x48xf32>
    %c0_239 = arith.constant 0 : index
    %c0_240 = arith.constant 0 : index
    %775 = vector.load %arg13[%c0_239, %c0_240] : memref<1x48xf32, #tpu.memory_space<vmem>>, vector<1x48xf32>
    %776 = vector.broadcast %775 : vector<1x48xf32> to vector<8x48xf32>
    %777 = arith.addf %774, %776 : vector<8x48xf32>
    %c0_241 = arith.constant 0 : index
    %c0_242 = arith.constant 0 : index
    %778 = vector.load %arg14[%c0_241, %c0_242] : memref<64x32xf32, #tpu.memory_space<vmem>>, vector<64x32xf32>
    %cst_243 = arith.constant dense<0.000000e+00> : vector<8x32xf32>
    %779 = tpu.matmul %766, %778, %cst_243 {dimension_numbers = #tpu.dot_dimension_numbers<[1], [0], [0], [1], [0, 0, 1, 1], [], []>} : vector<8x64xf32>, vector<64x32xf32>, vector<8x32xf32> -> vector<8x32xf32>
    %c0_244 = arith.constant 0 : index
    %c0_245 = arith.constant 0 : index
    %780 = vector.load %arg15[%c0_244, %c0_245] : memref<1x32xf32, #tpu.memory_space<vmem>>, vector<1x32xf32>
    %781 = vector.broadcast %780 : vector<1x32xf32> to vector<8x32xf32>
    %782 = arith.addf %779, %781 : vector<8x32xf32>
    %783 = vector.broadcast %1 : vector<8x1xi32> to vector<8x128xi32>
    %784 = arith.subi %783, %698 : vector<8x128xi32>
    %c0_i32_246 = arith.constant 0 : i32
    %785 = vector.broadcast %c0_i32_246 : i32 to vector<8x128xi32>
    %786 = arith.cmpi slt, %784, %785 : vector<8x128xi32>
    %c0_i32_247 = arith.constant 0 : i32
    %787 = vector.broadcast %c0_i32_247 : i32 to vector<8x128xi32>
    %788 = arith.select %786, %787, %784 : vector<8x128xi1>, vector<8x128xi32>
    %c31_i32_248 = arith.constant 31 : i32
    %789 = vector.broadcast %c31_i32_248 : i32 to vector<8x128xi32>
    %790 = arith.cmpi sgt, %788, %789 : vector<8x128xi32>
    %c31_i32_249 = arith.constant 31 : i32
    %791 = vector.broadcast %c31_i32_249 : i32 to vector<8x128xi32>
    %792 = arith.select %790, %791, %788 : vector<8x128xi1>, vector<8x128xi32>
    %793 = tpu.iota {dimensions = array<i32: 1>} : vector<8x16x128xi32>
    %794 = vector.shape_cast %692 : vector<8x128xi32> to vector<8x1x128xi32>
    %795 = vector.broadcast %794 : vector<8x1x128xi32> to vector<8x16x128xi32>
    %796 = arith.cmpi eq, %793, %795 : vector<8x16x128xi32>
    %797 = arith.extui %796 : vector<8x16x128xi1> to vector<8x16x128xi32>
    %798 = arith.sitofp %797 : vector<8x16x128xi32> to vector<8x16x128xf32>
    %799 = tpu.iota {dimensions = array<i32: 1>} : vector<8x48x128xi32>
    %800 = vector.shape_cast %695 : vector<8x128xi32> to vector<8x1x128xi32>
    %801 = vector.broadcast %800 : vector<8x1x128xi32> to vector<8x48x128xi32>
    %802 = arith.cmpi eq, %799, %801 : vector<8x48x128xi32>
    %803 = arith.extui %802 : vector<8x48x128xi1> to vector<8x48x128xi32>
    %804 = arith.sitofp %803 : vector<8x48x128xi32> to vector<8x48x128xf32>
    %805 = tpu.iota {dimensions = array<i32: 1>} : vector<8x32x128xi32>
    %806 = vector.shape_cast %792 : vector<8x128xi32> to vector<8x1x128xi32>
    %807 = vector.broadcast %806 : vector<8x1x128xi32> to vector<8x32x128xi32>
    %808 = arith.cmpi eq, %805, %807 : vector<8x32x128xi32>
    %809 = arith.extui %808 : vector<8x32x128xi1> to vector<8x32x128xi32>
    %810 = arith.sitofp %809 : vector<8x32x128xi32> to vector<8x32x128xf32>
    %811 = tpu.iota {dimensions = array<i32: 1>} : vector<8x8x16xi32>
    %c1_i32_250 = arith.constant 1 : i32
    %812 = vector.broadcast %c1_i32_250 : i32 to vector<8x8x16xi32>
    %813 = arith.cmpi eq, %811, %812 : vector<8x8x16xi32>
    %814 = vector.shape_cast %772 : vector<8x16xf32> to vector<8x1x16xf32>
    %815 = vector.shape_cast %21 : vector<1x1x16xf32> to vector<1x1x16xf32>
    %816 = vector.broadcast %815 : vector<1x1x16xf32> to vector<8x8x16xf32>
    %817 = vector.shape_cast %814 : vector<8x1x16xf32> to vector<8x1x16xf32>
    %818 = vector.broadcast %817 : vector<8x1x16xf32> to vector<8x8x16xf32>
    %819 = arith.select %813, %816, %818 : vector<8x8x16xi1>, vector<8x8x16xf32>
    "tpu.trace_start"() <{level = 10 : i32, message = "bcn,bna->bca"}> : () -> ()
    %cst_251 = arith.constant dense<0.000000e+00> : vector<8x8x128xf32>
    %820 = tpu.matmul %819, %798, %cst_251 {dimension_numbers = #tpu.dot_dimension_numbers<[2], [1], [1], [2], [0, 0, 0, 1, 1, 2], [0], [0]>} : vector<8x8x16xf32>, vector<8x16x128xf32>, vector<8x8x128xf32> -> vector<8x8x128xf32>
    "tpu.trace_stop"() : () -> ()
    %821 = vector.extract_strided_slice %820 {offsets = [0, 0, 0], sizes = [8, 1, 128], strides = [1, 1, 1]} : vector<8x8x128xf32> to vector<8x1x128xf32>
    %822 = vector.shape_cast %821 : vector<8x1x128xf32> to vector<8x128xf32>
    %823 = vector.extract_strided_slice %820 {offsets = [0, 1, 0], sizes = [8, 1, 128], strides = [1, 1, 1]} : vector<8x8x128xf32> to vector<8x1x128xf32>
    %824 = vector.shape_cast %823 : vector<8x1x128xf32> to vector<8x128xf32>
    %825 = tpu.iota {dimensions = array<i32: 1>} : vector<8x8x48xi32>
    %c1_i32_252 = arith.constant 1 : i32
    %826 = vector.broadcast %c1_i32_252 : i32 to vector<8x8x48xi32>
    %827 = arith.cmpi eq, %825, %826 : vector<8x8x48xi32>
    %828 = vector.shape_cast %777 : vector<8x48xf32> to vector<8x1x48xf32>
    %829 = vector.shape_cast %23 : vector<1x1x48xf32> to vector<1x1x48xf32>
    %830 = vector.broadcast %829 : vector<1x1x48xf32> to vector<8x8x48xf32>
    %831 = vector.shape_cast %828 : vector<8x1x48xf32> to vector<8x1x48xf32>
    %832 = vector.broadcast %831 : vector<8x1x48xf32> to vector<8x8x48xf32>
    %833 = arith.select %827, %830, %832 : vector<8x8x48xi1>, vector<8x8x48xf32>
    "tpu.trace_start"() <{level = 10 : i32, message = "bcn,bna->bca"}> : () -> ()
    %cst_253 = arith.constant dense<0.000000e+00> : vector<8x8x128xf32>
    %834 = tpu.matmul %833, %804, %cst_253 {dimension_numbers = #tpu.dot_dimension_numbers<[2], [1], [1], [2], [0, 0, 0, 1, 1, 2], [0], [0]>} : vector<8x8x48xf32>, vector<8x48x128xf32>, vector<8x8x128xf32> -> vector<8x8x128xf32>
    "tpu.trace_stop"() : () -> ()
    %835 = vector.extract_strided_slice %834 {offsets = [0, 0, 0], sizes = [8, 1, 128], strides = [1, 1, 1]} : vector<8x8x128xf32> to vector<8x1x128xf32>
    %836 = vector.shape_cast %835 : vector<8x1x128xf32> to vector<8x128xf32>
    %837 = vector.extract_strided_slice %834 {offsets = [0, 1, 0], sizes = [8, 1, 128], strides = [1, 1, 1]} : vector<8x8x128xf32> to vector<8x1x128xf32>
    %838 = vector.shape_cast %837 : vector<8x1x128xf32> to vector<8x128xf32>
    %839 = tpu.iota {dimensions = array<i32: 1>} : vector<8x8x32xi32>
    %c1_i32_254 = arith.constant 1 : i32
    %840 = vector.broadcast %c1_i32_254 : i32 to vector<8x8x32xi32>
    %841 = arith.cmpi eq, %839, %840 : vector<8x8x32xi32>
    %842 = vector.shape_cast %782 : vector<8x32xf32> to vector<8x1x32xf32>
    %843 = vector.shape_cast %25 : vector<1x1x32xf32> to vector<1x1x32xf32>
    %844 = vector.broadcast %843 : vector<1x1x32xf32> to vector<8x8x32xf32>
    %845 = vector.shape_cast %842 : vector<8x1x32xf32> to vector<8x1x32xf32>
    %846 = vector.broadcast %845 : vector<8x1x32xf32> to vector<8x8x32xf32>
    %847 = arith.select %841, %844, %846 : vector<8x8x32xi1>, vector<8x8x32xf32>
    "tpu.trace_start"() <{level = 10 : i32, message = "bcn,bna->bca"}> : () -> ()
    %cst_255 = arith.constant dense<0.000000e+00> : vector<8x8x128xf32>
    %848 = tpu.matmul %847, %810, %cst_255 {dimension_numbers = #tpu.dot_dimension_numbers<[2], [1], [1], [2], [0, 0, 0, 1, 1, 2], [0], [0]>} : vector<8x8x32xf32>, vector<8x32x128xf32>, vector<8x8x128xf32> -> vector<8x8x128xf32>
    "tpu.trace_stop"() : () -> ()
    %849 = vector.extract_strided_slice %848 {offsets = [0, 0, 0], sizes = [8, 1, 128], strides = [1, 1, 1]} : vector<8x8x128xf32> to vector<8x1x128xf32>
    %850 = vector.shape_cast %849 : vector<8x1x128xf32> to vector<8x128xf32>
    %851 = vector.extract_strided_slice %848 {offsets = [0, 1, 0], sizes = [8, 1, 128], strides = [1, 1, 1]} : vector<8x8x128xf32> to vector<8x1x128xf32>
    %852 = vector.shape_cast %851 : vector<8x1x128xf32> to vector<8x128xf32>
    %853 = arith.addf %836, %850 : vector<8x128xf32>
    %854 = arith.addf %824, %838 : vector<8x128xf32>
    %855 = arith.addf %854, %852 : vector<8x128xf32>
    %856 = vector.broadcast %767 : vector<8x1xf32> to vector<8x128xf32>
    %857 = arith.addf %855, %856 : vector<8x128xf32>
    %858 = arith.negf %857 : vector<8x128xf32>
    %859 = math.exp %858 : vector<8x128xf32>
    %cst_256 = arith.constant 1.000000e+00 : f32
    %860 = vector.broadcast %cst_256 : f32 to vector<8x128xf32>
    %861 = arith.addf %860, %859 : vector<8x128xf32>
    %862 = arith.divf %860, %861 : vector<8x128xf32>
    %cst_257 = arith.constant 1.000000e+00 : f32
    %863 = vector.broadcast %cst_257 : f32 to vector<8x128xf32>
    %864 = arith.subf %863, %862 : vector<8x128xf32>
    %865 = arith.mulf %864, %822 : vector<8x128xf32>
    %866 = arith.mulf %862, %853 : vector<8x128xf32>
    %867 = arith.addf %865, %866 : vector<8x128xf32>
    %cst_258 = arith.constant -1.000000e+09 : f32
    %868 = vector.broadcast %cst_258 : f32 to vector<8x128xf32>
    %869 = arith.select %690, %867, %868 : vector<8x128xi1>, vector<8x128xf32>
    %cst_259 = arith.constant dense<0xFF800000> : vector<8xf32>
    %870 = vector.multi_reduction <maximumf>, %869, %cst_259 [1] : vector<8x128xf32> to vector<8xf32>
    %871 = vector.shape_cast %870 : vector<8xf32> to vector<8x1xf32>
    %872 = vector.broadcast %871 : vector<8x1xf32> to vector<8x128xf32>
    %873 = arith.subf %869, %872 : vector<8x128xf32>
    %874 = math.exp %873 : vector<8x128xf32>
    %cst_260 = arith.constant dense<0.000000e+00> : vector<8xf32>
    %875 = vector.multi_reduction <add>, %874, %cst_260 [1] : vector<8x128xf32> to vector<8xf32>
    %876 = vector.shape_cast %875 : vector<8xf32> to vector<8x1xf32>
    %877 = math.log %876 : vector<8x1xf32>
    %878 = vector.broadcast %871 : vector<8x1xf32> to vector<8x128xf32>
    %879 = arith.subf %869, %878 : vector<8x128xf32>
    %880 = vector.broadcast %877 : vector<8x1xf32> to vector<8x128xf32>
    %881 = arith.subf %879, %880 : vector<8x128xf32>
    %882 = vector.broadcast %871 : vector<8x1xf32> to vector<8x128xf32>
    %883 = arith.cmpf oge, %869, %882 : vector<8x128xf32>
    %c128_i32_261 = arith.constant 128 : i32
    %884 = vector.broadcast %c128_i32_261 : i32 to vector<8x128xi32>
    %885 = arith.select %883, %3, %884 : vector<8x128xi1>, vector<8x128xi32>
    %cst_262 = arith.constant dense<2147483647> : vector<8xi32>
    %886 = vector.multi_reduction <minsi>, %885, %cst_262 [1] : vector<8x128xi32> to vector<8xi32>
    %887 = vector.shape_cast %886 : vector<8xi32> to vector<8x1xi32>
    %888 = vector.broadcast %887 : vector<8x1xi32> to vector<8x128xi32>
    %889 = arith.cmpi eq, %3, %888 : vector<8x128xi32>
    %c0_i32_263 = arith.constant 0 : i32
    %890 = vector.broadcast %c0_i32_263 : i32 to vector<8x128xi32>
    %891 = arith.select %889, %695, %890 : vector<8x128xi1>, vector<8x128xi32>
    %cst_264 = arith.constant dense<-2147483648> : vector<8xi32>
    %892 = vector.multi_reduction <maxsi>, %891, %cst_264 [1] : vector<8x128xi32> to vector<8xi32>
    %893 = vector.shape_cast %892 : vector<8xi32> to vector<8x1xi32>
    %c0_i32_265 = arith.constant 0 : i32
    %894 = vector.broadcast %c0_i32_265 : i32 to vector<8x128xi32>
    %895 = arith.select %889, %698, %894 : vector<8x128xi1>, vector<8x128xi32>
    %cst_266 = arith.constant dense<-2147483648> : vector<8xi32>
    %896 = vector.multi_reduction <maxsi>, %895, %cst_266 [1] : vector<8x128xi32> to vector<8xi32>
    %897 = vector.shape_cast %896 : vector<8xi32> to vector<8x1xi32>
    %c2 = arith.constant 2 : index
    %c0_267 = arith.constant 0 : index
    %c0_268 = arith.constant 0 : index
    %898 = vector.load %arg19[%c2, %c0_267, %c0_268] : memref<3x8x128xf32, #tpu.memory_space<vmem>>, vector<1x8x128xf32>
    %899 = vector.shape_cast %898 : vector<1x8x128xf32> to vector<8x128xf32>
    %900 = vector.shape_cast %881 : vector<8x128xf32> to vector<1x8x128xf32>
    tpu.vector_store %arg19[%c2, %c0_267, %c0_268], %900 {strides = array<i32>} : memref<3x8x128xf32, #tpu.memory_space<vmem>>, vector<1x8x128xf32>,
    %c0_i32_269 = arith.constant 0 : i32
    %901 = vector.broadcast %c0_i32_269 : i32 to vector<8x128xi32>
    %902 = arith.cmpi eq, %3, %901 : vector<8x128xi32>
    %cst_270 = arith.constant 0.000000e+00 : f32
    %903 = vector.shape_cast %877 : vector<8x1xf32> to vector<8x1xf32>
    %904 = vector.broadcast %903 : vector<8x1xf32> to vector<8x128xf32>
    %905 = vector.broadcast %cst_270 : f32 to vector<8x128xf32>
    %906 = arith.select %902, %904, %905 : vector<8x128xi1>, vector<8x128xf32>
    %c1_i32_271 = arith.constant 1 : i32
    %907 = vector.broadcast %c1_i32_271 : i32 to vector<8x128xi32>
    %908 = arith.cmpi eq, %3, %907 : vector<8x128xi32>
    %909 = arith.sitofp %887 : vector<8x1xi32> to vector<8x1xf32>
    %910 = vector.shape_cast %909 : vector<8x1xf32> to vector<8x1xf32>
    %911 = vector.broadcast %910 : vector<8x1xf32> to vector<8x128xf32>
    %912 = arith.select %908, %911, %906 : vector<8x128xi1>, vector<8x128xf32>
    %c2_i32_272 = arith.constant 2 : i32
    %913 = vector.broadcast %c2_i32_272 : i32 to vector<8x128xi32>
    %914 = arith.cmpi eq, %3, %913 : vector<8x128xi32>
    %915 = arith.sitofp %893 : vector<8x1xi32> to vector<8x1xf32>
    %916 = vector.shape_cast %915 : vector<8x1xf32> to vector<8x1xf32>
    %917 = vector.broadcast %916 : vector<8x1xf32> to vector<8x128xf32>
    %918 = arith.select %914, %917, %912 : vector<8x128xi1>, vector<8x128xf32>
    %c3_i32_273 = arith.constant 3 : i32
    %919 = vector.broadcast %c3_i32_273 : i32 to vector<8x128xi32>
    %920 = arith.cmpi eq, %3, %919 : vector<8x128xi32>
    %921 = arith.sitofp %897 : vector<8x1xi32> to vector<8x1xf32>
    %922 = vector.shape_cast %921 : vector<8x1xf32> to vector<8x1xf32>
    %923 = vector.broadcast %922 : vector<8x1xf32> to vector<8x128xf32>
    %924 = arith.select %920, %923, %918 : vector<8x128xi1>, vector<8x128xf32>
    %c2_274 = arith.constant 2 : index
    %c0_275 = arith.constant 0 : index
    %c0_276 = arith.constant 0 : index
    %925 = vector.load %arg20[%c2_274, %c0_275, %c0_276] : memref<3x8x128xf32, #tpu.memory_space<vmem>>, vector<1x8x128xf32>
    %926 = vector.shape_cast %925 : vector<1x8x128xf32> to vector<8x128xf32>
    %927 = vector.shape_cast %924 : vector<8x128xf32> to vector<1x8x128xf32>
    tpu.vector_store %arg20[%c2_274, %c0_275, %c0_276], %927 {strides = array<i32>} : memref<3x8x128xf32, #tpu.memory_space<vmem>>, vector<1x8x128xf32>,
    return
  }
  func.func @transform_0(%arg0: i32) -> (i32, i32) {
    %c0_i32 = arith.constant 0 : i32
    %c0_i32_0 = arith.constant 0 : i32
    return %arg0, %c0_i32 : i32, i32
  }
  func.func @transform_1(%arg0: i32) -> (i32, i32) {
    %c0_i32 = arith.constant 0 : i32
    %c0_i32_0 = arith.constant 0 : i32
    return %arg0, %c0_i32 : i32, i32
  }
  func.func @transform_2(%arg0: i32) -> (i32, i32) {
    %c0_i32 = arith.constant 0 : i32
    %c0_i32_0 = arith.constant 0 : i32
    return %arg0, %c0_i32 : i32, i32
  }
  func.func @transform_3(%arg0: i32) -> (i32, i32) {
    %c0_i32 = arith.constant 0 : i32
    %c0_i32_0 = arith.constant 0 : i32
    %c0_i32_1 = arith.constant 0 : i32
    return %c0_i32, %c0_i32_0 : i32, i32
  }
  func.func @transform_4(%arg0: i32) -> (i32, i32) {
    %c0_i32 = arith.constant 0 : i32
    %c0_i32_0 = arith.constant 0 : i32
    %c0_i32_1 = arith.constant 0 : i32
    return %c0_i32, %c0_i32_0 : i32, i32
  }
  func.func @transform_5(%arg0: i32) -> (i32, i32) {
    %c0_i32 = arith.constant 0 : i32
    %c0_i32_0 = arith.constant 0 : i32
    %c0_i32_1 = arith.constant 0 : i32
    return %c0_i32, %c0_i32_0 : i32, i32
  }
  func.func @transform_6(%arg0: i32) -> (i32, i32) {
    %c0_i32 = arith.constant 0 : i32
    %c0_i32_0 = arith.constant 0 : i32
    %c0_i32_1 = arith.constant 0 : i32
    return %c0_i32, %c0_i32_0 : i32, i32
  }
  func.func @transform_7(%arg0: i32) -> (i32, i32) {
    %c0_i32 = arith.constant 0 : i32
    %c0_i32_0 = arith.constant 0 : i32
    %c0_i32_1 = arith.constant 0 : i32
    return %c0_i32, %c0_i32_0 : i32, i32
  }
  func.func @transform_8(%arg0: i32) -> (i32, i32) {
    %c0_i32 = arith.constant 0 : i32
    %c0_i32_0 = arith.constant 0 : i32
    %c0_i32_1 = arith.constant 0 : i32
    return %c0_i32, %c0_i32_0 : i32, i32
  }
  func.func @transform_9(%arg0: i32) -> (i32, i32) {
    %c0_i32 = arith.constant 0 : i32
    %c0_i32_0 = arith.constant 0 : i32
    %c0_i32_1 = arith.constant 0 : i32
    return %c0_i32, %c0_i32_0 : i32, i32
  }
  func.func @transform_10(%arg0: i32) -> (i32, i32) {
    %c0_i32 = arith.constant 0 : i32
    %c0_i32_0 = arith.constant 0 : i32
    %c0_i32_1 = arith.constant 0 : i32
    return %c0_i32, %c0_i32_0 : i32, i32
  }
  func.func @transform_11(%arg0: i32) -> (i32, i32) {
    %c0_i32 = arith.constant 0 : i32
    %c0_i32_0 = arith.constant 0 : i32
    %c0_i32_1 = arith.constant 0 : i32
    return %c0_i32, %c0_i32_0 : i32, i32
  }
  func.func @transform_12(%arg0: i32) -> (i32, i32) {
    %c0_i32 = arith.constant 0 : i32
    %c0_i32_0 = arith.constant 0 : i32
    %c0_i32_1 = arith.constant 0 : i32
    return %c0_i32, %c0_i32_0 : i32, i32
  }
  func.func @transform_13(%arg0: i32) -> (i32, i32) {
    %c0_i32 = arith.constant 0 : i32
    %c0_i32_0 = arith.constant 0 : i32
    %c0_i32_1 = arith.constant 0 : i32
    return %c0_i32, %c0_i32_0 : i32, i32
  }
  func.func @transform_14(%arg0: i32) -> (i32, i32) {
    %c0_i32 = arith.constant 0 : i32
    %c0_i32_0 = arith.constant 0 : i32
    %c0_i32_1 = arith.constant 0 : i32
    return %c0_i32, %c0_i32_0 : i32, i32
  }
  func.func @transform_15(%arg0: i32) -> (i32, i32) {
    %c0_i32 = arith.constant 0 : i32
    %c0_i32_0 = arith.constant 0 : i32
    %c0_i32_1 = arith.constant 0 : i32
    return %c0_i32, %c0_i32_0 : i32, i32
  }
  func.func @transform_16(%arg0: i32) -> (i32, i32) {
    %c0_i32 = arith.constant 0 : i32
    %c0_i32_0 = arith.constant 0 : i32
    %c0_i32_1 = arith.constant 0 : i32
    return %c0_i32, %c0_i32_0 : i32, i32
  }
  func.func @transform_17(%arg0: i32) -> (i32, i32) {
    %c0_i32 = arith.constant 0 : i32
    %c0_i32_0 = arith.constant 0 : i32
    %c0_i32_1 = arith.constant 0 : i32
    return %c0_i32, %c0_i32_0 : i32, i32
  }
  func.func @transform_18(%arg0: i32) -> (i32, i32, i32) {
    %c0_i32 = arith.constant 0 : i32
    %c0_i32_0 = arith.constant 0 : i32
    %c0_i32_1 = arith.constant 0 : i32
    return %c0_i32, %arg0, %c0_i32_0 : i32, i32, i32
  }
  func.func @transform_19(%arg0: i32) -> (i32, i32, i32) {
    %c0_i32 = arith.constant 0 : i32
    %c0_i32_0 = arith.constant 0 : i32
    %c0_i32_1 = arith.constant 0 : i32
    return %c0_i32, %arg0, %c0_i32_0 : i32, i32, i32
  }
}

</mosaic_0001>

<bundles_post_ra>
// kernel: episode_forward.1
= control target key start
LH: loop header
LB: loop body
LE: loop exit
PB: predicated region body
PF: predicated region fallthrough
CT: control target
= control target key end

     0   :  { %s10918_s0 = inlined_call_operand.vmem [shape: s32[16,1], index: 0, kind: input, shape index: {}]   ;;  %s10919_s1 = inlined_call_operand.vmem [shape: s32[16,1], index: 1, kind: input, shape index: {}]   ;;  %s10920_s2 = inlined_call_operand.vmem [shape: s32[16,1], index: 2, kind: input, shape index: {}]   ;;  %s10921_s3 = inlined_call_operand.vmem [shape: bf16[96,256], index: 3, kind: input, shape index: {}]   ;;  %s10922_s4 = inlined_call_operand.vmem [shape: bf16[64,256], index: 4, kind: input, shape index: {}]   ;;  %s10923_s5 = inlined_call_operand.vmem [shape: f32[1,256], index: 5, kind: input, shape index: {}]   ;;  %s10924_s6 = inlined_call_operand.vmem [shape: bf16[64,128], index: 6, kind: input, shape index: {}]   ;;  %s10925_s7 = inlined_call_operand.vmem [shape: bf16[64,128], index: 7, kind: input, shape index: {}]   ;;  %s10926_s8 = inlined_call_operand.vmem [shape: f32[1,128], index: 8, kind: input, shape index: {}]   ;;  %s10927_s9 = inlined_call_operand.vmem [shape: f32[64,16], index: 9, kind: input, shape index: {}]   ;;  %s10928_s10 = inlined_call_operand.vmem [shape: f32[1,16], index: 10, kind: input, shape index: {}]   ;;  %s10929_s11 = inlined_call_operand.vmem [shape: f32[64,48], index: 11, kind: input, shape index: {}]   ;;  %s10930_s12 = inlined_call_operand.vmem [shape: f32[1,48], index: 12, kind: input, shape index: {}]   ;;  %s10931_s13 = inlined_call_operand.vmem [shape: f32[64,32], index: 13, kind: input, shape index: {}]   ;;  %s10932_s14 = inlined_call_operand.vmem [shape: f32[1,32], index: 14, kind: input, shape index: {}]   ;;  %s10933_s15 = inlined_call_operand.vmem [shape: f32[1,16], index: 15, kind: input, shape index: {}]   ;;  %s10934_s16 = inlined_call_operand.vmem [shape: f32[1,48], index: 16, kind: input, shape index: {}]   ;;  %s10935_s17 = inlined_call_operand.vmem [shape: f32[1,32], index: 17, kind: input, shape index: {}]   ;;  %s10936_s18 = inlined_call_operand.vmem [shape: f32[3,16,128], index: 18, kind: output, shape index: {0}]   ;;  %s10937_s19 = inlined_call_operand.vmem [shape: f32[3,16,128], index: 19, kind: output, shape index: {1}]  }
   0x1   :  { %10979 = sst [smem:[#allocation20_spill]] %s10918_s0 }
   0x2   :  { %10980 = sst [smem:[#allocation21_spill]] %s10919_s1 }
   0x3   :  { %10981 = sst [smem:[#allocation22_spill]] %s10920_s2 }
   0x4   :  { %10982 = sst [smem:[#allocation23_spill]] %s10921_s3 }
   0x5   :  { %10983 = sst [smem:[#allocation24_spill]] %s10936_s18 }
   0x6   :  { %10984 = sst [smem:[#allocation25_spill]] %s10937_s19 }
   0x7   :  { %s7851_s0 = smov 0   ;;  %s7853_s30 = smov 0  }
   0x8   :  { %s7855_s20 = smov 0  }
   0x9 LB: > { %10985 = sst [smem:[#allocation4_spill]] %s7740_s30  ;;  %s7864_s21 = sadd.s32 4294967295, %s7744_s20   ;;  %s7744_s20 = sphi %s7855_s20, %s11093_s20   ;;  %s7740_s30 = sphi %s7853_s30, %s11095_s30   ;;  %s7736_s0 = sphi %s7851_s0, %s11094_s0  }
   0xa   : > { %10986 = sst [smem:[#allocation5_spill]] %s7864_s21  ;;  %s7866_s1 = sadd.s32 1, %s7744_s20  }
   0xb   : > { %10987 = sst [smem:[#allocation6_spill]] %s7866_s1  ;;  %s427_s22 = ssub.s32 %s7744_s20, %s7866_s1 }
   0xc   : > { %s430_s2 = sadd.s32 1, %s7740_s30  ;;  %p428_p0 = scmp.eq.s32.totalorder %s427_s22, 0 }
   0xd   : > { %p440_p1 = scmp.ne.s32.totalorder %s7740_s30, %s7736_s0  ;;  %p441_p2 = scmp.eq.s32.totalorder %s7864_s21, 1 }
   0xe   : > { %p6372_p3 = scmp.ge.s32.totalorder %s7744_s20, 1  ;;  %p557_p5 = scmp.lt.s32.totalorder %s7744_s20, 3 }
   0xf   : > { %s7874_s23 = scalar_select %p428_p0, %s7740_s30, %s430_s2  }
  0x10   : > { %p7876_p4 = por %p441_p2, %p440_p1  ;;  %p558_p6 = pnand %p6372_p3, %p557_p5 }
  0x11   : > { %10988 = sst [smem:[#allocation7_spill]] %s7874_s23 }
  0x12   : > { %561 = sbr.rel (%p558_p6) target bundleno = 4938 (0x134a), region = 92 }
  0x17   : > { %p623_p7 = scmp.lt.s32.totalorder %s7864_s21, 1  ;;  %s10990_s26 = sld [smem:[#allocation23_spill]]  ;;  %v7746_v2 = vmov 0   ;;  %v6421_v6 = vld [vmem:[%s10922_s4 + $0x30] sm:$0xf]  ;;  %v7396_v8 = vld [vmem:[%s10925_s7 + $0x18] sm:$0xff] }
  0x18   : > { %7549 = vset.pattern.permute.xlu0 %v7746_v2  ;;  %7550 = vset.pattern.permute.xlu1 %v7746_v2  ;;  %v7416_v7 = vld [vmem:[%s10922_s4 + $0x34] sm:$0xf0]  ;;  %v6413_v11 = vld [vmem:[%s10922_s4 + $0x20] sm:$0xf]  ;;  %v7414_v12 = vld [vmem:[%s10922_s4 + $0x24] sm:$0xf0] }
  0x19   : > { %s624_s27 = scalar_select %p623_p7, %s7864_s21, 1  ;;  %7551 = vset.pattern.permute.xlu2 %v7746_v2  ;;  %v6422_v10 = vor.u32 %v7416_v7, %v6421_v6  ;;  %698 = vmatpush.bf16.msra.mxu0 %v7396_v8  ;;  %v7395_v15 = vld [vmem:[%s10925_s7 + $0x10] sm:$0xff]  ;;  %v6414_v18 = vor.u32 %v7414_v12, %v6413_v11  ;;  %v7412_v23 = vld [vmem:[%s10922_s4 + $0x14] sm:$0xf0]  ;;  %v6397_v32 = vld [vmem:[%s10922_s4] sm:$0xf] }
  0x1a   : > { %s10991_s2 = sld [smem:[#allocation20_spill]]  ;;  %v6405_v19 = vld [vmem:[%s10922_s4 + $0x10] sm:$0xf]  ;;  %v7410_v33 = vld [vmem:[%s10922_s4 + $0x4] sm:$0xf0]  ;;  %v7393_v42 = vld [vmem:[%s10925_s7] sm:$0xff] }
  0x1b   : > { %s7912_s25 = sshll.u32 %s624_s27, 3  ;;  %s10992_s21 = sld [smem:[#allocation22_spill]]  ;;  %840 = vmatpush.bf16.msra.mxu1 %v6422_v10  ;;  %v6406_v26 = vor.u32 %v7412_v23, %v6405_v19  ;;  %v7394_v34 = vld [vmem:[%s10925_s7 + $0x8] sm:$0xff]  ;;  %v6398_v35 = vor.u32 %v7410_v33, %v6397_v32  ;;  %v7415_v39 = vld [vmem:[%s10922_s4 + $0x34] sm:$0xf]  ;;  %v10943_v10 = vmov 0.0  }
  0x1c   : > { %v6423_v40 = vld [vmem:[%s10922_s4 + $0x38] sm:$0xf0]  ;;  %v7413_v46 = vld [vmem:[%s10922_s4 + $0x24] sm:$0xf]  ;;  %v6415_v47 = vld [vmem:[%s10922_s4 + $0x28] sm:$0xf0] }
  0x1d   : > { %v6469_v0 = vld [vmem:[%s10990_s26 + $0x50] sm:$0xf]  ;;  %v7408_v1 = vld [vmem:[%s10990_s26 + $0x54] sm:$0xf0]  ;;  %v6461_v4 = vld [vmem:[%s10990_s26 + $0x40] sm:$0xf]  ;;  %699 = vmatpush.bf16.msra.mxu0 %v7395_v15  ;;  %v6426_v41 = vor.u32 %v7415_v39, %v6423_v40  ;;  %v6418_v48 = vor.u32 %v7413_v46, %v6415_v47 }
  0x1e   : > { %v6470_v3 = vor.u32 %v7408_v1, %v6469_v0  ;;  %v7406_v5 = vld [vmem:[%s10990_s26 + $0x44] sm:$0xf0]  ;;  %v6453_v13 = vld [vmem:[%s10990_s26 + $0x30] sm:$0xf]  ;;  %v7404_v14 = vld [vmem:[%s10990_s26 + $0x34] sm:$0xf0] }
  0x1f   : > { %v6462_v9 = vor.u32 %v7406_v5, %v6461_v4  ;;  %v6454_v22 = vor.u32 %v7404_v14, %v6453_v13  ;;  %v6445_v24 = vld [vmem:[%s10990_s26 + $0x20] sm:$0xf]  ;;  %v7402_v25 = vld [vmem:[%s10990_s26 + $0x24] sm:$0xf0]  ;;  %841 = vmatpush.bf16.msra.mxu1 %v6414_v18  ;;  %v6437_v27 = vld [vmem:[%s10990_s26 + $0x10] sm:$0xf]  ;;  %853 = vmatpush.bf16.msra.mxu2 %v6426_v41  ;;  %v639_v4 = vlaneseq }
  0x20   : > { %928 = vmatpush.bf16.msra.mxu3 %v6470_v3  ;;  %s626_s27 = scalar_lea.vmem %s10991_s2, %s7912_s25  ;;  %v6446_v28 = vor.u32 %v7402_v25, %v6445_v24  ;;  %v7400_v29 = vld [vmem:[%s10990_s26 + $0x14] sm:$0xf0]  ;;  %v6429_v36 = vld [vmem:[%s10990_s26] sm:$0xf]  ;;  %v7398_v37 = vld [vmem:[%s10990_s26 + $0x4] sm:$0xf0] }
  0x21   : > { %s634_s23 = scalar_lea.vmem %s10992_s21, %s7912_s25  ;;  %v7931_v16 = vld [vmem:[%s626_s27] sm:$0xff]  ;;  %v6438_v30 = vor.u32 %v7400_v29, %v6437_v27  ;;  %700 = vmatpush.bf16.msra.mxu0 %v7394_v34  ;;  %v6430_v38 = vor.u32 %v7398_v37, %v6429_v36  ;;  %v7407_v43 = vld [vmem:[%s10990_s26 + $0x54] sm:$0xf]  ;;  %v6471_v44 = vld [vmem:[%s10990_s26 + $0x58] sm:$0xf0]  ;;  %v8035_v8 = vand.u32 127, %v639_v4 }
  0x22   : > { %v638_v17 = vld [vmem:[%s634_s23] sm:$0xff]  ;;  %v762_v20 = vadd.s32 16, %v7931_v16  ;;  %v722_v31 = vmul.u32 5, %v7931_v16  ;;  %v6474_v45 = vor.u32 %v7407_v43, %v6471_v44  ;;  %v6463_v50 = vld [vmem:[%s10990_s26 + $0x48] sm:$0xf0]  ;;  %vm922_vm5 = vcmask 785408  }
  0x23   : > { %v645_v21 = vadd.s32 48, %v638_v17  ;;  %842 = vmatpush.bf16.msra.mxu1 %v6406_v26  ;;  %v7405_v49 = vld [vmem:[%s10990_s26 + $0x44] sm:$0xf]  ;;  %854 = vmatpush.bf16.msra.mxu2 %v6418_v48  ;;  %v7411_v52 = vld [vmem:[%s10922_s4 + $0x14] sm:$0xf]  ;;  %vm761_vm0 = vcmp.eq.s32.totalorder %v8035_v8, 12 }
  0x24   : > { %929 = vmatpush.bf16.msra.mxu3 %v6462_v9  ;;  %764 = vperm.xlu0 %7549, %v762_v20   ;;  %v6466_v51 = vor.u32 %v7405_v49, %v6463_v50  ;;  %v6407_v53 = vld [vmem:[%s10922_s4 + $0x18] sm:$0xf0]  ;;  %v7403_v55 = vld [vmem:[%s10990_s26 + $0x34] sm:$0xf]  ;;  %v7409_v58 = vld [vmem:[%s10922_s4 + $0x4] sm:$0xf] }
  0x25   : > { %647 = vperm.xlu1 %7550, %v645_v21   ;;  %701 = vmatpush.bf16.msra.mxu0 %v7393_v42  ;;  %v6410_v54 = vor.u32 %v7411_v52, %v6407_v53  ;;  %v6455_v56 = vld [vmem:[%s10990_s26 + $0x38] sm:$0xf0]  ;;  %v6399_v59 = vld [vmem:[%s10922_s4 + $0x8] sm:$0xf0]  ;;  %v7401_v61 = vld [vmem:[%s10990_s26 + $0x24] sm:$0xf] }
  0x26   : > { %v6458_v57 = vor.u32 %v7403_v55, %v6455_v56  ;;  %v6402_v60 = vor.u32 %v7409_v58, %v6399_v59  ;;  %v6447_v62 = vld [vmem:[%s10990_s26 + $0x28] sm:$0xf0]  ;;  %v7399_v0 = vld [vmem:[%s10990_s26 + $0x14] sm:$0xf]  ;;  %v6439_v1 = vld [vmem:[%s10990_s26 + $0x18] sm:$0xf0] }
  0x27   : > { %843 = vmatpush.bf16.msra.mxu1 %v6398_v35  ;;  %855 = vmatpush.bf16.msra.mxu2 %v6410_v54  ;;  %v6450_v63 = vor.u32 %v7401_v61, %v6447_v62  ;;  %v6442_v3 = vor.u32 %v7399_v0, %v6439_v1  ;;  %v7397_v5 = vld [vmem:[%s10990_s26 + $0x4] sm:$0xf]  ;;  %v6431_v6 = vld [vmem:[%s10990_s26 + $0x8] sm:$0xf0]  ;;  %vm768_vm1 = vcmp.eq.s32.totalorder %v8035_v8, 64  ;;  %vm690_vm9 = vcmask 523264  }
  0x28   : > { %930 = vmatpush.bf16.msra.mxu3 %v6454_v22  ;;  %v6434_v7 = vor.u32 %v7397_v5, %v6431_v6  ;;  %v952_v22 = vld [vmem:[%s10923_s5] sm:$0x3]  ;;  %s7748_s30 = smov 64   ;;  %v7420_v5 = vld [vmem:[%s10924_s6 + $0x18] sm:$0xff]  ;;  %s10993_s23 = sld [smem:[#allocation21_spill]] }
  0x29   : > { %941 = vmatpush.bf16.msrb.mxu0 %v6474_v45  ;;  %v954_v23 = vperm.slane %v952_v22, 0  ;;  %s614_s20 = sand.u32 1, %s7736_s0   ;;  %s11089_s22 = sld [smem:[#allocation5_spill]] (%p7876_p4) }
  0x2a   : > { %844 = vmatmul.bf16.vlgmr.msra.gmra.mxu1 %v7746_v2 }
  0x2b   : > { %856 = vmatpush.bf16.msra.mxu2 %v6402_v60  ;;  %1051 = vmatpush.bf16.msrb.mxu1 %v7420_v5 }
  0x2c   : > { %931 = vmatpush.bf16.msra.mxu3 %v6446_v28  ;;  %642 = vperm.xlu0 %7549, %v7931_v16  }
  0x2d   : > { %942 = vmatpush.bf16.msrb.mxu0 %v6466_v51 }
  0x2e   : > { %857 = vmatmul.bf16.vlgmr.msra.gmra.mxu2 %v7746_v2  ;;  %s8079_s3 = scalar_lea.vmem %s10993_s23, %s7912_s25  ;;  %s11090_s23 = sld [smem:[#allocation24_spill]] (%p7876_p4) }
  0x2f   : > { %s7389_s25 = sshll.u32 (%p7876_p4), %s11089_s22, 3 }
  0x30   : > { %932 = vmatpush.bf16.msra.mxu3 %v6438_v30  ;;  %v747_v30 = vcvt.s32.f32 %v7931_v16 }
  0x31   : > { %943 = vmatpush.bf16.msrb.mxu0 %v6458_v57 }
  0x32   : > { %v748_v32 = vadd.f32 0.5, %v747_v30  ;;  %v1135_v30 = vld [vmem:[%s10931_s13 + $0x38] sm:$0xff] }
  0x34   : > { %725 = vperm.xlu0 %7549, %v722_v31   ;;  %933 = vmatpush.bf16.msra.mxu3 %v6430_v38  ;;  %v749_v35 = vmul.f32 0.007874016, %v748_v32  ;;  %v955_v38 = vperm.slane %v952_v22, 1  ;;  %v1102_v32 = vld [vmem:[%s10929_s11 + $0x30] sm:$0xff]  ;;  %s6178_s1 = scalar_lea.vmem (%p7876_p4), %s11090_s23, %s7389_s25 }
  0x35   : > { %944 = vmatpush.bf16.msrb.mxu0 %v6450_v63 }
  0x36   : > { %v7486_v39 = vceil.f32 %v749_v35  ;;  %v7487_v40 = vfloor.f32 %v749_v35  ;;  %vm7485_vm10 = vcmp.lt.s32.totalorder %v749_v35, 0  ;;  %v1101_v35 = vld [vmem:[%s10929_s11 + $0x28] sm:$0xff] }
  0x38   : > { %v7488_v44 = vsel %vm7485_vm10, %v7486_v39, %v7487_v40  ;;  %v1132_v39 = vld [vmem:[%s10931_s13 + $0x20] sm:$0xff]  ;;  %v1063_v40 = vld [vmem:[%s10927_s9 + $0x10] sm:$0xff] }
  0x39   : > { %945 = vmatpush.bf16.msrb.mxu0 %v6442_v3  ;;  %v7489_v50 = vcvt.f32.s32 %v7488_v44  ;;  %v1098_v44 = vld [vmem:[%s10929_s11 + $0x10] sm:$0xff] }
  0x3b   : > { %v751_v54 = vmul.u32 127, %v7489_v50  ;;  %v1128_v50 = vld [vmem:[%s10931_s13] sm:$0xff] }
  0x3d   : > { %946 = vmatpush.bf16.msrb.mxu0 %v6434_v7  ;;  %v752_v58 = vsub.s32 %v7931_v16, %v751_v54 }
  0x3f   : > { %v753_v59 = vadd.s32 1, %v752_v58 }
  0x96   : > { %v765_v9 = vpop.permute.xlu0 %764 }
  0x97   : > { %vm766_vm2 = vcmp.eq.s32.totalorder %v8035_v8, %v765_v9  ;;  %v648_v12 = vpop.permute.xlu1 %647  ;;  %v7419_v9 = vld [vmem:[%s10924_s6 + $0x10] sm:$0xff] }
  0x98   : > { %vm767_vm3 = vmor %vm761_vm0, %vm766_vm2  ;;  %vm649_vm6 = vcmp.eq.s32.totalorder %v8035_v8, %v648_v12  ;;  %1052 = vmatpush.bf16.msrb.mxu1 %v7419_v9 }
  0x99   : > { %vm769_vm4 = vmor %vm767_vm3, %vm768_vm1 }
  0x9a   : > { %v6394_v11 = vsel %vm769_vm4, 1.0, %v10943_v10 }
  0x9b   : > { %v772_v13 = vpack.c.bf16 %v6394_v11, %v6394_v11 }
  0x9d   : > { %6475 = vmatmul.msk.bf16.vlgmr.msra.gmra.mxu3 %vm922_vm5, %v772_v13 }
  0x9e   : > { %v8043_v14 = vpop.permute.xlu0 %642 }
  0x9f   : > { %vm644_vm7 = vcmp.eq.s32.totalorder %v8035_v8, %v8043_v14 }
  0xa0   : > { %vm650_vm8 = vmor %vm644_vm7, %vm649_vm6 }
  0xa1   : > { %v6376_v15 = vsel %vm650_vm8, 1.0, %v10943_v10 }
  0xa2   : > { %v653_v17 = vpack.c.bf16 %v6376_v15, %v6376_v15 }
  0xa4   : > { %6393 = vmatmul.msk.bf16.vlgmr.msra.gmra.mxu0 %vm690_vm9, %v653_v17  ;;  %v7418_v17 = vld [vmem:[%s10924_s6 + $0x8] sm:$0xff] }
  0xa5   : > { %1053 = vmatpush.bf16.msrb.mxu1 %v7418_v17  ;;  %v10945_v17 = vmov 1.0  }
  0xa7   : > { %v845_v18 = vpop.f32.mrf.mxu1 }
  0xaf   : > { %v847_v19 = vpop.f32.mrf.mxu1 }
  0xb1   : > { %v858_v20 = vpop.f32.mrf.mxu2 }
  0xb4   : > { %6476 = vmatmul.msk.bf16.vlgmr.msrb.gmra.mxu0 %vm922_vm5, %v772_v13 }
  0xb9   : > { %v860_v21 = vpop.f32.mrf.mxu2 }
 0x120   : > { %v935_v24 = vpop.f32.mrf.mxu3 }
 0x121   : > { %v936_v25 = vadd.f32 %v935_v24, %v845_v18  ;;  %v8053_v26 = vpop.f32.mrf.mxu0 }
 0x123   : > { %v958_v27 = vadd.f32 %v954_v23, %v936_v25  ;;  %v710_v25 = vmul.u32 7, %v7931_v16  ;;  %v1103_v16 = vld [vmem:[%s10929_s11 + $0x38] sm:$0xff] }
 0x124   : > { %1116 = vmatpush.msrb.mxu3 %v1103_v16 }
 0x125   : > { %v6477_v28 = vmul.f32 -1.442695, %v958_v27  ;;  %v637_v27 = vld [vmem:[%s8079_s3] sm:$0xff] }
 0x126   : > { %1117 = vmatpush.msrb.mxu3 %v1102_v32 }
 0x127   : > { %7570 = vpow2.f32 %v6477_v28  ;;  %v1068_v28 = vld [vmem:[%s10927_s9 + $0x38] sm:$0xff] }
 0x128   : > { %v937_v29 = vpop.f32.mrf.mxu3  ;;  %1084 = vmatpush.msrb.mxu2 %v1068_v28  ;;  %1118 = vmatpush.msrb.mxu3 %v1101_v35 }
 0x129   : > { %v705_v31 = vpop.f32.mrf.mxu0  ;;  %v1067_v29 = vld [vmem:[%s10927_s9 + $0x30] sm:$0xff] }
 0x12a   : > { %1085 = vmatpush.msrb.mxu2 %v1067_v29  ;;  %v1066_v31 = vld [vmem:[%s10927_s9 + $0x28] sm:$0xff] }
 0x12c   : > { %1086 = vmatpush.msrb.mxu2 %v1066_v31 }
 0x12d   : > { %v7571_v33 = vpop.eup %7570 }
 0x12e   : > { %v963_v34 = vadd.f32 1.0, %v7571_v33  ;;  %v1134_v33 = vld [vmem:[%s10931_s13 + $0x30] sm:$0xff] }
 0x130   : > { %7572 = vrcp.f32 %v963_v34  ;;  %v975_v47 = vand.u32 2147483648, %v963_v34  ;;  %v973_v49 = vand.u32 2147483647, %v963_v34  ;;  %vm969_vm12 = vweird.f32 %v963_v34 }
 0x131   : > { %v948_v36 = vpop.f32.mrf.mxu0 }
 0x132   : > { %v949_v37 = vadd.f32 %v948_v36, %v858_v20  ;;  %v976_v52 = vor.u32 1.1754944e-38, %v975_v47  ;;  %vm974_vm14 = vcmp.eq.f32.partialorder %v973_v49, 8.507059e+37  ;;  %v7417_v20 = vld [vmem:[%s10924_s6] sm:$0xff]  ;;  %v1133_v36 = vld [vmem:[%s10931_s13 + $0x28] sm:$0xff] }
 0x133   : > { %1054 = vmatpush.bf16.msrb.mxu1 %v7417_v20  ;;  %v1097_v47 = vld [vmem:[%s10929_s11 + $0x8] sm:$0xff]  ;;  %v1096_v49 = vld [vmem:[%s10929_s11] sm:$0xff]  ;;  %v8203_v20 = vmul.u32 11, %v8035_v8 }
 0x134   : > { %v959_v42 = vadd.f32 %v955_v38, %v949_v37  ;;  %v1064_v37 = vld [vmem:[%s10927_s9 + $0x18] sm:$0xff]  ;;  %v1100_v38 = vld [vmem:[%s10929_s11 + $0x20] sm:$0xff] }
 0x135   : > { %1119 = vmatpush.msrb.mxu3 %v1100_v38 }
 0x136   : > { %v7573_v41 = vpop.eup %7572  ;;  %7574 = vtanh.f32 %v959_v42  ;;  %v6478_v60 = vmul.f32 -1.442695, %v959_v42  ;;  %v1131_v42 = vld [vmem:[%s10931_s13 + $0x18] sm:$0xff] }
 0x137   : > { %v965_v43 = vmul.f32 %v7573_v41, %v963_v34  ;;  %vm970_vm11 = vweird.f32 %v7573_v41  ;;  %1148 = vmatpush.msra.mxu1 %v1135_v30  ;;  %v1065_v34 = vld [vmem:[%s10927_s9 + $0x20] sm:$0xff] }
 0x138   : > { %vm971_vm13 = vmor %vm969_vm12, %vm970_vm11  ;;  %7576 = vpow2.f32 %v6478_v60  ;;  %1087 = vmatpush.msrb.mxu2 %v1065_v34 }
 0x139   : > { %v950_v45 = vpop.f32.mrf.mxu0  ;;  %v966_v46 = vsub.f32 1.0, %v965_v43  ;;  %1149 = vmatpush.msra.mxu1 %v1134_v33  ;;  %v1062_v43 = vld [vmem:[%s10927_s9 + $0x8] sm:$0xff]  ;;  %v7557_v33 = vld [vmem:[%s10926_s8] ss:$0 sm:$0xff] }
 0x13a   : > { %1088 = vmatpush.msrb.mxu2 %v1064_v37  ;;  %v1130_v45 = vld [vmem:[%s10931_s13 + $0x10] sm:$0xff]  ;;  %v8214_v37 = vadd.f32 %v7557_v33, %v8053_v26 }
 0x13b   : > { %v967_v48 = vmul.f32 %v7573_v41, %v966_v46  ;;  %1150 = vmatpush.msra.mxu1 %v1133_v36  ;;  %v1061_v46 = vld [vmem:[%s10927_s9] sm:$0xff] }
 0x13c   : > { %v7575_v55 = vpop.eup %7574  ;;  %1089 = vmatpush.msrb.mxu2 %v1063_v40  ;;  %10994 = vst [vmem:[#allocation8_spill] sm:$0xff] %v8214_v37 }
 0x13d   : > { %v968_v51 = vadd.f32 %v7573_v41, %v967_v48  ;;  %1151 = vmatpush.msra.mxu1 %v1132_v39  ;;  %v1129_v48 = vld [vmem:[%s10931_s13 + $0x8] sm:$0xff] }
 0x13e   : > { %v7577_v61 = vpop.eup %7576  ;;  %1090 = vmatpush.msrb.mxu2 %v1062_v43 }
 0x13f   : > { %v972_v53 = vsel %vm971_vm13, %v7573_v41, %v968_v51  ;;  %v983_v62 = vadd.f32 1.0, %v7577_v61  ;;  %v1099_v41 = vld [vmem:[%s10929_s11 + $0x18] sm:$0xff]  ;;  %1152 = vmatpush.msra.mxu1 %v1131_v42 }
 0x140   : > { %v977_v56 = vsel %vm974_vm14, %v976_v52, %v972_v53  ;;  %1120 = vmatpush.msrb.mxu3 %v1099_v41  ;;  %1091 = vmatpush.msrb.mxu2 %v1061_v46  ;;  %v8159_v52 = vmul.u32 3, %v8035_v8 }
 0x141   : > { %v1000_v57 = vmul.f32 %v7575_v55, %v977_v56  ;;  %7578 = vrcp.f32 %v983_v62  ;;  %v999_v6 = vmul.f32 0.0, %v977_v56  ;;  %v995_v13 = vand.u32 2147483648, %v983_v62  ;;  %1153 = vmatpush.msra.mxu1 %v1130_v45 }
 0x142   : > { %vm989_vm0 = vweird.f32 %v983_v62  ;;  %v993_v15 = vand.u32 2147483647, %v983_v62  ;;  %1121 = vmatpush.msrb.mxu3 %v1098_v44 }
 0x143   : > { %1002 = vrot.lane.b32.xlu1 %v1000_v57, %s7748_s30  ;;  %v996_v19 = vor.u32 1.1754944e-38, %v995_v13  ;;  %1154 = vmatpush.msra.mxu1 %v1129_v48  ;;  %v735_v48 = vcvt.s32.f32 %v8035_v8 }
 0x144   : > { %vm994_vm2 = vcmp.eq.f32.partialorder %v993_v15, 8.507059e+37  ;;  %1122 = vmatpush.msrb.mxu3 %v1097_v47 }
 0x145   : > { %1155 = vmatpush.msra.mxu1 %v1128_v50 }
 0x146   : > { %1123 = vmatpush.msrb.mxu3 %v1096_v49  ;;  %v736_v49 = vadd.f32 0.5, %v735_v48 }
 0x147   : > { %v7579_v63 = vpop.eup %7578 }
 0x148   : > { %v985_v0 = vmul.f32 %v7579_v63, %v983_v62  ;;  %vm990_vm15 = vweird.f32 %v7579_v63  ;;  %v8163_v62 = vshrl.u32 %v639_v4, 7  ;;  %v737_v50 = vmul.f32 0.2, %v736_v49 }
 0x149   : > { %vm991_vm1 = vmor %vm989_vm0, %vm990_vm15 }
 0x14a   : > { %v986_v1 = vsub.f32 1.0, %v985_v0  ;;  %v8175_v5 = vadd.s32 8, %v8163_v62  ;;  %v8224_v43 = vadd.s32 40, %v8163_v62  ;;  %v8228_v26 = vadd.s32 32, %v8163_v62 }
 0x14b   : > { %755 = vperm.xlu1 %7550, %v753_v59   ;;  %v8247_v47 = vadd.s32 16, %v8163_v62 }
 0x14c   : > { %v987_v3 = vmul.f32 %v7579_v63, %v986_v1  ;;  %10995 = vst [vmem:[#allocation9_spill] sm:$0xff] %v8224_v43 }
 0x14d   : > { %10996 = vst [vmem:[#allocation10_spill] sm:$0xff] %v8228_v26 }
 0x14e   : > { %v988_v12 = vadd.f32 %v7579_v63, %v987_v3  ;;  %10998 = vst [vmem:[#allocation12_spill] sm:$0xff] %v8247_v47 }
 0x150   : > { %v992_v18 = vsel %vm991_vm1, %v7579_v63, %v988_v12 }
 0x151   : > { %v997_v22 = vsel %vm994_vm2, %v996_v19, %v992_v18 }
 0x1b5   : > { %v1003_v7 = vpop.permute.xlu1 %1002 }
 0x1b6   : > { %v8064_v11 = vadd.f32 %v1003_v7, %v999_v6 }
 0x1b8   : > { %7580 = vtanh.f32 %v8064_v11 }
 0x1bd   : > { %v8165_v63 = vpop.permute.xlu1 %755 }
 0x1be   : > { %v7581_v21 = vpop.eup %7580  ;;  %vm757_vm4 = vcmp.lt.s32.totalorder %v8035_v8, %v8165_v63 }
 0x1bf   : > { %v1007_v23 = vmul.f32 %v7581_v21, %v997_v22  ;;  %v726_v21 = vpop.permute.xlu0 %725 }
 0x1c0   : > { %v727_v22 = vadd.s32 %v726_v21, %v8203_v20 }
 0x1c1   : > { %v1008_v24 = vpack.c.bf16 %v1007_v23, %v1007_v23 }
 0x1c2   : > { %v728_v23 = vadd.s32 1, %v727_v22 }
 0x1c3   : > { %1018 = vrot.lane.b32.xlu2 %v1008_v24, %s7748_s30 }
 0x1c4   : > { %v729_v24 = vcvt.s32.f32 %v728_v23 }
 0x1cb   : > { %713 = vperm.xlu2 %7551, %v710_v25   ;;  %v10947_v25 = vmov 64  }
 0x1cc   : > { %7552 = vset.pattern.permute.xlu0 %v10947_v25 }
 0x1d3   : > { %742 = vperm.xlu2 %7551, %v637_v27   ;;  %v730_v27 = vadd.f32 0.5, %v729_v24 }
 0x1d5   : > { %v731_v28 = vmul.f32 0.025, %v730_v27 }
 0x1d7   : > { %v7476_v29 = vceil.f32 %v731_v28  ;;  %v7477_v16 = vfloor.f32 %v731_v28  ;;  %vm7475_vm1 = vcmp.lt.s32.totalorder %v731_v28, 0 }
 0x1d9   : > { %v7478_v30 = vsel %vm7475_vm1, %v7476_v29, %v7477_v16  ;;  %vm1541_vm1 = vcmask 130048  }
 0x1da   : > { %v7479_v31 = vcvt.f32.s32 %v7478_v30 }
 0x1db   : > { %7555 = vset.pattern.permute.xlu2 %v10947_v25 }
 0x1dc   : > { %v733_v32 = vmul.u32 40, %v7479_v31  ;;  %v7560_v31 = vld [vmem:[%s10930_s12] ss:$0 sm:$0xff] }
 0x1de   : > { %v734_v34 = vsub.s32 %v728_v23, %v733_v32 }
 0x1e0   : > { %v8220_v38 = vsel %vm757_vm4, %v734_v34, %v8043_v14  ;;  %v8238_v14 = vadd.s32 24, %v8163_v62 }
 0x1e1   : > { %v1242_v44 = vperm.slane %v8220_v38, 0  ;;  %v1235_v34 = vrot.slane %v8220_v38, 1 }
 0x1e2   : > { %10997 = vst [vmem:[#allocation11_spill] sm:$0xff] %v8238_v14 }
 0x1e3   : > { %v8343_v48 = vperm.slane %v1235_v34, 0 }
 0x21d   : > { %v8154_v51 = vpop.permute.xlu2 %1018 }
 0x21e   : > { %6495 = vmatmul.msk.bf16.vlgmr.msrb.gmra.mxu1 %vm690_vm9, %v8154_v51 }
 0x225   : > { %v714_v53 = vpop.permute.xlu2 %713 }
 0x226   : > { %v715_v54 = vadd.s32 %v714_v53, %v8159_v52  ;;  %v7481_v53 = vceil.f32 %v737_v50 }
 0x228   : > { %v716_v55 = vcvt.s32.f32 %v715_v54 }
 0x22a   : > { %v717_v56 = vadd.f32 0.5, %v716_v55 }
 0x22c   : > { %v718_v57 = vmul.f32 0.083333336, %v717_v56 }
 0x22e   : > { %vm7470_vm3 = vcmp.lt.s32.totalorder %v718_v57, 0  ;;  %v7471_v58 = vceil.f32 %v718_v57  ;;  %v7472_v59 = vfloor.f32 %v718_v57 }
 0x230   : > { %v7473_v60 = vsel %vm7470_vm3, %v7471_v58, %v7472_v59  ;;  %v8264_v58 = vpop.permute.xlu2 %742 }
 0x231   : > { %v7474_v61 = vcvt.f32.s32 %v7473_v60  ;;  %11000 = vst [vmem:[#allocation14_spill] sm:$0xff] %v8264_v58 }
 0x233   : > { %v720_v0 = vmul.u32 12, %v7474_v61  ;;  %v7559_v61 = vld [vmem:[%s10928_s10] ss:$0 sm:$0xff] }
 0x235   : > { %v721_v1 = vsub.s32 %v715_v54, %v720_v0  ;;  %v7482_v54 = vfloor.f32 %v737_v50 }
 0x237   : > { %v8172_v3 = vsel %vm757_vm4, %v721_v1, 12 }
 0x238   : > { %v1175_v6 = vperm.slane %v8172_v3, 0  ;;  %v1169_v4 = vrot.slane %v8172_v3, 2  ;;  %v1170_v7 = vrot.slane %v8172_v3, 3  ;;  %v1171_v9 = vrot.slane %v8172_v3, 4 }
 0x239   : > { %v1174_v12 = vrot.slane %v8172_v3, 7  ;;  %v1168_v35 = vrot.slane %v8172_v3, 1  ;;  %v1173_v36 = vrot.slane %v8172_v3, 6  ;;  %v1172_v0 = vrot.slane %v8172_v3, 5 }
 0x23a   : > { %vm1184_vm6 = vcmp.eq.s32.totalorder %v8175_v5, %v1175_v6  ;;  %v1177_v13 = vperm.slane %v1169_v4, 0  ;;  %v1178_v15 = vperm.slane %v1170_v7, 0  ;;  %v1179_v18 = vperm.slane %v1171_v9, 0 }
 0x23b   : > { %6595 = vmatpush.msk.msra.mxu2 %vm1184_vm6, %v10945_v17  ;;  %vm1183_vm7 = vcmp.eq.s32.totalorder %v8163_v62, %v1175_v6  ;;  %v1182_v19 = vperm.slane %v1174_v12, 0  ;;  %v1176_v41 = vperm.slane %v1168_v35, 0  ;;  %v1181_v42 = vperm.slane %v1173_v36, 0  ;;  %v8285_v12 = vld [vmem:[%s10933_s15] ss:$0 sm:$0xff] }
 0x23c   : > { %vm1188_vm8 = vcmp.eq.s32.totalorder %v8175_v5, %v1177_v13  ;;  %vm1190_vm10 = vcmp.eq.s32.totalorder %v8175_v5, %v1178_v15  ;;  %vm1192_vm11 = vcmp.eq.s32.totalorder %v8175_v5, %v1179_v18  ;;  %vm1187_vm12 = vcmp.eq.s32.totalorder %v8163_v62, %v1177_v13 }
 0x23d   : > { %6596 = vmatpush.msk.msra.mxu2 %vm1183_vm7, %v10945_v17  ;;  %6601 = vmatpush.msk.msra.mxu3 %vm1188_vm8, %v10945_v17  ;;  %vm1189_vm13 = vcmp.eq.s32.totalorder %v8163_v62, %v1178_v15  ;;  %vm1191_vm14 = vcmp.eq.s32.totalorder %v8163_v62, %v1179_v18  ;;  %vm1198_vm15 = vcmp.eq.s32.totalorder %v8175_v5, %v1182_v19  ;;  %v1236_v4 = vrot.slane %v8220_v38, 2 }
 0x23e   : > { %6604 = vmatpush.msk.msra.mxu0 %vm1190_vm10, %v10945_v17  ;;  %6607 = vmatpush.msk.msrb.mxu1 %vm1192_vm11, %v10945_v17  ;;  %vm1197_vm0 = vcmp.eq.s32.totalorder %v8163_v62, %v1182_v19  ;;  %vm1186_vm2 = vcmp.eq.s32.totalorder %v8175_v5, %v1176_v41  ;;  %vm1196_vm3 = vcmp.eq.s32.totalorder %v8175_v5, %v1181_v42  ;;  %v1237_v7 = vrot.slane %v8220_v38, 3 }
 0x23f   : > { %6602 = vmatpush.msk.msra.mxu3 %vm1187_vm12, %v10945_v17  ;;  %vm1255_vm6 = vcmp.eq.s32.totalorder %v8224_v43, %v1242_v44  ;;  %vm1185_vm7 = vcmp.eq.s32.totalorder %v8163_v62, %v1176_v41  ;;  %vm1195_vm8 = vcmp.eq.s32.totalorder %v8163_v62, %v1181_v42  ;;  %vm1254_vm10 = vcmp.eq.s32.totalorder %v8228_v26, %v1242_v44 }
 0x240   : > { %6605 = vmatpush.msk.msra.mxu0 %vm1189_vm13, %v10945_v17  ;;  %6608 = vmatpush.msk.msrb.mxu1 %vm1191_vm14, %v10945_v17  ;;  %vm1253_vm11 = vcmp.eq.s32.totalorder %v8238_v14, %v1242_v44  ;;  %vm1252_vm12 = vcmp.eq.s32.totalorder %v8247_v47, %v1242_v44  ;;  %vm1251_vm13 = vcmp.eq.s32.totalorder %v8175_v5, %v1242_v44  ;;  %v1180_v15 = vperm.slane %v1172_v0, 0 }
 0x241   : > { %vm1250_vm14 = vcmp.eq.s32.totalorder %v8163_v62, %v1242_v44  ;;  %v1238_v18 = vrot.slane %v8220_v38, 4  ;;  %v8295_v24 = vperm.slane %v1236_v4, 0  ;;  %v8297_v27 = vperm.slane %v1237_v7, 0 }
 0x242   : > { %6616 = vmatpush.msk.msrb.mxu0 %vm1198_vm15, %v10945_v17  ;;  %vm7480_vm15 = vcmp.lt.s32.totalorder %v737_v50, 0 }
 0x243   : > { %v8307_v32 = vperm.slane %v1238_v18, 0 }
 0x244   : > { %6617 = vmatpush.msk.msrb.mxu0 %vm1197_vm0, %v10945_v17 }
 0x29b   : > { %v1056_v39 = vpop.f32.mrf.mxu1 }
 0x29c   : > { %v1057_v40 = vadd.f32 %v1056_v39, %v8214_v37 }
 0x29e   : > { %v1060_v45 = vmax.f32 %v1057_v40, 0.0  ;;  %2192 = vperm.xlu0 %7552, %v1057_v40  }
 0x2a0   : > { %6496 = vmatmul.msk.f32.vlgmr.msrb.gmra.mxu2 %vm690_vm9, %v1060_v45  ;;  %6497 = vmatmul.msk.f32.vlgmr.msrb.gmra.mxu3 %vm690_vm9, %v1060_v45 }
 0x2a1   : > { %6498 = vmatmul.msk.f32.vlgmr.msra.gmra.mxu1 %vm690_vm9, %v1060_v45  ;;  %6598 = vmatpush.msk.msrb.mxu2 %vm1186_vm2, %v10945_v17  ;;  %vm1505_vm2 = vcmp.eq.s32.totalorder %v8163_v62, 1 }
 0x2a2   : > { %6613 = vmatpush.msk.msrb.mxu3 %vm1196_vm3, %v10945_v17  ;;  %6619 = vmatpush.msk.msra.mxu1 %vm1255_vm6, %v10945_v17  ;;  %vm1194_vm3 = vcmp.eq.s32.totalorder %v8175_v5, %v1180_v15 }
 0x2a3   : > { %6599 = vmatpush.msk.msrb.mxu2 %vm1185_vm7, %v10945_v17  ;;  %v1058_v46 = vpop.f32.mrf.mxu1  ;;  %vm1193_vm7 = vcmp.eq.s32.totalorder %v8163_v62, %v1180_v15 }
 0x2a4   : > { %6614 = vmatpush.msk.msrb.mxu3 %vm1195_vm8, %v10945_v17  ;;  %6620 = vmatpush.msk.msra.mxu1 %vm1254_vm10, %v10945_v17  ;;  %vm1267_vm8 = vcmp.eq.s32.totalorder %v8224_v43, %v8295_v24  ;;  %vm1273_vm10 = vcmp.eq.s32.totalorder %v8224_v43, %v8297_v27 }
 0x2a6   : > { %6621 = vmatpush.msk.msra.mxu1 %vm1253_vm11, %v10945_v17  ;;  %7554 = vset.pattern.permute.xlu0 %v7746_v2  ;;  %v7483_v2 = vsel %vm7480_vm15, %v7481_v53, %v7482_v54  ;;  %vm1279_vm11 = vcmp.eq.s32.totalorder %v8224_v43, %v8307_v32  ;;  %vm1265_vm15 = vcmp.eq.s32.totalorder %v8238_v14, %v8295_v24  ;;  %v8364_v54 = vld [vmem:[%s10934_s16] ss:$0 sm:$0xff] }
 0x2a7   : > { %v7484_v55 = vcvt.f32.s32 %v7483_v2 }
 0x2a8   : > { %6622 = vmatpush.msk.msra.mxu1 %vm1252_vm12, %v10945_v17  ;;  %vm1266_vm12 = vcmp.eq.s32.totalorder %v8228_v26, %v8295_v24 }
 0x2a9   : > { %v739_v56 = vmul.u32 5, %v7484_v55  ;;  %v1240_v55 = vrot.slane %v8220_v38, 6 }
 0x2aa   : > { %6623 = vmatpush.msk.msra.mxu1 %vm1251_vm13, %v10945_v17  ;;  %vm1272_vm13 = vcmp.eq.s32.totalorder %v8228_v26, %v8297_v27 }
 0x2ab   : > { %v8262_v57 = vsub.s32 %v8035_v8, %v739_v56  ;;  %v1241_v56 = vrot.slane %v8220_v38, 7 }
 0x2ac   : > { %6624 = vmatpush.msk.msra.mxu1 %vm1250_vm14, %v10945_v17  ;;  %vm1278_vm14 = vcmp.eq.s32.totalorder %v8228_v26, %v8307_v32 }
 0x2ad   : > { %10999 = vst [vmem:[#allocation13_spill] sm:$0xff] %v8262_v57  ;;  %v744_v59 = vsub.s32 %v8264_v58, %v8262_v57  ;;  %v8408_v7 = vperm.slane %v1241_v56, 0  ;;  %v7440_v56 = vld [vmem:[%s10922_s4 + $0x34] sm:$0xf0] }
 0x2af   : > { %vm745_vm0 = vcmp.lt.s32.totalorder %v744_v59, 0 }
 0x2b0   : > { %v746_v60 = vsel %vm745_vm0, 0, %v744_v59 }
 0x2b1   : > { %v8276_v1 = vsel %vm757_vm4, %v746_v60, %v8264_v58 }
 0x2b2   : > { %v1160_v13 = vsub.s32 %v8264_v58, %v8276_v1 }
 0x2b4   : > { %vm1161_vm6 = vcmp.lt.s32.totalorder %v1160_v13, 0 }
 0x2b5   : > { %v1162_v44 = vsel %vm1161_vm6, 0, %v1160_v13  ;;  %vm1277_vm6 = vcmp.eq.s32.totalorder %v8238_v14, %v8307_v32 }
 0x2b6   : > { %vm1163_vm0 = vcmp.gt.s32.totalorder %v1162_v44, 31 }
 0x2b7   : > { %v8376_v59 = vsel %vm1163_vm0, 31, %v1162_v44  ;;  %vm1275_vm0 = vcmp.eq.s32.totalorder %v8175_v5, %v8307_v32 }
 0x2b8   : > { %v8411_v13 = vperm.slane %v8376_v59, 0  ;;  %v1395_v34 = vrot.slane %v8376_v59, 2 }
 0x2ba   : > { %v8520_v44 = vperm.slane %v1395_v34, 0 }
 0x323   : > { %v1093_v6 = vpop.f32.mrf.mxu2  ;;  %v1125_v35 = vpop.f32.mrf.mxu3 }
 0x324   : > { %v8280_v9 = vadd.f32 %v7559_v61, %v1093_v6  ;;  %v8332_v45 = vadd.f32 %v7560_v31, %v1125_v35  ;;  %v8399_v6 = vperm.slane %v1240_v55, 0  ;;  %v1157_v31 = vpop.f32.mrf.mxu1  ;;  %v1396_v35 = vrot.slane %v8376_v59, 3  ;;  %v6750_v55 = vld [vmem:[%s10922_s4 + $0x30] sm:$0xf] }
 0x326   : > { %v1517_v19 = vperm.slane %v8280_v9, 0  ;;  %v1508_v21 = vrot.slane %v8280_v9, 2  ;;  %v1509_v22 = vrot.slane %v8280_v9, 3  ;;  %v1510_v23 = vrot.slane %v8280_v9, 4 }
 0x327   : > { %v1507_v33 = vrot.slane %v8280_v9, 1  ;;  %v1512_v41 = vrot.slane %v8280_v9, 6  ;;  %v1513_v42 = vrot.slane %v8280_v9, 7  ;;  %v1737_v2 = vperm.slane %v8332_v45, 0 }
 0x328   : > { %v1533_v28 = vsel %vm1505_vm2, %v8285_v12, %v1517_v19  ;;  %v1519_v29 = vperm.slane %v1508_v21, 0  ;;  %v1520_v16 = vperm.slane %v1509_v22, 0  ;;  %v1521_v30 = vperm.slane %v1510_v23, 0 }
 0x329   : > { %6597 = vmatmul.msk.f32.vlgmr.msra.gmra.mxu2 %vm1541_vm1, %v1533_v28  ;;  %v1518_v46 = vperm.slane %v1507_v33, 0  ;;  %v1523_v49 = vperm.slane %v1512_v41, 0  ;;  %v1524_v50 = vperm.slane %v1513_v42, 0  ;;  %v1753_v0 = vsel %vm1505_vm2, %v8364_v54, %v1737_v2 }
 0x32a   : > { %6610 = vmatpush.msk.msra.mxu2 %vm1194_vm3, %v10945_v17  ;;  %v1535_v36 = vsel %vm1505_vm2, %v8285_v12, %v1519_v29  ;;  %v1536_v39 = vsel %vm1505_vm2, %v8285_v12, %v1520_v16  ;;  %v1537_v40 = vsel %vm1505_vm2, %v8285_v12, %v1521_v30  ;;  %vm1271_vm3 = vcmp.eq.s32.totalorder %v8238_v14, %v8297_v27 }
 0x32b   : > { %6603 = vmatmul.msk.f32.vlgmr.msra.gmra.mxu3 %vm1541_vm1, %v1535_v36  ;;  %6606 = vmatmul.msk.f32.vlgmr.msra.gmra.mxu0 %vm1541_vm1, %v1536_v39  ;;  %v1534_v53 = vsel %vm1505_vm2, %v8285_v12, %v1518_v46  ;;  %v1539_v60 = vsel %vm1505_vm2, %v8285_v12, %v1523_v49  ;;  %v1540_v61 = vsel %vm1505_vm2, %v8285_v12, %v1524_v50  ;;  %v1511_v4 = vrot.slane %v8280_v9, 5  ;;  %v8539_v50 = vld [vmem:[%s10935_s17] ss:$0 sm:$0xff] }
 0x32c   : > { %6609 = vmatmul.msk.f32.vlgmr.msrb.gmra.mxu1 %vm1541_vm1, %v1537_v40  ;;  %6611 = vmatpush.msk.msra.mxu2 %vm1193_vm7, %v10945_v17  ;;  %vm1261_vm7 = vcmp.eq.s32.totalorder %v8224_v43, %v8343_v48  ;;  %v1728_v9 = vrot.slane %v8332_v45, 2  ;;  %v1729_v15 = vrot.slane %v8332_v45, 3  ;;  %v1730_v19 = vrot.slane %v8332_v45, 4 }
 0x32d   : > { %6633 = vmatpush.msk.msra.mxu3 %vm1267_vm8, %v10945_v17  ;;  %6640 = vmatpush.msk.msra.mxu0 %vm1273_vm10, %v10945_v17  ;;  %vm1264_vm8 = vcmp.eq.s32.totalorder %v8247_v47, %v8295_v24  ;;  %vm1270_vm10 = vcmp.eq.s32.totalorder %v8247_v47, %v8297_v27  ;;  %v1522_v18 = vperm.slane %v1511_v4, 0  ;;  %v1239_v21 = vrot.slane %v8220_v38, 5 }
 0x32e   : > { %6647 = vmatpush.msk.msrb.mxu1 %vm1279_vm11, %v10945_v17  ;;  %vm1276_vm11 = vcmp.eq.s32.totalorder %v8247_v47, %v8307_v32  ;;  %v1739_v22 = vperm.slane %v1728_v9, 0  ;;  %v1740_v23 = vperm.slane %v1729_v15, 0  ;;  %v1741_v28 = vperm.slane %v1730_v19, 0 }
 0x32f   : > { %6634 = vmatpush.msk.msra.mxu3 %vm1266_vm12, %v10945_v17  ;;  %6641 = vmatpush.msk.msra.mxu0 %vm1272_vm13, %v10945_v17  ;;  %vm10975_vm12 = vcmask 392192   ;;  %vm1260_vm13 = vcmp.eq.s32.totalorder %v8228_v26, %v8343_v48  ;;  %v8461_v29 = vperm.slane %v1239_v21, 0  ;;  %v1727_v30 = vrot.slane %v8332_v45, 1 }
 0x330   : > { %6648 = vmatpush.msk.msrb.mxu1 %vm1278_vm14, %v10945_v17  ;;  %vm1263_vm14 = vcmp.eq.s32.totalorder %v8175_v5, %v8295_v24  ;;  %v1755_v16 = vsel %vm1505_vm2, %v8364_v54, %v1739_v22  ;;  %v1757_v36 = vsel %vm1505_vm2, %v8364_v54, %v1741_v28  ;;  %v1732_v39 = vrot.slane %v8332_v45, 6 }
 0x331   : > { %6635 = vmatpush.msk.msra.mxu3 %vm1265_vm15, %v10945_v17  ;;  %6642 = vmatpush.msk.msra.mxu0 %vm1271_vm3, %v10945_v17  ;;  %vm1269_vm15 = vcmp.eq.s32.totalorder %v8175_v5, %v8297_v27  ;;  %vm1259_vm3 = vcmp.eq.s32.totalorder %v8238_v14, %v8343_v48  ;;  %v1733_v40 = vrot.slane %v8332_v45, 7  ;;  %v1738_v42 = vperm.slane %v1727_v30, 0  ;;  %v6734_v30 = vld [vmem:[%s10922_s4 + $0x10] sm:$0xf] }
 0x332   : > { %6649 = vmatpush.msk.msrb.mxu1 %vm1277_vm6, %v10945_v17  ;;  %6600 = vmatmul.msk.f32.vlgmr.msrb.gmra.mxu2 %vm1541_vm1, %v1534_v53  ;;  %vm1262_vm6 = vcmp.eq.s32.totalorder %v8163_v62, %v8295_v24  ;;  %v1397_v24 = vrot.slane %v8376_v59, 4  ;;  %v8522_v46 = vperm.slane %v1396_v35, 0  ;;  %v6751_v4 = vor.u32 %v7440_v56, %v6750_v55  ;;  %v7439_v55 = vld [vmem:[%s10922_s4 + $0x34] sm:$0xf]  ;;  %v6752_v56 = vld [vmem:[%s10922_s4 + $0x38] sm:$0xf0] }
 0x333   : > { %6626 = vmatpush.msk.msrb.mxu2 %vm1261_vm7, %v10945_v17  ;;  %6636 = vmatpush.msk.msra.mxu3 %vm1264_vm8, %v10945_v17  ;;  %vm1268_vm7 = vcmp.eq.s32.totalorder %v8163_v62, %v8297_v27  ;;  %vm1274_vm8 = vcmp.eq.s32.totalorder %v8163_v62, %v8307_v32  ;;  %v1538_v27 = vsel %vm1505_vm2, %v8285_v12, %v1522_v18  ;;  %v7558_v12 = vld [vmem:[%s10932_s14] ss:$0 sm:$0xff]  ;;  %v1744_v49 = vperm.slane %v1733_v40, 0 }
 0x334   : > { %6643 = vmatpush.msk.msra.mxu0 %vm1270_vm10, %v10945_v17  ;;  %6650 = vmatpush.msk.msrb.mxu1 %vm1276_vm11, %v10945_v17  ;;  %vm1291_vm10 = vcmp.eq.s32.totalorder %v8224_v43, %v8399_v6  ;;  %vm1297_vm11 = vcmp.eq.s32.totalorder %v8224_v43, %v8408_v7  ;;  %v1756_v32 = vsel %vm1505_vm2, %v8364_v54, %v1740_v23  ;;  %v8487_v33 = vperm.slane %v1397_v24, 0  ;;  %v6742_v18 = vld [vmem:[%s10922_s4 + $0x20] sm:$0xf] }
 0x335   : > { %6615 = vmatmul.msk.f32.vlgmr.msrb.gmra.mxu3 %vm1541_vm1, %v1539_v60  ;;  %6618 = vmatmul.msk.f32.vlgmr.msrb.gmra.mxu0 %vm1541_vm1, %v1540_v61  ;;  %v8506_v41 = vadd.f32 %v7558_v12, %v1157_v31  ;;  %v1754_v53 = vsel %vm1505_vm2, %v8364_v54, %v1738_v42  ;;  %v1394_v60 = vrot.slane %v8376_v59, 1  ;;  %v1399_v61 = vrot.slane %v8376_v59, 6  ;;  %v7436_v31 = vld [vmem:[%s10922_s4 + $0x14] sm:$0xf0]  ;;  %v6726_v42 = vld [vmem:[%s10922_s4] sm:$0xf] }
 0x336   : > { %6625 = vmatmul.msk.f32.vlgmr.msra.gmra.mxu1 %vm10975_vm12, %v1753_v0  ;;  %6627 = vmatpush.msk.msrb.mxu2 %vm1260_vm13, %v10945_v17  ;;  %vm1412_vm13 = vcmp.eq.s32.totalorder %v8238_v14, %v8411_v13  ;;  %v1731_v9 = vrot.slane %v8332_v45, 5  ;;  %v7438_v45 = vld [vmem:[%s10922_s4 + $0x24] sm:$0xf0]  ;;  %v1398_v12 = vrot.slane %v8376_v59, 5 }
 0x337   : > { %6637 = vmatpush.msk.msra.mxu3 %vm1263_vm14, %v10945_v17  ;;  %6644 = vmatpush.msk.msra.mxu0 %vm1269_vm15, %v10945_v17  ;;  %vm1258_vm14 = vcmp.eq.s32.totalorder %v8247_v47, %v8343_v48  ;;  %vm1290_vm15 = vcmp.eq.s32.totalorder %v8228_v26, %v8399_v6  ;;  %v1957_v2 = vperm.slane %v8506_v41, 0  ;;  %v8592_v15 = vperm.slane %v1394_v60, 0 }
 0x338   : > { %6651 = vmatpush.msk.msrb.mxu1 %vm1275_vm0, %v10945_v17  ;;  %6628 = vmatpush.msk.msrb.mxu2 %vm1259_vm3, %v10945_v17  ;;  %vm1296_vm0 = vcmp.eq.s32.totalorder %v8228_v26, %v8408_v7  ;;  %vm1411_vm3 = vcmp.eq.s32.totalorder %v8247_v47, %v8411_v13  ;;  %v8604_v19 = vperm.slane %v1399_v61, 0  ;;  %v1948_v21 = vrot.slane %v8506_v41, 2 }
 0x339   : > { %6638 = vmatpush.msk.msra.mxu3 %vm1262_vm6, %v10945_v17  ;;  %6645 = vmatpush.msk.msra.mxu0 %vm1268_vm7, %v10945_v17  ;;  %vm1289_vm6 = vcmp.eq.s32.totalorder %v8238_v14, %v8399_v6  ;;  %vm1257_vm7 = vcmp.eq.s32.totalorder %v8175_v5, %v8343_v48  ;;  %v1949_v22 = vrot.slane %v8506_v41, 3  ;;  %v1950_v24 = vrot.slane %v8506_v41, 4 }
 0x33a   : > { %6652 = vmatpush.msk.msrb.mxu1 %vm1274_vm8, %v10945_v17  ;;  %6629 = vmatpush.msk.msrb.mxu2 %vm1258_vm14, %v10945_v17  ;;  %vm1295_vm8 = vcmp.eq.s32.totalorder %v8238_v14, %v8408_v7  ;;  %vm1288_vm14 = vcmp.eq.s32.totalorder %v8247_v47, %v8399_v6  ;;  %v1742_v28 = vperm.slane %v1731_v9, 0  ;;  %v1947_v34 = vrot.slane %v8506_v41, 1 }
 0x33b   : > { %6661 = vmatpush.msk.msrb.mxu3 %vm1291_vm10, %v10945_v17  ;;  %6668 = vmatpush.msk.msrb.mxu0 %vm1297_vm11, %v10945_v17  ;;  %vm1410_vm10 = vcmp.eq.s32.totalorder %v8175_v5, %v8411_v13  ;;  %vm1256_vm11 = vcmp.eq.s32.totalorder %v8163_v62, %v8343_v48  ;;  %v1743_v48 = vperm.slane %v1732_v39, 0  ;;  %v1952_v39 = vrot.slane %v8506_v41, 6 }
 0x33c   : > { %6675 = vmatpush.msk.msra.mxu1 %vm1412_vm13, %v10945_v17  ;;  %6612 = vmatmul.msk.f32.vlgmr.msra.gmra.mxu2 %vm1541_vm1, %v1538_v27  ;;  %vm1285_vm13 = vcmp.eq.s32.totalorder %v8224_v43, %v8461_v29  ;;  %v6743_v27 = vor.u32 %v7438_v45, %v6742_v18  ;;  %v1951_v61 = vrot.slane %v8506_v41, 5  ;;  %v6736_v18 = vld [vmem:[%s10922_s4 + $0x18] sm:$0xf0] }
 0x33d   : > { %6662 = vmatpush.msk.msrb.mxu3 %vm1290_vm15, %v10945_v17  ;;  %6669 = vmatpush.msk.msrb.mxu0 %vm1296_vm0, %v10945_v17  ;;  %vm1294_vm15 = vcmp.eq.s32.totalorder %v8247_v47, %v8408_v7  ;;  %vm1409_vm0 = vcmp.eq.s32.totalorder %v8163_v62, %v8411_v13  ;;  %v1759_v0 = vsel %vm1505_vm2, %v8364_v54, %v1743_v48  ;;  %v1958_v48 = vperm.slane %v1947_v34, 0 }
 0x33e   : > { %6676 = vmatpush.msk.msra.mxu1 %vm1411_vm3, %v10945_v17  ;;  %6630 = vmatpush.msk.msrb.mxu2 %vm1257_vm7, %v10945_v17  ;;  %vm1284_vm3 = vcmp.eq.s32.totalorder %v8228_v26, %v8461_v29  ;;  %vm1287_vm7 = vcmp.eq.s32.totalorder %v8175_v5, %v8399_v6  ;;  %v1973_v13 = vsel %vm1505_vm2, %v8539_v50, %v1957_v2 }
 0x33f   : > { %6663 = vmatpush.msk.msrb.mxu3 %vm1289_vm6, %v10945_v17  ;;  %6670 = vmatpush.msk.msrb.mxu0 %vm1295_vm8, %v10945_v17  ;;  %vm1428_vm6 = vcmp.eq.s32.totalorder %v8238_v14, %v8487_v33  ;;  %vm1293_vm8 = vcmp.eq.s32.totalorder %v8175_v5, %v8408_v7  ;;  %v1974_v60 = vsel %vm1505_vm2, %v8539_v50, %v1958_v48 }
 0x340   : > { %6677 = vmatpush.msk.msra.mxu1 %vm1410_vm10, %v10945_v17  ;;  %6639 = vmatmul.msk.f32.vlgmr.msra.gmra.mxu3 %vm10975_vm12, %v1755_v16  ;;  %vm1283_vm10 = vcmp.eq.s32.totalorder %v8238_v14, %v8461_v29  ;;  %v1960_v16 = vperm.slane %v1949_v22, 0  ;;  %v6728_v22 = vld [vmem:[%s10922_s4 + $0x8] sm:$0xf0] }
 0x341   : > { %6631 = vmatpush.msk.msrb.mxu2 %vm1256_vm11, %v10945_v17  ;;  %6646 = vmatmul.msk.f32.vlgmr.msra.gmra.mxu0 %vm10975_vm12, %v1756_v32  ;;  %vm1427_vm11 = vcmp.eq.s32.totalorder %v8247_v47, %v8487_v33  ;;  %v1758_v32 = vsel %vm1505_vm2, %v8364_v54, %v1742_v28 }
 0x342   : > { %6653 = vmatmul.msk.f32.vlgmr.msrb.gmra.mxu1 %vm10975_vm12, %v1757_v36  ;;  %6664 = vmatpush.msk.msrb.mxu3 %vm1288_vm14, %v10945_v17  ;;  %vm1292_vm14 = vcmp.eq.s32.totalorder %v8163_v62, %v8408_v7  ;;  %v1400_v7 = vrot.slane %v8376_v59, 7  ;;  %v1961_v59 = vperm.slane %v1950_v24, 0  ;;  %v1976_v35 = vsel %vm1505_vm2, %v8539_v50, %v1960_v16 }
 0x343   : > { %6654 = vmatpush.msk.msra.mxu2 %vm1285_vm13, %v10945_v17  ;;  %6671 = vmatpush.msk.msrb.mxu0 %vm1294_vm15, %v10945_v17  ;;  %vm1286_vm13 = vcmp.eq.s32.totalorder %v8163_v62, %v8399_v6  ;;  %vm1420_vm15 = vcmp.eq.s32.totalorder %v8238_v14, %v8520_v44  ;;  %v1760_v6 = vsel %vm1505_vm2, %v8364_v54, %v1744_v49 }
 0x344   : > { %6678 = vmatpush.msk.msra.mxu1 %vm1409_vm0, %v10945_v17  ;;  %6665 = vmatpush.msk.msrb.mxu3 %vm1287_vm7, %v10945_v17  ;;  %vm1424_vm0 = vcmp.eq.s32.totalorder %v8238_v14, %v8522_v46  ;;  %vm10953_vm7 = vcmask 261120   ;;  %v8613_v23 = vperm.slane %v1400_v7, 0  ;;  %v6735_v36 = vor.u32 %v7436_v31, %v6734_v30  ;;  %v6744_v7 = vld [vmem:[%s10922_s4 + $0x28] sm:$0xf0] }
 0x345   : > { %6655 = vmatpush.msk.msra.mxu2 %vm1284_vm3, %v10945_v17  ;;  %6672 = vmatpush.msk.msrb.mxu0 %vm1293_vm8, %v10945_v17  ;;  %vm1426_vm3 = vcmp.eq.s32.totalorder %v8175_v5, %v8487_v33  ;;  %vm1419_vm8 = vcmp.eq.s32.totalorder %v8247_v47, %v8520_v44  ;;  %v1977_v40 = vsel %vm1505_vm2, %v8539_v50, %v1961_v59 }
 0x346   : > { %6695 = vmatpush.msk.msrb.mxu1 %vm1428_vm6, %v10945_v17  ;;  %6666 = vmatpush.msk.msrb.mxu3 %vm1286_vm13, %v10945_v17  ;;  %vm1282_vm6 = vcmp.eq.s32.totalorder %v8247_v47, %v8461_v29  ;;  %vm1281_vm13 = vcmp.eq.s32.totalorder %v8175_v5, %v8461_v29 }
 0x347   : > { %6656 = vmatpush.msk.msra.mxu2 %vm1283_vm10, %v10945_v17  ;;  %6673 = vmatpush.msk.msrb.mxu0 %vm1292_vm14, %v10945_v17  ;;  %vm1423_vm10 = vcmp.eq.s32.totalorder %v8247_v47, %v8522_v46  ;;  %vm1418_vm14 = vcmp.eq.s32.totalorder %v8175_v5, %v8520_v44 }
 0x348   : > { %6696 = vmatpush.msk.msrb.mxu1 %vm1427_vm11, %v10945_v17  ;;  %6632 = vmatmul.msk.f32.vlgmr.msrb.gmra.mxu2 %vm10975_vm12, %v1754_v53  ;;  %vm1425_vm11 = vcmp.eq.s32.totalorder %v8163_v62, %v8487_v33  ;;  %v1406_v33 = vperm.slane %v1398_v12, 0  ;;  %v1963_v53 = vperm.slane %v1952_v39, 0 }
 0x349   : > { %6685 = vmatpush.msk.msra.mxu3 %vm1420_vm15, %v10945_v17  ;;  %6690 = vmatpush.msk.msra.mxu0 %vm1424_vm0, %v10945_v17  ;;  %vm1422_vm15 = vcmp.eq.s32.totalorder %v8175_v5, %v8522_v46  ;;  %vm1280_vm0 = vcmp.eq.s32.totalorder %v8163_v62, %v8461_v29  ;;  %v1959_v29 = vperm.slane %v1948_v21, 0  ;;  %v7433_v21 = vld [vmem:[%s10922_s4 + $0x4] sm:$0xf] }
 0x34a   : > { %6697 = vmatpush.msk.msrb.mxu1 %vm1426_vm3, %v10945_v17  ;;  %6657 = vmatpush.msk.msra.mxu2 %vm1282_vm6, %v10945_v17  ;;  %vm1416_vm3 = vcmp.eq.s32.totalorder %v8238_v14, %v8592_v15  ;;  %vm1417_vm6 = vcmp.eq.s32.totalorder %v8163_v62, %v8520_v44  ;;  %v7434_v44 = vld [vmem:[%s10922_s4 + $0x4] sm:$0xf0] }
 0x34b   : > { %6667 = vmatmul.msk.f32.vlgmr.msrb.gmra.mxu3 %vm10975_vm12, %v1759_v0  ;;  %6674 = vmatmul.msk.f32.vlgmr.msrb.gmra.mxu0 %vm10975_vm12, %v1760_v6  ;;  %v1975_v54 = vsel %vm1505_vm2, %v8539_v50, %v1959_v29  ;;  %v6727_v49 = vor.u32 %v7434_v44, %v6726_v42  ;;  %v1979_v0 = vsel %vm1505_vm2, %v8539_v50, %v1963_v53 }
 0x34c   : > { %6679 = vmatmul.msk.f32.vlgmr.msra.gmra.mxu1 %vm10953_vm7, %v1973_v13  ;;  %6686 = vmatpush.msk.msra.mxu3 %vm1419_vm8, %v10945_v17  ;;  %vm1421_vm8 = vcmp.eq.s32.totalorder %v8163_v62, %v8522_v46  ;;  %v1953_v46 = vrot.slane %v8506_v41, 7  ;;  %v6755_v6 = vor.u32 %v7439_v55, %v6752_v56  ;;  %v7437_v41 = vld [vmem:[%s10922_s4 + $0x24] sm:$0xf]  ;;  %v1962_v13 = vperm.slane %v1951_v61, 0 }
 0x34d   : > { %6691 = vmatpush.msk.msra.mxu0 %vm1423_vm10, %v10945_v17  ;;  %6698 = vmatpush.msk.msrb.mxu1 %vm1425_vm11, %v10945_v17  ;;  %vm1436_vm10 = vcmp.eq.s32.totalorder %v8238_v14, %v8604_v19  ;;  %vm1440_vm11 = vcmp.eq.s32.totalorder %v8238_v14, %v8613_v23  ;;  %v6747_v9 = vor.u32 %v7437_v41, %v6744_v7 }
 0x34e   : > { %6658 = vmatpush.msk.msra.mxu2 %vm1281_vm13, %v10945_v17  ;;  %6687 = vmatpush.msk.msra.mxu3 %vm1418_vm14, %v10945_v17  ;;  %vm1435_vm13 = vcmp.eq.s32.totalorder %v8247_v47, %v8604_v19  ;;  %vm1415_vm14 = vcmp.eq.s32.totalorder %v8247_v47, %v8592_v15  ;;  %v1964_v2 = vperm.slane %v1953_v46, 0  ;;  %v1978_v45 = vsel %vm1505_vm2, %v8539_v50, %v1962_v13 }
 0x34f   : > { %2678 = vmatpush.bf16.msra.mxu1 %v6751_v4  ;;  %6692 = vmatpush.msk.msra.mxu0 %vm1422_vm15, %v10945_v17  ;;  %vm1439_vm15 = vcmp.eq.s32.totalorder %v8247_v47, %v8613_v23 }
 0x350   : > { %6659 = vmatpush.msk.msra.mxu2 %vm1280_vm0, %v10945_v17  ;;  %6688 = vmatpush.msk.msra.mxu3 %vm1417_vm6, %v10945_v17  ;;  %vm1414_vm0 = vcmp.eq.s32.totalorder %v8175_v5, %v8592_v15  ;;  %vm1438_vm6 = vcmp.eq.s32.totalorder %v8175_v5, %v8613_v23  ;;  %v1980_v4 = vsel %vm1505_vm2, %v8539_v50, %v1964_v2 }
 0x351   : > { %6693 = vmatpush.msk.msra.mxu0 %vm1421_vm8, %v10945_v17  ;;  %6660 = vmatmul.msk.f32.vlgmr.msra.gmra.mxu2 %vm10975_vm12, %v1758_v32  ;;  %vm1413_vm8 = vcmp.eq.s32.totalorder %v8163_v62, %v8592_v15  ;;  %v7435_v15 = vld [vmem:[%s10922_s4 + $0x14] sm:$0xf] }
 0x352   : > { %6680 = vmatpush.msk.msrb.mxu2 %vm1416_vm3, %v10945_v17  ;;  %6705 = vmatpush.msk.msrb.mxu3 %vm1436_vm10, %v10945_v17  ;;  %vm1434_vm3 = vcmp.eq.s32.totalorder %v8175_v5, %v8604_v19  ;;  %vm1432_vm10 = vcmp.eq.s32.totalorder %v8238_v14, %v1406_v33 }
 0x353   : > { %6710 = vmatpush.msk.msrb.mxu0 %vm1440_vm11, %v10945_v17  ;;  %2679 = vmatpush.bf16.msra.mxu1 %v6743_v27  ;;  %vm1433_vm11 = vcmp.eq.s32.totalorder %v8163_v62, %v8604_v19  ;;  %v6739_v19 = vor.u32 %v7435_v15, %v6736_v18 }
 0x354   : > { %6706 = vmatpush.msk.msrb.mxu3 %vm1435_vm13, %v10945_v17  ;;  %6681 = vmatpush.msk.msrb.mxu2 %vm1415_vm14, %v10945_v17  ;;  %vm1437_vm13 = vcmp.eq.s32.totalorder %v8163_v62, %v8613_v23  ;;  %vm1431_vm14 = vcmp.eq.s32.totalorder %v8247_v47, %v1406_v33  ;;  %v6731_v23 = vor.u32 %v7433_v21, %v6728_v22 }
 0x355   : > { %6711 = vmatpush.msk.msrb.mxu0 %vm1439_vm15, %v10945_v17  ;;  %6689 = vmatmul.msk.f32.vlgmr.msra.gmra.mxu3 %vm10953_vm7, %v1975_v54  ;;  %vm1430_vm15 = vcmp.eq.s32.totalorder %v8175_v5, %v1406_v33 }
 0x356   : > { %6694 = vmatmul.msk.f32.vlgmr.msra.gmra.mxu0 %vm10953_vm7, %v1976_v35  ;;  %6682 = vmatpush.msk.msrb.mxu2 %vm1414_vm0, %v10945_v17  ;;  %vm1429_vm0 = vcmp.eq.s32.totalorder %v8163_v62, %v1406_v33  ;;  %v8768_v33 = vpop.permute.xlu0 %2192 }
 0x357   : > { %6699 = vmatmul.msk.f32.vlgmr.msrb.gmra.mxu1 %vm10953_vm7, %v1977_v40  ;;  %6707 = vmatpush.msk.msrb.mxu3 %vm1434_vm3, %v10945_v17  ;;  %v2194_v40 = vrot.slane %v8768_v33, 7  ;;  %v2196_v56 = vrot.slane %v8768_v33, 2 }
 0x358   : > { %6712 = vmatpush.msk.msrb.mxu0 %vm1438_vm6, %v10945_v17  ;;  %2680 = vmatpush.bf16.msra.mxu1 %v6735_v36 }
 0x359   : > { %6683 = vmatpush.msk.msrb.mxu2 %vm1413_vm8, %v10945_v17  ;;  %6708 = vmatpush.msk.msrb.mxu3 %vm1433_vm11, %v10945_v17 }
 0x35a   : > { %6713 = vmatpush.msk.msrb.mxu0 %vm1437_vm13, %v10945_v17  ;;  %6684 = vmatmul.msk.f32.vlgmr.msrb.gmra.mxu2 %vm10953_vm7, %v1974_v60 }
 0x35b   : > { %6700 = vmatpush.msk.msra.mxu2 %vm1432_vm10, %v10945_v17 }
 0x35c   : > { %2681 = vmatpush.bf16.msra.mxu1 %v6727_v49 }
 0x35d   : > { %6701 = vmatpush.msk.msra.mxu2 %vm1431_vm14, %v10945_v17  ;;  %6709 = vmatmul.msk.f32.vlgmr.msrb.gmra.mxu3 %vm10953_vm7, %v1979_v0 }
 0x35e   : > { %6714 = vmatmul.msk.f32.vlgmr.msrb.gmra.mxu0 %vm10953_vm7, %v1980_v4 }
 0x35f   : > { %6702 = vmatpush.msk.msra.mxu2 %vm1430_vm15, %v10945_v17  ;;  %6756 = vmatmul.msk.bf16.vlgmr.msra.gmra.mxu1 %vm690_vm9, %v8154_v51 }
 0x361   : > { %6703 = vmatpush.msk.msra.mxu2 %vm1429_vm0, %v10945_v17 }
 0x362   : > { %6704 = vmatmul.msk.f32.vlgmr.msra.gmra.mxu2 %vm10953_vm7, %v1978_v45  ;;  %v2195_v45 = vrot.slane %v8768_v33, 1 }
 0x363   : > { %2691 = vmatpush.bf16.msrb.mxu2 %v6755_v6  ;;  %v2197_v6 = vrot.slane %v8768_v33, 3 }
 0x367   : > { %2692 = vmatpush.bf16.msrb.mxu2 %v6747_v9 }
 0x36b   : > { %2693 = vmatpush.bf16.msrb.mxu2 %v6739_v19 }
 0x36f   : > { %2694 = vmatpush.bf16.msrb.mxu2 %v6731_v23 }
 0x372   : > { %6757 = vmatmul.msk.bf16.vlgmr.msrb.gmra.mxu2 %vm690_vm9, %v8154_v51 }
 0x3a8   : > { %v8748_v24 = vpop.f32.mrf.mxu0 }
 0x3a9   : > { %v8750_v50 = vpop.f32.mrf.mxu1 }
 0x3ac   : > { %v8752_v27 = vpop.f32.mrf.mxu2 }
 0x3ae   : > { %v8754_v28 = vpop.f32.mrf.mxu3 }
 0x3b2   : > { %v8756_v12 = vpop.f32.mrf.mxu0 }
 0x3b3   : > { %v1782_v29 = vpop.f32.mrf.mxu1 }
 0x3b4   : > { %v2174_v34 = vadd.f32 %v1782_v29, %v8752_v27 }
 0x3b5   : > { %v8758_v16 = vpop.f32.mrf.mxu2 }
 0x3b8   : > { %v8760_v59 = vpop.f32.mrf.mxu3 }
 0x3be   : > { %v8762_v30 = vpop.f32.mrf.mxu0 }
 0x3bf   : > { %v1874_v31 = vpop.f32.mrf.mxu1  ;;  %v8764_v32 = vpop.f32.mrf.mxu2  ;;  %v2177_v49 = vadd.f32 %v8762_v30, %v8748_v24 }
 0x3c0   : > { %v2178_v53 = vadd.f32 %v1874_v31, %v8750_v50 }
 0x3c3   : > { %v8766_v51 = vpop.f32.mrf.mxu3 }
 0x3c4   : > { %v2176_v9 = vadd.f32 %v8766_v51, %v8754_v28 }
 0x3c8   : > { %v8771_v54 = vpop.f32.mrf.mxu0 }
 0x3c9   : > { %v2002_v35 = vpop.f32.mrf.mxu1 }
 0x3ca   : > { %v8773_v36 = vadd.f32 %v2002_v35, %v1782_v29  ;;  %v2182_v39 = vadd.f32 %v2174_v34, %v2002_v35  ;;  %v2181_v34 = vadd.f32 %v8771_v54, %v8756_v12 }
 0x3cb   : > { %v8776_v44 = vpop.f32.mrf.mxu2 }
 0x3cc   : > { %v2209_v42 = vadd.f32 %v2194_v40, %v2182_v39  ;;  %v2175_v39 = vadd.f32 %v8776_v44, %v8758_v16 }
 0x3ce   : > { %v6715_v46 = vmul.f32 -1.442695, %v2209_v42  ;;  %v8778_v48 = vpop.f32.mrf.mxu3 }
 0x3d0   : > { %7582 = vpow2.f32 %v6715_v46 }
 0x3d3   : > { %v8783_v2 = vpop.f32.mrf.mxu0 }
 0x3d4   : > { %v2185_v55 = vadd.f32 %v2177_v49, %v8783_v2  ;;  %v2094_v60 = vpop.f32.mrf.mxu1  ;;  %v8790_v13 = vpop.f32.mrf.mxu2  ;;  %v2180_v49 = vadd.f32 %v8778_v48, %v8760_v59  ;;  %v8854_v17 = vadd.f32 %v8783_v2, %v8762_v30 }
 0x3d5   : > { %v8787_v61 = vadd.f32 %v2094_v60, %v1874_v31  ;;  %v2186_v0 = vadd.f32 %v2178_v53, %v2094_v60 }
 0x3d6   : > { %v2212_v4 = vadd.f32 %v2196_v56, %v2185_v55  ;;  %v7583_v41 = vpop.eup %7582 }
 0x3d7   : > { %v2213_v7 = vadd.f32 %v2197_v6, %v2186_v0  ;;  %v8797_v19 = vadd.f32 1.0, %v7583_v41  ;;  %v2200_v0 = vrot.slane %v8768_v33, 6 }
 0x3d8   : > { %v6718_v15 = vmul.f32 -1.442695, %v2212_v4  ;;  %v8794_v18 = vpop.f32.mrf.mxu3 }
 0x3d9   : > { %v6719_v21 = vmul.f32 -1.442695, %v2213_v7  ;;  %v2184_v22 = vadd.f32 %v2176_v9, %v8794_v18  ;;  %vm2254_vm3 = vweird.f32 %v8797_v19 }
 0x3da   : > { %7584 = vpow2.f32 %v6718_v15  ;;  %v2199_v15 = vrot.slane %v8768_v33, 5 }
 0x3db   : > { %7586 = vpow2.f32 %v6719_v21  ;;  %v2211_v23 = vadd.f32 %v2195_v45, %v2184_v22  ;;  %v8800_v29 = vpop.f32.mrf.mxu0 }
 0x3dc   : > { %v8802_v31 = vpop.f32.mrf.mxu1  ;;  %7588 = vrcp.f32 %v8797_v19  ;;  %v2189_v42 = vadd.f32 %v2181_v34, %v8800_v29 }
 0x3dd   : > { %v6717_v35 = vmul.f32 -1.442695, %v2211_v23  ;;  %v8810_v46 = vpop.f32.mrf.mxu2 }
 0x3de   : > { %v2183_v55 = vadd.f32 %v2175_v39, %v8810_v46  ;;  %v2216_v7 = vadd.f32 %v2200_v0, %v2189_v42 }
 0x3df   : > { %7590 = vpow2.f32 %v6717_v35 }
 0x3e0   : > { %v7585_v40 = vpop.eup %7584  ;;  %v8817_v56 = vpop.f32.mrf.mxu3  ;;  %v2210_v9 = vadd.f32 %v8768_v33, %v2183_v55  ;;  %v6722_v39 = vmul.f32 -1.442695, %v2216_v7 }
 0x3e1   : > { %v8814_v53 = vadd.f32 1.0, %v7585_v40  ;;  %v7587_v60 = vpop.eup %7586  ;;  %v2188_v6 = vadd.f32 %v2180_v49, %v8817_v56 }
 0x3e2   : > { %v8822_v4 = vpop.eup %7588  ;;  %v8824_v41 = vadd.f32 1.0, %v7587_v60  ;;  %v6716_v34 = vmul.f32 -1.442695, %v2210_v9  ;;  %v2258_v9 = vand.u32 2147483647, %v8797_v19 }
 0x3e3   : > { %7592 = vrcp.f32 %v8814_v53  ;;  %v2250_v22 = vmul.f32 %v8822_v4, %v8797_v19  ;;  %v2215_v35 = vadd.f32 %v2199_v15, %v2188_v6  ;;  %v2260_v6 = vand.u32 2147483648, %v8797_v19 }
 0x3e4   : > { %v2685_v45 = vpop.f32.mrf.mxu1  ;;  %7594 = vrcp.f32 %v8824_v41  ;;  %vm8859_vm6 = vcmp.eq.f32.partialorder %v2258_v9, 8.507059e+37  ;;  %vm2255_vm8 = vweird.f32 %v8822_v4  ;;  %vm2299_vm10 = vweird.f32 %v8814_v53 }
 0x3e5   : > { %v7591_v21 = vpop.eup %7590  ;;  %v2251_v49 = vsub.f32 1.0, %v2250_v22  ;;  %v6721_v55 = vmul.f32 -1.442695, %v2215_v35  ;;  %v8840_v45 = vpop.f32.mrf.mxu2  ;;  %v2303_v9 = vand.u32 2147483647, %v8814_v53  ;;  %vm8879_vm14 = vmor %vm2254_vm3, %vm2255_vm8  ;;  %vm2314_vm8 = vweird.f32 %v8824_v41 }
 0x3e6   : > { %v8831_v23 = vadd.f32 1.0, %v7591_v21  ;;  %v2168_v22 = vadd.f32 %v8794_v18, %v8766_v51 }
 0x3e7   : > { %vm8898_vm3 = vcmp.eq.f32.partialorder %v2303_v9, 8.507059e+37 }
 0x3e8   : > { %7596 = vrcp.f32 %v8831_v23  ;;  %vm2284_vm15 = vweird.f32 %v8831_v23  ;;  %v2288_v47 = vand.u32 2147483647, %v8831_v23 }
 0x3e9   : > { %v8833_v40 = vpop.eup %7592  ;;  %7598 = vpow2.f32 %v6716_v34 }
 0x3ea   : > { %v2295_v42 = vmul.f32 %v8833_v40, %v8814_v53  ;;  %v8838_v60 = vpop.eup %7594  ;;  %7600 = vpow2.f32 %v6722_v39  ;;  %v2252_v39 = vmul.f32 %v8822_v4, %v2251_v49  ;;  %v2261_v49 = vor.u32 1.1754944e-38, %v2260_v6 }
 0x3eb   : > { %v2310_v7 = vmul.f32 %v8838_v60, %v8824_v41  ;;  %7602 = vpow2.f32 %v6721_v55  ;;  %v2179_v55 = vadd.f32 %v8790_v13, %v8764_v32  ;;  %vm2300_vm11 = vweird.f32 %v8833_v40 }
 0x3ec   : > { %v2296_v0 = vsub.f32 1.0, %v2295_v42  ;;  %v2253_v10 = vadd.f32 %v8822_v4, %v2252_v39  ;;  %v2290_v39 = vand.u32 2147483648, %v8831_v23  ;;  %vm8888_vm0 = vmor %vm2299_vm10, %vm2300_vm11  ;;  %vm2315_vm7 = vweird.f32 %v8838_v60 }
 0x3ed   : > { %v2311_v42 = vsub.f32 1.0, %v2310_v7  ;;  %vm8917_vm11 = vmor %vm2314_vm8, %vm2315_vm7  ;;  %v2187_v43 = vadd.f32 %v2179_v55, %v8840_v45  ;;  %v2386_v55 = vrot.slane %v8758_v16, 7  ;;  %vm10966_vm8 = vcmask 1042434  }
 0x3ee   : > { %v7597_v34 = vpop.eup %7596  ;;  %v2297_v25 = vmul.f32 %v8833_v40, %v2296_v0  ;;  %v2291_v26 = vor.u32 1.1754944e-38, %v2290_v39  ;;  %v2417_v39 = vrot.slane %v8773_v36, 7 }
 0x3ef   : > { %v2280_v15 = vmul.f32 %v7597_v34, %v8831_v23  ;;  %v7599_v21 = vpop.eup %7598  ;;  %v2312_v30 = vmul.f32 %v8838_v60, %v2311_v42  ;;  %vm2285_vm13 = vweird.f32 %v7597_v34 }
 0x3f0   : > { %v7601_v7 = vpop.eup %7600  ;;  %v8867_v0 = vadd.f32 1.0, %v7599_v21  ;;  %v2298_v6 = vadd.f32 %v8833_v40, %v2297_v25  ;;  %v2305_v21 = vand.u32 2147483648, %v8814_v53  ;;  %v2257_v53 = vsel %vm8879_vm14, %v8822_v4, %v2253_v10  ;;  %vm8905_vm10 = vmor %vm2284_vm15, %vm2285_vm13 }
 0x3f1   : > { %v2281_v2 = vsub.f32 1.0, %v2280_v15  ;;  %v7603_v42 = vpop.eup %7602  ;;  %v8886_v25 = vadd.f32 1.0, %v7601_v7  ;;  %v2313_v57 = vadd.f32 %v8838_v60, %v2312_v30  ;;  %v2320_v7 = vand.u32 2147483648, %v8824_v41 }
 0x3f2   : > { %7604 = vrcp.f32 %v8867_v0  ;;  %v2302_v23 = vsel %vm8888_vm0, %v8833_v40, %v2298_v6  ;;  %v8915_v4 = vadd.f32 1.0, %v7603_v42  ;;  %v2306_v9 = vor.u32 1.1754944e-38, %v2305_v21 }
 0x3f3   : > { %v2282_v35 = vmul.f32 %v7597_v34, %v2281_v2  ;;  %7606 = vrcp.f32 %v8886_v25  ;;  %v2262_v40 = vsel %vm8859_vm6, %v2261_v49, %v2257_v53  ;;  %vm2289_vm13 = vcmp.eq.f32.partialorder %v2288_v47, 8.507059e+37 }
 0x3f4   : > { %7608 = vrcp.f32 %v8915_v4  ;;  %v2321_v6 = vor.u32 1.1754944e-38, %v2320_v7  ;;  %v11013_v2 = vrot.slane %v8768_v33, 4  ;;  %v2275_v7 = vand.u32 2147483648, %v8867_v0 }
 0x3f5   : > { %v8875_v58 = vpop.f32.mrf.mxu2  ;;  %v2283_v19 = vadd.f32 %v7597_v34, %v2282_v35  ;;  %v2318_v35 = vand.u32 2147483647, %v8824_v41  ;;  %v2317_v41 = vsel %vm8917_vm11, %v8838_v60, %v2313_v57  ;;  %v2369_v57 = vsub.f32 1.0, %v2262_v40 }
 0x3f6   : > { %v2214_v14 = vadd.f32 %v11013_v2, %v2187_v43  ;;  %v2273_v30 = vand.u32 2147483647, %v8867_v0  ;;  %v2419_v33 = vrot.slane %v2168_v22, 7  ;;  %v2167_v43 = vadd.f32 %v8810_v46, %v8776_v44 }
 0x3f7   : > { %v2287_v10 = vsel %vm8905_vm10, %v7597_v34, %v2283_v19  ;;  %v2307_v34 = vsel %vm8898_vm3, %v2306_v9, %v2302_v23  ;;  %vm2319_vm7 = vcmp.eq.f32.partialorder %v2318_v35, 8.507059e+37  ;;  %v2421_v35 = vrot.slane %v8787_v61, 7 }
 0x3f8   : > { %v7605_v37 = vpop.eup %7604  ;;  %v2292_v42 = vsel %vm2289_vm13, %v2291_v26, %v2287_v10  ;;  %v2322_v47 = vsel %vm2319_vm7, %v2321_v6, %v2317_v41  ;;  %v2372_v19 = vsub.f32 1.0, %v2307_v34  ;;  %v2420_v26 = vrot.slane %v8854_v17, 7 }
 0x3f9   : > { %v2265_v21 = vmul.f32 %v7605_v37, %v8867_v0  ;;  %v2371_v53 = vsub.f32 1.0, %v2292_v42  ;;  %v8940_v16 = vpop.eup %7606  ;;  %vm2270_vm6 = vweird.f32 %v7605_v37  ;;  %v6720_v51 = vmul.f32 -1.442695, %v2214_v14 }
 0x3fa   : > { %v8943_v18 = vpop.eup %7608  ;;  %v2373_v23 = vsub.f32 1.0, %v2322_v47  ;;  %v11014_v17 = vrot.slane %v8752_v27, 7  ;;  %vm2269_vm14 = vweird.f32 %v8867_v0  ;;  %v11015_v41 = vrot.slane %v8754_v28, 7 }
 0x3fb   : > { %v2266_v60 = vsub.f32 1.0, %v2265_v21  ;;  %v2340_v15 = vmul.f32 %v8943_v18, %v8915_v4  ;;  %v2355_v21 = vmul.f32 %v8940_v16, %v8886_v25  ;;  %vm2271_vm15 = vmor %vm2269_vm14, %vm2270_vm6  ;;  %v2276_v61 = vor.u32 1.1754944e-38, %v2275_v7 }
 0x3fc   : > { %v2401_v10 = vmul.f32 %v11014_v17, %v2369_v57  ;;  %v2403_v6 = vmul.f32 %v11015_v41, %v2371_v53  ;;  %7610 = vpow2.f32 %v6720_v51  ;;  %v2433_v22 = vmul.f32 %v2417_v39, %v2262_v40 }
 0x3fd   : > { %v2698_v49 = vpop.f32.mrf.mxu2  ;;  %v2267_v36 = vmul.f32 %v7605_v37, %v2266_v60  ;;  %v11016_v44 = vrot.slane %v8748_v24, 7  ;;  %vm2274_vm0 = vcmp.eq.f32.partialorder %v2273_v30, 8.507059e+37  ;;  %v11017_v0 = vrot.slane %v8750_v50, 7 }
 0x3fe   : > { %v2435_v57 = vmul.f32 %v2419_v33, %v2292_v42  ;;  %v2418_v2 = vrot.slane %v2167_v43, 7  ;;  %v2441_v28 = vadd.f32 %v2433_v22, %v2401_v10  ;;  %v2436_v14 = vmul.f32 %v2420_v26, %v2307_v34 }
 0x3ff   : > { %v2268_v9 = vadd.f32 %v7605_v37, %v2267_v36  ;;  %v2404_v27 = vmul.f32 %v11016_v44, %v2372_v19  ;;  %v2405_v49 = vmul.f32 %v11017_v0, %v2373_v23  ;;  %v2341_v36 = vsub.f32 1.0, %v2340_v15 }
 0x400   : > { %v2437_v17 = vmul.f32 %v2421_v35, %v2322_v47  ;;  %v2443_v41 = vadd.f32 %v2435_v57, %v2403_v6  ;;  %v2356_v7 = vsub.f32 1.0, %v2355_v21  ;;  %vm2458_vm3 = vcmask 1041409  }
 0x401   : > { %v2272_v46 = vsel %vm2271_vm15, %v7605_v37, %v2268_v9  ;;  %v2444_v51 = vadd.f32 %v2436_v14, %v2404_v27  ;;  %v2457_v37 = vrot.slane %v2441_v28, 1  ;;  %v2342_v42 = vmul.f32 %v8943_v18, %v2341_v36 }
 0x402   : > { %v2277_v60 = vsel %vm2274_vm0, %v2276_v61, %v2272_v46  ;;  %v7611_v24 = vpop.eup %7610  ;;  %v2445_v19 = vadd.f32 %v2437_v17, %v2405_v49  ;;  %v2460_v23 = vrot.slane %v2443_v41, 7  ;;  %v2357_v34 = vmul.f32 %v8940_v16, %v2356_v7 }
 0x403   : > { %v2370_v53 = vsub.f32 1.0, %v2277_v60  ;;  %v2434_v39 = vmul.f32 %v2418_v2, %v2277_v60  ;;  %v2246_v30 = vadd.f32 1.0, %v7611_v24  ;;  %vm10965_vm10 = vcmask 1043459  }
 0x404   : > { %v2463_v26 = vrot.slane %v2444_v51, 6  ;;  %vm10964_vm11 = vcmask 1044484   ;;  %v2343_v33 = vadd.f32 %v8943_v18, %v2342_v42  ;;  %vm2345_vm13 = vweird.f32 %v8943_v18 }
 0x405   : > { %v2402_v40 = vmul.f32 %v2386_v55, %v2370_v53  ;;  %7612 = vrcp.f32 %v2246_v30  ;;  %v2466_v55 = vrot.slane %v2445_v19, 5  ;;  %v2358_v10 = vadd.f32 %v8940_v16, %v2357_v34 }
 0x406   : > { %vm2360_vm7 = vweird.f32 %v8940_v16  ;;  %v2350_v9 = vand.u32 2147483648, %v8915_v4  ;;  %v2365_v6 = vand.u32 2147483648, %v8886_v25  ;;  %vm2344_vm6 = vweird.f32 %v8915_v4 }
 0x407   : > { %v2442_v50 = vadd.f32 %v2434_v39, %v2402_v40  ;;  %v2348_v21 = vand.u32 2147483647, %v8915_v4  ;;  %vm2359_vm14 = vweird.f32 %v8886_v25  ;;  %v2363_v61 = vand.u32 2147483647, %v8886_v25  ;;  %vm2346_vm15 = vmor %vm2344_vm6, %vm2345_vm13 }
 0x408   : > { %vm2361_vm0 = vmor %vm2359_vm14, %vm2360_vm7  ;;  %v2347_v44 = vsel %vm2346_vm15, %v8943_v18, %v2343_v33  ;;  %v2351_v46 = vor.u32 1.1754944e-38, %v2350_v9  ;;  %v2366_v49 = vor.u32 1.1754944e-38, %v2365_v6  ;;  %v2335_v4 = vand.u32 2147483648, %v2246_v30 }
 0x409   : > { %v2459_v47 = vsel %vm2458_vm3, %v2442_v50, %v2457_v37  ;;  %v2362_v27 = vsel %vm2361_vm0, %v8940_v16, %v2358_v10  ;;  %v2333_v14 = vand.u32 2147483647, %v2246_v30  ;;  %v2173_v25 = vadd.f32 %v8800_v29, %v8771_v54 }
 0x40a   : > { %v2462_v35 = vsel %vm10966_vm8, %v2460_v23, %v2459_v47  ;;  %v2172_v18 = vadd.f32 %v8817_v56, %v8778_v48  ;;  %v2171_v36 = vadd.f32 %v8840_v45, %v8790_v13  ;;  %vm2329_vm13 = vweird.f32 %v2246_v30 }
 0x40b   : > { %v2465_v43 = vsel %vm10965_vm10, %v2463_v26, %v2462_v35  ;;  %v7613_v22 = vpop.eup %7612  ;;  %vm2364_vm10 = vcmp.eq.f32.partialorder %v2363_v61, 8.507059e+37  ;;  %v2391_v41 = vrot.slane %v8760_v59, 7  ;;  %v2336_v7 = vor.u32 1.1754944e-38, %v2335_v4 }
 0x40c   : > { %v2468_v15 = vsel %vm10964_vm11, %v2466_v55, %v2465_v43  ;;  %v2325_v0 = vmul.f32 %v7613_v22, %v2246_v30  ;;  %vm2349_vm11 = vcmp.eq.f32.partialorder %v2348_v21, 8.507059e+37  ;;  %v2367_v2 = vsel %vm2364_vm10, %v2366_v49, %v2362_v27 }
 0x40d   : > { %v2352_v57 = vsel %vm2349_vm11, %v2351_v46, %v2347_v44  ;;  %vm2330_vm8 = vweird.f32 %v7613_v22  ;;  %v2376_v16 = vsub.f32 1.0, %v2367_v2  ;;  %v2392_v51 = vrot.slane %v8756_v12, 7 }
 0x40e   : > { %v2326_v60 = vsub.f32 1.0, %v2325_v0  ;;  %v2375_v53 = vsub.f32 1.0, %v2352_v57  ;;  %vm2331_vm10 = vmor %vm2329_vm13, %vm2330_vm8  ;;  %vm2334_vm11 = vcmp.eq.f32.partialorder %v2333_v14, 8.507059e+37  ;;  %v2390_v54 = vrot.slane %v8764_v32, 7 }
 0x40f   : > { %v2423_v39 = vrot.slane %v2172_v18, 7  ;;  %v2408_v56 = vmul.f32 %v2392_v51, %v2376_v16  ;;  %v2424_v24 = vrot.slane %v2173_v25, 7  ;;  %v2422_v37 = vrot.slane %v2171_v36, 7  ;;  %v2904_v51 = vld [vmem:[%s10927_s9 + $0x30] sm:$0xff] }
 0x410   : > { %v2327_v28 = vmul.f32 %v7613_v22, %v2326_v60  ;;  %v2407_v29 = vmul.f32 %v2391_v41, %v2375_v53  ;;  %vm2470_vm8 = vcmask 1045509   ;;  %vm2473_vm7 = vcmask 1046534  }
 0x411   : > { %v2439_v13 = vmul.f32 %v2423_v39, %v2352_v57  ;;  %v2440_v45 = vmul.f32 %v2424_v24, %v2367_v2  ;;  %vm10967_vm6 = vcmask 1047559   ;;  %v7443_v39 = vld [vmem:[%s10924_s6 + $0x10] sm:$0xff] }
 0x412   : > { %v2328_v17 = vadd.f32 %v7613_v22, %v2327_v28  ;;  %v2900_v24 = vld [vmem:[%s10927_s9 + $0x10] sm:$0xff] }
 0x413   : > { %v2447_v59 = vadd.f32 %v2439_v13, %v2407_v29  ;;  %v2448_v30 = vadd.f32 %v2440_v45, %v2408_v56  ;;  %v7442_v13 = vld [vmem:[%s10924_s6 + $0x8] sm:$0xff] }
 0x414   : > { %v2332_v40 = vsel %vm2331_vm10, %v7613_v22, %v2328_v17  ;;  %v2899_v45 = vld [vmem:[%s10927_s9 + $0x8] sm:$0xff] }
 0x415   : > { %v2337_v48 = vsel %vm2334_vm11, %v2336_v7, %v2332_v40  ;;  %v2472_v34 = vrot.slane %v2447_v59, 3  ;;  %v2475_v32 = vrot.slane %v2448_v30, 2  ;;  %v2903_v40 = vld [vmem:[%s10927_s9 + $0x28] sm:$0xff]  ;;  %v2898_v59 = vld [vmem:[%s10927_s9] sm:$0xff] }
 0x416   : > { %v2374_v19 = vsub.f32 1.0, %v2337_v48  ;;  %v2438_v42 = vmul.f32 %v2422_v37, %v2337_v48  ;;  %v2901_v48 = vld [vmem:[%s10927_s9 + $0x18] sm:$0xff] }
 0x418   : > { %v2406_v50 = vmul.f32 %v2390_v54, %v2374_v19  ;;  %v2902_v54 = vld [vmem:[%s10927_s9 + $0x20] sm:$0xff] }
 0x41a   : > { %v2446_v23 = vadd.f32 %v2438_v42, %v2406_v50 }
 0x41c   : > { %v2469_v12 = vrot.slane %v2446_v23, 4  ;;  %v7714_v23 = vld [vmem:[%s8079_s3] sm:$0xff] }
 0x41e   : > { %v2471_v26 = vsel %vm2470_vm8, %v2469_v12, %v2468_v15 }
 0x41f   : > { %v2474_v47 = vsel %vm2473_vm7, %v2472_v34, %v2471_v26  ;;  %v7441_v34 = vld [vmem:[%s10924_s6] sm:$0xff] }
 0x420   : > { %v2477_v55 = vsel %vm10967_vm6, %v2475_v32, %v2474_v47 }
 0x421   : > { %v8994_v35 = vsel %vm757_vm4, %v2477_v55, -1e+09 }
 0x422   : > { %11018 = vst [vmem:[#allocation15_spill] sm:$0xff] %v8994_v35  ;;  %2480 = vmax.xlane.f32.xlu1 %v8994_v35 }
 0x495   : > { %v8997_v33 = vpop.xlane.xlu1 %2480 }
 0x496   : > { %11019 = vst [vmem:[#allocation16_spill] sm:$0xff] %v8997_v33  ;;  %vm2490_vm14 = vcmp.ge.f32.partialorder %v8994_v35, %v8997_v33 }
 0x497   : > { %v2491_v43 = vsel %vm2490_vm14, %v8035_v8, 128 }
 0x498   : > { %v2493_v10 = vshra.s32 %v2491_v43, 16  ;;  %v2492_v15 = vand.u32 65535, %v2491_v43 }
 0x49a   : > { %v2495_v9 = vcvt.s32.f32 %v2493_v10  ;;  %v2494_v21 = vcvt.s32.f32 %v2492_v15  ;;  %v7432_v15 = vld [vmem:[%s10990_s26 + $0x54] sm:$0xf0] }
 0x49c   : > { %2496 = vmin.xlane.f32.xlu2 %v2495_v9 }
 0x50f   : > { %v2497_v6 = vpop.xlane.xlu2 %2496 }
 0x510   : > { %vm2498_vm15 = vcmp.eq.f32.partialorder %v2495_v9, %v2497_v6  ;;  %v2503_v63 = vcvt.f32.s32 %v2497_v6  ;;  %v6800_v9 = vld [vmem:[%s10990_s26 + $0x50] sm:$0xf] }
 0x511   : > { %v2499_v61 = vsel %vm2498_vm15, %v2494_v21, inf }
 0x512   : > { %2500 = vmin.xlane.f32.xlu0 %v2499_v61  ;;  %v2504_v44 = vshll.u32 %v2503_v63, 16  ;;  %v6801_v61 = vor.u32 %v7432_v15, %v6800_v9  ;;  %v7431_v63 = vld [vmem:[%s10990_s26 + $0x54] sm:$0xf]  ;;  %v6760_v9 = vld [vmem:[%s10990_s26] sm:$0xf] }
 0x513   : > { %v7422_v15 = vld [vmem:[%s10990_s26 + $0x4] sm:$0xf0] }
 0x514   : > { %2765 = vmatpush.bf16.msra.mxu3 %v6801_v61  ;;  %v7421_v61 = vld [vmem:[%s10990_s26 + $0x4] sm:$0xf] }
 0x585   : > { %v2501_v22 = vpop.xlane.xlu0 %2500 }
 0x586   : > { %v2502_v27 = vcvt.f32.s32 %v2501_v22  ;;  %v6802_v22 = vld [vmem:[%s10990_s26 + $0x58] sm:$0xf0] }
 0x588   : > { %v9002_v46 = vadd.s32 %v2504_v44, %v2502_v27 }
 0x58a   : > { %11020 = vst [vmem:[#allocation17_spill] sm:$0xff] %v9002_v46  ;;  %vm2506_vm4 = vcmp.eq.s32.totalorder %v8035_v8, %v9002_v46 }
 0x58b   : > { %v2537_v0 = vsel %vm2506_vm4, %v8276_v1, 0  ;;  %v2522_v60 = vsel %vm2506_vm4, %v8220_v38, 0  ;;  %v2507_v53 = vsel %vm2506_vm4, %v8172_v3, 0  ;;  %v2905_v38 = vld [vmem:[%s10927_s9 + $0x38] sm:$0xff] }
 0x58c   : > { %v2539_v49 = vshra.s32 %v2537_v0, 16  ;;  %v2524_v2 = vshra.s32 %v2522_v60, 16  ;;  %v2538_v28 = vand.u32 65535, %v2537_v0  ;;  %v2523_v16 = vand.u32 65535, %v2522_v60  ;;  %2921 = vmatpush.msra.mxu2 %v2905_v38  ;;  %v7444_v3 = vld [vmem:[%s10924_s6 + $0x18] sm:$0xff] }
 0x58d   : > { %v2509_v36 = vshra.s32 %v2507_v53, 16  ;;  %2888 = vmatpush.bf16.msrb.mxu1 %v7444_v3  ;;  %v2508_v42 = vand.u32 65535, %v2507_v53  ;;  %v6805_v0 = vor.u32 %v7431_v63, %v6802_v22  ;;  %v7428_v53 = vld [vmem:[%s10990_s26 + $0x34] sm:$0xf0]  ;;  %v6762_v63 = vld [vmem:[%s10990_s26 + $0x8] sm:$0xf0] }
 0x58e   : > { %v2541_v57 = vcvt.s32.f32 %v2539_v49  ;;  %v2526_v4 = vcvt.s32.f32 %v2524_v2  ;;  %v2540_v25 = vcvt.s32.f32 %v2538_v28  ;;  %v2525_v1 = vcvt.s32.f32 %v2523_v16  ;;  %2922 = vmatpush.msra.mxu2 %v2904_v51  ;;  %v6792_v49 = vld [vmem:[%s10990_s26 + $0x40] sm:$0xf]  ;;  %v7429_v2 = vld [vmem:[%s10990_s26 + $0x44] sm:$0xf] }
 0x58f   : > { %v2511_v41 = vcvt.s32.f32 %v2509_v36  ;;  %v2510_v47 = vcvt.s32.f32 %v2508_v42  ;;  %2778 = vmatpush.bf16.msra.mxu0 %v6805_v0  ;;  %v7427_v36 = vld [vmem:[%s10990_s26 + $0x34] sm:$0xf]  ;;  %v7424_v42 = vld [vmem:[%s10990_s26 + $0x14] sm:$0xf0]  ;;  %v6761_v0 = vor.u32 %v7422_v15, %v6760_v9 }
 0x590   : > { %2542 = vmax.xlane.f32.xlu2 %v2541_v57  ;;  %2923 = vmatpush.msra.mxu2 %v2903_v40  ;;  %v6776_v40 = vld [vmem:[%s10990_s26 + $0x20] sm:$0xf] }
 0x591   : > { %2889 = vmatpush.bf16.msrb.mxu1 %v7443_v39  ;;  %v6778_v39 = vld [vmem:[%s10990_s26 + $0x28] sm:$0xf0] }
 0x592   : > { %2924 = vmatpush.msra.mxu2 %v2902_v54  ;;  %v7426_v54 = vld [vmem:[%s10990_s26 + $0x24] sm:$0xf0] }
 0x594   : > { %2925 = vmatpush.msra.mxu2 %v2901_v48 }
 0x595   : > { %2890 = vmatpush.bf16.msrb.mxu1 %v7442_v13 }
 0x596   : > { %2926 = vmatpush.msra.mxu2 %v2900_v24 }
 0x598   : > { %2527 = vmax.xlane.f32.xlu2 %v2526_v4  ;;  %2927 = vmatpush.msra.mxu2 %v2899_v45  ;;  %v6768_v45 = vld [vmem:[%s10990_s26 + $0x10] sm:$0xf] }
 0x599   : > { %2891 = vmatpush.bf16.msrb.mxu1 %v7441_v34 }
 0x59a   : > { %2928 = vmatpush.msra.mxu2 %v2898_v59 }
 0x603   : > { %v2543_v14 = vpop.xlane.xlu2 %2542 }
 0x604   : > { %vm2544_vm0 = vcmp.eq.f32.partialorder %v2541_v57, %v2543_v14  ;;  %v2549_v29 = vcvt.f32.s32 %v2543_v14  ;;  %v7430_v57 = vld [vmem:[%s10990_s26 + $0x44] sm:$0xf0] }
 0x605   : > { %v2545_v18 = vsel %vm2544_vm0, %v2540_v25, -inf  ;;  %v6793_v60 = vor.u32 %v7430_v57, %v6792_v49  ;;  %v6765_v49 = vor.u32 %v7421_v61, %v6762_v63 }
 0x606   : > { %2546 = vmax.xlane.f32.xlu1 %v2545_v18  ;;  %v2550_v19 = vshll.u32 %v2549_v29, 16  ;;  %v6784_v18 = vld [vmem:[%s10990_s26 + $0x30] sm:$0xf]  ;;  %v7425_v29 = vld [vmem:[%s10990_s26 + $0x24] sm:$0xf] }
 0x607   : > { %2766 = vmatpush.bf16.msra.mxu3 %v6793_v60  ;;  %v6781_v13 = vor.u32 %v7425_v29, %v6778_v39  ;;  %v2934_v29 = vld [vmem:[%s10929_s11 + $0x8] sm:$0xff] }
 0x608   : > { %v2966_v39 = vld [vmem:[%s10931_s13 + $0x8] sm:$0xff] }
 0x60b   : > { %v2528_v17 = vpop.xlane.xlu2 %2527 }
 0x60c   : > { %vm2529_vm13 = vcmp.eq.f32.partialorder %v2526_v4, %v2528_v17  ;;  %v2534_v30 = vcvt.f32.s32 %v2528_v17  ;;  %v6794_v4 = vld [vmem:[%s10990_s26 + $0x48] sm:$0xf0]  ;;  %v6786_v17 = vld [vmem:[%s10990_s26 + $0x38] sm:$0xf0] }
 0x60d   : > { %v2530_v7 = vsel %vm2529_vm13, %v2525_v1, -inf  ;;  %v6797_v16 = vor.u32 %v7429_v2, %v6794_v4  ;;  %v6789_v3 = vor.u32 %v7427_v36, %v6786_v17  ;;  %v2940_v2 = vld [vmem:[%s10929_s11 + $0x38] sm:$0xff]  ;;  %v2938_v36 = vld [vmem:[%s10929_s11 + $0x28] sm:$0xff] }
 0x60e   : > { %2531 = vmax.xlane.f32.xlu2 %v2530_v7  ;;  %2512 = vmax.xlane.f32.xlu1 %v2511_v41  ;;  %v2535_v43 = vshll.u32 %v2534_v30, 16  ;;  %v6785_v7 = vor.u32 %v7428_v53, %v6784_v18  ;;  %v7423_v30 = vld [vmem:[%s10990_s26 + $0x14] sm:$0xf]  ;;  %v2972_v4 = vld [vmem:[%s10931_s13 + $0x38] sm:$0xff]  ;;  %v2970_v17 = vld [vmem:[%s10931_s13 + $0x28] sm:$0xff] }
 0x60f   : > { %2779 = vmatpush.bf16.msra.mxu0 %v6797_v16  ;;  %v2971_v18 = vld [vmem:[%s10931_s13 + $0x30] sm:$0xff] }
 0x610   : > { %2767 = vmatpush.bf16.msra.mxu3 %v6785_v7  ;;  %v2937_v7 = vld [vmem:[%s10929_s11 + $0x20] sm:$0xff] }
 0x613   : > { %2780 = vmatpush.bf16.msra.mxu0 %v6789_v3  ;;  %v2968_v3 = vld [vmem:[%s10931_s13 + $0x18] sm:$0xff] }
 0x617   : > { %2781 = vmatpush.bf16.msra.mxu0 %v6781_v13 }
 0x679   : > { %v2547_v56 = vpop.xlane.xlu1 %2546 }
 0x67a   : > { %v2548_v37 = vcvt.f32.s32 %v2547_v56 }
 0x67c   : > { %v9039_v50 = vadd.s32 %v2550_v19, %v2548_v37  ;;  %v6777_v19 = vor.u32 %v7426_v54, %v6776_v40  ;;  %v2935_v40 = vld [vmem:[%s10929_s11 + $0x10] sm:$0xff] }
 0x67d   : > { %v2967_v54 = vld [vmem:[%s10931_s13 + $0x10] sm:$0xff] }
 0x67e   : > { %11021 = vst [vmem:[#allocation18_spill] sm:$0xff] %v9039_v50  ;;  %v2595_v12 = vsub.s32 %v7714_v23, %v9039_v50  ;;  %v6770_v23 = vld [vmem:[%s10990_s26 + $0x18] sm:$0xf0]  ;;  %2768 = vmatpush.bf16.msra.mxu3 %v6777_v19 }
 0x680   : > { %vm2596_vm10 = vcmp.lt.s32.totalorder %v2595_v12, 0 }
 0x681   : > { %v2532_v32 = vpop.xlane.xlu2 %2531  ;;  %v9049_v26 = vpop.xlane.xlu1 %2512  ;;  %v2597_v55 = vsel %vm2596_vm10, 0, %v2595_v12 }
 0x682   : > { %v2533_v10 = vcvt.f32.s32 %v2532_v32  ;;  %vm2514_vm11 = vcmp.eq.f32.partialorder %v2511_v41, %v9049_v26  ;;  %vm2598_vm14 = vcmp.gt.s32.totalorder %v2597_v55, 31  ;;  %v11023_v32 = vmov 64  }
 0x683   : > { %v2515_v6 = vsel %vm2514_vm11, %v2510_v47, -inf  ;;  %v2599_v21 = vsel %vm2598_vm14, 31, %v2597_v55  ;;  %v6769_v55 = vor.u32 %v7424_v42, %v6768_v45 }
 0x684   : > { %v9064_v44 = vadd.s32 %v2535_v43, %v2533_v10  ;;  %2516 = vmax.xlane.f32.xlu0 %v2515_v6  ;;  %v2604_v27 = vadd.s32 16, %v2599_v21  ;;  %v6773_v10 = vor.u32 %v7423_v30, %v6770_v23 }
 0x685   : > { %2769 = vmatpush.bf16.msra.mxu3 %v6769_v55 }
 0x686   : > { %11022 = vst [vmem:[#allocation19_spill] sm:$0xff] %v9064_v44  ;;  %v10968_v28 = vcvt.s32.f32 %v9064_v44  ;;  %v2565_v14 = vmul.u32 7, %v9064_v44  ;;  %v2605_v25 = vadd.s32 48, %v2604_v27  ;;  %2782 = vmatpush.bf16.msra.mxu0 %v6773_v10  ;;  %v2601_v45 = vadd.s32 16, %v9064_v44  ;;  %v2789_v10 = vld [vmem:[%s10923_s5] sm:$0x3] }
 0x687   : > { %v2791_v9 = vperm.slane %v2789_v10, 0 }
 0x688   : > { %v2566_v1 = vadd.s32 %v2565_v14, %v8159_v52  ;;  %v2585_v41 = vadd.f32 0.5, %v10968_v28  ;;  %2607 = vperm.xlu1 %7550, %v2605_v25   ;;  %v2939_v14 = vld [vmem:[%s10929_s11 + $0x30] sm:$0xff] }
 0x689   : > { %2770 = vmatpush.bf16.msra.mxu3 %v6761_v0 }
 0x68a   : > { %v2567_v38 = vcvt.s32.f32 %v2566_v1  ;;  %v2586_v51 = vmul.f32 0.007874016, %v2585_v41  ;;  %2783 = vmatpush.bf16.msra.mxu0 %v6765_v49  ;;  %v11024_v41 = vmov 1.0  }
 0x68c   : > { %v2568_v48 = vadd.f32 0.5, %v2567_v38  ;;  %vm7500_vm15 = vcmp.lt.s32.totalorder %v2586_v51, 0  ;;  %v7501_v56 = vceil.f32 %v2586_v51  ;;  %v7502_v24 = vfloor.f32 %v2586_v51  ;;  %v2969_v38 = vld [vmem:[%s10931_s13 + $0x20] sm:$0xff]  ;;  %v2936_v51 = vld [vmem:[%s10929_s11 + $0x18] sm:$0xff] }
 0x68d   : > { %2953 = vmatpush.msrb.mxu3 %v2940_v2 }
 0x68e   : > { %v2569_v37 = vmul.f32 0.083333336, %v2568_v48  ;;  %v7503_v59 = vsel %vm7500_vm15, %v7501_v56, %v7502_v24  ;;  %2985 = vmatpush.msrb.mxu0 %v2972_v4  ;;  %v2933_v48 = vld [vmem:[%s10929_s11] sm:$0xff]  ;;  %v2519_v24 = vcvt.f32.s32 %v9049_v26  ;;  %vm2602_vm15 = vcmp.eq.s32.totalorder %v8035_v8, %v2601_v45 }
 0x68f   : > { %v7504_v47 = vcvt.f32.s32 %v7503_v59  ;;  %2954 = vmatpush.msrb.mxu3 %v2939_v14  ;;  %v2965_v56 = vld [vmem:[%s10931_s13] sm:$0xff] }
 0x690   : > { %vm7490_vm4 = vcmp.lt.s32.totalorder %v2569_v37, 0  ;;  %v7491_v12 = vceil.f32 %v2569_v37  ;;  %v7492_v34 = vfloor.f32 %v2569_v37  ;;  %7553 = vset.pattern.permute.xlu1 %v11023_v32  ;;  %2986 = vmatpush.msrb.mxu0 %v2971_v18  ;;  %v2520_v37 = vshll.u32 %v2519_v24, 16 }
 0x691   : > { %v2588_v21 = vmul.u32 127, %v7504_v47  ;;  %2955 = vmatpush.msrb.mxu3 %v2938_v36 }
 0x692   : > { %v7493_v43 = vsel %vm7490_vm4, %v7491_v12, %v7492_v34  ;;  %2987 = vmatpush.msrb.mxu0 %v2970_v17  ;;  %v11025_v34 = vmov 0.0  }
 0x693   : > { %v7494_v6 = vcvt.f32.s32 %v7493_v43  ;;  %v2589_v27 = vsub.s32 %v9064_v44, %v2588_v21  ;;  %2956 = vmatpush.msrb.mxu3 %v2937_v7 }
 0x694   : > { %2988 = vmatpush.msrb.mxu0 %v2969_v38 }
 0x695   : > { %v2571_v22 = vmul.u32 12, %v7494_v6  ;;  %v9133_v60 = vadd.s32 1, %v2589_v27  ;;  %2957 = vmatpush.msrb.mxu3 %v2936_v51 }
 0x696   : > { %2989 = vmatpush.msrb.mxu0 %v2968_v3 }
 0x697   : > { %v2572_v57 = vsub.s32 %v2566_v1, %v2571_v22  ;;  %vm2591_vm0 = vcmp.lt.s32.totalorder %v8035_v8, %v9133_v60  ;;  %2958 = vmatpush.msrb.mxu3 %v2935_v40 }
 0x698   : > { %2990 = vmatpush.msrb.mxu0 %v2967_v54 }
 0x699   : > { %v9149_v25 = vsel %vm2591_vm0, %v2572_v57, 12  ;;  %2959 = vmatpush.msrb.mxu3 %v2934_v29  ;;  %v2792_v57 = vperm.slane %v2789_v10, 1 }
 0x69a   : > { %v3009_v53 = vperm.slane %v9149_v25, 0  ;;  %v3002_v16 = vrot.slane %v9149_v25, 1  ;;  %2991 = vmatpush.msrb.mxu0 %v2966_v39  ;;  %v3004_v30 = vrot.slane %v9149_v25, 3  ;;  %v3005_v23 = vrot.slane %v9149_v25, 4 }
 0x69b   : > { %2960 = vmatpush.msrb.mxu3 %v2933_v48 }
 0x69c   : > { %vm3018_vm13 = vcmp.eq.s32.totalorder %v8175_v5, %v3009_v53  ;;  %v3010_v1 = vperm.slane %v3002_v16, 0  ;;  %vm3017_vm10 = vcmp.eq.s32.totalorder %v8163_v62, %v3009_v53  ;;  %2992 = vmatpush.msrb.mxu0 %v2965_v56  ;;  %v3012_v26 = vperm.slane %v3004_v30, 0 }
 0x69d   : > { %6926 = vmatpush.msk.msrb.mxu2 %vm3018_vm13, %v11024_v41  ;;  %v3013_v12 = vperm.slane %v3005_v23, 0 }
 0x69e   : > { %vm3020_vm11 = vcmp.eq.s32.totalorder %v8175_v5, %v3010_v1  ;;  %vm3019_vm14 = vcmp.eq.s32.totalorder %v8163_v62, %v3010_v1 }
 0x69f   : > { %6927 = vmatpush.msk.msrb.mxu2 %vm3017_vm10, %v11024_v41  ;;  %6929 = vmatpush.msk.msra.mxu1 %vm3020_vm11, %v11024_v41  ;;  %vm3026_vm6 = vcmp.eq.s32.totalorder %v8175_v5, %v3013_v12 }
 0x6a1   : > { %6930 = vmatpush.msk.msra.mxu1 %vm3019_vm14, %v11024_v41  ;;  %vm3024_vm14 = vcmp.eq.s32.totalorder %v8175_v5, %v3012_v26 }
 0x6f7   : > { %v2517_v19 = vpop.xlane.xlu0 %2516 }
 0x6f8   : > { %v2518_v13 = vcvt.f32.s32 %v2517_v19 }
 0x6fa   : > { %v2521_v42 = vadd.s32 %v2520_v37, %v2518_v13  ;;  %v2608_v59 = vpop.permute.xlu1 %2607 }
 0x6fb   : > { %vm2609_vm10 = vcmp.eq.s32.totalorder %v8035_v8, %v2608_v59 }
 0x6fc   : > { %vm2600_vm4 = vcmp.eq.s32.totalorder %v8035_v8, %v2521_v42 }
 0x6fd   : > { %vm2603_vm13 = vmor %vm2600_vm4, %vm2602_vm15  ;;  %vm3023_vm15 = vcmp.eq.s32.totalorder %v8163_v62, %v3012_v26  ;;  %vm3025_vm4 = vcmp.eq.s32.totalorder %v8163_v62, %v3013_v12 }
 0x6fe   : > { %vm2610_vm11 = vmor %vm2603_vm13, %vm2609_vm10 }
 0x6ff   : > { %v6723_v47 = vsel %vm2610_vm11, 1.0, %v11025_v34 }
 0x700   : > { %v2613_v55 = vpack.c.bf16 %v6723_v47, %v6723_v47 }
 0x702   : > { %6806 = vmatmul.msk.bf16.vlgmr.msra.gmra.mxu3 %vm922_vm5, %v2613_v55  ;;  %6807 = vmatmul.msk.bf16.vlgmr.msra.gmra.mxu0 %vm922_vm5, %v2613_v55 }
 0x703   : > { %6935 = vmatpush.msk.msra.mxu3 %vm3024_vm14, %v11024_v41  ;;  %6938 = vmatpush.msk.msra.mxu0 %vm3026_vm6, %v11024_v41 }
 0x705   : > { %6936 = vmatpush.msk.msra.mxu3 %vm3023_vm15, %v11024_v41  ;;  %6939 = vmatpush.msk.msra.mxu0 %vm3025_vm4, %v11024_v41 }
 0x77f   : > { %v2785_v43 = vpop.f32.mrf.mxu0 }
 0x780   : > { %v2786_v49 = vadd.f32 %v2785_v43, %v8875_v58  ;;  %v2573_v43 = vmul.u32 5, %v9064_v44 }
 0x782   : > { %v2796_v4 = vadd.f32 %v2792_v57, %v2786_v49  ;;  %v2574_v10 = vadd.s32 %v2573_v43, %v8203_v20  ;;  %v3003_v57 = vrot.slane %v9149_v25, 2 }
 0x784   : > { %v6809_v58 = vmul.f32 -1.442695, %v2796_v4 }
 0x785   : > { %v2772_v15 = vpop.f32.mrf.mxu3 }
 0x786   : > { %v2773_v6 = vadd.f32 %v2772_v15, %v8802_v31 }
 0x787   : > { %v2787_v21 = vpop.f32.mrf.mxu0 }
 0x788   : > { %v2795_v61 = vadd.f32 %v2791_v9, %v2773_v6  ;;  %v2575_v9 = vadd.s32 1, %v2574_v10  ;;  %v9303_v10 = vld [vmem:[%s10933_s15] ss:$0 sm:$0xff] }
 0x78a   : > { %v6808_v63 = vmul.f32 -1.442695, %v2795_v61  ;;  %v2576_v15 = vcvt.s32.f32 %v2575_v9 }
 0x78c   : > { %7614 = vpow2.f32 %v6808_v63  ;;  %v2577_v6 = vadd.f32 0.5, %v2576_v15 }
 0x78d   : > { %v2774_v22 = vpop.f32.mrf.mxu3 }
 0x78e   : > { %v2578_v21 = vmul.f32 0.025, %v2577_v6 }
 0x790   : > { %v7496_v61 = vceil.f32 %v2578_v21  ;;  %v7497_v63 = vfloor.f32 %v2578_v21 }
 0x792   : > { %v7615_v27 = vpop.eup %7614 }
 0x793   : > { %v2800_v0 = vadd.f32 1.0, %v7615_v27 }
 0x795   : > { %7616 = vrcp.f32 %v2800_v0  ;;  %v2812_v53 = vand.u32 2147483648, %v2800_v0  ;;  %v2810_v31 = vand.u32 2147483647, %v2800_v0  ;;  %vm2806_vm13 = vweird.f32 %v2800_v0 }
 0x796   : > { %7618 = vtanh.f32 %v2796_v4 }
 0x797   : > { %v2813_v17 = vor.u32 1.1754944e-38, %v2812_v53  ;;  %vm2811_vm11 = vcmp.eq.f32.partialorder %v2810_v31, 8.507059e+37  ;;  %7620 = vpow2.f32 %v6809_v58  ;;  %v11030_v58 = vld [vmem:[#allocation12_spill] sm:$0xff] }
 0x79b   : > { %v7617_v2 = vpop.eup %7616 }
 0x79c   : > { %v2802_v14 = vmul.f32 %v7617_v2, %v2800_v0  ;;  %vm2807_vm6 = vweird.f32 %v7617_v2  ;;  %v7619_v7 = vpop.eup %7618 }
 0x79d   : > { %vm2808_vm10 = vmor %vm2806_vm13, %vm2807_vm6  ;;  %v7621_v3 = vpop.eup %7620 }
 0x79e   : > { %v2803_v18 = vsub.f32 1.0, %v2802_v14  ;;  %v2820_v40 = vadd.f32 1.0, %v7621_v3  ;;  %v11031_v3 = vld [vmem:[#allocation13_spill] sm:$0xff] }
 0x7a0   : > { %v2804_v16 = vmul.f32 %v7617_v2, %v2803_v18  ;;  %7622 = vrcp.f32 %v2820_v40  ;;  %v2832_v13 = vand.u32 2147483648, %v2820_v40  ;;  %vm2826_vm15 = vweird.f32 %v2820_v40  ;;  %v11026_v18 = vld [vmem:[#allocation8_spill] sm:$0xff] }
 0x7a1   : > { %v2830_v45 = vand.u32 2147483647, %v2820_v40 }
 0x7a2   : > { %v2805_v36 = vadd.f32 %v7617_v2, %v2804_v16  ;;  %v2833_v59 = vor.u32 1.1754944e-38, %v2832_v13  ;;  %v3011_v16 = vperm.slane %v3003_v57, 0 }
 0x7a3   : > { %vm2831_vm6 = vcmp.eq.f32.partialorder %v2830_v45, 8.507059e+37 }
 0x7a4   : > { %v2809_v1 = vsel %vm2808_vm10, %v7617_v2, %v2805_v36  ;;  %v3008_v2 = vrot.slane %v9149_v25, 7 }
 0x7a5   : > { %v2814_v38 = vsel %vm2811_vm11, %v2813_v17, %v2809_v1  ;;  %vm7495_vm11 = vcmp.lt.s32.totalorder %v2578_v21, 0  ;;  %v11027_v1 = vld [vmem:[#allocation9_spill] sm:$0xff] }
 0x7a6   : > { %v2837_v51 = vmul.f32 %v7619_v7, %v2814_v38  ;;  %v7623_v54 = vpop.eup %7622  ;;  %v2836_v56 = vmul.f32 %v2814_v38, %v8064_v11  ;;  %v3006_v11 = vrot.slane %v9149_v25, 5  ;;  %v7498_v22 = vsel %vm7495_vm11, %v7496_v61, %v7497_v63  ;;  %v11028_v7 = vld [vmem:[#allocation10_spill] sm:$0xff]  ;;  %v7566_v61 = vld [vmem:[%s10930_s12] ss:$0 sm:$0xff] }
 0x7a7   : > { %v2822_v29 = vmul.f32 %v7623_v54, %v2820_v40  ;;  %vm2827_vm14 = vweird.f32 %v7623_v54  ;;  %v7499_v27 = vcvt.f32.s32 %v7498_v22  ;;  %v3016_v31 = vperm.slane %v3008_v2, 0 }
 0x7a8   : > { %2839 = vrot.lane.b32.xlu2 %v2837_v51, %s7748_s30  ;;  %vm2828_vm4 = vmor %vm2826_vm15, %vm2827_vm14  ;;  %v3014_v47 = vperm.slane %v3006_v11, 0  ;;  %vm3022_vm14 = vcmp.eq.s32.totalorder %v8175_v5, %v3011_v16  ;;  %v11029_v51 = vld [vmem:[#allocation11_spill] sm:$0xff]  ;;  %v2582_v40 = vsub.s32 %v9039_v50, %v11031_v3 }
 0x7a9   : > { %v2823_v39 = vsub.f32 1.0, %v2822_v29  ;;  %v2580_v0 = vmul.u32 40, %v7499_v27  ;;  %vm3032_vm15 = vcmp.eq.s32.totalorder %v8175_v5, %v3016_v31 }
 0x7aa   : > { %vm3028_vm13 = vcmp.eq.s32.totalorder %v8175_v5, %v3014_v47  ;;  %vm3027_vm10 = vcmp.eq.s32.totalorder %v8163_v62, %v3014_v47 }
 0x7ab   : > { %v2824_v48 = vmul.f32 %v7623_v54, %v2823_v39  ;;  %v2581_v49 = vsub.s32 %v2575_v9, %v2580_v0  ;;  %v7565_v39 = vld [vmem:[%s10928_s10] ss:$0 sm:$0xff] }
 0x7ad   : > { %v2825_v37 = vadd.f32 %v7623_v54, %v2824_v48  ;;  %v9246_v4 = vsel %vm2591_vm0, %v2581_v49, %v9064_v44  ;;  %v3007_v48 = vrot.slane %v9149_v25, 6 }
 0x7ae   : > { %v3072_v36 = vperm.slane %v9246_v4, 0  ;;  %v3065_v13 = vrot.slane %v9246_v4, 1  ;;  %v3067_v45 = vrot.slane %v9246_v4, 3  ;;  %v3066_v2 = vrot.slane %v9246_v4, 2 }
 0x7af   : > { %v2829_v42 = vsel %vm2828_vm4, %v7623_v54, %v2825_v37 }
 0x7b0   : > { %v2834_v23 = vsel %vm2831_vm6, %v2833_v59, %v2829_v42  ;;  %vm3085_vm4 = vcmp.eq.s32.totalorder %v11027_v1, %v3072_v36  ;;  %vm3021_vm6 = vcmp.eq.s32.totalorder %v8163_v62, %v3011_v16  ;;  %vm3083_vm11 = vcmp.eq.s32.totalorder %v11029_v51, %v3072_v36 }
 0x7b1   : > { %v3015_v59 = vperm.slane %v3007_v48, 0  ;;  %v9296_v47 = vperm.slane %v3065_v13, 0  ;;  %v9298_v43 = vperm.slane %v3067_v45, 0  ;;  %v3069_v48 = vrot.slane %v9246_v4, 5 }
 0x802   : > { %v2840_v24 = vpop.permute.xlu2 %2839 }
 0x803   : > { %v9225_v19 = vadd.f32 %v2840_v24, %v2836_v56  ;;  %v11032_v56 = vld [vmem:[#allocation14_spill] sm:$0xff] }
 0x805   : > { %7624 = vtanh.f32 %v9225_v19 }
 0x80b   : > { %v7625_v30 = vpop.eup %7624 }
 0x80c   : > { %v2844_v26 = vmul.f32 %v7625_v30, %v2834_v23  ;;  %v3068_v30 = vrot.slane %v9246_v4, 4 }
 0x80e   : > { %v2845_v12 = vpack.c.bf16 %v2844_v26, %v2844_v26  ;;  %v9313_v63 = vperm.slane %v3068_v30, 0 }
 0x810   : > { %2855 = vrot.lane.b32.xlu0 %v2845_v12, %s7748_s30 }
 0x882   : > { %v9230_v55 = vpop.permute.xlu0 %2855 }
 0x883   : > { %6826 = vmatmul.msk.bf16.vlgmr.msrb.gmra.mxu1 %vm690_vm9, %v9230_v55 }
 0x884   : > { %6941 = vmatpush.msk.msrb.mxu1 %vm3028_vm13, %v11024_v41  ;;  %vm3031_vm13 = vcmp.eq.s32.totalorder %v8163_v62, %v3016_v31 }
 0x886   : > { %6942 = vmatpush.msk.msrb.mxu1 %vm3027_vm10, %v11024_v41  ;;  %vm3084_vm10 = vcmp.eq.s32.totalorder %v11028_v7, %v3072_v36 }
 0x900   : > { %v2893_v14 = vpop.f32.mrf.mxu1 }
 0x901   : > { %v2894_v53 = vadd.f32 %v2893_v14, %v11026_v18 }
 0x903   : > { %v2897_v17 = vmax.f32 %v2894_v53, 0.0  ;;  %4009 = vperm.xlu1 %7553, %v2894_v53  }
 0x905   : > { %6827 = vmatmul.msk.f32.vlgmr.msra.gmra.mxu2 %vm690_vm9, %v2897_v17  ;;  %6828 = vmatmul.msk.f32.vlgmr.msrb.gmra.mxu3 %vm690_vm9, %v2897_v17 }
 0x906   : > { %6829 = vmatmul.msk.f32.vlgmr.msrb.gmra.mxu0 %vm690_vm9, %v2897_v17  ;;  %6932 = vmatpush.msk.msra.mxu2 %vm3022_vm14, %v11024_v41  ;;  %vm3082_vm14 = vcmp.eq.s32.totalorder %v11030_v58, %v3072_v36  ;;  %v9350_v17 = vperm.slane %v3066_v2, 0 }
 0x907   : > { %6947 = vmatpush.msk.msrb.mxu3 %vm3032_vm15, %v11024_v41  ;;  %6950 = vmatpush.msk.msrb.mxu0 %vm3085_vm4, %v11024_v41  ;;  %vm3081_vm15 = vcmp.eq.s32.totalorder %v8175_v5, %v3072_v36  ;;  %vm3080_vm4 = vcmp.eq.s32.totalorder %v8163_v62, %v3072_v36 }
 0x908   : > { %6933 = vmatpush.msk.msra.mxu2 %vm3021_vm6, %v11024_v41  ;;  %v2895_v38 = vpop.f32.mrf.mxu1  ;;  %vm2583_vm6 = vcmp.lt.s32.totalorder %v2582_v40, 0 }
 0x909   : > { %6948 = vmatpush.msk.msrb.mxu3 %vm3031_vm13, %v11024_v41  ;;  %6951 = vmatpush.msk.msrb.mxu0 %vm3084_vm10, %v11024_v41  ;;  %v2584_v54 = vsel %vm2583_vm6, 0, %v2582_v40  ;;  %vm3030_vm10 = vcmp.eq.s32.totalorder %v8175_v5, %v3015_v59  ;;  %vm3090_vm6 = vcmp.eq.s32.totalorder %v11028_v7, %v9296_v47 }
 0x90a   : > { %v9279_v29 = vsel %vm2591_vm0, %v2584_v54, %v9039_v50 }
 0x90b   : > { %6952 = vmatpush.msk.msrb.mxu0 %vm3083_vm11, %v11024_v41  ;;  %v2997_v24 = vsub.s32 %v11032_v56, %v9279_v29  ;;  %vm3029_vm11 = vcmp.eq.s32.totalorder %v8163_v62, %v3015_v59  ;;  %v9399_v59 = vld [vmem:[%s10934_s16] ss:$0 sm:$0xff] }
 0x90d   : > { %6953 = vmatpush.msk.msrb.mxu0 %vm3082_vm14, %v11024_v41  ;;  %vm2998_vm13 = vcmp.lt.s32.totalorder %v2997_v24, 0  ;;  %vm3091_vm14 = vcmp.eq.s32.totalorder %v11027_v1, %v9296_v47 }
 0x90e   : > { %v2999_v14 = vsel %vm2998_vm13, 0, %v2997_v24  ;;  %vm3102_vm13 = vcmp.eq.s32.totalorder %v11028_v7, %v9298_v43  ;;  %v3071_v24 = vrot.slane %v9246_v4, 7 }
 0x90f   : > { %6954 = vmatpush.msk.msrb.mxu0 %vm3081_vm15, %v11024_v41  ;;  %vm3103_vm15 = vcmp.eq.s32.totalorder %v11027_v1, %v9298_v43 }
 0x911   : > { %6955 = vmatpush.msk.msrb.mxu0 %vm3080_vm4, %v11024_v41  ;;  %vm3109_vm4 = vcmp.eq.s32.totalorder %v11027_v1, %v9313_v63 }
 0x988   : > { %v2930_v37 = vpop.f32.mrf.mxu2  ;;  %v2962_v27 = vpop.f32.mrf.mxu3 }
 0x989   : > { %v9289_v42 = vadd.f32 %v7565_v39, %v2930_v37  ;;  %v9339_v31 = vadd.f32 %v7566_v61, %v2962_v27 }
 0x98b   : > { %v3343_v23 = vperm.slane %v9289_v42, 0  ;;  %v3336_v26 = vrot.slane %v9289_v42, 1  ;;  %v3338_v12 = vrot.slane %v9289_v42, 3  ;;  %v3339_v11 = vrot.slane %v9289_v42, 4 }
 0x98c   : > { %v3337_v22 = vrot.slane %v9289_v42, 2  ;;  %v3340_v53 = vrot.slane %v9289_v42, 5  ;;  %v3342_v16 = vrot.slane %v9289_v42, 7  ;;  %v3559_v39 = vperm.slane %v9339_v31, 0 }
 0x98d   : > { %v3359_v9 = vsel %vm1505_vm2, %v9303_v10, %v3343_v23  ;;  %v3344_v15 = vperm.slane %v3336_v26, 0  ;;  %v3346_v6 = vperm.slane %v3338_v12, 0  ;;  %v3347_v21 = vperm.slane %v3339_v11, 0 }
 0x98e   : > { %6928 = vmatmul.msk.f32.vlgmr.msrb.gmra.mxu2 %vm1541_vm1, %v3359_v9  ;;  %v3345_v36 = vperm.slane %v3337_v22, 0  ;;  %v3348_v38 = vperm.slane %v3340_v53, 0  ;;  %v3350_v40 = vperm.slane %v3342_v16, 0  ;;  %v3575_v30 = vsel %vm1505_vm2, %v9399_v59, %v3559_v39 }
 0x98f   : > { %6944 = vmatpush.msk.msrb.mxu2 %vm3030_vm10, %v11024_v41  ;;  %v3360_v0 = vsel %vm1505_vm2, %v9303_v10, %v3344_v15  ;;  %v3362_v49 = vsel %vm1505_vm2, %v9303_v10, %v3346_v6  ;;  %v3363_v57 = vsel %vm1505_vm2, %v9303_v10, %v3347_v21  ;;  %vm3108_vm10 = vcmp.eq.s32.totalorder %v11028_v7, %v9313_v63 }
 0x990   : > { %6931 = vmatmul.msk.f32.vlgmr.msra.gmra.mxu1 %vm1541_vm1, %v3360_v0  ;;  %6937 = vmatmul.msk.f32.vlgmr.msra.gmra.mxu3 %vm1541_vm1, %v3362_v49  ;;  %v3361_v54 = vsel %vm1505_vm2, %v9303_v10, %v3345_v36  ;;  %v3364_v13 = vsel %vm1505_vm2, %v9303_v10, %v3348_v38  ;;  %v3366_v45 = vsel %vm1505_vm2, %v9303_v10, %v3350_v40  ;;  %v9406_v23 = vperm.slane %v3069_v48, 0 }
 0x991   : > { %6940 = vmatmul.msk.f32.vlgmr.msra.gmra.mxu0 %vm1541_vm1, %v3363_v57  ;;  %6945 = vmatpush.msk.msrb.mxu2 %vm3029_vm11, %v11024_v41  ;;  %vm3000_vm11 = vcmp.gt.s32.totalorder %v2999_v14, 31  ;;  %v3341_v26 = vrot.slane %v9289_v42, 6  ;;  %v9415_v12 = vperm.slane %v3071_v24, 0  ;;  %v3552_v42 = vrot.slane %v9339_v31, 1  ;;  %v2994_v57 = vpop.f32.mrf.mxu0 }
 0x992   : > { %6957 = vmatpush.msk.msra.mxu1 %vm3091_vm14, %v11024_v41  ;;  %6971 = vmatpush.msk.msra.mxu3 %vm3103_vm15, %v11024_v41  ;;  %vm3089_vm14 = vcmp.eq.s32.totalorder %v11029_v51, %v9296_v47  ;;  %vm3101_vm15 = vcmp.eq.s32.totalorder %v11029_v51, %v9298_v43  ;;  %v9384_v37 = vsel %vm3000_vm11, 31, %v2999_v14  ;;  %vm3087_vm11 = vcmp.eq.s32.totalorder %v8175_v5, %v9296_v47 }
 0x993   : > { %6978 = vmatpush.msk.msra.mxu0 %vm3109_vm4, %v11024_v41  ;;  %vm3107_vm4 = vcmp.eq.s32.totalorder %v11029_v51, %v9313_v63  ;;  %v9418_v11 = vperm.slane %v9384_v37, 0  ;;  %v3554_v9 = vrot.slane %v9339_v31, 3  ;;  %v3555_v15 = vrot.slane %v9339_v31, 4 }
 0x994   : > { %6958 = vmatpush.msk.msra.mxu1 %vm3090_vm6, %v11024_v41  ;;  %6972 = vmatpush.msk.msra.mxu3 %vm3102_vm13, %v11024_v41  ;;  %vm3088_vm6 = vcmp.eq.s32.totalorder %v11030_v58, %v9296_v47  ;;  %vm3097_vm13 = vcmp.eq.s32.totalorder %v11027_v1, %v9350_v17  ;;  %v3560_v6 = vperm.slane %v3552_v42, 0  ;;  %v3227_v61 = vrot.slane %v9384_v37, 4 }
 0x995   : > { %6979 = vmatpush.msk.msra.mxu0 %vm3108_vm10, %v11024_v41  ;;  %vm3100_vm10 = vcmp.eq.s32.totalorder %v11030_v58, %v9298_v43  ;;  %v3562_v21 = vperm.slane %v3554_v9, 0  ;;  %v3563_v22 = vperm.slane %v3555_v15, 0  ;;  %v3553_v49 = vrot.slane %v9339_v31, 2 }
 0x996   : > { %6959 = vmatpush.msk.msra.mxu1 %vm3089_vm14, %v11024_v41  ;;  %6973 = vmatpush.msk.msra.mxu3 %vm3101_vm15, %v11024_v41  ;;  %vm3106_vm14 = vcmp.eq.s32.totalorder %v11030_v58, %v9313_v63  ;;  %vm3096_vm15 = vcmp.eq.s32.totalorder %v11028_v7, %v9350_v17  ;;  %v3576_v0 = vsel %vm1505_vm2, %v9399_v59, %v3560_v6  ;;  %v9494_v14 = vperm.slane %v3227_v61, 0 }
 0x997   : > { %6980 = vmatpush.msk.msra.mxu0 %vm3107_vm4, %v11024_v41  ;;  %6934 = vmatmul.msk.f32.vlgmr.msra.gmra.mxu2 %vm1541_vm1, %v3361_v54  ;;  %vm3099_vm4 = vcmp.eq.s32.totalorder %v8175_v5, %v9298_v43  ;;  %v3578_v2 = vsel %vm1505_vm2, %v9399_v59, %v3562_v21  ;;  %v3224_v53 = vrot.slane %v9384_v37, 1  ;;  %v3226_v16 = vrot.slane %v9384_v37, 3 }
 0x998   : > { %6960 = vmatpush.msk.msra.mxu1 %vm3088_vm6, %v11024_v41  ;;  %6964 = vmatpush.msk.msra.mxu2 %vm3097_vm13, %v11024_v41  ;;  %vm3105_vm6 = vcmp.eq.s32.totalorder %v8175_v5, %v9313_v63  ;;  %vm3086_vm13 = vcmp.eq.s32.totalorder %v8163_v62, %v9296_v47  ;;  %v3349_v47 = vperm.slane %v3341_v26, 0  ;;  %v3579_v36 = vsel %vm1505_vm2, %v9399_v59, %v3563_v22  ;;  %v7464_v26 = vld [vmem:[%s10922_s4 + $0x34] sm:$0xf0] }
 0x999   : > { %6974 = vmatpush.msk.msra.mxu3 %vm3100_vm10, %v11024_v41  ;;  %6981 = vmatpush.msk.msra.mxu0 %vm3106_vm14, %v11024_v41  ;;  %vm3095_vm10 = vcmp.eq.s32.totalorder %v11029_v51, %v9350_v17  ;;  %vm3098_vm14 = vcmp.eq.s32.totalorder %v8163_v62, %v9298_v43  ;;  %v3070_v43 = vrot.slane %v9246_v4, 6  ;;  %v3558_v38 = vrot.slane %v9339_v31, 7 }
 0x99a   : > { %6943 = vmatmul.msk.f32.vlgmr.msrb.gmra.mxu1 %vm1541_vm1, %v3364_v13  ;;  %6949 = vmatmul.msk.f32.vlgmr.msrb.gmra.mxu3 %vm1541_vm1, %v3366_v45  ;;  %v3561_v54 = vperm.slane %v3553_v49, 0  ;;  %v9527_v39 = vperm.slane %v3224_v53, 0  ;;  %v9529_v48 = vperm.slane %v3226_v16, 0  ;;  %v3230_v15 = vrot.slane %v9384_v37, 7 }
 0x99b   : > { %6956 = vmatmul.msk.f32.vlgmr.msrb.gmra.mxu0 %vm10975_vm12, %v3575_v30  ;;  %6961 = vmatpush.msk.msra.mxu1 %vm3087_vm11, %v11024_v41  ;;  %vm3104_vm11 = vcmp.eq.s32.totalorder %v8163_v62, %v9313_v63  ;;  %v3365_v63 = vsel %vm1505_vm2, %v9303_v10, %v3349_v47  ;;  %v9474_v27 = vperm.slane %v3070_v43, 0  ;;  %v7564_v10 = vld [vmem:[%s10932_s14] ss:$0 sm:$0xff]  ;;  %v3566_v13 = vperm.slane %v3558_v38, 0 }
 0x99c   : > { %6965 = vmatpush.msk.msra.mxu2 %vm3096_vm15, %v11024_v41  ;;  %6975 = vmatpush.msk.msra.mxu3 %vm3099_vm4, %v11024_v41  ;;  %vm3115_vm15 = vcmp.eq.s32.totalorder %v11027_v1, %v9406_v23  ;;  %vm3127_vm4 = vcmp.eq.s32.totalorder %v11027_v1, %v9415_v12  ;;  %v9513_v40 = vadd.f32 %v7564_v10, %v2994_v57  ;;  %v9585_v43 = vld [vmem:[%s10935_s17] ss:$0 sm:$0xff]  ;;  %v3557_v21 = vrot.slane %v9339_v31, 6 }
 0x99d   : > { %6982 = vmatpush.msk.msra.mxu0 %vm3105_vm6, %v11024_v41  ;;  %6962 = vmatpush.msk.msra.mxu1 %vm3086_vm13, %v11024_v41  ;;  %vm3242_vm6 = vcmp.eq.s32.totalorder %v11029_v51, %v9418_v11  ;;  %vm3094_vm13 = vcmp.eq.s32.totalorder %v11030_v58, %v9350_v17  ;;  %v3577_v45 = vsel %vm1505_vm2, %v9399_v59, %v3561_v54  ;;  %v9620_v49 = vperm.slane %v3230_v15, 0  ;;  %v7077_v15 = vld [vmem:[%s10922_s4 + $0x28] sm:$0xf0] }
 0x99e   : > { %6966 = vmatpush.msk.msra.mxu2 %vm3095_vm10, %v11024_v41  ;;  %6976 = vmatpush.msk.msra.mxu3 %vm3098_vm14, %v11024_v41  ;;  %vm3114_vm10 = vcmp.eq.s32.totalorder %v11028_v7, %v9406_v23  ;;  %vm3126_vm14 = vcmp.eq.s32.totalorder %v11028_v7, %v9415_v12  ;;  %v3775_v30 = vperm.slane %v9513_v40, 0  ;;  %v3582_v9 = vsel %vm1505_vm2, %v9399_v59, %v3566_v13 }
 0x99f   : > { %6983 = vmatpush.msk.msra.mxu0 %vm3104_vm11, %v11024_v41  ;;  %6985 = vmatpush.msk.msrb.mxu1 %vm3115_vm15, %v11024_v41  ;;  %vm3241_vm11 = vcmp.eq.s32.totalorder %v11030_v58, %v9418_v11  ;;  %vm3113_vm15 = vcmp.eq.s32.totalorder %v11029_v51, %v9406_v23  ;;  %v3768_v10 = vrot.slane %v9513_v40, 1  ;;  %v3771_v57 = vrot.slane %v9513_v40, 4 }
 0x9a0   : > { %6999 = vmatpush.msk.msrb.mxu3 %vm3127_vm4, %v11024_v41  ;;  %6967 = vmatpush.msk.msra.mxu2 %vm3094_vm13, %v11024_v41  ;;  %vm3093_vm4 = vcmp.eq.s32.totalorder %v8175_v5, %v9350_v17  ;;  %vm3240_vm13 = vcmp.eq.s32.totalorder %v8175_v5, %v9418_v11  ;;  %v3791_v6 = vsel %vm1505_vm2, %v9585_v43, %v3775_v30  ;;  %v3229_v53 = vrot.slane %v9384_v37, 6 }
 0x9a1   : > { %7006 = vmatpush.msk.msrb.mxu0 %vm3242_vm6, %v11024_v41  ;;  %6986 = vmatpush.msk.msrb.mxu1 %vm3114_vm10, %v11024_v41  ;;  %vm3125_vm6 = vcmp.eq.s32.totalorder %v11029_v51, %v9415_v12  ;;  %vm3092_vm10 = vcmp.eq.s32.totalorder %v8163_v62, %v9350_v17  ;;  %v3556_v17 = vrot.slane %v9339_v31, 5  ;;  %v7462_v31 = vld [vmem:[%s10922_s4 + $0x24] sm:$0xf0]  ;;  %v3772_v30 = vrot.slane %v9513_v40, 5 }
 0x9a2   : > { %7000 = vmatpush.msk.msrb.mxu3 %vm3126_vm14, %v11024_v41  ;;  %6946 = vmatmul.msk.f32.vlgmr.msrb.gmra.mxu2 %vm1541_vm1, %v3365_v63  ;;  %vm3112_vm14 = vcmp.eq.s32.totalorder %v11030_v58, %v9406_v23  ;;  %v7075_v63 = vld [vmem:[%s10922_s4 + $0x20] sm:$0xf]  ;;  %v3237_v54 = vperm.slane %v3229_v53, 0  ;;  %v7061_v53 = vld [vmem:[%s10922_s4 + $0x8] sm:$0xf0] }
 0x9a3   : > { %7007 = vmatpush.msk.msrb.mxu0 %vm3241_vm11, %v11024_v41  ;;  %6987 = vmatpush.msk.msrb.mxu1 %vm3113_vm15, %v11024_v41  ;;  %vm3121_vm11 = vcmp.eq.s32.totalorder %v11027_v1, %v9474_v27  ;;  %vm3124_vm15 = vcmp.eq.s32.totalorder %v11030_v58, %v9415_v12  ;;  %v3564_v24 = vperm.slane %v3556_v17, 0  ;;  %v7460_v17 = vld [vmem:[%s10922_s4 + $0x14] sm:$0xf0] }
 0x9a4   : > { %6968 = vmatpush.msk.msra.mxu2 %vm3093_vm4, %v11024_v41  ;;  %7001 = vmatpush.msk.msrb.mxu3 %vm3125_vm6, %v11024_v41  ;;  %vm3239_vm4 = vcmp.eq.s32.totalorder %v8163_v62, %v9418_v11  ;;  %vm3111_vm6 = vcmp.eq.s32.totalorder %v8175_v5, %v9406_v23  ;;  %v3228_v11 = vrot.slane %v9384_v37, 5 }
 0x9a5   : > { %7008 = vmatpush.msk.msrb.mxu0 %vm3240_vm13, %v11024_v41  ;;  %6963 = vmatmul.msk.f32.vlgmr.msra.gmra.mxu1 %vm10975_vm12, %v3576_v0  ;;  %vm3258_vm13 = vcmp.eq.s32.totalorder %v11029_v51, %v9494_v14  ;;  %v3580_v42 = vsel %vm1505_vm2, %v9399_v59, %v3564_v24  ;;  %v3770_v0 = vrot.slane %v9513_v40, 3 }
 0x9a6   : > { %6969 = vmatpush.msk.msra.mxu2 %vm3092_vm10, %v11024_v41  ;;  %6977 = vmatmul.msk.f32.vlgmr.msra.gmra.mxu3 %vm10975_vm12, %v3578_v2  ;;  %vm3120_vm10 = vcmp.eq.s32.totalorder %v11028_v7, %v9474_v27  ;;  %v9611_v22 = vperm.slane %v3228_v11, 0  ;;  %v7076_v2 = vor.u32 %v7462_v31, %v7075_v63  ;;  %v3774_v11 = vrot.slane %v9513_v40, 7 }
 0x9a7   : > { %6984 = vmatmul.msk.f32.vlgmr.msra.gmra.mxu0 %vm10975_vm12, %v3579_v36  ;;  %6988 = vmatpush.msk.msrb.mxu1 %vm3112_vm14, %v11024_v41  ;;  %vm3123_vm14 = vcmp.eq.s32.totalorder %v8175_v5, %v9415_v12  ;;  %v3778_v16 = vperm.slane %v3770_v0, 0  ;;  %v7067_v36 = vld [vmem:[%s10922_s4 + $0x10] sm:$0xf]  ;;  %v3773_v0 = vrot.slane %v9513_v40, 6 }
 0x9a8   : > { %6992 = vmatpush.msk.msrb.mxu2 %vm3121_vm11, %v11024_v41  ;;  %7002 = vmatpush.msk.msrb.mxu3 %vm3124_vm15, %v11024_v41  ;;  %vm3110_vm11 = vcmp.eq.s32.totalorder %v8163_v62, %v9406_v23  ;;  %vm3257_vm15 = vcmp.eq.s32.totalorder %v11030_v58, %v9494_v14  ;;  %v7083_v23 = vld [vmem:[%s10922_s4 + $0x30] sm:$0xf] }
 0x9a9   : > { %7009 = vmatpush.msk.msrb.mxu0 %vm3239_vm4, %v11024_v41  ;;  %6989 = vmatpush.msk.msrb.mxu1 %vm3111_vm6, %v11024_v41  ;;  %vm3119_vm4 = vcmp.eq.s32.totalorder %v11029_v51, %v9474_v27  ;;  %vm3122_vm6 = vcmp.eq.s32.totalorder %v8163_v62, %v9415_v12  ;;  %v3225_v12 = vrot.slane %v9384_v37, 2  ;;  %v7084_v47 = vor.u32 %v7464_v26, %v7083_v23  ;;  %v7059_v26 = vld [vmem:[%s10922_s4] sm:$0xf] }
 0x9aa   : > { %6993 = vmatpush.msk.msrb.mxu2 %vm3120_vm10, %v11024_v41  ;;  %7003 = vmatpush.msk.msrb.mxu3 %vm3123_vm14, %v11024_v41  ;;  %vm3254_vm10 = vcmp.eq.s32.totalorder %v11029_v51, %v9529_v48  ;;  %vm3256_vm14 = vcmp.eq.s32.totalorder %v8175_v5, %v9494_v14  ;;  %v3779_v37 = vperm.slane %v3771_v57, 0  ;;  %v3794_v13 = vsel %vm1505_vm2, %v9585_v43, %v3778_v16 }
 0x9ab   : > { %7026 = vmatpush.msk.msra.mxu0 %vm3258_vm13, %v11024_v41  ;;  %6990 = vmatpush.msk.msrb.mxu1 %vm3110_vm11, %v11024_v41  ;;  %vm3246_vm13 = vcmp.eq.s32.totalorder %v11029_v51, %v9527_v39  ;;  %vm3118_vm11 = vcmp.eq.s32.totalorder %v11030_v58, %v9474_v27  ;;  %v9599_v61 = vperm.slane %v3225_v12, 0  ;;  %v7458_v12 = vld [vmem:[%s10922_s4 + $0x4] sm:$0xf0] }
 0x9ac   : > { %6994 = vmatpush.msk.msrb.mxu2 %vm3119_vm4, %v11024_v41  ;;  %7004 = vmatpush.msk.msrb.mxu3 %vm3122_vm6, %v11024_v41  ;;  %vm11033_vm4 = vcmask 261120   ;;  %vm3253_vm6 = vcmp.eq.s32.totalorder %v11030_v58, %v9529_v48  ;;  %v3795_v23 = vsel %vm1505_vm2, %v9585_v43, %v3779_v37 }
 0x9ad   : > { %7027 = vmatpush.msk.msra.mxu0 %vm3257_vm15, %v11024_v41  ;;  %6970 = vmatmul.msk.f32.vlgmr.msra.gmra.mxu2 %vm10975_vm12, %v3577_v45  ;;  %vm3245_vm15 = vcmp.eq.s32.totalorder %v11030_v58, %v9527_v39  ;;  %v7068_v45 = vor.u32 %v7460_v17, %v7067_v36 }
 0x9ae   : > { %7011 = vmatpush.msk.msra.mxu1 %vm3246_vm13, %v11024_v41  ;;  %7021 = vmatpush.msk.msra.mxu3 %vm3254_vm10, %v11024_v41  ;;  %vm3255_vm13 = vcmp.eq.s32.totalorder %v8163_v62, %v9494_v14  ;;  %vm3117_vm10 = vcmp.eq.s32.totalorder %v8175_v5, %v9474_v27  ;;  %v3565_v14 = vperm.slane %v3557_v21, 0  ;;  %v3780_v21 = vperm.slane %v3772_v30, 0 }
 0x9af   : > { %7028 = vmatpush.msk.msra.mxu0 %vm3256_vm14, %v11024_v41  ;;  %6995 = vmatpush.msk.msrb.mxu2 %vm3118_vm11, %v11024_v41  ;;  %vm3244_vm14 = vcmp.eq.s32.totalorder %v8175_v5, %v9527_v39  ;;  %vm3252_vm11 = vcmp.eq.s32.totalorder %v8175_v5, %v9529_v48 }
 0x9b0   : > { %6991 = vmatmul.msk.f32.vlgmr.msrb.gmra.mxu1 %vm10975_vm12, %v3580_v42  ;;  %7005 = vmatmul.msk.f32.vlgmr.msrb.gmra.mxu3 %vm10975_vm12, %v3582_v9  ;;  %v3581_v38 = vsel %vm1505_vm2, %v9399_v59, %v3565_v14  ;;  %v7085_v59 = vld [vmem:[%s10922_s4 + $0x38] sm:$0xf0]  ;;  %v7457_v14 = vld [vmem:[%s10922_s4 + $0x4] sm:$0xf] }
 0x9b1   : > { %7010 = vmatmul.msk.f32.vlgmr.msrb.gmra.mxu0 %vm11033_vm4, %v3791_v6  ;;  %7012 = vmatpush.msk.msra.mxu1 %vm3245_vm15, %v11024_v41  ;;  %vm3116_vm15 = vcmp.eq.s32.totalorder %v8163_v62, %v9474_v27  ;;  %vm3243_vm4 = vcmp.eq.s32.totalorder %v8163_v62, %v9527_v39  ;;  %v3776_v27 = vperm.slane %v3768_v10, 0  ;;  %v7463_v39 = vld [vmem:[%s10922_s4 + $0x34] sm:$0xf]  ;;  %v7060_v6 = vor.u32 %v7458_v12, %v7059_v26  ;;  %v7069_v10 = vld [vmem:[%s10922_s4 + $0x18] sm:$0xf0] }
 0x9b2   : > { %7022 = vmatpush.msk.msra.mxu3 %vm3253_vm6, %v11024_v41  ;;  %7029 = vmatpush.msk.msra.mxu0 %vm3255_vm13, %v11024_v41  ;;  %vm3250_vm6 = vcmp.eq.s32.totalorder %v11029_v51, %v9599_v61  ;;  %vm3251_vm13 = vcmp.eq.s32.totalorder %v8163_v62, %v9529_v48  ;;  %v3769_v48 = vrot.slane %v9513_v40, 2  ;;  %v7088_v42 = vor.u32 %v7463_v39, %v7085_v59 }
 0x9b3   : > { %6996 = vmatpush.msk.msrb.mxu2 %vm3117_vm10, %v11024_v41  ;;  %7013 = vmatpush.msk.msra.mxu1 %vm3244_vm14, %v11024_v41  ;;  %vm3262_vm10 = vcmp.eq.s32.totalorder %v11029_v51, %v9611_v22  ;;  %vm3270_vm14 = vcmp.eq.s32.totalorder %v11029_v51, %v9620_v49  ;;  %v3792_v24 = vsel %vm1505_vm2, %v9585_v43, %v3776_v27 }
 0x9b4   : > { %4486 = vmatpush.bf16.msrb.mxu0 %v7084_v47  ;;  %7023 = vmatpush.msk.msra.mxu3 %vm3252_vm11, %v11024_v41  ;;  %vm3261_vm11 = vcmp.eq.s32.totalorder %v11030_v58, %v9611_v22  ;;  %v3777_v9 = vperm.slane %v3769_v48, 0  ;;  %v7461_v47 = vld [vmem:[%s10922_s4 + $0x24] sm:$0xf]  ;;  %v7064_v27 = vor.u32 %v7457_v14, %v7061_v53 }
 0x9b5   : > { %6997 = vmatpush.msk.msrb.mxu2 %vm3116_vm15, %v11024_v41  ;;  %7014 = vmatpush.msk.msra.mxu1 %vm3243_vm4, %v11024_v41  ;;  %vm3249_vm15 = vcmp.eq.s32.totalorder %v11030_v58, %v9599_v61  ;;  %vm3269_vm4 = vcmp.eq.s32.totalorder %v11030_v58, %v9620_v49  ;;  %v7080_v63 = vor.u32 %v7461_v47, %v7077_v15 }
 0x9b6   : > { %7024 = vmatpush.msk.msra.mxu3 %vm3251_vm13, %v11024_v41  ;;  %6998 = vmatmul.msk.f32.vlgmr.msrb.gmra.mxu2 %vm10975_vm12, %v3581_v38  ;;  %vm3248_vm13 = vcmp.eq.s32.totalorder %v8175_v5, %v9599_v61  ;;  %v3793_v31 = vsel %vm1505_vm2, %v9585_v43, %v3777_v9 }
 0x9b7   : > { %7016 = vmatpush.msk.msra.mxu2 %vm3250_vm6, %v11024_v41  ;;  %7031 = vmatpush.msk.msrb.mxu1 %vm3262_vm10, %v11024_v41  ;;  %vm11034_vm6 = vcmask 261120  }
 0x9b8   : > { %7041 = vmatpush.msk.msrb.mxu3 %vm3270_vm14, %v11024_v41  ;;  %4487 = vmatpush.bf16.msrb.mxu0 %v7076_v2  ;;  %vm11035_vm10 = vmmov %vm11034_vm6  ;;  %v3781_v2 = vperm.slane %v3773_v0, 0 }
 0x9b9   : > { %7032 = vmatpush.msk.msrb.mxu1 %vm3261_vm11, %v11024_v41  ;;  %7017 = vmatpush.msk.msra.mxu2 %vm3249_vm15, %v11024_v41  ;;  %vm11036_vm14 = vmmov %vm11034_vm6  ;;  %vm3260_vm11 = vcmp.eq.s32.totalorder %v8175_v5, %v9611_v22  ;;  %vm3268_vm15 = vcmp.eq.s32.totalorder %v8175_v5, %v9620_v49 }
 0x9ba   : > { %7042 = vmatpush.msk.msrb.mxu3 %vm3269_vm4, %v11024_v41  ;;  %7015 = vmatmul.msk.f32.vlgmr.msra.gmra.mxu1 %vm11034_vm6, %v3792_v24  ;;  %vm3247_vm4 = vcmp.eq.s32.totalorder %v8163_v62, %v9599_v61  ;;  %vm3259_vm6 = vcmp.eq.s32.totalorder %v8163_v62, %v9611_v22  ;;  %v3782_v61 = vperm.slane %v3774_v11, 0  ;;  %v7459_v22 = vld [vmem:[%s10922_s4 + $0x14] sm:$0xf]  ;;  %v3797_v16 = vsel %vm1505_vm2, %v9585_v43, %v3781_v2 }
 0x9bb   : > { %7025 = vmatmul.msk.f32.vlgmr.msra.gmra.mxu3 %vm11035_vm10, %v3794_v13  ;;  %7018 = vmatpush.msk.msra.mxu2 %vm3248_vm13, %v11024_v41  ;;  %vm3266_vm13 = vcmp.eq.s32.totalorder %v11029_v51, %v3237_v54  ;;  %vm3267_vm10 = vcmp.eq.s32.totalorder %v8163_v62, %v9620_v49  ;;  %v3796_v49 = vsel %vm1505_vm2, %v9585_v43, %v3780_v21 }
 0x9bc   : > { %7030 = vmatmul.msk.f32.vlgmr.msra.gmra.mxu0 %vm11036_vm14, %v3795_v23  ;;  %7033 = vmatpush.msk.msrb.mxu1 %vm3260_vm11, %v11024_v41  ;;  %vm3265_vm14 = vcmp.eq.s32.totalorder %v11030_v58, %v3237_v54  ;;  %vm11037_vm11 = vcmask 261120   ;;  %v3798_v57 = vsel %vm1505_vm2, %v9585_v43, %v3782_v61  ;;  %v7072_v40 = vor.u32 %v7459_v22, %v7069_v10 }
 0x9bd   : > { %7043 = vmatpush.msk.msrb.mxu3 %vm3268_vm15, %v11024_v41  ;;  %4488 = vmatpush.bf16.msrb.mxu0 %v7068_v45  ;;  %vm3264_vm15 = vcmp.eq.s32.totalorder %v8175_v5, %v3237_v54  ;;  %v9775_v45 = vpop.permute.xlu1 %4009 }
 0x9be   : > { %7019 = vmatpush.msk.msra.mxu2 %vm3247_vm4, %v11024_v41  ;;  %7034 = vmatpush.msk.msrb.mxu1 %vm3259_vm6, %v11024_v41  ;;  %vm11038_vm4 = vmmov %vm11037_vm11 }
 0x9bf   : > { %7044 = vmatpush.msk.msrb.mxu3 %vm3267_vm10, %v11024_v41  ;;  %7020 = vmatmul.msk.f32.vlgmr.msra.gmra.mxu2 %vm11037_vm11, %v3793_v31  ;;  %vm11039_vm6 = vmmov %vm11038_vm4 }
 0x9c0   : > { %7036 = vmatpush.msk.msrb.mxu2 %vm3266_vm13, %v11024_v41  ;;  %4499 = vmatpush.bf16.msra.mxu1 %v7088_v42  ;;  %vm3263_vm13 = vcmp.eq.s32.totalorder %v8163_v62, %v3237_v54  ;;  %vm11040_vm10 = vmmov %vm11038_vm4  ;;  %v4011_v42 = vrot.slane %v9775_v45, 7 }
 0x9c1   : > { %4489 = vmatpush.bf16.msrb.mxu0 %v7060_v6 }
 0x9c2   : > { %7037 = vmatpush.msk.msrb.mxu2 %vm3265_vm14, %v11024_v41  ;;  %7035 = vmatmul.msk.f32.vlgmr.msrb.gmra.mxu1 %vm11038_vm4, %v3796_v49  ;;  %v4014_v49 = vrot.slane %v9775_v45, 3 }
 0x9c3   : > { %7045 = vmatmul.msk.f32.vlgmr.msrb.gmra.mxu3 %vm11039_vm6, %v3798_v57 }
 0x9c4   : > { %7038 = vmatpush.msk.msrb.mxu2 %vm3264_vm15, %v11024_v41  ;;  %4500 = vmatpush.bf16.msra.mxu1 %v7080_v63 }
 0x9c5   : > { %7089 = vmatmul.msk.bf16.vlgmr.msrb.gmra.mxu0 %vm690_vm9, %v9230_v55 }
 0x9c6   : > { %7039 = vmatpush.msk.msrb.mxu2 %vm3263_vm13, %v11024_v41 }
 0x9c7   : > { %7040 = vmatmul.msk.f32.vlgmr.msrb.gmra.mxu2 %vm11040_vm10, %v3797_v16 }
 0x9c8   : > { %4501 = vmatpush.bf16.msra.mxu1 %v7072_v40 }
 0x9cc   : > { %4502 = vmatpush.bf16.msra.mxu1 %v7064_v27 }
 0x9cf   : > { %7090 = vmatmul.msk.bf16.vlgmr.msra.gmra.mxu1 %vm690_vm9, %v9230_v55 }
 0xa0d   : > { %v9755_v37 = vpop.f32.mrf.mxu1 }
 0xa0e   : > { %v9757_v36 = vpop.f32.mrf.mxu0 }
 0xa11   : > { %v9759_v17 = vpop.f32.mrf.mxu2 }
 0xa13   : > { %v9761_v38 = vpop.f32.mrf.mxu3 }
 0xa17   : > { %v9763_v54 = vpop.f32.mrf.mxu1 }
 0xa18   : > { %v3603_v39 = vpop.f32.mrf.mxu0 }
 0xa19   : > { %v3991_v30 = vadd.f32 %v3603_v39, %v9759_v17 }
 0xa1a   : > { %v9765_v59 = vpop.f32.mrf.mxu2 }
 0xa1d   : > { %v9767_v43 = vpop.f32.mrf.mxu3 }
 0xa22   : > { %v9769_v48 = vpop.f32.mrf.mxu1 }
 0xa23   : > { %v3992_v21 = vadd.f32 %v9769_v48, %v9755_v37 }
 0xa24   : > { %v3695_v24 = vpop.f32.mrf.mxu0 }
 0xa25   : > { %v9771_v13 = vpop.f32.mrf.mxu2  ;;  %v3995_v61 = vadd.f32 %v3695_v24, %v9757_v36 }
 0xa29   : > { %v9773_v55 = vpop.f32.mrf.mxu3 }
 0xa2a   : > { %v3994_v27 = vadd.f32 %v9773_v55, %v9761_v38 }
 0xa2d   : > { %v9778_v23 = vpop.f32.mrf.mxu1 }
 0xa2e   : > { %v3819_v26 = vpop.f32.mrf.mxu0 }
 0xa2f   : > { %v9780_v12 = vadd.f32 %v3819_v26, %v3603_v39  ;;  %v3999_v11 = vadd.f32 %v3991_v30, %v3819_v26  ;;  %v4013_v26 = vrot.slane %v9775_v45, 2 }
 0xa30   : > { %v9783_v47 = vpop.f32.mrf.mxu2 }
 0xa31   : > { %v4026_v9 = vadd.f32 %v4011_v42, %v3999_v11  ;;  %v3996_v11 = vadd.f32 %v9778_v23, %v9763_v54 }
 0xa33   : > { %v7046_v15 = vmul.f32 -1.442695, %v4026_v9  ;;  %v9785_v6 = vpop.f32.mrf.mxu3 }
 0xa35   : > { %7626 = vpow2.f32 %v7046_v15 }
 0xa37   : > { %v3842_v63 = vpop.f32.mrf.mxu1 }
 0xa38   : > { %v4000_v31 = vadd.f32 %v3992_v21, %v3842_v63  ;;  %v4015_v21 = vrot.slane %v9775_v45, 4  ;;  %v9828_v35 = vadd.f32 %v3842_v63, %v9769_v48  ;;  %v4202_v63 = vrot.slane %v9759_v17, 7 }
 0xa39   : > { %v3911_v22 = vpop.f32.mrf.mxu0  ;;  %v9794_v53 = vpop.f32.mrf.mxu2 }
 0xa3a   : > { %v9790_v10 = vadd.f32 %v3911_v22, %v3695_v24  ;;  %v4003_v0 = vadd.f32 %v3995_v61, %v3911_v22  ;;  %v4027_v40 = vadd.f32 %v9775_v45, %v4000_v31  ;;  %v4235_v33 = vrot.slane %v9828_v35, 7 }
 0xa3b   : > { %v7627_v57 = vpop.eup %7626  ;;  %v3997_v35 = vadd.f32 %v9794_v53, %v9771_v13 }
 0xa3c   : > { %v4058_v2 = vadd.f32 1.0, %v7627_v57  ;;  %v4030_v14 = vadd.f32 %v4014_v49, %v4003_v0  ;;  %v7047_v16 = vmul.f32 -1.442695, %v4027_v40  ;;  %v3993_v0 = vadd.f32 %v9783_v47, %v9765_v59 }
 0xa3e   : > { %7628 = vrcp.f32 %v4058_v2  ;;  %v9798_v39 = vpop.f32.mrf.mxu3  ;;  %v7050_v24 = vmul.f32 -1.442695, %v4030_v14  ;;  %v4077_v28 = vand.u32 2147483648, %v4058_v2  ;;  %vm4071_vm11 = vweird.f32 %v4058_v2 }
 0xa3f   : > { %7630 = vpow2.f32 %v7047_v16  ;;  %v4002_v30 = vadd.f32 %v3994_v27, %v9798_v39  ;;  %v9804_v42 = vpop.f32.mrf.mxu1 }
 0xa40   : > { %7632 = vpow2.f32 %v7050_v24  ;;  %v4004_v15 = vadd.f32 %v3996_v11, %v9804_v42  ;;  %v4012_v11 = vrot.slane %v9775_v45, 1 }
 0xa41   : > { %v4029_v9 = vadd.f32 %v4013_v26, %v4002_v30 }
 0xa42   : > { %v9808_v61 = vpop.f32.mrf.mxu0  ;;  %v4031_v49 = vadd.f32 %v4015_v21, %v4004_v15  ;;  %v9812_v14 = vpop.f32.mrf.mxu2 }
 0xa43   : > { %v7049_v31 = vmul.f32 -1.442695, %v4029_v9  ;;  %v4001_v24 = vadd.f32 %v3993_v0, %v9812_v14  ;;  %v4075_v9 = vand.u32 2147483647, %v4058_v2  ;;  %v4017_v0 = vrot.slane %v9775_v45, 6 }
 0xa44   : > { %v7629_v22 = vpop.eup %7628  ;;  %v7051_v16 = vmul.f32 -1.442695, %v4031_v49 }
 0xa45   : > { %v7631_v57 = vpop.eup %7630  ;;  %v4067_v40 = vmul.f32 %v7629_v22, %v4058_v2  ;;  %7634 = vpow2.f32 %v7049_v31  ;;  %vm4072_vm14 = vweird.f32 %v7629_v22  ;;  %v4028_v31 = vadd.f32 %v4012_v11, %v4001_v24 }
 0xa46   : > { %v9814_v27 = vadd.f32 1.0, %v7631_v57  ;;  %v7633_v30 = vpop.eup %7632  ;;  %v3998_v57 = vadd.f32 %v9785_v6, %v9767_v43  ;;  %v9823_v49 = vpop.f32.mrf.mxu3  ;;  %vm4073_vm15 = vmor %vm4071_vm11, %vm4072_vm14  ;;  %v4078_v24 = vor.u32 1.1754944e-38, %v4077_v28  ;;  %vm4076_vm4 = vcmp.eq.f32.partialorder %v4075_v9, 8.507059e+37 }
 0xa47   : > { %v4068_v26 = vsub.f32 1.0, %v4067_v40  ;;  %v9819_v21 = vadd.f32 1.0, %v7633_v30 }
 0xa48   : > { %7636 = vrcp.f32 %v9814_v27  ;;  %v4006_v2 = vadd.f32 %v3998_v57, %v9823_v49  ;;  %vm4086_vm13 = vweird.f32 %v9814_v27 }
 0xa49   : > { %v4069_v15 = vmul.f32 %v7629_v22, %v4068_v26  ;;  %7638 = vpow2.f32 %v7051_v16  ;;  %v7048_v26 = vmul.f32 -1.442695, %v4028_v31  ;;  %v4234_v16 = vrot.slane %v9780_v12, 7 }
 0xa4a   : > { %v4493_v40 = vpop.f32.mrf.mxu0  ;;  %7640 = vrcp.f32 %v9819_v21  ;;  %v4135_v3 = vand.u32 2147483647, %v9819_v21  ;;  %vm4131_vm11 = vweird.f32 %v9819_v21 }
 0xa4b   : > { %v7635_v50 = vpop.eup %7634  ;;  %v4070_v46 = vadd.f32 %v7629_v22, %v4069_v15  ;;  %v4238_v40 = vrot.slane %v9790_v10, 7  ;;  %v9855_v10 = vadd.f32 %v9804_v42, %v9778_v23 }
 0xa4c   : > { %v9833_v30 = vadd.f32 1.0, %v7635_v50  ;;  %v9835_v11 = vpop.f32.mrf.mxu1 }
 0xa4d   : > { %v4074_v44 = vsel %vm4073_vm15, %v7629_v22, %v4070_v46  ;;  %v4090_v46 = vand.u32 2147483647, %v9814_v27  ;;  %v4092_v22 = vand.u32 2147483648, %v9814_v27 }
 0xa4e   : > { %v7637_v48 = vpop.eup %7636  ;;  %v4079_v15 = vsel %vm4076_vm4, %v4078_v24, %v4074_v44  ;;  %7642 = vrcp.f32 %v9833_v30  ;;  %v4033_v24 = vadd.f32 %v4017_v0, %v4006_v2  ;;  %vm9865_vm4 = vcmp.eq.f32.partialorder %v4135_v3, 8.507059e+37 }
 0xa4f   : > { %v7639_v28 = vpop.eup %7638  ;;  %v4186_v50 = vsub.f32 1.0, %v4079_v15  ;;  %v4082_v31 = vmul.f32 %v7637_v48, %v9814_v27  ;;  %7644 = vpow2.f32 %v7048_v26  ;;  %v4250_v12 = vmul.f32 %v4234_v16, %v4079_v15 }
 0xa50   : > { %v9847_v9 = vadd.f32 1.0, %v7639_v28  ;;  %v7641_v44 = vpop.eup %7640  ;;  %vm4087_vm6 = vweird.f32 %v7637_v48  ;;  %v4137_v16 = vand.u32 2147483648, %v9819_v21  ;;  %v7053_v2 = vmul.f32 -1.442695, %v4033_v24 }
 0xa51   : > { %v4218_v17 = vmul.f32 %v4202_v63, %v4186_v50  ;;  %v4083_v57 = vsub.f32 1.0, %v4082_v31  ;;  %v4127_v56 = vmul.f32 %v7641_v44, %v9819_v21  ;;  %vm4091_vm10 = vcmp.eq.f32.partialorder %v4090_v46, 8.507059e+37  ;;  %vm4088_vm14 = vmor %vm4086_vm13, %vm4087_vm6 }
 0xa52   : > { %7646 = vrcp.f32 %v9847_v9  ;;  %v4093_v50 = vor.u32 1.1754944e-38, %v4092_v22  ;;  %vm4132_vm15 = vweird.f32 %v7641_v44  ;;  %vm4116_vm12 = vweird.f32 %v9833_v30 }
 0xa53   : > { %v4258_v58 = vadd.f32 %v4250_v12, %v4218_v17  ;;  %v4084_v28 = vmul.f32 %v7637_v48, %v4083_v57  ;;  %v4128_v0 = vsub.f32 1.0, %v4127_v56  ;;  %7648 = vpow2.f32 %v7053_v2  ;;  %vm4133_vm6 = vmor %vm4131_vm11, %vm4132_vm15 }
 0xa54   : > { %v9858_v26 = vpop.eup %7642  ;;  %v4506_v63 = vpop.f32.mrf.mxu1  ;;  %v4138_v57 = vor.u32 1.1754944e-38, %v4137_v16  ;;  %v11043_v16 = vrot.slane %v9755_v37, 7  ;;  %v4152_v1 = vand.u32 2147483648, %v9847_v9 }
 0xa55   : > { %v4085_v15 = vadd.f32 %v7637_v48, %v4084_v28  ;;  %v4112_v23 = vmul.f32 %v9858_v26, %v9833_v30  ;;  %v7645_v42 = vpop.eup %7644  ;;  %v4129_v31 = vmul.f32 %v7641_v44, %v4128_v0  ;;  %v4120_v0 = vand.u32 2147483647, %v9833_v30 }
 0xa56   : > { %v9869_v12 = vadd.f32 1.0, %v7645_v42  ;;  %vm4117_vm13 = vweird.f32 %v9858_v26  ;;  %v9883_v42 = vpop.f32.mrf.mxu2  ;;  %v4274_v51 = vrot.slane %v4258_v58, 1 }
 0xa57   : > { %v4089_v17 = vsel %vm4088_vm14, %v7637_v48, %v4085_v15  ;;  %v4113_v27 = vsub.f32 1.0, %v4112_v23  ;;  %v4130_v22 = vadd.f32 %v7641_v44, %v4129_v31  ;;  %v4122_v48 = vand.u32 2147483648, %v9833_v30 }
 0xa58   : > { %v4094_v46 = vsel %vm4091_vm10, %v4093_v50, %v4089_v17  ;;  %v7647_v24 = vpop.eup %7646  ;;  %7650 = vrcp.f32 %v9869_v12  ;;  %vm9895_vm10 = vmor %vm4116_vm12, %vm4117_vm13  ;;  %v4005_v58 = vadd.f32 %v3997_v35, %v9883_v42  ;;  %vm4146_vm12 = vweird.f32 %v9847_v9 }
 0xa59   : > { %v4187_v28 = vsub.f32 1.0, %v4094_v46  ;;  %v4114_v21 = vmul.f32 %v9858_v26, %v4113_v27  ;;  %v4134_v3 = vsel %vm4133_vm6, %v7641_v44, %v4130_v22  ;;  %v4142_v2 = vmul.f32 %v7647_v24, %v9847_v9  ;;  %v7649_v31 = vpop.eup %7648 }
 0xa5a   : > { %v4251_v15 = vmul.f32 %v4235_v33, %v4094_v46  ;;  %v4139_v50 = vsel %vm9865_vm4, %v4138_v57, %v4134_v3  ;;  %v4150_v22 = vand.u32 2147483647, %v9847_v9  ;;  %v9887_v37 = vadd.f32 1.0, %v7649_v31 }
 0xa5b   : > { %v4219_v63 = vmul.f32 %v11043_v16, %v4187_v28  ;;  %v4115_v23 = vadd.f32 %v9858_v26, %v4114_v21  ;;  %v4190_v17 = vsub.f32 1.0, %v4139_v50  ;;  %v4254_v44 = vmul.f32 %v4238_v40, %v4139_v50 }
 0xa5c   : > { %v4143_v27 = vsub.f32 1.0, %v4142_v2  ;;  %v11044_v33 = vrot.slane %v9757_v36, 7  ;;  %vm4147_vm14 = vweird.f32 %v7647_v24  ;;  %v4123_v21 = vor.u32 1.1754944e-38, %v4122_v48 }
 0xa5d   : > { %v4259_v7 = vadd.f32 %v4251_v15, %v4219_v63  ;;  %v4119_v36 = vsel %vm9895_vm10, %v9858_v26, %v4115_v23  ;;  %7652 = vrcp.f32 %v9887_v37  ;;  %v4207_v16 = vrot.slane %v9763_v54, 7  ;;  %vm4148_vm15 = vmor %vm4146_vm12, %vm4147_vm14 }
 0xa5e   : > { %v4222_v56 = vmul.f32 %v11044_v33, %v4190_v17  ;;  %v4144_v40 = vmul.f32 %v7647_v24, %v4143_v27  ;;  %v7651_v57 = vpop.eup %7650  ;;  %vm4121_vm11 = vcmp.eq.f32.partialorder %v4120_v0, 8.507059e+37  ;;  %vm4151_vm4 = vcmp.eq.f32.partialorder %v4150_v22, 8.507059e+37 }
 0xa5f   : > { %v4275_v28 = vsel %vm2458_vm3, %v4259_v7, %v4274_v51  ;;  %v4097_v2 = vmul.f32 %v7651_v57, %v9869_v12  ;;  %v4153_v7 = vor.u32 1.1754944e-38, %v4152_v1  ;;  %v4124_v51 = vsel %vm4121_vm11, %v4123_v21, %v4119_v36 }
 0xa60   : > { %v9905_v3 = vadd.f32 %v4254_v44, %v4222_v56  ;;  %v4145_v30 = vadd.f32 %v7647_v24, %v4144_v40  ;;  %v11047_v26 = vrot.slane %v9775_v45, 5  ;;  %v4239_v50 = vrot.slane %v9855_v10, 7 }
 0xa61   : > { %v4098_v63 = vsub.f32 1.0, %v4097_v2  ;;  %v4105_v23 = vand.u32 2147483647, %v9869_v12  ;;  %v4107_v9 = vand.u32 2147483648, %v9869_v12  ;;  %vm4102_vm6 = vweird.f32 %v7651_v57 }
 0xa62   : > { %v4149_v35 = vsel %vm4148_vm15, %v7647_v24, %v4145_v30  ;;  %v4032_v48 = vadd.f32 %v11047_v26, %v4005_v58  ;;  %v3986_v1 = vadd.f32 %v9798_v39, %v9773_v55  ;;  %v4189_v24 = vsub.f32 1.0, %v4124_v51 }
 0xa63   : > { %v4154_v15 = vsel %vm4151_vm4, %v4153_v7, %v4149_v35  ;;  %v4099_v17 = vmul.f32 %v7651_v57, %v4098_v63  ;;  %v7653_v0 = vpop.eup %7652  ;;  %v3985_v45 = vadd.f32 %v9812_v14, %v9783_v47  ;;  %vm4101_vm13 = vweird.f32 %v9869_v12 }
 0xa64   : > { %v4191_v31 = vsub.f32 1.0, %v4154_v15  ;;  %v7052_v54 = vmul.f32 -1.442695, %v4032_v48  ;;  %v4255_v10 = vmul.f32 %v4239_v50, %v4154_v15  ;;  %v4172_v22 = vmul.f32 %v7653_v0, %v9887_v37  ;;  %vm4103_vm10 = vmor %vm4101_vm13, %vm4102_vm6 }
 0xa65   : > { %v4100_v27 = vadd.f32 %v7651_v57, %v4099_v17  ;;  %v4205_v33 = vrot.slane %v9761_v38, 7  ;;  %v4108_v56 = vor.u32 1.1754944e-38, %v4107_v9  ;;  %vm4106_vm14 = vcmp.eq.f32.partialorder %v4105_v23, 8.507059e+37 }
 0xa66   : > { %v4223_v44 = vmul.f32 %v4207_v16, %v4191_v31  ;;  %7654 = vpow2.f32 %v7052_v54  ;;  %v4237_v39 = vrot.slane %v3986_v1, 7  ;;  %v4204_v47 = vrot.slane %v9765_v59, 7 }
 0xa67   : > { %v4104_v40 = vsel %vm4103_vm10, %v7651_v57, %v4100_v27  ;;  %v4221_v55 = vmul.f32 %v4205_v33, %v4189_v24  ;;  %v4236_v12 = vrot.slane %v3985_v45, 7  ;;  %v4173_v36 = vsub.f32 1.0, %v4172_v22 }
 0xa68   : > { %v4263_v46 = vadd.f32 %v4255_v10, %v4223_v44  ;;  %v4109_v58 = vsel %vm4106_vm14, %v4108_v56, %v4104_v40  ;;  %v4253_v21 = vmul.f32 %v4237_v39, %v4124_v51  ;;  %v4280_v48 = vrot.slane %v9905_v3, 5 }
 0xa69   : > { %v4188_v14 = vsub.f32 1.0, %v4109_v58  ;;  %v4252_v2 = vmul.f32 %v4236_v12, %v4109_v58  ;;  %v4174_v35 = vmul.f32 %v7653_v0, %v4173_v36  ;;  %vm11048_vm12 = vcmask 1042434  }
 0xa6a   : > { %v4261_v7 = vadd.f32 %v4253_v21, %v4221_v55  ;;  %vm4177_vm11 = vweird.f32 %v7653_v0  ;;  %v4282_v59 = vrot.slane %v4263_v46, 4  ;;  %v4182_v23 = vand.u32 2147483648, %v9887_v37 }
 0xa6b   : > { %v4220_v30 = vmul.f32 %v4204_v47, %v4188_v14  ;;  %v4175_v50 = vadd.f32 %v7653_v0, %v4174_v35  ;;  %vm11049_vm15 = vcmask 1043459   ;;  %vm4176_vm4 = vweird.f32 %v9887_v37 }
 0xa6c   : > { %v7655_v16 = vpop.eup %7654  ;;  %v4278_v57 = vrot.slane %v4261_v7, 6  ;;  %v4180_v9 = vand.u32 2147483647, %v9887_v37  ;;  %vm11050_vm6 = vcmask 1044484   ;;  %vm4178_vm13 = vmor %vm4176_vm4, %vm4177_vm11  ;;  %v4183_v1 = vor.u32 1.1754944e-38, %v4182_v23 }
 0xa6d   : > { %v4260_v38 = vadd.f32 %v4252_v2, %v4220_v30  ;;  %v4064_v63 = vadd.f32 1.0, %v7655_v16  ;;  %v4179_v3 = vsel %vm4178_vm13, %v7653_v0, %v4175_v50  ;;  %v3990_v22 = vadd.f32 %v9823_v49, %v9785_v6 }
 0xa6e   : > { %vm4181_vm10 = vcmp.eq.f32.partialorder %v4180_v9, 8.507059e+37  ;;  %v3989_v33 = vadd.f32 %v9883_v42, %v9794_v53  ;;  %v4209_v0 = vrot.slane %v9767_v43, 7  ;;  %v4208_v47 = vrot.slane %v9771_v13, 7 }
 0xa6f   : > { %v4276_v26 = vrot.slane %v4260_v38, 7  ;;  %7656 = vrcp.f32 %v4064_v63  ;;  %v4184_v24 = vsel %vm4181_vm10, %v4183_v1, %v4179_v3  ;;  %v4167_v44 = vand.u32 2147483648, %v4064_v63 }
 0xa70   : > { %v4165_v27 = vand.u32 2147483647, %v4064_v63  ;;  %v4193_v37 = vsub.f32 1.0, %v4184_v24  ;;  %v4241_v39 = vrot.slane %v3990_v22, 7  ;;  %v4240_v12 = vrot.slane %v3989_v33, 7 }
 0xa71   : > { %v4277_v15 = vsel %vm11048_vm12, %v4276_v26, %v4275_v28  ;;  %vm4161_vm12 = vweird.f32 %v4064_v63  ;;  %v4168_v46 = vor.u32 1.1754944e-38, %v4167_v44  ;;  %vm11051_vm4 = vcmask 1047559  }
 0xa72   : > { %v4279_v51 = vsel %vm11049_vm15, %v4278_v57, %v4277_v15  ;;  %vm4166_vm15 = vcmp.eq.f32.partialorder %v4165_v27, 8.507059e+37  ;;  %v4225_v55 = vmul.f32 %v4209_v0, %v4193_v37  ;;  %v4257_v6 = vmul.f32 %v4241_v39, %v4184_v24  ;;  %v4711_v39 = vld [vmem:[%s10927_s9 + $0x28] sm:$0xff] }
 0xa73   : > { %v4281_v31 = vsel %vm11050_vm6, %v4280_v48, %v4279_v51 }
 0xa74   : > { %v4283_v17 = vsel %vm2470_vm8, %v4282_v59, %v4281_v31  ;;  %v4265_v21 = vadd.f32 %v4257_v6, %v4225_v55  ;;  %v7468_v55 = vld [vmem:[%s10924_s6 + $0x18] sm:$0xff] }
 0xa75   : > { %v7657_v54 = vpop.eup %7656  ;;  %4696 = vmatpush.bf16.msra.mxu0 %v7468_v55 }
 0xa76   : > { %v4157_v28 = vmul.f32 %v7657_v54, %v4064_v63  ;;  %vm4162_vm14 = vweird.f32 %v7657_v54  ;;  %v4286_v30 = vrot.slane %v4265_v21, 2 }
 0xa77   : > { %vm4163_vm11 = vmor %vm4161_vm12, %vm4162_vm14 }
 0xa78   : > { %v4158_v45 = vsub.f32 1.0, %v4157_v28 }
 0xa7a   : > { %v4159_v10 = vmul.f32 %v7657_v54, %v4158_v45 }
 0xa7c   : > { %v4160_v56 = vadd.f32 %v7657_v54, %v4159_v10 }
 0xa7e   : > { %v4164_v40 = vsel %vm4163_vm11, %v7657_v54, %v4160_v56 }
 0xa7f   : > { %v4169_v58 = vsel %vm4166_vm15, %v4168_v46, %v4164_v40  ;;  %v4713_v46 = vld [vmem:[%s10927_s9 + $0x38] sm:$0xff]  ;;  %v4712_v40 = vld [vmem:[%s10927_s9 + $0x30] sm:$0xff] }
 0xa80   : > { %v4192_v14 = vsub.f32 1.0, %v4169_v58  ;;  %v4256_v36 = vmul.f32 %v4240_v12, %v4169_v58  ;;  %4729 = vmatpush.msrb.mxu1 %v4713_v46  ;;  %v4710_v58 = vld [vmem:[%s10927_s9 + $0x20] sm:$0xff]  ;;  %v4709_v12 = vld [vmem:[%s10927_s9 + $0x18] sm:$0xff] }
 0xa82   : > { %v4224_v49 = vmul.f32 %v4208_v47, %v4192_v14  ;;  %4730 = vmatpush.msrb.mxu1 %v4712_v40  ;;  %v7467_v14 = vld [vmem:[%s10924_s6 + $0x10] sm:$0xff] }
 0xa83   : > { %4697 = vmatpush.bf16.msra.mxu0 %v7467_v14  ;;  %v7111_v14 = vld [vmem:[%s10990_s26 + $0x28] sm:$0xf0] }
 0xa84   : > { %v4264_v53 = vadd.f32 %v4256_v36, %v4224_v49  ;;  %4731 = vmatpush.msrb.mxu1 %v4711_v39  ;;  %v4708_v49 = vld [vmem:[%s10927_s9 + $0x10] sm:$0xff] }
 0xa86   : > { %v4284_v42 = vrot.slane %v4264_v53, 3  ;;  %4732 = vmatpush.msrb.mxu1 %v4710_v58  ;;  %v7466_v53 = vld [vmem:[%s10924_s6 + $0x8] sm:$0xff]  ;;  %v7109_v58 = vld [vmem:[%s10990_s26 + $0x20] sm:$0xf] }
 0xa87   : > { %4698 = vmatpush.bf16.msra.mxu0 %v7466_v53 }
 0xa88   : > { %v4285_v43 = vsel %vm2473_vm7, %v4284_v42, %v4283_v17  ;;  %4733 = vmatpush.msrb.mxu1 %v4709_v12  ;;  %v4707_v42 = vld [vmem:[%s10927_s9 + $0x8] sm:$0xff] }
 0xa89   : > { %v4287_v2 = vsel %vm11051_vm4, %v4286_v30, %v4285_v43  ;;  %v4706_v43 = vld [vmem:[%s10927_s9] sm:$0xff] }
 0xa8a   : > { %v9942_v16 = vsel %vm2591_vm0, %v4287_v2, -1e+09  ;;  %4734 = vmatpush.msrb.mxu1 %v4708_v49 }
 0xa8b   : > { %4290 = vmax.xlane.f32.xlu0 %v9942_v16 }
 0xa8c   : > { %4735 = vmatpush.msrb.mxu1 %v4707_v42  ;;  %v7101_v42 = vld [vmem:[%s10990_s26 + $0x10] sm:$0xf] }
 0xa8e   : > { %4736 = vmatpush.msrb.mxu1 %v4706_v43  ;;  %v7448_v43 = vld [vmem:[%s10990_s26 + $0x14] sm:$0xf0] }
 0xafe   : > { %v9945_v13 = vpop.xlane.xlu0 %4290 }
 0xaff   : > { %vm4300_vm6 = vcmp.ge.f32.partialorder %v9942_v16, %v9945_v13 }
 0xb00   : > { %v4301_v7 = vsel %vm4300_vm6, %v8035_v8, 128 }
 0xb01   : > { %v4303_v38 = vshra.s32 %v4301_v7, 16  ;;  %v4302_v63 = vand.u32 65535, %v4301_v7  ;;  %v7718_v7 = vld [vmem:[%s8079_s3] sm:$0xff]  ;;  %s7469_s3 = smul.u32 24, %s614_s20 }
 0xb03   : > { %v4305_v35 = vcvt.s32.f32 %v4303_v38  ;;  %v4304_v57 = vcvt.s32.f32 %v4302_v63  ;;  %s10851_s0 = scalar_lea.vmem [#allocation2], %s7469_s3 }
 0xb05   : > { %4306 = vmin.xlane.f32.xlu2 %v4305_v35 }
 0xb78   : > { %v4307_v26 = vpop.xlane.xlu2 %4306 }
 0xb79   : > { %vm4308_vm13 = vcmp.eq.f32.partialorder %v4305_v35, %v4307_v26  ;;  %v4313_v60 = vcvt.f32.s32 %v4307_v26  ;;  %v7465_v35 = vld [vmem:[%s10924_s6] sm:$0xff] }
 0xb7a   : > { %v4309_v48 = vsel %vm4308_vm13, %v4304_v57, inf  ;;  %4699 = vmatpush.bf16.msra.mxu0 %v7465_v35 }
 0xb7b   : > { %4310 = vmin.xlane.f32.xlu1 %v4309_v48  ;;  %v4314_v50 = vshll.u32 %v4313_v60, 16  ;;  %v7133_v60 = vld [vmem:[%s10990_s26 + $0x50] sm:$0xf] }
 0xbee   : > { %v4311_v15 = vpop.xlane.xlu1 %4310 }
 0xbef   : > { %v4312_v59 = vcvt.f32.s32 %v4311_v15  ;;  %v7456_v15 = vld [vmem:[%s10990_s26 + $0x54] sm:$0xf0] }
 0xbf1   : > { %v9950_v23 = vadd.s32 %v4314_v50, %v4312_v59  ;;  %v7134_v59 = vor.u32 %v7456_v15, %v7133_v60  ;;  %v7093_v15 = vld [vmem:[%s10990_s26] sm:$0xf] }
 0xbf3   : > { %vm4316_vm0 = vcmp.eq.s32.totalorder %v8035_v8, %v9950_v23  ;;  %4573 = vmatpush.bf16.msra.mxu2 %v7134_v59 }
 0xbf4   : > { %v4347_v51 = vsel %vm4316_vm0, %v9279_v29, 0  ;;  %v4332_v9 = vsel %vm4316_vm0, %v9246_v4, 0  ;;  %v4317_v1 = vsel %vm4316_vm0, %v9149_v25, 0 }
 0xbf5   : > { %v4349_v31 = vshra.s32 %v4347_v51, 16  ;;  %v4334_v17 = vshra.s32 %v4332_v9, 16  ;;  %v4319_v28 = vshra.s32 %v4317_v1, 16  ;;  %v4348_v45 = vand.u32 65535, %v4347_v51  ;;  %v7455_v51 = vld [vmem:[%s10990_s26 + $0x54] sm:$0xf] }
 0xbf6   : > { %v4333_v22 = vand.u32 65535, %v4332_v9  ;;  %v4318_v4 = vand.u32 65535, %v4317_v1  ;;  %v7135_v9 = vld [vmem:[%s10990_s26 + $0x58] sm:$0xf0]  ;;  %v7454_v1 = vld [vmem:[%s10990_s26 + $0x44] sm:$0xf0] }
 0xbf7   : > { %v4351_v54 = vcvt.s32.f32 %v4349_v31  ;;  %v4336_v3 = vcvt.s32.f32 %v4334_v17  ;;  %v4321_v24 = vcvt.s32.f32 %v4319_v28  ;;  %v4350_v10 = vcvt.s32.f32 %v4348_v45  ;;  %v7127_v45 = vld [vmem:[%s10990_s26 + $0x48] sm:$0xf0] }
 0xbf8   : > { %v4335_v33 = vcvt.s32.f32 %v4333_v22  ;;  %v4320_v56 = vcvt.s32.f32 %v4318_v4  ;;  %v7452_v22 = vld [vmem:[%s10990_s26 + $0x34] sm:$0xf0] }
 0xbf9   : > { %4352 = vmax.xlane.f32.xlu0 %v4351_v54  ;;  %4337 = vmax.xlane.f32.xlu1 %v4336_v3 }
 0xc01   : > { %4322 = vmax.xlane.f32.xlu0 %v4321_v24 }
 0xc6c   : > { %v4353_v44 = vpop.xlane.xlu0 %4352  ;;  %v4338_v29 = vpop.xlane.xlu1 %4337 }
 0xc6d   : > { %vm4354_vm10 = vcmp.eq.f32.partialorder %v4351_v54, %v4353_v44  ;;  %vm4339_vm14 = vcmp.eq.f32.partialorder %v4336_v3, %v4338_v29  ;;  %v4359_v47 = vcvt.f32.s32 %v4353_v44  ;;  %v4344_v2 = vcvt.f32.s32 %v4338_v29  ;;  %v7125_v3 = vld [vmem:[%s10990_s26 + $0x40] sm:$0xf]  ;;  %v7117_v29 = vld [vmem:[%s10990_s26 + $0x30] sm:$0xf] }
 0xc6e   : > { %v4355_v27 = vsel %vm4354_vm10, %v4350_v10, -inf  ;;  %v4340_v25 = vsel %vm4339_vm14, %v4335_v33, -inf  ;;  %v7138_v54 = vor.u32 %v7455_v51, %v7135_v9  ;;  %v7126_v28 = vor.u32 %v7454_v1, %v7125_v3  ;;  %v7451_v33 = vld [vmem:[%s10990_s26 + $0x34] sm:$0xf]  ;;  %v7095_v9 = vld [vmem:[%s10990_s26 + $0x8] sm:$0xf0] }
 0xc6f   : > { %4356 = vmax.xlane.f32.xlu2 %v4355_v27  ;;  %v4360_v36 = vshll.u32 %v4359_v47, 16  ;;  %v4345_v57 = vshll.u32 %v4344_v2, 16  ;;  %v7118_v46 = vor.u32 %v7452_v22, %v7117_v29  ;;  %v7450_v47 = vld [vmem:[%s10990_s26 + $0x24] sm:$0xf0]  ;;  %v4779_v22 = vld [vmem:[%s10931_s13 + $0x30] sm:$0xff] }
 0xc70   : > { %4586 = vmatpush.bf16.msra.mxu3 %v7138_v54  ;;  %4574 = vmatpush.bf16.msra.mxu2 %v7126_v28 }
 0xc74   : > { %v9957_v37 = vpop.xlane.xlu0 %4322  ;;  %4575 = vmatpush.bf16.msra.mxu2 %v7118_v46  ;;  %v4745_v46 = vld [vmem:[%s10929_s11 + $0x20] sm:$0xff] }
 0xc75   : > { %vm4324_vm12 = vcmp.eq.f32.partialorder %v4321_v24, %v9957_v37  ;;  %v7453_v24 = vld [vmem:[%s10990_s26 + $0x44] sm:$0xf] }
 0xc76   : > { %v4325_v0 = vsel %vm4324_vm12, %v4320_v56, -inf  ;;  %v7130_v4 = vor.u32 %v7453_v24, %v7127_v45  ;;  %v7119_v56 = vld [vmem:[%s10990_s26 + $0x38] sm:$0xf0] }
 0xc77   : > { %4341 = vmax.xlane.f32.xlu2 %v4340_v25  ;;  %4326 = vmax.xlane.f32.xlu1 %v4325_v0  ;;  %v7122_v39 = vor.u32 %v7451_v33, %v7119_v56  ;;  %v4748_v45 = vld [vmem:[%s10929_s11 + $0x38] sm:$0xff]  ;;  %v4746_v56 = vld [vmem:[%s10929_s11 + $0x28] sm:$0xff] }
 0xc78   : > { %4587 = vmatpush.bf16.msra.mxu3 %v7130_v4 }
 0xc7c   : > { %4588 = vmatpush.bf16.msra.mxu3 %v7122_v39  ;;  %v4776_v39 = vld [vmem:[%s10931_s13 + $0x18] sm:$0xff] }
 0xce2   : > { %v4357_v6 = vpop.xlane.xlu2 %4356 }
 0xce3   : > { %v4358_v21 = vcvt.f32.s32 %v4357_v6 }
 0xce5   : > { %v9990_v30 = vadd.s32 %v4360_v36, %v4358_v21  ;;  %v7110_v36 = vor.u32 %v7450_v47, %v7109_v58  ;;  %v4743_v58 = vld [vmem:[%s10929_s11 + $0x10] sm:$0xff] }
 0xce6   : > { %v4775_v47 = vld [vmem:[%s10931_s13 + $0x10] sm:$0xff] }
 0xce7   : > { %v4403_v38 = vsub.s32 %v7718_v7, %v9990_v30  ;;  %v7447_v7 = vld [vmem:[%s10990_s26 + $0x14] sm:$0xf]  ;;  %4576 = vmatpush.bf16.msra.mxu2 %v7110_v36  ;;  %v4329_v36 = vcvt.f32.s32 %v9957_v37 }
 0xce9   : > { %vm4404_vm11 = vcmp.lt.s32.totalorder %v4403_v38, 0 }
 0xcea   : > { %v4342_v63 = vpop.xlane.xlu2 %4341  ;;  %v4405_v26 = vsel %vm4404_vm11, 0, %v4403_v38  ;;  %v7103_v38 = vld [vmem:[%s10990_s26 + $0x18] sm:$0xf0] }
 0xceb   : > { %v4343_v48 = vcvt.f32.s32 %v4342_v63  ;;  %vm4406_vm15 = vcmp.gt.s32.totalorder %v4405_v26, 31  ;;  %v7106_v60 = vor.u32 %v7447_v7, %v7103_v38 }
 0xcec   : > { %v4407_v50 = vsel %vm4406_vm15, 31, %v4405_v26 }
 0xced   : > { %v10012_v31 = vadd.s32 %v4345_v57, %v4343_v48  ;;  %v4412_v17 = vadd.s32 16, %v4407_v50  ;;  %v7102_v57 = vor.u32 %v7448_v43, %v7101_v42  ;;  %v7446_v50 = vld [vmem:[%s10990_s26 + $0x4] sm:$0xf0] }
 0xcee   : > { %v7094_v3 = vor.u32 %v7446_v50, %v7093_v15 }
 0xcef   : > { %v4367_v44 = vcvt.s32.f32 %v10012_v31  ;;  %v4373_v10 = vmul.u32 7, %v10012_v31  ;;  %v4413_v27 = vadd.s32 48, %v4412_v17  ;;  %4577 = vmatpush.bf16.msra.mxu2 %v7102_v57  ;;  %v4409_v42 = vadd.s32 16, %v10012_v31 }
 0xcf1   : > { %v4374_v25 = vadd.s32 %v4373_v10, %v8159_v52  ;;  %v4393_v0 = vadd.f32 0.5, %v4367_v44  ;;  %4415 = vperm.xlu0 %7554, %v4413_v27   ;;  %v7449_v52 = vld [vmem:[%s10990_s26 + $0x24] sm:$0xf]  ;;  %v4780_v10 = vld [vmem:[%s10931_s13 + $0x38] sm:$0xff]  ;;  %v4747_v27 = vld [vmem:[%s10929_s11 + $0x30] sm:$0xff]  ;;  %vm4410_vm11 = vcmp.eq.s32.totalorder %v8035_v8, %v4409_v42 }
 0xcf2   : > { %v7114_v53 = vor.u32 %v7449_v52, %v7111_v14  ;;  %v4742_v52 = vld [vmem:[%s10929_s11 + $0x8] sm:$0xff] }
 0xcf3   : > { %v4375_v40 = vcvt.s32.f32 %v4374_v25  ;;  %v4394_v55 = vmul.f32 0.007874016, %v4393_v0  ;;  %4578 = vmatpush.bf16.msra.mxu2 %v7094_v3  ;;  %v4774_v14 = vld [vmem:[%s10931_s13 + $0x8] sm:$0xff] }
 0xcf4   : > { %4589 = vmatpush.bf16.msra.mxu3 %v7114_v53  ;;  %v4330_v53 = vshll.u32 %v4329_v36, 16 }
 0xcf5   : > { %v4376_v12 = vadd.f32 0.5, %v4375_v40  ;;  %vm7515_vm4 = vcmp.lt.s32.totalorder %v4394_v55, 0  ;;  %v7516_v6 = vceil.f32 %v4394_v55  ;;  %v7517_v49 = vfloor.f32 %v4394_v55  ;;  %v4777_v40 = vld [vmem:[%s10931_s13 + $0x20] sm:$0xff]  ;;  %v4744_v55 = vld [vmem:[%s10929_s11 + $0x18] sm:$0xff] }
 0xcf7   : > { %v4377_v21 = vmul.f32 0.083333336, %v4376_v12  ;;  %v7518_v2 = vsel %vm7515_vm4, %v7516_v6, %v7517_v49  ;;  %4761 = vmatpush.msrb.mxu2 %v4748_v45  ;;  %v4741_v12 = vld [vmem:[%s10929_s11] sm:$0xff]  ;;  %v4327_v49 = vpop.xlane.xlu1 %4326 }
 0xcf8   : > { %v7519_v26 = vcvt.f32.s32 %v7518_v2  ;;  %4590 = vmatpush.bf16.msra.mxu3 %v7106_v60  ;;  %v4773_v6 = vld [vmem:[%s10931_s13] sm:$0xff] }
 0xcf9   : > { %vm7505_vm6 = vcmp.lt.s32.totalorder %v4377_v21, 0  ;;  %v7506_v35 = vceil.f32 %v4377_v21  ;;  %v7507_v63 = vfloor.f32 %v4377_v21  ;;  %7556 = vset.pattern.permute.xlu0 %v11023_v32  ;;  %v7445_v32 = vld [vmem:[%s10990_s26 + $0x4] sm:$0xf]  ;;  %4762 = vmatpush.msrb.mxu2 %v4747_v27  ;;  %v4328_v21 = vcvt.f32.s32 %v4327_v49 }
 0xcfa   : > { %v4396_v51 = vmul.u32 127, %v7519_v26  ;;  %v7098_v1 = vor.u32 %v7445_v32, %v7095_v9 }
 0xcfb   : > { %v7508_v48 = vsel %vm7505_vm6, %v7506_v35, %v7507_v63  ;;  %4763 = vmatpush.msrb.mxu2 %v4746_v56  ;;  %v4331_v43 = vadd.s32 %v4330_v53, %v4328_v21 }
 0xcfc   : > { %v7509_v59 = vcvt.f32.s32 %v7508_v48  ;;  %v4397_v54 = vsub.s32 %v10012_v31, %v4396_v51  ;;  %4591 = vmatpush.bf16.msra.mxu3 %v7098_v1 }
 0xcfd   : > { %4764 = vmatpush.msrb.mxu2 %v4745_v46  ;;  %vm4408_vm15 = vcmp.eq.s32.totalorder %v8035_v8, %v4331_v43 }
 0xcfe   : > { %v4379_v17 = vmul.u32 12, %v7509_v59  ;;  %v10081_v24 = vadd.s32 1, %v4397_v54  ;;  %vm4411_vm4 = vmor %vm4408_vm15, %vm4410_vm11 }
 0xcff   : > { %4765 = vmatpush.msrb.mxu2 %v4744_v55 }
 0xd00   : > { %v4380_v28 = vsub.s32 %v4374_v25, %v4379_v17  ;;  %vm4399_vm13 = vcmp.lt.s32.totalorder %v8035_v8, %v10081_v24  ;;  %4793 = vmatpush.msrb.mxu3 %v4780_v10  ;;  %v4778_v25 = vld [vmem:[%s10931_s13 + $0x28] sm:$0xff] }
 0xd01   : > { %4766 = vmatpush.msrb.mxu2 %v4743_v58 }
 0xd02   : > { %v10097_v29 = vsel %vm4399_vm13, %v4380_v28, 12  ;;  %4794 = vmatpush.msrb.mxu3 %v4779_v22 }
 0xd03   : > { %v4817_v4 = vperm.slane %v10097_v29, 0  ;;  %v4810_v33 = vrot.slane %v10097_v29, 1  ;;  %4767 = vmatpush.msrb.mxu2 %v4742_v52  ;;  %v4812_v2 = vrot.slane %v10097_v29, 3  ;;  %v4813_v7 = vrot.slane %v10097_v29, 4 }
 0xd04   : > { %4795 = vmatpush.msrb.mxu3 %v4778_v25 }
 0xd05   : > { %vm4826_vm0 = vcmp.eq.s32.totalorder %v8175_v5, %v4817_v4  ;;  %v4818_v0 = vperm.slane %v4810_v33, 0  ;;  %vm4825_vm10 = vcmp.eq.s32.totalorder %v8163_v62, %v4817_v4  ;;  %4768 = vmatpush.msrb.mxu2 %v4741_v12  ;;  %v4820_v35 = vperm.slane %v4812_v2, 0 }
 0xd06   : > { %7259 = vmatpush.msk.msra.mxu1 %vm4826_vm0, %v11024_v41  ;;  %4796 = vmatpush.msrb.mxu3 %v4777_v40  ;;  %v4821_v37 = vperm.slane %v4813_v7, 0 }
 0xd07   : > { %vm4828_vm14 = vcmp.eq.s32.totalorder %v8175_v5, %v4818_v0  ;;  %vm4827_vm12 = vcmp.eq.s32.totalorder %v8163_v62, %v4818_v0 }
 0xd08   : > { %7260 = vmatpush.msk.msra.mxu1 %vm4825_vm10, %v11024_v41  ;;  %7262 = vmatpush.msk.msrb.mxu0 %vm4828_vm14, %v11024_v41  ;;  %vm4832_vm10 = vcmp.eq.s32.totalorder %v8175_v5, %v4820_v35  ;;  %vm4834_vm14 = vcmp.eq.s32.totalorder %v8175_v5, %v4821_v37  ;;  %vm4833_vm11 = vcmp.eq.s32.totalorder %v8163_v62, %v4821_v37 }
 0xd09   : > { %4797 = vmatpush.msrb.mxu3 %v4776_v39 }
 0xd0a   : > { %7263 = vmatpush.msk.msrb.mxu0 %vm4827_vm12, %v11024_v41  ;;  %vm4831_vm12 = vcmp.eq.s32.totalorder %v8163_v62, %v4820_v35 }
 0xd0b   : > { %4798 = vmatpush.msrb.mxu3 %v4775_v47 }
 0xd0d   : > { %4799 = vmatpush.msrb.mxu3 %v4774_v14 }
 0xd0f   : > { %4800 = vmatpush.msrb.mxu3 %v4773_v6 }
 0xd63   : > { %v4416_v38 = vpop.permute.xlu0 %4415 }
 0xd64   : > { %vm4417_vm6 = vcmp.eq.s32.totalorder %v8035_v8, %v4416_v38 }
 0xd65   : > { %vm4418_vm0 = vmor %vm4411_vm4, %vm4417_vm6 }
 0xd66   : > { %v7056_v63 = vsel %vm4418_vm0, 1.0, %v11025_v34  ;;  %v4597_v34 = vld [vmem:[%s10923_s5] sm:$0x3] }
 0xd67   : > { %v4421_v26 = vpack.c.bf16 %v7056_v63, %v7056_v63  ;;  %v4599_v57 = vperm.slane %v4597_v34, 0  ;;  %v4600_v3 = vperm.slane %v4597_v34, 1  ;;  %v4381_v63 = vmul.u32 5, %v10012_v31 }
 0xd69   : > { %7139 = vmatmul.msk.bf16.vlgmr.msra.gmra.mxu2 %vm922_vm5, %v4421_v26  ;;  %7140 = vmatmul.msk.bf16.vlgmr.msra.gmra.mxu3 %vm922_vm5, %v4421_v26  ;;  %v4382_v26 = vadd.s32 %v4381_v63, %v8203_v20 }
 0xd6a   : > { %7268 = vmatpush.msk.msra.mxu2 %vm4832_vm10, %v11024_v41  ;;  %7271 = vmatpush.msk.msra.mxu3 %vm4834_vm14, %v11024_v41 }
 0xd6b   : > { %v4383_v34 = vadd.s32 1, %v4382_v26 }
 0xd6c   : > { %7269 = vmatpush.msk.msra.mxu2 %vm4831_vm12, %v11024_v41  ;;  %7272 = vmatpush.msk.msra.mxu3 %vm4833_vm11, %v11024_v41 }
 0xdec   : > { %v4580_v48 = vpop.f32.mrf.mxu2  ;;  %v4593_v60 = vpop.f32.mrf.mxu3 }
 0xded   : > { %v4581_v15 = vadd.f32 %v4580_v48, %v9808_v61  ;;  %v4594_v54 = vadd.f32 %v4593_v60, %v9835_v11 }
 0xdef   : > { %v4603_v50 = vadd.f32 %v4599_v57, %v4581_v15  ;;  %v4604_v28 = vadd.f32 %v4600_v3, %v4594_v54  ;;  %v4384_v57 = vcvt.s32.f32 %v4383_v34  ;;  %v4816_v54 = vrot.slane %v10097_v29, 7 }
 0xdf1   : > { %v7141_v59 = vmul.f32 -1.442695, %v4603_v50  ;;  %v7142_v11 = vmul.f32 -1.442695, %v4604_v28  ;;  %v4385_v48 = vadd.f32 0.5, %v4384_v57 }
 0xdf3   : > { %7658 = vpow2.f32 %v7141_v59  ;;  %v4386_v60 = vmul.f32 0.025, %v4385_v48 }
 0xdf4   : > { %v4582_v51 = vpop.f32.mrf.mxu2  ;;  %v4595_v32 = vpop.f32.mrf.mxu3 }
 0xdf5   : > { %v7511_v15 = vceil.f32 %v4386_v60  ;;  %v7512_v50 = vfloor.f32 %v4386_v60 }
 0xdf9   : > { %v7659_v9 = vpop.eup %7658 }
 0xdfa   : > { %v4608_v17 = vadd.f32 1.0, %v7659_v9 }
 0xdfc   : > { %7660 = vrcp.f32 %v4608_v17  ;;  %v4620_v27 = vand.u32 2147483648, %v4608_v17  ;;  %v4618_v61 = vand.u32 2147483647, %v4608_v17  ;;  %vm4614_vm15 = vweird.f32 %v4608_v17 }
 0xdfd   : > { %7662 = vtanh.f32 %v4604_v28 }
 0xdfe   : > { %v4621_v33 = vor.u32 1.1754944e-38, %v4620_v27  ;;  %vm4619_vm6 = vcmp.eq.f32.partialorder %v4618_v61, 8.507059e+37  ;;  %7664 = vpow2.f32 %v7142_v11  ;;  %v7567_v11 = vld [vmem:[%s10928_s10] ss:$0 sm:$0xff] }
 0xe02   : > { %v7661_v1 = vpop.eup %7660 }
 0xe03   : > { %v4610_v45 = vmul.f32 %v7661_v1, %v4608_v17  ;;  %vm4615_vm5 = vweird.f32 %v7661_v1  ;;  %v7663_v25 = vpop.eup %7662  ;;  %v4811_v17 = vrot.slane %v10097_v29, 2 }
 0xe04   : > { %vm4616_vm4 = vmor %vm4614_vm15, %vm4615_vm5  ;;  %v7665_v40 = vpop.eup %7664  ;;  %vm7510_vm15 = vcmp.lt.s32.totalorder %v4386_v60, 0 }
 0xe05   : > { %v4611_v10 = vsub.f32 1.0, %v4610_v45  ;;  %v4628_v55 = vadd.f32 1.0, %v7665_v40  ;;  %v7513_v59 = vsel %vm7510_vm15, %v7511_v15, %v7512_v50  ;;  %v4819_v28 = vperm.slane %v4811_v17, 0 }
 0xe06   : > { %v7514_v51 = vcvt.f32.s32 %v7513_v59  ;;  %v4824_v45 = vperm.slane %v4816_v54, 0  ;;  %v4815_v40 = vrot.slane %v10097_v29, 6 }
 0xe07   : > { %v4612_v22 = vmul.f32 %v7661_v1, %v4611_v10  ;;  %7666 = vrcp.f32 %v4628_v55  ;;  %v4640_v36 = vand.u32 2147483648, %v4628_v55  ;;  %vm4634_vm10 = vweird.f32 %v4628_v55 }
 0xe08   : > { %v4638_v21 = vand.u32 2147483647, %v4628_v55  ;;  %v4388_v32 = vmul.u32 40, %v7514_v51 }
 0xe09   : > { %v4613_v4 = vadd.f32 %v7661_v1, %v4612_v22  ;;  %v4641_v42 = vor.u32 1.1754944e-38, %v4640_v36  ;;  %v11052_v22 = vld [vmem:[#allocation9_spill] sm:$0xff] }
 0xe0a   : > { %vm4639_vm12 = vcmp.eq.f32.partialorder %v4638_v21, 8.507059e+37  ;;  %v4389_v9 = vsub.s32 %v4383_v34, %v4388_v32 }
 0xe0b   : > { %v4617_v56 = vsel %vm4616_vm4, %v7661_v1, %v4613_v4  ;;  %vm4830_vm4 = vcmp.eq.s32.totalorder %v8175_v5, %v4819_v28  ;;  %v11054_v4 = vld [vmem:[#allocation11_spill] sm:$0xff] }
 0xe0c   : > { %v4622_v0 = vsel %vm4619_vm6, %v4621_v33, %v4617_v56  ;;  %v10188_v20 = vsel %vm4399_vm13, %v4389_v9, %v10012_v31  ;;  %vm4840_vm6 = vcmp.eq.s32.totalorder %v8175_v5, %v4824_v45  ;;  %v11055_v33 = vld [vmem:[#allocation12_spill] sm:$0xff]  ;;  %v11056_v56 = vld [vmem:[#allocation13_spill] sm:$0xff] }
 0xe0d   : > { %v4645_v46 = vmul.f32 %v7663_v25, %v4622_v0  ;;  %v7667_v39 = vpop.eup %7666  ;;  %v4644_v14 = vmul.f32 %v4622_v0, %v9225_v19  ;;  %v4814_v19 = vrot.slane %v10097_v29, 5  ;;  %v4880_v10 = vperm.slane %v10188_v20, 0 }
 0xe0e   : > { %v4630_v58 = vmul.f32 %v7667_v39, %v4628_v55  ;;  %vm4635_vm0 = vweird.f32 %v7667_v39  ;;  %v4390_v25 = vsub.s32 %v9990_v30, %v11056_v56  ;;  %v11057_v55 = vld [vmem:[#allocation14_spill] sm:$0xff]  ;;  %v4874_v60 = vrot.slane %v10188_v20, 2  ;;  %v10341_v56 = vld [vmem:[%s10934_s16] ss:$0 sm:$0xff] }
 0xe0f   : > { %4647 = vrot.lane.b32.xlu2 %v4645_v46, %s7748_s30  ;;  %vm4636_vm14 = vmor %vm4634_vm10, %vm4635_vm0  ;;  %v4822_v35 = vperm.slane %v4814_v19, 0  ;;  %vm4893_vm0 = vcmp.eq.s32.totalorder %v11052_v22, %v4880_v10  ;;  %vm4829_vm10 = vcmp.eq.s32.totalorder %v8163_v62, %v4819_v28  ;;  %vm4888_vm15 = vcmp.eq.s32.totalorder %v8163_v62, %v4880_v10 }
 0xe10   : > { %v4631_v47 = vsub.f32 1.0, %v4630_v58  ;;  %v10292_v9 = vperm.slane %v4874_v60, 0  ;;  %v4877_v28 = vrot.slane %v10188_v20, 5 }
 0xe11   : > { %vm4836_vm11 = vcmp.eq.s32.totalorder %v8175_v5, %v4822_v35  ;;  %vm4835_vm5 = vcmp.eq.s32.totalorder %v8163_v62, %v4822_v35  ;;  %v7568_v35 = vld [vmem:[%s10930_s12] ss:$0 sm:$0xff] }
 0xe12   : > { %v4632_v52 = vmul.f32 %v7667_v39, %v4631_v47  ;;  %v4873_v47 = vrot.slane %v10188_v20, 1 }
 0xe14   : > { %v4633_v49 = vadd.f32 %v7667_v39, %v4632_v52  ;;  %v4875_v52 = vrot.slane %v10188_v20, 3 }
 0xe16   : > { %v4637_v53 = vsel %vm4636_vm14, %v7667_v39, %v4633_v49  ;;  %vm4839_vm14 = vcmp.eq.s32.totalorder %v8163_v62, %v4824_v45  ;;  %v4879_v45 = vrot.slane %v10188_v20, 7 }
 0xe17   : > { %v4642_v2 = vsel %vm4639_vm12, %v4641_v42, %v4637_v53  ;;  %v10238_v53 = vperm.slane %v4873_v47, 0  ;;  %v10240_v42 = vperm.slane %v4875_v52, 0 }
 0xe69   : > { %v4648_v12 = vpop.permute.xlu2 %4647 }
 0xe6a   : > { %v4650_v6 = vadd.f32 %v4648_v12, %v4644_v14  ;;  %v4823_v12 = vperm.slane %v4815_v40, 0  ;;  %v10357_v40 = vperm.slane %v4879_v45, 0 }
 0xe6c   : > { %7668 = vtanh.f32 %v4650_v6  ;;  %v4876_v6 = vrot.slane %v10188_v20, 4 }
 0xe72   : > { %v7669_v43 = vpop.eup %7668 }
 0xe73   : > { %v4652_v7 = vmul.f32 %v7669_v43, %v4642_v2  ;;  %v10245_v43 = vld [vmem:[%s10933_s15] ss:$0 sm:$0xff] }
 0xe75   : > { %v4653_v38 = vpack.c.bf16 %v4652_v7, %v4652_v7 }
 0xe77   : > { %4663 = vrot.lane.b32.xlu1 %v4653_v38, %s7748_s30  ;;  %s10860_s30 = scalar_lea.vmem [#allocation3], %s7469_s3 }
 0xee9   : > { %v4664_v37 = vpop.permute.xlu1 %4663 }
 0xeea   : > { %7159 = vmatmul.msk.bf16.vlgmr.msra.gmra.mxu0 %vm690_vm9, %v4664_v37  ;;  %v10255_v37 = vperm.slane %v4876_v6, 0 }
 0xeeb   : > { %7274 = vmatpush.msk.msra.mxu0 %vm4836_vm11, %v11024_v41  ;;  %vm4890_vm11 = vcmp.eq.s32.totalorder %v11055_v33, %v4880_v10 }
 0xeed   : > { %7275 = vmatpush.msk.msra.mxu0 %vm4835_vm5, %v11024_v41  ;;  %vm4889_vm5 = vcmp.eq.s32.totalorder %v8175_v5, %v4880_v10 }
 0xf67   : > { %v4701_v3 = vpop.f32.mrf.mxu0 }
 0xf68   : > { %v4702_v1 = vadd.f32 %v4701_v3, %v11026_v18  ;;  %v11053_v18 = vld [vmem:[#allocation10_spill] sm:$0xff] }
 0xf69   : > { %vm4892_vm12 = vcmp.eq.s32.totalorder %v11053_v18, %v4880_v10 }
 0xf6a   : > { %v4705_v27 = vmax.f32 %v4702_v1, 0.0  ;;  %5817 = vperm.xlu2 %7555, %v4702_v1  }
 0xf6c   : > { %7160 = vmatmul.msk.f32.vlgmr.msrb.gmra.mxu1 %vm690_vm9, %v4705_v27  ;;  %7161 = vmatmul.msk.f32.vlgmr.msrb.gmra.mxu2 %vm690_vm9, %v4705_v27 }
 0xf6d   : > { %7162 = vmatmul.msk.f32.vlgmr.msrb.gmra.mxu3 %vm690_vm9, %v4705_v27  ;;  %7265 = vmatpush.msk.msrb.mxu1 %vm4830_vm4, %v11024_v41  ;;  %vm4891_vm9 = vcmp.eq.s32.totalorder %v11054_v4, %v4880_v10  ;;  %vm4391_vm4 = vcmp.lt.s32.totalorder %v4390_v25, 0 }
 0xf6e   : > { %7280 = vmatpush.msk.msrb.mxu2 %vm4840_vm6, %v11024_v41  ;;  %7283 = vmatpush.msk.msrb.mxu3 %vm4893_vm0, %v11024_v41  ;;  %v4392_v0 = vsel %vm4391_vm4, 0, %v4390_v25  ;;  %vm4838_vm0 = vcmp.eq.s32.totalorder %v8175_v5, %v4823_v12 }
 0xf6f   : > { %7266 = vmatpush.msk.msrb.mxu1 %vm4829_vm10, %v11024_v41  ;;  %v4703_v61 = vpop.f32.mrf.mxu0  ;;  %v10221_v46 = vsel %vm4399_vm13, %v4392_v0, %v9990_v30  ;;  %vm4837_vm10 = vcmp.eq.s32.totalorder %v8163_v62, %v4823_v12  ;;  %v10348_v0 = vperm.slane %v4877_v28, 0  ;;  %v10520_v28 = vld [vmem:[%s10935_s17] ss:$0 sm:$0xff] }
 0xf70   : > { %7281 = vmatpush.msk.msrb.mxu2 %vm4839_vm14, %v11024_v41  ;;  %7284 = vmatpush.msk.msrb.mxu3 %vm4892_vm12, %v11024_v41  ;;  %v4805_v39 = vsub.s32 %v11057_v55, %v10221_v46  ;;  %vm4899_vm14 = vcmp.eq.s32.totalorder %v11052_v22, %v10238_v53  ;;  %vm4911_vm12 = vcmp.eq.s32.totalorder %v11052_v22, %v10240_v42 }
 0xf72   : > { %7285 = vmatpush.msk.msrb.mxu3 %vm4891_vm9, %v11024_v41  ;;  %vm4806_vm6 = vcmp.lt.s32.totalorder %v4805_v39, 0  ;;  %vm4917_vm9 = vcmp.eq.s32.totalorder %v11052_v22, %v10255_v37 }
 0xf73   : > { %v4807_v15 = vsel %vm4806_vm6, 0, %v4805_v39  ;;  %vm4897_vm6 = vcmp.eq.s32.totalorder %v11054_v4, %v10238_v53 }
 0xf74   : > { %7286 = vmatpush.msk.msrb.mxu3 %vm4890_vm11, %v11024_v41  ;;  %vm4898_vm11 = vcmp.eq.s32.totalorder %v11053_v18, %v10238_v53  ;;  %vm4808_vm4 = vcmp.gt.s32.totalorder %v4807_v15, 31 }
 0xf75   : > { %v10326_v10 = vsel %vm4808_vm4, 31, %v4807_v15  ;;  %vm4904_vm4 = vcmp.eq.s32.totalorder %v11053_v18, %v10292_v9 }
 0xf76   : > { %7287 = vmatpush.msk.msrb.mxu3 %vm4889_vm5, %v11024_v41  ;;  %vm4910_vm5 = vcmp.eq.s32.totalorder %v11053_v18, %v10240_v42  ;;  %v10360_v55 = vperm.slane %v10326_v10, 0 }
 0xf78   : > { %7288 = vmatpush.msk.msrb.mxu3 %vm4888_vm15, %v11024_v41  ;;  %vm4916_vm15 = vcmp.eq.s32.totalorder %v11053_v18, %v10255_v37 }
 0xfe9   : > { %v4738_v58 = vpop.f32.mrf.mxu1 }
 0xfea   : > { %v10231_v14 = vadd.f32 %v7567_v11, %v4738_v58 }
 0xfec   : > { %v5151_v49 = vperm.slane %v10231_v14, 0  ;;  %v5144_v36 = vrot.slane %v10231_v14, 1  ;;  %v5146_v21 = vrot.slane %v10231_v14, 3  ;;  %v5147_v29 = vrot.slane %v10231_v14, 4 }
 0xfed   : > { %v5145_v63 = vrot.slane %v10231_v14, 2  ;;  %v5148_v50 = vrot.slane %v10231_v14, 5  ;;  %v5150_v59 = vrot.slane %v10231_v14, 7  ;;  %v5149_v11 = vrot.slane %v10231_v14, 6 }
 0xfee   : > { %v5167_v2 = vsel %vm1505_vm2, %v10245_v43, %v5151_v49  ;;  %v5152_v7 = vperm.slane %v5144_v36, 0  ;;  %v5154_v38 = vperm.slane %v5146_v21, 0  ;;  %v5155_v19 = vperm.slane %v5147_v29, 0 }
 0xfef   : > { %7261 = vmatmul.msk.f32.vlgmr.msra.gmra.mxu1 %vm1541_vm1, %v5167_v2  ;;  %v4770_v26 = vpop.f32.mrf.mxu2  ;;  %v5153_v32 = vperm.slane %v5145_v63, 0  ;;  %v5156_v17 = vperm.slane %v5148_v50, 0  ;;  %v5158_v54 = vperm.slane %v5150_v59, 0  ;;  %v5157_v47 = vperm.slane %v5149_v11, 0 }
 0xff0   : > { %7277 = vmatpush.msk.msra.mxu1 %vm4838_vm0, %v11024_v41  ;;  %v5168_v34 = vsel %vm1505_vm2, %v10245_v43, %v5152_v7  ;;  %v5170_v57 = vsel %vm1505_vm2, %v10245_v43, %v5154_v38  ;;  %v5171_v48 = vsel %vm1505_vm2, %v10245_v43, %v5155_v19  ;;  %v10281_v51 = vadd.f32 %v7568_v35, %v4770_v26  ;;  %v4802_v2 = vpop.f32.mrf.mxu3 }
 0xff1   : > { %7264 = vmatmul.msk.f32.vlgmr.msrb.gmra.mxu0 %vm1541_vm1, %v5168_v34  ;;  %7270 = vmatmul.msk.f32.vlgmr.msra.gmra.mxu2 %vm1541_vm1, %v5170_v57  ;;  %vm4909_vm0 = vcmp.eq.s32.totalorder %v11054_v4, %v10240_v42  ;;  %v5169_v3 = vsel %vm1505_vm2, %v10245_v43, %v5153_v32  ;;  %v5172_v27 = vsel %vm1505_vm2, %v10245_v43, %v5156_v17  ;;  %v4878_v14 = vrot.slane %v10188_v20, 6 }
 0xff2   : > { %7273 = vmatmul.msk.f32.vlgmr.msra.gmra.mxu3 %vm1541_vm1, %v5171_v48  ;;  %7278 = vmatpush.msk.msra.mxu1 %vm4837_vm10, %v11024_v41  ;;  %vm4915_vm10 = vcmp.eq.s32.totalorder %v11054_v4, %v10255_v37  ;;  %v5367_v1 = vperm.slane %v10281_v51, 0  ;;  %v5174_v61 = vsel %vm1505_vm2, %v10245_v43, %v5158_v54  ;;  %v5360_v39 = vrot.slane %v10281_v51, 1 }
 0xff3   : > { %7290 = vmatpush.msk.msrb.mxu0 %vm4899_vm14, %v11024_v41  ;;  %7304 = vmatpush.msk.msra.mxu2 %vm4911_vm12, %v11024_v41  ;;  %vm4896_vm14 = vcmp.eq.s32.totalorder %v11055_v33, %v10238_v53  ;;  %vm4905_vm12 = vcmp.eq.s32.totalorder %v11052_v22, %v10292_v9  ;;  %v5362_v58 = vrot.slane %v10281_v51, 3  ;;  %v5363_v52 = vrot.slane %v10281_v51, 4 }
 0xff4   : > { %7311 = vmatpush.msk.msra.mxu3 %vm4917_vm9, %v11024_v41  ;;  %vm4908_vm9 = vcmp.eq.s32.totalorder %v11055_v33, %v10240_v42  ;;  %v5383_v25 = vsel %vm1505_vm2, %v10341_v56, %v5367_v1  ;;  %v5368_v12 = vperm.slane %v5360_v39, 0  ;;  %v5035_v49 = vrot.slane %v10326_v10, 4 }
 0xff5   : > { %7291 = vmatpush.msk.msrb.mxu0 %vm4898_vm11, %v11024_v41  ;;  %7305 = vmatpush.msk.msra.mxu2 %vm4910_vm5, %v11024_v41  ;;  %vm4914_vm11 = vcmp.eq.s32.totalorder %v11055_v33, %v10255_v37  ;;  %vm4895_vm5 = vcmp.eq.s32.totalorder %v8175_v5, %v10238_v53  ;;  %v5370_v6 = vperm.slane %v5362_v58, 0  ;;  %v5173_v36 = vsel %vm1505_vm2, %v10245_v43, %v5157_v47 }
 0xff6   : > { %7312 = vmatpush.msk.msra.mxu3 %vm4916_vm15, %v11024_v41  ;;  %vm11058_vm15 = vcmask 392192   ;;  %v5371_v21 = vperm.slane %v5363_v52, 0  ;;  %v10416_v29 = vperm.slane %v4878_v14, 0  ;;  %v5361_v43 = vrot.slane %v10281_v51, 2 }
 0xff7   : > { %7292 = vmatpush.msk.msrb.mxu0 %vm4897_vm6, %v11024_v41  ;;  %7306 = vmatpush.msk.msra.mxu2 %vm4909_vm0, %v11024_v41  ;;  %vm4907_vm6 = vcmp.eq.s32.totalorder %v8175_v5, %v10240_v42  ;;  %vm4913_vm0 = vcmp.eq.s32.totalorder %v8175_v5, %v10255_v37  ;;  %v5386_v7 = vsel %vm1505_vm2, %v10341_v56, %v5370_v6  ;;  %v10436_v38 = vperm.slane %v5035_v49, 0 }
 0xff8   : > { %7313 = vmatpush.msk.msra.mxu3 %vm4915_vm10, %v11024_v41  ;;  %7267 = vmatmul.msk.f32.vlgmr.msrb.gmra.mxu1 %vm1541_vm1, %v5169_v3  ;;  %vm4894_vm10 = vcmp.eq.s32.totalorder %v8163_v62, %v10238_v53  ;;  %v7569_v53 = vld [vmem:[%s10932_s14] ss:$0 sm:$0xff]  ;;  %v5032_v19 = vrot.slane %v10326_v10, 1  ;;  %v5034_v35 = vrot.slane %v10326_v10, 3  ;;  %v5364_v63 = vrot.slane %v10281_v51, 5 }
 0xff9   : > { %7293 = vmatpush.msk.msrb.mxu0 %vm4896_vm14, %v11024_v41  ;;  %7297 = vmatpush.msk.msrb.mxu1 %vm4905_vm12, %v11024_v41  ;;  %vm4903_vm14 = vcmp.eq.s32.totalorder %v11054_v4, %v10292_v9  ;;  %vm4906_vm12 = vcmp.eq.s32.totalorder %v8163_v62, %v10240_v42  ;;  %v5384_v42 = vsel %vm1505_vm2, %v10341_v56, %v5368_v12  ;;  %v5366_v26 = vrot.slane %v10281_v51, 7 }
 0xffa   : > { %7307 = vmatpush.msk.msra.mxu2 %vm4908_vm9, %v11024_v41  ;;  %7314 = vmatpush.msk.msra.mxu3 %vm4914_vm11, %v11024_v41  ;;  %vm4912_vm9 = vcmp.eq.s32.totalorder %v8163_v62, %v10255_v37  ;;  %vm4923_vm11 = vcmp.eq.s32.totalorder %v11052_v22, %v10348_v0  ;;  %v5387_v37 = vsel %vm1505_vm2, %v10341_v56, %v5371_v21  ;;  %v5040_v57 = vperm.slane %v5032_v19, 0 }
 0xffb   : > { %7276 = vmatmul.msk.f32.vlgmr.msra.gmra.mxu0 %vm1541_vm1, %v5172_v27  ;;  %7282 = vmatmul.msk.f32.vlgmr.msrb.gmra.mxu2 %vm1541_vm1, %v5174_v61  ;;  %v10455_v34 = vadd.f32 %v7569_v53, %v4802_v2  ;;  %v10469_v48 = vperm.slane %v5034_v35, 0  ;;  %v5374_v60 = vperm.slane %v5366_v26, 0  ;;  %v5033_v59 = vrot.slane %v10326_v10, 2 }
 0xffc   : > { %7289 = vmatmul.msk.f32.vlgmr.msrb.gmra.mxu3 %vm11058_vm15, %v5383_v25  ;;  %7294 = vmatpush.msk.msrb.mxu0 %vm4895_vm5, %v11024_v41  ;;  %vm4935_vm5 = vcmp.eq.s32.totalorder %v11052_v22, %v10357_v40  ;;  %vm5050_vm15 = vcmp.eq.s32.totalorder %v11054_v4, %v10360_v55  ;;  %v5036_v32 = vrot.slane %v10326_v10, 5  ;;  %v5365_v3 = vrot.slane %v10281_v51, 6 }
 0xffd   : > { %7298 = vmatpush.msk.msrb.mxu1 %vm4904_vm4, %v11024_v41  ;;  %7308 = vmatpush.msk.msra.mxu2 %vm4907_vm6, %v11024_v41  ;;  %vm4902_vm4 = vcmp.eq.s32.totalorder %v11055_v33, %v10292_v9  ;;  %vm4922_vm6 = vcmp.eq.s32.totalorder %v11053_v18, %v10348_v0  ;;  %v5583_v50 = vperm.slane %v10455_v34, 0  ;;  %v5390_v54 = vsel %vm1505_vm2, %v10341_v56, %v5374_v60 }
 0xffe   : > { %7315 = vmatpush.msk.msra.mxu3 %vm4913_vm0, %v11024_v41  ;;  %7295 = vmatpush.msk.msrb.mxu0 %vm4894_vm10, %v11024_v41  ;;  %vm4934_vm0 = vcmp.eq.s32.totalorder %v11053_v18, %v10357_v40  ;;  %vm5049_vm10 = vcmp.eq.s32.totalorder %v11055_v33, %v10360_v55  ;;  %v5576_v1 = vrot.slane %v10455_v34, 1  ;;  %v5041_v51 = vperm.slane %v5033_v59, 0 }
 0xfff   : > { %7299 = vmatpush.msk.msrb.mxu1 %vm4903_vm14, %v11024_v41  ;;  %7309 = vmatpush.msk.msra.mxu2 %vm4906_vm12, %v11024_v41  ;;  %vm4921_vm14 = vcmp.eq.s32.totalorder %v11054_v4, %v10348_v0  ;;  %vm4901_vm12 = vcmp.eq.s32.totalorder %v8175_v5, %v10292_v9  ;;  %v5599_v45 = vsel %vm1505_vm2, %v10520_v28, %v5583_v50  ;;  %v5579_v27 = vrot.slane %v10455_v34, 4 }
0x1000   : > { %7316 = vmatpush.msk.msra.mxu3 %vm4912_vm9, %v11024_v41  ;;  %7318 = vmatpush.msk.msra.mxu0 %vm4923_vm11, %v11024_v41  ;;  %vm4933_vm9 = vcmp.eq.s32.totalorder %v11054_v4, %v10357_v40  ;;  %vm4900_vm11 = vcmp.eq.s32.totalorder %v8163_v62, %v10292_v9  ;;  %v5038_v9 = vrot.slane %v10326_v10, 7  ;;  %v5044_v61 = vperm.slane %v5036_v32, 0 }
0x1001   : > { %7332 = vmatpush.msk.msrb.mxu2 %vm4935_vm5, %v11024_v41  ;;  %7300 = vmatpush.msk.msrb.mxu1 %vm4902_vm4, %v11024_v41  ;;  %vm11059_vm5 = vcmask 392192   ;;  %vm4920_vm4 = vcmp.eq.s32.totalorder %v11055_v33, %v10348_v0  ;;  %v5373_v11 = vperm.slane %v5365_v3, 0  ;;  %v5037_v39 = vrot.slane %v10326_v10, 6 }
0x1002   : > { %7339 = vmatpush.msk.msrb.mxu3 %vm5050_vm15, %v11024_v41  ;;  %7319 = vmatpush.msk.msra.mxu0 %vm4922_vm6, %v11024_v41  ;;  %vm11060_vm15 = vmmov %vm11059_vm5  ;;  %v5046_v25 = vperm.slane %v5038_v9, 0  ;;  %v5580_v52 = vrot.slane %v10455_v34, 5  ;;  %v5577_v14 = vrot.slane %v10455_v34, 2  ;;  %v5582_v49 = vrot.slane %v10455_v34, 7 }
0x1003   : > { %7333 = vmatpush.msk.msrb.mxu2 %vm4934_vm0, %v11024_v41  ;;  %7279 = vmatmul.msk.f32.vlgmr.msra.gmra.mxu1 %vm1541_vm1, %v5173_v36  ;;  %vm5048_vm1 = vcmp.eq.s32.totalorder %v8175_v5, %v10360_v55  ;;  %vm11061_vm6 = vmmov %vm11059_vm5  ;;  %vm4929_vm0 = vcmp.eq.s32.totalorder %v11052_v22, %v10416_v29  ;;  %v5369_v22 = vperm.slane %v5361_v43, 0  ;;  %v5389_v47 = vsel %vm1505_vm2, %v10341_v56, %v5373_v11 }
0x1004   : > { %7340 = vmatpush.msk.msrb.mxu3 %vm5049_vm10, %v11024_v41  ;;  %7320 = vmatpush.msk.msra.mxu0 %vm4921_vm14, %v11024_v41  ;;  %vm4932_vm10 = vcmp.eq.s32.totalorder %v11055_v33, %v10357_v40  ;;  %vm5047_vm14 = vcmp.eq.s32.totalorder %v8163_v62, %v10360_v55  ;;  %v5587_v55 = vperm.slane %v5579_v27, 0  ;;  %v5045_v12 = vperm.slane %v5037_v39, 0 }
0x1005   : > { %7301 = vmatpush.msk.msrb.mxu1 %vm4901_vm12, %v11024_v41  ;;  %7334 = vmatpush.msk.msrb.mxu2 %vm4933_vm9, %v11024_v41  ;;  %vm4919_vm12 = vcmp.eq.s32.totalorder %v8175_v5, %v10348_v0  ;;  %vm5066_vm9 = vcmp.eq.s32.totalorder %v11054_v4, %v10436_v38  ;;  %v5385_v15 = vsel %vm1505_vm2, %v10341_v56, %v5369_v22  ;;  %v5588_v36 = vperm.slane %v5580_v52, 0 }
0x1006   : > { %7341 = vmatpush.msk.msrb.mxu3 %vm5048_vm1, %v11024_v41  ;;  %7296 = vmatmul.msk.f32.vlgmr.msrb.gmra.mxu0 %vm11059_vm5, %v5384_v42  ;;  %vm4928_vm1 = vcmp.eq.s32.totalorder %v11053_v18, %v10416_v29  ;;  %vm4918_vm5 = vcmp.eq.s32.totalorder %v8163_v62, %v10348_v0  ;;  %v5372_v18 = vperm.slane %v5364_v63, 0  ;;  %v5578_v0 = vrot.slane %v10455_v34, 3 }
0x1007   : > { %7302 = vmatpush.msk.msrb.mxu1 %vm4900_vm11, %v11024_v41  ;;  %7310 = vmatmul.msk.f32.vlgmr.msra.gmra.mxu2 %vm11060_vm15, %v5386_v7  ;;  %vm4931_vm11 = vcmp.eq.s32.totalorder %v8175_v5, %v10357_v40  ;;  %vm5065_vm15 = vcmp.eq.s32.totalorder %v11055_v33, %v10436_v38  ;;  %v5585_v21 = vperm.slane %v5577_v14, 0  ;;  %v5604_v53 = vsel %vm1505_vm2, %v10520_v28, %v5588_v36 }
0x1008   : > { %7317 = vmatmul.msk.f32.vlgmr.msra.gmra.mxu3 %vm11061_vm6, %v5387_v37  ;;  %7321 = vmatpush.msk.msra.mxu0 %vm4920_vm4, %v11024_v41  ;;  %vm4927_vm4 = vcmp.eq.s32.totalorder %v11054_v4, %v10416_v29  ;;  %vm4930_vm6 = vcmp.eq.s32.totalorder %v8163_v62, %v10357_v40  ;;  %v5388_v17 = vsel %vm1505_vm2, %v10341_v56, %v5372_v18  ;;  %v5584_v40 = vperm.slane %v5576_v1, 0  ;;  %v10643_v18 = vpop.permute.xlu2 %5817 }
0x1009   : > { %7325 = vmatpush.msk.msra.mxu1 %vm4929_vm0, %v11024_v41  ;;  %7335 = vmatpush.msk.msrb.mxu2 %vm4932_vm10, %v11024_v41  ;;  %vm11062_vm0 = vcmask 392192   ;;  %vm5054_vm10 = vcmp.eq.s32.totalorder %v11054_v4, %v5040_v57  ;;  %v5586_v58 = vperm.slane %v5578_v0, 0  ;;  %v5603_v56 = vsel %vm1505_vm2, %v10520_v28, %v5587_v55 }
0x100a   : > { %7342 = vmatpush.msk.msrb.mxu3 %vm5047_vm14, %v11024_v41  ;;  %7322 = vmatpush.msk.msra.mxu0 %vm4919_vm12, %v11024_v41  ;;  %vm5062_vm14 = vcmp.eq.s32.totalorder %v11054_v4, %v10469_v48  ;;  %vm5064_vm12 = vcmp.eq.s32.totalorder %v8175_v5, %v10436_v38  ;;  %v5600_v10 = vsel %vm1505_vm2, %v10520_v28, %v5584_v40  ;;  %v5581_v42 = vrot.slane %v10455_v34, 6 }
0x100b   : > { %7326 = vmatpush.msk.msra.mxu1 %vm4928_vm1, %v11024_v41  ;;  %7336 = vmatpush.msk.msrb.mxu2 %vm4931_vm11, %v11024_v41  ;;  %vm11063_vm1 = vmmov %vm11062_vm0  ;;  %v5602_v6 = vsel %vm1505_vm2, %v10520_v28, %v5586_v58  ;;  %v5820_v39 = vrot.slane %v10643_v18, 1 }
0x100c   : > { %7359 = vmatpush.msk.msra.mxu3 %vm5066_vm9, %v11024_v41  ;;  %7323 = vmatpush.msk.msra.mxu0 %vm4918_vm5, %v11024_v41  ;;  %vm4926_vm9 = vcmp.eq.s32.totalorder %v11055_v33, %v10416_v29  ;;  %vm11064_vm11 = vmmov %vm11062_vm0  ;;  %vm5053_vm5 = vcmp.eq.s32.totalorder %v11055_v33, %v5040_v57  ;;  %v5589_v43 = vperm.slane %v5581_v42, 0 }
0x100d   : > { %7327 = vmatpush.msk.msra.mxu1 %vm4927_vm4, %v11024_v41  ;;  %7337 = vmatpush.msk.msrb.mxu2 %vm4930_vm6, %v11024_v41  ;;  %vm11065_vm4 = vcmask 261120   ;;  %vm5061_vm6 = vcmp.eq.s32.totalorder %v11055_v33, %v10469_v48 }
0x100e   : > { %7360 = vmatpush.msk.msra.mxu3 %vm5065_vm15, %v11024_v41  ;;  %7303 = vmatmul.msk.f32.vlgmr.msrb.gmra.mxu1 %vm11062_vm0, %v5385_v15  ;;  %vm5063_vm15 = vcmp.eq.s32.totalorder %v8163_v62, %v10436_v38  ;;  %vm4925_vm0 = vcmp.eq.s32.totalorder %v8175_v5, %v10416_v29  ;;  %v5605_v2 = vsel %vm1505_vm2, %v10520_v28, %v5589_v43 }
0x100f   : > { %7344 = vmatpush.msk.msrb.mxu0 %vm5054_vm10, %v11024_v41  ;;  %7354 = vmatpush.msk.msra.mxu2 %vm5062_vm14, %v11024_v41  ;;  %vm5052_vm10 = vcmp.eq.s32.totalorder %v8175_v5, %v5040_v57  ;;  %vm5060_vm14 = vcmp.eq.s32.totalorder %v8175_v5, %v10469_v48 }
0x1010   : > { %7361 = vmatpush.msk.msra.mxu3 %vm5064_vm12, %v11024_v41  ;;  %7328 = vmatpush.msk.msra.mxu1 %vm4926_vm9, %v11024_v41  ;;  %vm4924_vm12 = vcmp.eq.s32.totalorder %v8163_v62, %v10416_v29  ;;  %vm5051_vm9 = vcmp.eq.s32.totalorder %v8163_v62, %v5040_v57  ;;  %v5590_v29 = vperm.slane %v5582_v49, 0 }
0x1011   : > { %7324 = vmatmul.msk.f32.vlgmr.msra.gmra.mxu0 %vm11063_vm1, %v5388_v17  ;;  %7338 = vmatmul.msk.f32.vlgmr.msrb.gmra.mxu2 %vm11064_vm11, %v5390_v54  ;;  %vm5058_vm1 = vcmp.eq.s32.totalorder %v11054_v4, %v5041_v51  ;;  %vm5059_vm11 = vcmp.eq.s32.totalorder %v8163_v62, %v10469_v48  ;;  %v5819_v17 = vrot.slane %v10643_v18, 7 }
0x1012   : > { %7343 = vmatmul.msk.f32.vlgmr.msrb.gmra.mxu3 %vm11065_vm4, %v5599_v45  ;;  %7345 = vmatpush.msk.msrb.mxu0 %vm5053_vm5, %v11024_v41  ;;  %vm5070_vm5 = vcmp.eq.s32.totalorder %v11054_v4, %v5044_v61  ;;  %vm11066_vm4 = vcmask 392192  }
0x1013   : > { %7355 = vmatpush.msk.msra.mxu2 %vm5061_vm6, %v11024_v41  ;;  %7362 = vmatpush.msk.msra.mxu3 %vm5063_vm15, %v11024_v41  ;;  %vm5078_vm15 = vcmp.eq.s32.totalorder %v11054_v4, %v5046_v25  ;;  %vm5057_vm6 = vcmp.eq.s32.totalorder %v11055_v33, %v5041_v51 }
0x1014   : > { %7329 = vmatpush.msk.msra.mxu1 %vm4925_vm0, %v11024_v41  ;;  %7346 = vmatpush.msk.msrb.mxu0 %vm5052_vm10, %v11024_v41  ;;  %vm5069_vm0 = vcmp.eq.s32.totalorder %v11055_v33, %v5044_v61  ;;  %vm11067_vm10 = vcmask 261120  }
0x1015   : > { %7356 = vmatpush.msk.msra.mxu2 %vm5060_vm14, %v11024_v41  ;;  %vm5077_vm14 = vcmp.eq.s32.totalorder %v11055_v33, %v5046_v25 }
0x1016   : > { %7330 = vmatpush.msk.msra.mxu1 %vm4924_vm12, %v11024_v41  ;;  %7347 = vmatpush.msk.msrb.mxu0 %vm5051_vm9, %v11024_v41  ;;  %vm5056_vm12 = vcmp.eq.s32.totalorder %v8175_v5, %v5041_v51  ;;  %vm11068_vm9 = vmmov %vm11067_vm10 }
0x1017   : > { %7357 = vmatpush.msk.msra.mxu2 %vm5059_vm11, %v11024_v41  ;;  %7331 = vmatmul.msk.f32.vlgmr.msra.gmra.mxu1 %vm11066_vm4, %v5389_v47  ;;  %vm5068_vm11 = vcmp.eq.s32.totalorder %v8175_v5, %v5044_v61  ;;  %vm5067_vm4 = vcmp.eq.s32.totalorder %v8163_v62, %v5044_v61  ;;  %v5821_v47 = vrot.slane %v10643_v18, 2 }
0x1018   : > { %7349 = vmatpush.msk.msrb.mxu1 %vm5058_vm1, %v11024_v41  ;;  %7364 = vmatpush.msk.msra.mxu0 %vm5070_vm5, %v11024_v41  ;;  %vm11069_vm1 = vmmov %vm11068_vm9  ;;  %vm5076_vm5 = vcmp.eq.s32.totalorder %v8175_v5, %v5046_v25 }
0x1019   : > { %7374 = vmatpush.msk.msrb.mxu2 %vm5078_vm15, %v11024_v41  ;;  %7348 = vmatmul.msk.f32.vlgmr.msrb.gmra.mxu0 %vm11067_vm10, %v5600_v10  ;;  %vm5055_vm15 = vcmp.eq.s32.totalorder %v8163_v62, %v5041_v51  ;;  %vm5073_vm10 = vcmp.eq.s32.totalorder %v11055_v33, %v5045_v12  ;;  %v5606_v33 = vsel %vm1505_vm2, %v10520_v28, %v5590_v29  ;;  %v5823_v29 = vrot.slane %v10643_v18, 4 }
0x101a   : > { %7350 = vmatpush.msk.msrb.mxu1 %vm5057_vm6, %v11024_v41  ;;  %7365 = vmatpush.msk.msra.mxu0 %vm5069_vm0, %v11024_v41  ;;  %vm5074_vm6 = vcmp.eq.s32.totalorder %v11054_v4, %v5045_v12  ;;  %vm5075_vm0 = vcmp.eq.s32.totalorder %v8163_v62, %v5046_v25  ;;  %v5601_v4 = vsel %vm1505_vm2, %v10520_v28, %v5585_v21 }
0x101b   : > { %7375 = vmatpush.msk.msrb.mxu2 %vm5077_vm14, %v11024_v41  ;;  %7363 = vmatmul.msk.f32.vlgmr.msra.gmra.mxu3 %vm11068_vm9, %v5603_v56  ;;  %vm11070_vm14 = vmmov %vm11069_vm1  ;;  %vm5072_vm9 = vcmp.eq.s32.totalorder %v8175_v5, %v5045_v12  ;;  %v5822_v56 = vrot.slane %v10643_v18, 3 }
0x101c   : > { %7351 = vmatpush.msk.msrb.mxu1 %vm5056_vm12, %v11024_v41  ;;  %7358 = vmatmul.msk.f32.vlgmr.msra.gmra.mxu2 %vm11069_vm1, %v5602_v6  ;;  %vm11071_vm12 = vmmov %vm11069_vm1 }
0x101d   : > { %7366 = vmatpush.msk.msra.mxu0 %vm5068_vm11, %v11024_v41  ;;  %7376 = vmatpush.msk.msrb.mxu2 %vm5076_vm5, %v11024_v41  ;;  %vm5071_vm11 = vcmp.eq.s32.totalorder %v8163_v62, %v5045_v12  ;;  %vm11072_vm5 = vmmov %vm11069_vm1 }
0x101e   : > { %7352 = vmatpush.msk.msrb.mxu1 %vm5055_vm15, %v11024_v41 }
0x101f   : > { %7367 = vmatpush.msk.msra.mxu0 %vm5067_vm4, %v11024_v41  ;;  %7377 = vmatpush.msk.msrb.mxu2 %vm5075_vm0, %v11024_v41 }
0x1020   : > { %7369 = vmatpush.msk.msra.mxu1 %vm5074_vm6, %v11024_v41 }
0x1021   : > { %7368 = vmatmul.msk.f32.vlgmr.msra.gmra.mxu0 %vm11070_vm14, %v5604_v53  ;;  %7353 = vmatmul.msk.f32.vlgmr.msrb.gmra.mxu1 %vm11071_vm12, %v5601_v4 }
0x1022   : > { %7370 = vmatpush.msk.msra.mxu1 %vm5073_vm10, %v11024_v41 }
0x1024   : > { %7371 = vmatpush.msk.msra.mxu1 %vm5072_vm9, %v11024_v41  ;;  %7378 = vmatmul.msk.f32.vlgmr.msrb.gmra.mxu2 %vm11069_vm1, %v5606_v33 }
0x1026   : > { %7372 = vmatpush.msk.msra.mxu1 %vm5071_vm11, %v11024_v41 }
0x1029   : > { %7373 = vmatmul.msk.f32.vlgmr.msra.gmra.mxu1 %vm11072_vm5, %v5605_v2 }
0x106c   : > { %v10621_v5 = vpop.f32.mrf.mxu1 }
0x106e   : > { %v10623_v7 = vpop.f32.mrf.mxu0 }
0x1074   : > { %v10625_v38 = vpop.f32.mrf.mxu2 }
0x1075   : > { %v10627_v19 = vpop.f32.mrf.mxu3  ;;  %v10629_v35 = vpop.f32.mrf.mxu1 }
0x1078   : > { %v10631_v37 = vpop.f32.mrf.mxu0 }
0x107e   : > { %v10633_v41 = vpop.f32.mrf.mxu2 }
0x107f   : > { %v5411_v63 = vpop.f32.mrf.mxu3 }
0x1080   : > { %v10635_v26 = vpop.f32.mrf.mxu1  ;;  %v5799_v60 = vadd.f32 %v5411_v63, %v10621_v5 }
0x1083   : > { %v5434_v62 = vpop.f32.mrf.mxu0 }
0x1084   : > { %v5800_v15 = vadd.f32 %v5434_v62, %v10623_v7 }
0x108a   : > { %v10637_v34 = vpop.f32.mrf.mxu2 }
0x108b   : > { %v10639_v22 = vpop.f32.mrf.mxu3  ;;  %v5457_v57 = vpop.f32.mrf.mxu1  ;;  %v5802_v25 = vadd.f32 %v10637_v34, %v10625_v38 }
0x108c   : > { %v5803_v27 = vadd.f32 %v10639_v22, %v10627_v19  ;;  %v5801_v61 = vadd.f32 %v5457_v57, %v10629_v35 }
0x108e   : > { %v10641_v48 = vpop.f32.mrf.mxu0 }
0x108f   : > { %v5804_v0 = vadd.f32 %v10641_v48, %v10631_v37 }
0x1094   : > { %v10647_v50 = vpop.f32.mrf.mxu2  ;;  %v10649_v32 = vpop.f32.mrf.mxu1 }
0x1095   : > { %v5627_v59 = vpop.f32.mrf.mxu3 }
0x1096   : > { %v5807_v9 = vadd.f32 %v5799_v60, %v5627_v59  ;;  %v5650_v54 = vpop.f32.mrf.mxu0  ;;  %v5824_v60 = vrot.slane %v10643_v18, 5 }
0x1097   : > { %v5808_v3 = vadd.f32 %v5800_v15, %v5650_v54  ;;  %v5825_v15 = vrot.slane %v10643_v18, 6 }
0x1098   : > { %v5834_v1 = vadd.f32 %v5819_v17, %v5807_v9  ;;  %v6010_v9 = vrot.slane %v10621_v5, 7  ;;  %v6011_v17 = vrot.slane %v10623_v7, 7 }
0x1099   : > { %v5835_v28 = vadd.f32 %v10643_v18, %v5808_v3  ;;  %v5806_v18 = vadd.f32 %v10647_v50, %v10633_v41 }
0x109a   : > { %v7379_v45 = vmul.f32 -1.442695, %v5834_v1  ;;  %v5805_v1 = vadd.f32 %v10649_v32, %v10635_v26 }
0x109b   : > { %v7380_v51 = vmul.f32 -1.442695, %v5835_v28  ;;  %v10676_v28 = vadd.f32 %v5627_v59, %v5411_v63  ;;  %v6014_v59 = vrot.slane %v10627_v19, 7 }
0x109c   : > { %7670 = vpow2.f32 %v7379_v45  ;;  %v10678_v45 = vadd.f32 %v5650_v54, %v5434_v62  ;;  %v6015_v54 = vrot.slane %v10631_v37, 7 }
0x109d   : > { %7672 = vpow2.f32 %v7380_v51 }
0x109e   : > { %v5719_v11 = vpop.f32.mrf.mxu3  ;;  %v5742_v40 = vpop.f32.mrf.mxu0 }
0x109f   : > { %v5673_v55 = vpop.f32.mrf.mxu1  ;;  %v5696_v58 = vpop.f32.mrf.mxu2  ;;  %v5811_v10 = vadd.f32 %v5803_v27, %v5719_v11  ;;  %v5812_v12 = vadd.f32 %v5804_v0, %v5742_v40  ;;  %v6012_v0 = vrot.slane %v10629_v35, 7 }
0x10a0   : > { %v5809_v52 = vadd.f32 %v5801_v61, %v5673_v55  ;;  %v5810_v14 = vadd.f32 %v5802_v25, %v5696_v58  ;;  %v10686_v61 = vadd.f32 %v5673_v55, %v5457_v57  ;;  %v10691_v63 = vadd.f32 %v5696_v58, %v10637_v34 }
0x10a1   : > { %v5838_v21 = vadd.f32 %v5822_v56, %v5811_v10  ;;  %v5839_v2 = vadd.f32 %v5823_v29, %v5812_v12  ;;  %v6042_v55 = vrot.slane %v10676_v28, 7  ;;  %v6043_v10 = vrot.slane %v10678_v45, 7 }
0x10a2   : > { %v7671_v6 = vpop.eup %7670  ;;  %v5836_v49 = vadd.f32 %v5820_v39, %v5809_v52  ;;  %v5837_v36 = vadd.f32 %v5821_v47, %v5810_v14  ;;  %v6013_v39 = vrot.slane %v10625_v38, 7  ;;  %v10700_v52 = vadd.f32 %v5719_v11, %v10639_v22 }
0x10a3   : > { %v7673_v53 = vpop.eup %7672  ;;  %v10664_v4 = vadd.f32 1.0, %v7671_v6  ;;  %v7383_v3 = vmul.f32 -1.442695, %v5838_v21  ;;  %v7384_v25 = vmul.f32 -1.442695, %v5839_v2  ;;  %v10703_v34 = vadd.f32 %v5742_v40, %v10641_v48 }
0x10a4   : > { %v10666_v42 = vadd.f32 1.0, %v7673_v53  ;;  %v7381_v33 = vmul.f32 -1.442695, %v5836_v49  ;;  %v7382_v43 = vmul.f32 -1.442695, %v5837_v36  ;;  %v6044_v56 = vrot.slane %v10686_v61, 7 }
0x10a5   : > { %7674 = vrcp.f32 %v10664_v4  ;;  %vm5879_vm2 = vweird.f32 %v10664_v4  ;;  %v5883_v49 = vand.u32 2147483647, %v10664_v4  ;;  %v6045_v22 = vrot.slane %v10691_v63, 7 }
0x10a6   : > { %7676 = vrcp.f32 %v10666_v42  ;;  %v5885_v48 = vand.u32 2147483648, %v10664_v4  ;;  %vm5894_vm4 = vweird.f32 %v10666_v42 }
0x10a7   : > { %7678 = vpow2.f32 %v7381_v33  ;;  %v10680_v51 = vpop.f32.mrf.mxu1  ;;  %v10682_v27 = vpop.f32.mrf.mxu2  ;;  %v5898_v33 = vand.u32 2147483647, %v10666_v42  ;;  %vm5884_vm0 = vcmp.eq.f32.partialorder %v5883_v49, 8.507059e+37 }
0x10a8   : > { %7680 = vpow2.f32 %v7382_v43  ;;  %v5813_v62 = vadd.f32 %v5805_v1, %v10680_v51  ;;  %v5814_v47 = vadd.f32 %v5806_v18, %v10682_v27  ;;  %v5900_v43 = vand.u32 2147483648, %v10666_v42 }
0x10a9   : > { %7682 = vpow2.f32 %v7383_v3  ;;  %vm5899_vm14 = vcmp.eq.f32.partialorder %v5898_v33, 8.507059e+37 }
0x10aa   : > { %7684 = vpow2.f32 %v7384_v25  ;;  %v5840_v12 = vadd.f32 %v5824_v60, %v5813_v62  ;;  %v5841_v29 = vadd.f32 %v5825_v15, %v5814_v47  ;;  %v5886_v62 = vor.u32 1.1754944e-38, %v5885_v48 }
0x10ab   : > { %v7675_v57 = vpop.eup %7674 }
0x10ac   : > { %v7677_v58 = vpop.eup %7676  ;;  %v5875_v14 = vmul.f32 %v7675_v57, %v10664_v4  ;;  %vm5880_vm15 = vweird.f32 %v7675_v57  ;;  %v7385_v1 = vmul.f32 -1.442695, %v5840_v12  ;;  %v7386_v47 = vmul.f32 -1.442695, %v5841_v29 }
0x10ad   : > { %v7679_v6 = vpop.eup %7678  ;;  %v5890_v36 = vmul.f32 %v7677_v58, %v10666_v42  ;;  %vm5895_vm6 = vweird.f32 %v7677_v58  ;;  %vm5881_vm10 = vmor %vm5879_vm2, %vm5880_vm15  ;;  %v5901_v42 = vor.u32 1.1754944e-38, %v5900_v43 }
0x10ae   : > { %v7681_v11 = vpop.eup %7680  ;;  %v5876_v21 = vsub.f32 1.0, %v5875_v14  ;;  %v10712_v40 = vadd.f32 1.0, %v7679_v6  ;;  %vm5896_vm12 = vmor %vm5894_vm4, %vm5895_vm6 }
0x10af   : > { %v5891_v53 = vsub.f32 1.0, %v5890_v36  ;;  %v10716_v2 = vadd.f32 1.0, %v7681_v11  ;;  %v7683_v60 = vpop.eup %7682 }
0x10b0   : > { %v5877_v3 = vmul.f32 %v7675_v57, %v5876_v21  ;;  %7686 = vrcp.f32 %v10712_v40  ;;  %v7685_v15 = vpop.eup %7684  ;;  %v5913_v6 = vand.u32 2147483647, %v10712_v40  ;;  %v10724_v36 = vadd.f32 1.0, %v7683_v60 }
0x10b1   : > { %v5892_v18 = vmul.f32 %v7677_v58, %v5891_v53  ;;  %7688 = vrcp.f32 %v10716_v2  ;;  %v5915_v11 = vand.u32 2147483648, %v10712_v40  ;;  %vm5909_vm9 = vweird.f32 %v10712_v40 }
0x10b2   : > { %v5878_v25 = vadd.f32 %v7675_v57, %v5877_v3  ;;  %7690 = vpow2.f32 %v7385_v1  ;;  %v10729_v4 = vadd.f32 1.0, %v7685_v15  ;;  %vm5924_vm1 = vweird.f32 %v10716_v2 }
0x10b3   : > { %v5893_v14 = vadd.f32 %v7677_v58, %v5892_v18  ;;  %7692 = vrcp.f32 %v10724_v36  ;;  %vm10734_vm11 = vcmp.eq.f32.partialorder %v5913_v6, 8.507059e+37  ;;  %v5930_v3 = vand.u32 2147483648, %v10716_v2 }
0x10b4   : > { %v5882_v12 = vsel %vm5881_vm10, %v7675_v57, %v5878_v25  ;;  %v5928_v57 = vand.u32 2147483647, %v10716_v2  ;;  %7694 = vpow2.f32 %v7386_v47  ;;  %v5916_v15 = vor.u32 1.1754944e-38, %v5915_v11 }
0x10b5   : > { %v5887_v21 = vsel %vm5884_vm0, %v5886_v62, %v5882_v12  ;;  %v5897_v53 = vsel %vm5896_vm12, %v7677_v58, %v5893_v14  ;;  %7696 = vrcp.f32 %v10729_v4  ;;  %v5931_v7 = vor.u32 1.1754944e-38, %v5930_v3 }
0x10b6   : > { %v7687_v49 = vpop.eup %7686  ;;  %v5994_v48 = vsub.f32 1.0, %v5887_v21  ;;  %v5902_v29 = vsel %vm5899_vm14, %v5901_v42, %v5897_v53  ;;  %v6058_v18 = vmul.f32 %v6042_v55, %v5887_v21  ;;  %vm10749_vm5 = vcmp.eq.f32.partialorder %v5928_v57, 8.507059e+37 }
0x10b7   : > { %v7689_v33 = vpop.eup %7688  ;;  %v5995_v43 = vsub.f32 1.0, %v5902_v29  ;;  %v5905_v60 = vmul.f32 %v7687_v49, %v10712_v40  ;;  %v6059_v47 = vmul.f32 %v6043_v10, %v5902_v29  ;;  %vm5910_vm2 = vweird.f32 %v7687_v49 }
0x10b8   : > { %v6026_v1 = vmul.f32 %v6010_v9, %v5994_v48  ;;  %v5920_v25 = vmul.f32 %v7689_v33, %v10716_v2  ;;  %v7691_v6 = vpop.eup %7690  ;;  %v5943_v9 = vand.u32 2147483647, %v10724_v36  ;;  %vm5925_vm15 = vweird.f32 %v7689_v33  ;;  %vm5911_vm6 = vmor %vm5909_vm9, %vm5910_vm2 }
0x10b9   : > { %v6027_v62 = vmul.f32 %v6011_v17, %v5995_v43  ;;  %v5906_v14 = vsub.f32 1.0, %v5905_v60  ;;  %v7693_v28 = vpop.eup %7692  ;;  %vm5939_vm4 = vweird.f32 %v10724_v36  ;;  %v5945_v48 = vand.u32 2147483648, %v10724_v36  ;;  %vm5926_vm10 = vmor %vm5924_vm1, %vm5925_vm15 }
0x10ba   : > { %v6066_v12 = vadd.f32 %v6058_v18, %v6026_v1  ;;  %v5921_v42 = vsub.f32 1.0, %v5920_v25  ;;  %v7695_v17 = vpop.eup %7694  ;;  %v5935_v21 = vmul.f32 %v7693_v28, %v10724_v36  ;;  %v10757_v29 = vadd.f32 1.0, %v7691_v6 }
0x10bb   : > { %v6067_v55 = vadd.f32 %v6059_v47, %v6027_v62  ;;  %v5907_v11 = vmul.f32 %v7687_v49, %v5906_v14  ;;  %vm10762_vm0 = vcmp.eq.f32.partialorder %v5943_v9, 8.507059e+37  ;;  %v7697_v1 = vpop.eup %7696  ;;  %vm5940_vm14 = vweird.f32 %v7693_v28 }
0x10bc   : > { %v6082_v45 = vrot.slane %v6066_v12, 1  ;;  %v5922_v10 = vmul.f32 %v7689_v33, %v5921_v42  ;;  %v5936_v60 = vsub.f32 1.0, %v5935_v21  ;;  %7698 = vrcp.f32 %v10757_v29 }
0x10bd   : > { %v5908_v53 = vadd.f32 %v7687_v49, %v5907_v11  ;;  %v10769_v25 = vadd.f32 1.0, %v7695_v17  ;;  %v5950_v14 = vmul.f32 %v7697_v1, %v10729_v4  ;;  %v5958_v2 = vand.u32 2147483647, %v10729_v4 }
0x10be   : > { %v6083_v57 = vsel %vm2458_vm3, %v6067_v55, %v6082_v45  ;;  %v5923_v43 = vadd.f32 %v7689_v33, %v5922_v10  ;;  %v5937_v47 = vmul.f32 %v7693_v28, %v5936_v60  ;;  %v5960_v11 = vand.u32 2147483648, %v10729_v4  ;;  %vm5941_vm3 = vmor %vm5939_vm4, %vm5940_vm14 }
0x10bf   : > { %v5912_v18 = vsel %vm5911_vm6, %v7687_v49, %v5908_v53  ;;  %v5946_v49 = vor.u32 1.1754944e-38, %v5945_v48  ;;  %v5951_v55 = vsub.f32 1.0, %v5950_v14  ;;  %vm5955_vm12 = vweird.f32 %v7697_v1 }
0x10c0   : > { %v5917_v40 = vsel %vm10734_vm11, %v5916_v15, %v5912_v18  ;;  %v5927_v62 = vsel %vm5926_vm10, %v7689_v33, %v5923_v43  ;;  %v5938_v9 = vadd.f32 %v7693_v28, %v5937_v47  ;;  %7700 = vrcp.f32 %v10769_v25 }
0x10c1   : > { %v5996_v6 = vsub.f32 1.0, %v5917_v40  ;;  %v5932_v12 = vsel %vm10749_vm5, %v5931_v7, %v5927_v62  ;;  %v6060_v33 = vmul.f32 %v6044_v56, %v5917_v40  ;;  %v5952_v17 = vmul.f32 %v7697_v1, %v5951_v55 }
0x10c2   : > { %v5997_v42 = vsub.f32 1.0, %v5932_v12  ;;  %v6061_v5 = vmul.f32 %v6045_v22, %v5932_v12  ;;  %v5942_v7 = vsel %vm5941_vm3, %v7693_v28, %v5938_v9  ;;  %v7699_v35 = vpop.eup %7698  ;;  %v6046_v56 = vrot.slane %v10700_v52, 7 }
0x10c3   : > { %v6028_v58 = vmul.f32 %v6012_v0, %v5996_v6  ;;  %v5947_v61 = vsel %vm10762_vm0, %v5946_v49, %v5942_v7  ;;  %v6047_v36 = vrot.slane %v10703_v34, 7  ;;  %v5953_v21 = vadd.f32 %v7697_v1, %v5952_v17 }
0x10c4   : > { %v6029_v15 = vmul.f32 %v6013_v39, %v5997_v42  ;;  %v5998_v10 = vsub.f32 1.0, %v5947_v61  ;;  %vm5954_vm9 = vweird.f32 %v10729_v4  ;;  %vm5959_vm11 = vcmp.eq.f32.partialorder %v5958_v2, 8.507059e+37 }
0x10c5   : > { %v6068_v0 = vadd.f32 %v6060_v33, %v6028_v58  ;;  %vm5956_vm1 = vmor %vm5954_vm9, %vm5955_vm12  ;;  %v5961_v39 = vor.u32 1.1754944e-38, %v5960_v11  ;;  %v5965_v63 = vmul.f32 %v7699_v35, %v10757_v29  ;;  %v6062_v53 = vmul.f32 %v6046_v56, %v5947_v61 }
0x10c6   : > { %v6069_v45 = vadd.f32 %v6061_v5, %v6029_v15  ;;  %v6030_v28 = vmul.f32 %v6014_v59, %v5998_v10  ;;  %v5957_v52 = vsel %vm5956_vm1, %v7697_v1, %v5953_v21  ;;  %v7701_v48 = vpop.eup %7700  ;;  %vm11079_vm5 = vcmask 1042434  }
0x10c7   : > { %v6084_v38 = vrot.slane %v6068_v0, 7  ;;  %v5962_v43 = vsel %vm5959_vm11, %v5961_v39, %v5957_v52  ;;  %v5966_v60 = vsub.f32 1.0, %v5965_v63  ;;  %v5973_v4 = vand.u32 2147483647, %v10757_v29 }
0x10c8   : > { %v6086_v22 = vrot.slane %v6069_v45, 6  ;;  %vm11080_vm2 = vcmask 1043459   ;;  %v6070_v18 = vadd.f32 %v6062_v53, %v6030_v28  ;;  %v5999_v40 = vsub.f32 1.0, %v5962_v43 }
0x10c9   : > { %v6085_v34 = vsel %vm11079_vm5, %v6084_v38, %v6083_v57  ;;  %v5975_v62 = vand.u32 2147483648, %v10757_v29  ;;  %v5967_v47 = vmul.f32 %v7699_v35, %v5966_v60  ;;  %vm5970_vm15 = vweird.f32 %v7699_v35 }
0x10ca   : > { %v6087_v3 = vsel %vm11080_vm2, %v6086_v22, %v6085_v34  ;;  %v5980_v19 = vmul.f32 %v7701_v48, %v10769_v25  ;;  %v6088_v59 = vrot.slane %v6070_v18, 5  ;;  %v6031_v1 = vmul.f32 %v6015_v54, %v5999_v40 }
0x10cb   : > { %v6063_v14 = vmul.f32 %v6047_v36, %v5962_v43  ;;  %v5797_v57 = vadd.f32 %v10680_v51, %v10649_v32  ;;  %v5968_v6 = vadd.f32 %v7699_v35, %v5967_v47  ;;  %vm5969_vm4 = vweird.f32 %v10757_v29  ;;  %v11083_v47 = vld [vmem:[#allocation16_spill] sm:$0xff] }
0x10cc   : > { %vm5974_vm6 = vcmp.eq.f32.partialorder %v5973_v4, 8.507059e+37  ;;  %v5981_v12 = vsub.f32 1.0, %v5980_v19  ;;  %vm5971_vm0 = vmor %vm5969_vm4, %vm5970_vm15  ;;  %v5976_v2 = vor.u32 1.1754944e-38, %v5975_v62  ;;  %v5990_v42 = vand.u32 2147483648, %v10769_v25  ;;  %v11084_v19 = vld [vmem:[#allocation15_spill] sm:$0xff] }
0x10cd   : > { %v6071_v49 = vadd.f32 %v6063_v14, %v6031_v1  ;;  %vm11081_vm10 = vcmask 1044484   ;;  %v5972_v55 = vsel %vm5971_vm0, %v7699_v35, %v5968_v6  ;;  %vm5985_vm14 = vweird.f32 %v7701_v48 }
0x10ce   : > { %v6089_v9 = vsel %vm11081_vm10, %v6088_v59, %v6087_v3  ;;  %v5982_v11 = vmul.f32 %v7701_v48, %v5981_v12  ;;  %v5988_v37 = vand.u32 2147483647, %v10769_v25  ;;  %v6016_v54 = vrot.slane %v10635_v26, 7 }
0x10cf   : > { %v6090_v32 = vrot.slane %v6071_v49, 4  ;;  %v5977_v51 = vsel %vm5974_vm6, %v5976_v2, %v5972_v55  ;;  %v5798_v29 = vadd.f32 %v10682_v27, %v10647_v50  ;;  %v6048_v33 = vrot.slane %v5797_v57, 7 }
0x10d0   : > { %v6000_v58 = vsub.f32 1.0, %v5977_v51  ;;  %v5983_v15 = vadd.f32 %v7701_v48, %v5982_v11  ;;  %vm5984_vm3 = vweird.f32 %v10769_v25  ;;  %v5991_v5 = vor.u32 1.1754944e-38, %v5990_v42 }
0x10d1   : > { %vm5986_vm12 = vmor %vm5984_vm3, %vm5985_vm14  ;;  %v6091_v7 = vsel %vm2470_vm8, %v6090_v32, %v6089_v9  ;;  %v6064_v35 = vmul.f32 %v6048_v33, %v5977_v51  ;;  %vm5989_vm9 = vcmp.eq.f32.partialorder %v5988_v37, 8.507059e+37  ;;  %v6017_v26 = vrot.slane %v10633_v41, 7 }
0x10d2   : > { %v6032_v17 = vmul.f32 %v6016_v54, %v6000_v58  ;;  %v5987_v0 = vsel %vm5986_vm12, %v7701_v48, %v5983_v15  ;;  %v6049_v45 = vrot.slane %v5798_v29, 7  ;;  %vm11082_vm1 = vcmask 1047559  }
0x10d3   : > { %v5992_v61 = vsel %vm5989_vm9, %v5991_v5, %v5987_v0  ;;  %v4292_v52 = vsub.f32 %v9942_v16, %v9945_v13  ;;  %v10828_v59 = vsub.f32 %v11084_v19, %v11083_v47  ;;  %vm2553_vm11 = vcmp.eq.s32.totalorder %v8035_v8, 0 }
0x10d4   : > { %v6072_v56 = vadd.f32 %v6064_v35, %v6032_v17  ;;  %v6001_v36 = vsub.f32 1.0, %v5992_v61  ;;  %v6065_v10 = vmul.f32 %v6049_v45, %v5992_v61  ;;  %vm2555_vm5 = vcmp.eq.s32.totalorder %v8035_v8, 1 }
0x10d5   : > { %v4293_v34 = vmul.f32 1.442695, %v4292_v52  ;;  %v2483_v57 = vmul.f32 1.442695, %v10828_v59  ;;  %v4365_v11 = vcvt.s32.f32 %v9950_v23  ;;  %vm2558_vm2 = vcmp.eq.s32.totalorder %v8035_v8, 2 }
0x10d6   : > { %v6092_v50 = vrot.slane %v6072_v56, 3  ;;  %v6033_v27 = vmul.f32 %v6017_v26, %v6001_v36  ;;  %vm2561_vm15 = vcmp.eq.s32.totalorder %v8035_v8, 3  ;;  %v4369_v51 = vcvt.s32.f32 %v9990_v30 }
0x10d7   : > { %7702 = vpow2.f32 %v4293_v34 }
0x10d8   : > { %v6073_v21 = vadd.f32 %v6065_v10, %v6033_v27  ;;  %v6093_v25 = vsel %vm2473_vm7, %v6092_v50, %v6091_v7  ;;  %v11085_v50 = vld [vmem:[#allocation17_spill] sm:$0xff] }
0x10d9   : > { %v2556_v27 = vcvt.s32.f32 %v11085_v50 }
0x10da   : > { %v6094_v38 = vrot.slane %v6073_v21, 2 }
0x10dc   : > { %v6095_v39 = vsel %vm11082_vm1, %v6094_v38, %v6093_v25 }
0x10dd   : > { %v6097_v63 = vsel %vm4399_vm13, %v6095_v39, -1e+09  ;;  %v7703_v24 = vpop.eup %7702 }
0x10de   : > { %6098 = vmax.xlane.f32.xlu1 %v6097_v63 }
0x1151   : > { %v6099_v22 = vpop.xlane.xlu1 %6098 }
0x1152   : > { %vm6108_vm8 = vcmp.ge.f32.partialorder %v6097_v63, %v6099_v22  ;;  %v10832_v13 = vsub.f32 %v6097_v63, %v6099_v22  ;;  %v11086_v63 = vld [vmem:[#allocation18_spill] sm:$0xff] }
0x1153   : > { %v6109_v41 = vsel %vm6108_vm8, %v8035_v8, 128  ;;  %v2562_v22 = vcvt.s32.f32 %v11086_v63 }
0x1154   : > { %v6111_v28 = vshra.s32 %v6109_v41, 16  ;;  %v6110_v48 = vand.u32 65535, %v6109_v41  ;;  %v6101_v49 = vmul.f32 1.442695, %v10832_v13 }
0x1156   : > { %v6113_v53 = vcvt.s32.f32 %v6111_v28  ;;  %v6112_v60 = vcvt.s32.f32 %v6110_v48  ;;  %v11087_v28 = vld [vmem:[#allocation19_spill] sm:$0xff] }
0x1158   : > { %6114 = vmin.xlane.f32.xlu2 %v6113_v53 }
0x11cb   : > { %v6115_v43 = vpop.xlane.xlu2 %6114 }
0x11cc   : > { %vm6116_vm7 = vcmp.eq.f32.partialorder %v6113_v53, %v6115_v43  ;;  %v6121_v3 = vcvt.f32.s32 %v6115_v43  ;;  %v11088_v53 = vcvt.s32.f32 %v11087_v28 }
0x11cd   : > { %v6117_v4 = vsel %vm6116_vm7, %v6112_v60, inf }
0x11ce   : > { %6118 = vmin.xlane.f32.xlu0 %v6117_v4  ;;  %v6122_v40 = vshll.u32 %v6121_v3, 16 }
0x11d6   : > { %4295 = vadd.xlane.f32.xlu0 %v7703_v24 }
0x1241   : > { %v6119_v18 = vpop.xlane.xlu0 %6118 }
0x1242   : > { %v6120_v62 = vcvt.f32.s32 %v6119_v18 }
0x1244   : > { %v10830_v16 = vadd.s32 %v6122_v40, %v6120_v62 }
0x1246   : > { %vm6124_vm13 = vcmp.eq.s32.totalorder %v8035_v8, %v10830_v16  ;;  %v6158_v36 = vcvt.s32.f32 %v10830_v16 }
0x1247   : > { %v6140_v1 = vsel %vm6124_vm13, %v10221_v46, 0  ;;  %v6125_v14 = vsel %vm6124_vm13, %v10188_v20, 0 }
0x1248   : > { %v6142_v6 = vshra.s32 %v6140_v1, 16  ;;  %v6127_v12 = vshra.s32 %v6125_v14, 16  ;;  %v6141_v30 = vand.u32 65535, %v6140_v1  ;;  %v6126_v33 = vand.u32 65535, %v6125_v14 }
0x1249   : > { %v4296_v2 = vpop.xlane.xlu0 %4295 }
0x124a   : > { %7704 = vlog2.f32 %v4296_v2  ;;  %v6144_v42 = vcvt.s32.f32 %v6142_v6  ;;  %v6129_v9 = vcvt.s32.f32 %v6127_v12  ;;  %v6143_v7 = vcvt.s32.f32 %v6141_v30 }
0x124b   : > { %7706 = vpow2.f32 %v2483_v57  ;;  %v6128_v17 = vcvt.s32.f32 %v6126_v33 }
0x124c   : > { %6145 = vmax.xlane.f32.xlu2 %v6144_v42  ;;  %6130 = vmax.xlane.f32.xlu1 %v6129_v9  ;;  %7708 = vpow2.f32 %v6101_v49 }
0x1250   : > { %v7705_v55 = vpop.eup %7704 }
0x1251   : > { %v4298_v20 = vmul.f32 0.6931472, %v7705_v55  ;;  %v7707_v46 = vpop.eup %7706 }
0x1252   : > { %v7709_v37 = vpop.eup %7708 }
0x1253   : > { %v4299_v54 = vsub.f32 %v4292_v52, %v4298_v20  ;;  %v4364_v32 = vsel %vm2553_vm11, %v4298_v20, 0.0 }
0x1254   : > { %v4366_v29 = vsel %vm2555_vm5, %v4365_v11, %v4364_v32  ;;  %6103 = vadd.xlane.f32.xlu2 %v7709_v37  ;;  %2485 = vadd.xlane.f32.xlu1 %v7707_v46 }
0x1255   : > { %7054 = vst [vmem:[%s10851_s0 + $0x8] sm:$0xff] %v4299_v54  ;;  %v4368_v23 = vsel %vm2558_vm2, %v4367_v44, %v4366_v29 }
0x1256   : > { %v4370_v58 = vsel %vm2561_vm15, %v4369_v51, %v4368_v23 }
0x1257   : > { %7055 = vst [vmem:[%s10860_s30 + $0x8] sm:$0xff] %v4370_v58 }
0x125c   : > { %v6213_v14 = vld [vmem:[%s10851_s0 + $0x8] sm:$0xff] (%p7876_p4) }
0x125d   : > { %6214 = vst [vmem:[%s6178_s1 + $0x10] sm:$0xff] (%p7876_p4), %v6213_v14 }
0x12bf   : > { %v6146_v15 = vpop.xlane.xlu2 %6145  ;;  %v6131_v5 = vpop.xlane.xlu1 %6130 }
0x12c0   : > { %vm6147_vm4 = vcmp.eq.f32.partialorder %v6144_v42, %v6146_v15  ;;  %vm6132_vm6 = vcmp.eq.f32.partialorder %v6129_v9, %v6131_v5  ;;  %v6152_v34 = vcvt.f32.s32 %v6146_v15  ;;  %v6137_v43 = vcvt.f32.s32 %v6131_v5 }
0x12c1   : > { %v6148_v35 = vsel %vm6147_vm4, %v6143_v7, -inf  ;;  %v6133_v31 = vsel %vm6132_vm6, %v6128_v17, -inf }
0x12c2   : > { %6149 = vmax.xlane.f32.xlu0 %v6148_v35  ;;  %6134 = vmax.xlane.f32.xlu1 %v6133_v31  ;;  %v6153_v24 = vshll.u32 %v6152_v34, 16  ;;  %v6138_v3 = vshll.u32 %v6137_v43, 16 }
0x12c7   : > { %v6104_v44 = vpop.xlane.xlu2 %6103  ;;  %v2486_v0 = vpop.xlane.xlu1 %2485 }
0x12c8   : > { %7710 = vlog2.f32 %v6104_v44 }
0x12c9   : > { %7712 = vlog2.f32 %v2486_v0 }
0x12ce   : > { %v7711_v61 = vpop.eup %7710 }
0x12cf   : > { %v7713_v26 = vpop.eup %7712  ;;  %v6106_v56 = vmul.f32 0.6931472, %v7711_v61 }
0x12d0   : > { %v2488_v45 = vmul.f32 0.6931472, %v7713_v26 }
0x12d1   : > { %v6107_v10 = vsub.f32 %v10832_v13, %v6106_v56  ;;  %v6157_v21 = vsel %vm2553_vm11, %v6106_v56, 0.0 }
0x12d2   : > { %v6159_v25 = vsel %vm2555_vm5, %v6158_v36, %v6157_v21  ;;  %v2489_v38 = vsub.f32 %v10828_v59, %v2488_v45  ;;  %v2554_v39 = vsel %vm2553_vm11, %v2488_v45, 0.0 }
0x12d3   : > { %7387 = vst [vmem:[%s10851_s0 + $0x10] sm:$0xff] %v6107_v10  ;;  %v2557_v41 = vsel %vm2555_vm5, %v2556_v27, %v2554_v39 }
0x12d4   : > { %2552 = vst [vmem:[%s10851_s0] sm:$0xff] %v2489_v38  ;;  %v2560_v52 = vsel %vm2558_vm2, %v11088_v53, %v2557_v41 }
0x12d5   : > { %v2563_v48 = vsel %vm2561_vm15, %v2562_v22, %v2560_v52 }
0x12d6   : > { %2564 = vst [vmem:[%s10860_s30] sm:$0xff] %v2563_v48 }
0x12da   : > { %v6215_v57 = vld [vmem:[%s10851_s0 + $0x10] sm:$0xff] (%p7876_p4) }
0x12db   : > { %v6211_v1 = vld [vmem:[%s10851_s0] sm:$0xff] (%p7876_p4)  ;;  %6216 = vst [vmem:[%s6178_s1 + $0x20] sm:$0xff] (%p7876_p4), %v6215_v57 }
0x12dc   : > { %6212 = vst [vmem:[%s6178_s1] sm:$0xff] (%p7876_p4), %v6211_v1 }
0x1335   : > { %v6150_v60 = vpop.xlane.xlu0 %6149  ;;  %v6135_v4 = vpop.xlane.xlu1 %6134 }
0x1336   : > { %v6151_v18 = vcvt.f32.s32 %v6150_v60  ;;  %v6136_v40 = vcvt.f32.s32 %v6135_v4 }
0x1338   : > { %v6154_v62 = vadd.s32 %v6153_v24, %v6151_v18  ;;  %v6139_v47 = vadd.s32 %v6138_v3, %v6136_v40 }
0x133a   : > { %v6162_v19 = vcvt.s32.f32 %v6154_v62  ;;  %v6160_v59 = vcvt.s32.f32 %v6139_v47  ;;  %6176 = sbr.rel (!%p7876_p4) target bundleno = 4927 (0x133f), region = 96 }
0x133c   : > { %v6161_v16 = vsel %vm2558_vm2, %v6160_v59, %v6159_v25 }
0x133d   : > { %v6163_v13 = vsel %vm2561_vm15, %v6162_v19, %v6161_v16 }
0x133e   : > { %7388 = vst [vmem:[%s10860_s30 + $0x10] sm:$0xff] %v6163_v13 }
0x133f PF: > { %6222 = sbr.rel (!%p7876_p4) target bundleno = 4938 (0x134a), region = 134  ;;  %s11091_s28 = sld [smem:[#allocation5_spill]] (%p7876_p4)  ;;  %v6257_v8 = vld [vmem:[%s10860_s30] sm:$0xff] (%p7876_p4)  ;;  %v6259_v6 = vld [vmem:[%s10860_s30 + $0x8] sm:$0xff] (%p7876_p4) }
0x1340   : > { %s11092_s29 = sld [smem:[#allocation25_spill]] (%p7876_p4) }
0x1345   : > { %s7390_s18 = sshll.u32 %s11091_s28, 3  ;;  %v6261_v12 = vld [vmem:[%s10860_s30 + $0x10] sm:$0xff] }
0x1346   : > { %s6224_s20 = scalar_lea.vmem %s11092_s29, %s7390_s18 }
0x1347   : > { %6258 = vst [vmem:[%s6224_s20] sm:$0xff] %v6257_v8 }
0x1348   : > { %6260 = vst [vmem:[%s6224_s20 + $0x10] sm:$0xff] %v6259_v6 }
0x1349   : > { %6262 = vst [vmem:[%s6224_s20 + $0x20] sm:$0xff] %v6261_v12 }
0x134a PF: > { %s11093_s20 = sld [smem:[#allocation6_spill]] }
0x134b   : > { %s11094_s0 = sld [smem:[#allocation4_spill]] }
0x134c   : > { %s11095_s30 = sld [smem:[#allocation7_spill]] }
0x1350   : > { %p27_p8 = scmp.ge.s32.totalorder %s11093_s20, 4  }
0x1352   :  { %29 = sbr.rel (!%p27_p8) target bundleno = 9 (0x9), region = 220 }

</bundles_post_ra>
